<compile_context>
chip_gen: v5e
topology: v5e:2x2
jax: 0.10.0
libtpu: 0.0.40
codegen_flags: <defaults>
</compile_context>

<pallas_src>
import functools

import jax
import jax.numpy as jnp
from jax.experimental import pallas as pl
from jax.experimental.pallas import tpu as pltpu


C_PAD = 128          # lane-dense feature / output width (full 128-lane tile)
SUB = 256            # in-kernel column group of the point chunk (bounds VMEM live set)
MAX_P_CHUNK = 2048   # packed-point chunk resident in VMEM per reduction step
MAX_PIX_TILE = 1024  # pixel tile (multiple of 256 for the v6e/v7x 256x256 MXU)


def _round_up(x, m):
    return (x + m - 1) // m * m


# ----------------------------------------------------------------------------
# Rasterizer (plain-JAX glue; stands in for pytorch3d PointsRasterizer)
# ----------------------------------------------------------------------------
def rasterize_points(points, radius, image_size, K):
    """Brute-force point rasterization.

    Returns fragments (idx, zbuf, dists), each (N, H, W, K).
    idx indexes into the *packed* feature tensor (N*P, C); -1 == empty slot.
    """
    N, P, _ = points.shape
    H, W = image_size
    # pixel-center NDC coordinates (pytorch3d convention: +X left, +Y up)
    ys = 1.0 - (jnp.arange(H, dtype=jnp.float32) + 0.5) * (2.0 / H)  # (H,)
    xs = 1.0 - (jnp.arange(W, dtype=jnp.float32) + 0.5) * (2.0 / W)  # (W,)
    px = xs[None, None, :, None]                                     # (1,1,W,1)
    py = ys[None, :, None, None]                                     # (1,H,1,1)

    x = points[:, None, None, :, 0]                                  # (N,1,1,P)
    y = points[:, None, None, :, 1]
    z = points[:, None, None, :, 2]

    dist2 = (x - px) ** 2 + (y - py) ** 2                            # (N,H,W,P)
    inside = (dist2 <= radius * radius) & (z > 0.0)                  # (N,H,W,P)
    z_sel = jnp.where(inside, z, jnp.inf)

    neg_z_top, top_idx = jax.lax.top_k(-z_sel, K)                    # (N,H,W,K)
    z_top = -neg_z_top
    valid = jnp.isfinite(z_top)
    d2_top = jnp.take_along_axis(dist2, top_idx, axis=-1)

    offsets = (jnp.arange(N, dtype=jnp.int32) * P)[:, None, None, None]
    idx = jnp.where(valid, top_idx.astype(jnp.int32) + offsets, -1)
    zbuf = jnp.where(valid, z_top, -1.0).astype(jnp.float32)
    dists = jnp.where(valid, d2_top, -1.0).astype(jnp.float32)
    return idx, zbuf, dists


# ----------------------------------------------------------------------------
# Pallas kernel: weights = 1 - dists/r^2  +  alpha compositing (chunked over points)
# ----------------------------------------------------------------------------
def _composite_kernel(frag_ref, feat_ref, out_ref, *, inv_r2, K, p_chunk,
                      scatter_dtype, cmp_dtype):
    pc = pl.program_id(1)                               # packed-point chunk (reduction)

    frag = frag_ref[...]                                # (T, 2K) int32: [idx | bitcast(dists)]
    idx = frag[:, :K]                                   # (T, K) packed point ids, -1 == empty
    d2 = pltpu.bitcast(frag[:, K:], jnp.float32)        # (T, K) squared distances

    # weights = 1 - dists / r^2, clamped to [0,1]; empty slots get weight 0.
    w = 1.0 - d2 * inv_r2
    w = jnp.clip(w, 0.0, 1.0)
    # Load-bearing: empty slots carry dists = -1 (-> w clamps to 1) and must not kill
    # the transmittance.  Do not remove when micro-optimizing the VALU path.
    w = jnp.where(idx >= 0, w, 0.0)

    T = idx.shape[0]
    lo = pc * p_chunk

    # Front-to-back alpha compositing: alpha_k = w_k * prod_{j<k}(1 - w_j).
    # Alphas / local column indices are precomputed once (tiny (T,1) work) and reused
    # across the SUB-wide column sweep below.  The transmittance uses ALL K slots
    # (chunk-independent); only the one-hot scatter is restricted to this chunk.
    cum = jnp.ones((T, 1), jnp.float32)
    alphas, cols = [], []
    for k in range(K):                                  # K is small & static
        wk = w[:, k:k + 1]
        alphas.append((wk * cum).astype(scatter_dtype))
        cols.append(idx[:, k:k + 1] - lo)               # local index in this chunk (int32, exact)
        cum = cum * (1.0 - wk)

    @pl.when(pc == 0)
    def _():
        out_ref[...] = jnp.zeros_like(out_ref)

    # Column iota for one column group.  The equality test runs in `cmp_dtype`:
    # int32 for the f32 path; bf16 for the bf16 path (exact: group values are
    # 0..SUB-1 <= 255, and no integer >= 256 or < 0 can round into that range).
    sub_iota = jax.lax.broadcasted_iota(jnp.int32, (T, SUB), 1).astype(cmp_dtype)
    n_sub = p_chunk // SUB

    # Rolled loop over SUB-wide column groups of the point chunk: bounds the live
    # temporaries of the K-unrolled scatter at (T, SUB) per value regardless of the
    # pipeline chunk size (VMEM safety), while the DMA pipeline still moves the full
    # (p_chunk, C_PAD) feature block per grid step.
    @pl.loop(0, n_sub)
    def _(g):
        base = pl.multiple_of(g * SUB, SUB)
        wmat = jnp.zeros((T, SUB), scatter_dtype)
        for k in range(K):
            # exact int32 shift into this column group, then cheap (T,1) cast
            ck = (cols[k] - base).astype(cmp_dtype)
            # one-hot scatter as select-then-add (compare + select + add per element;
            # the mask-multiply form costs one extra convert on TPU).
            wmat = wmat + jnp.where(ck == sub_iota, alphas[k], 0.0)
        # Lane-dense MXU matmul for this column group, accumulated into the resident
        # out tile.  MXU and DMA are far from binding; the scatter above is.
        out_ref[...] += jnp.dot(wmat.astype(feat_ref.dtype),
                                feat_ref[pl.ds(base, SUB), :],
                                preferred_element_type=jnp.float32)


def alpha_composite_pallas(idx, dists, feats_packed, radius, *, precision="f32",
                           max_pix_tile=MAX_PIX_TILE, max_p_chunk=MAX_P_CHUNK):
    """idx/dists: (N, H, W, K); feats_packed: (Ppk, C) -> images (N, H, W, C).

    precision:
      "f32"         exact (default; matches the f32 reference bit-for-bit tolerances)
      "bf16_matmul" bf16 feature table + bf16 MXU, f32 scatter  (v5e recommendation)
      "bf16"        bf16 scatter + bf16 feature table / MXU      (v6e/v7x recommendation)
    """
    N, H, W, K = idx.shape
    Ppk, C = feats_packed.shape
    assert C <= C_PAD, "feature channels must fit one 128-lane tile"
    NPIX = N * H * W

    if precision == "f32":
        feat_dtype, scatter_dtype, cmp_dtype = jnp.float32, jnp.float32, jnp.int32
    elif precision == "bf16_matmul":
        feat_dtype, scatter_dtype, cmp_dtype = jnp.bfloat16, jnp.float32, jnp.int32
    elif precision == "bf16":
        feat_dtype, scatter_dtype, cmp_dtype = jnp.bfloat16, jnp.bfloat16, jnp.bfloat16
        assert SUB <= 256  # bf16 equality test exactness requires group width <= 256
    else:
        raise ValueError(f"unknown precision: {precision}")

    # Pixel tile: as big as possible (amortizes ~0.35us/grid-step), 256-aligned, but
    # balanced so the pixel grid keeps >= 2 steps (two v7x TensorCores) where possible
    # and padding waste stays low.
    n_tiles_target = max(2, pl.cdiv(NPIX, max_pix_tile))
    T = min(max_pix_tile, _round_up(pl.cdiv(NPIX, n_tiles_target), 256))
    NPIX_pad = _round_up(NPIX, T)
    n_tiles = NPIX_pad // T

    # Point chunk: balanced across chunks, 256-aligned (dense scatter lanes, MXU-K
    # alignment) and a multiple of the in-kernel SUB column group.
    n_chunks = pl.cdiv(Ppk, max_p_chunk)
    P_CHUNK = _round_up(pl.cdiv(Ppk, n_chunks), SUB)
    Ppk_pad = P_CHUNK * n_chunks

    # Fragments: pack idx and bitcast(dists) into ONE (NPIX_pad, 2K) int32 array so each
    # pixel tile is a single DMA; padded pixel rows get idx = -1 (zero weight).
    idx_f = jnp.pad(idx.reshape(NPIX, K).astype(jnp.int32),
                    ((0, NPIX_pad - NPIX), (0, 0)), constant_values=-1)
    d_f = jnp.pad(dists.reshape(NPIX, K).astype(jnp.float32),
                  ((0, NPIX_pad - NPIX), (0, 0)))
    frag = jnp.concatenate([idx_f, jax.lax.bitcast_convert_type(d_f, jnp.int32)], axis=-1)

    # Feature table: pad points to a multiple of P_CHUNK and channels to a full 128-lane
    # tile so the output BlockSpec is lane-dense (unmasked stores) and the MXU output
    # tile is full width.  Padded rows/cols are zero and are never selected.
    feats = jnp.pad(feats_packed.astype(feat_dtype),
                    ((0, Ppk_pad - Ppk), (0, C_PAD - C)))

    r2 = float(radius) * float(radius)
    kernel = functools.partial(_composite_kernel, inv_r2=1.0 / r2, K=K,
                               p_chunk=P_CHUNK, scatter_dtype=scatter_dtype,
                               cmp_dtype=cmp_dtype)

    # The feature chunk is the only operand that changes along the reduction axis; when
    # there is a single chunk it is constant -> don't double-buffer it (saves VMEM).
    feat_kwargs = {"pipeline_mode": pl.Buffered(1)} if n_chunks == 1 else {}
    feat_spec = pl.BlockSpec((P_CHUNK, C_PAD), lambda i, pc: (pc, 0), **feat_kwargs)

    # Feature bytes: DMA'd once when resident (single chunk, constant index map),
    # re-streamed once per pixel tile otherwise.  Output is write-only.
    feat_bytes = Ppk_pad * C_PAD * jnp.dtype(feat_dtype).itemsize
    cost = pl.CostEstimate(
        flops=int(2 * NPIX_pad * Ppk_pad * C_PAD        # MXU
                  + 3 * K * NPIX_pad * Ppk_pad),        # VPU compare/select/add scatter
        transcendentals=0,
        bytes_accessed=int(frag.size * 4
                           + (feat_bytes if n_chunks == 1 else n_tiles * feat_bytes)
                           + NPIX_pad * C_PAD * 4),
    )

    out = pl.pallas_call(
        kernel,
        out_shape=jax.ShapeDtypeStruct((NPIX_pad, C_PAD), jnp.float32),
        grid_spec=pltpu.PrefetchScalarGridSpec(
            num_scalar_prefetch=0,
            grid=(n_tiles, n_chunks),                   # reduction (point chunks) last
            in_specs=[
                pl.BlockSpec((T, 2 * K), lambda i, pc: (i, 0)),   # fragments (resident over pc)
                feat_spec,                                        # packed feature chunk
            ],
            out_specs=pl.BlockSpec((T, C_PAD), lambda i, pc: (i, 0)),   # accumulator tile
        ),
        compiler_params=pltpu.CompilerParams(
            # TODO(synk): confirm the parallel pixel axis shards across both v7x TCs.
            dimension_semantics=("parallel", "arbitrary"),
            # Working set per step: frag(2 x T*2K*4) + feats(2 x P_CHUNK*128*itm)
            # + out(T*128*4) + the (T, SUB)-bounded scatter temporaries  < ~30 MiB
            # even with zero buffer reuse; 32 MiB fits v5e/v6e (128 MiB) and v7x (64 MiB).
            vmem_limit_bytes=32 * 1024 * 1024,
        ),
        cost_estimate=cost,
    )(frag, feats)

    return out[:NPIX, :C].reshape(N, H, W, C)


# ----------------------------------------------------------------------------
# Full module forward: PointRendererWithDepth
# ----------------------------------------------------------------------------
def point_renderer_with_depth(points, features, radius, image_size, K, *,
                              precision="f32", max_pix_tile=MAX_PIX_TILE,
                              max_p_chunk=MAX_P_CHUNK):
    """Returns (images (N,H,W,C), zbuf (N,H,W,K)) -- matches the PyTorch forward."""
    idx, zbuf, dists = rasterize_points(points, radius, image_size, K)   # fragments
    feats_packed = features.reshape(-1, features.shape[-1])              # features_packed()
    images = alpha_composite_pallas(idx, dists, feats_packed, radius,
                                    precision=precision,
                                    max_pix_tile=max_pix_tile,
                                    max_p_chunk=max_p_chunk)             # compositor (Pallas)
    return images, zbuf


# ----------------------------------------------------------------------------
# Pure-JAX reference for correctness checking
# ----------------------------------------------------------------------------
def _alpha_composite_ref(idx, dists, feats_packed, radius):
    r2 = radius * radius
    valid = idx >= 0
    # Same clamp semantics as the kernel (no-op with this rasterizer: dists <= r^2).
    w = jnp.clip(1.0 - dists / r2, 0.0, 1.0)
    w = jnp.where(valid, w, 0.0)                                         # (N,H,W,K)
    f = feats_packed[jnp.where(valid, idx, 0)]                           # (N,H,W,K,C)
    one_minus = 1.0 - w
    cum_prev = jnp.concatenate(
        [jnp.ones_like(w[..., :1]), jnp.cumprod(one_minus, axis=-1)[..., :-1]],
        axis=-1)
    a = w * cum_prev
    return jnp.sum(a[..., None] * f, axis=-2)


def _forward_ref(points, features, radius, image_size, K):
    idx, zbuf, dists = rasterize_points(points, radius, image_size, K)
    feats_packed = features.reshape(-1, features.shape[-1])
    return _alpha_composite_ref(idx, dists, feats_packed, radius), zbuf


# ----------------------------------------------------------------------------
if __name__ == "__main__":
    def _make_inputs(key, N, P, C):
        k_xy, k_z, k_feat = jax.random.split(key, 3)
        xy = jax.random.uniform(k_xy, (N, P, 2), minval=-1.0, maxval=1.0)
        z = jax.random.uniform(k_z, (N, P, 1), minval=0.5, maxval=2.0)
        points = jnp.concatenate([xy, z], axis=-1).astype(jnp.float32)    # (N, P, 3)
        features = jax.random.uniform(k_feat, (N, P, C), dtype=jnp.float32)
        return points, features

    # Case 1: toy problem (single point chunk / single column group, two pixel tiles).
    N, P, C, H, W, K, radius = 2, 128, 4, 16, 16, 8, 0.3
    points, features = _make_inputs(jax.random.PRNGKey(0), N, P, C)
    images, zbuf = point_renderer_with_depth(points, features, radius, (H, W), K)
    jax.block_until_ready((images, zbuf))

    images_ref, zbuf_ref = _forward_ref(points, features, radius, (H, W), K)
    assert images.shape == (N, H, W, C) and zbuf.shape == (N, H, W, K)
    assert jnp.allclose(images, images_ref, atol=1e-5, rtol=1e-5)
    assert jnp.allclose(zbuf, zbuf_ref, atol=1e-6, rtol=1e-6)

    # Case 2: odd shapes exercising pixel / point / channel padding, the multi-chunk
    # (reduction axis) accumulator path and the rolled multi-group column sweep
    # (max_p_chunk override forces 2 chunks x 2 column groups).
    N2, P2, C2, H2, W2, K2, radius2 = 1, 700, 3, 12, 20, 4, 0.25
    points2, features2 = _make_inputs(jax.random.PRNGKey(1), N2, P2, C2)
    images2, zbuf2 = point_renderer_with_depth(points2, features2, radius2, (H2, W2), K2,
                                               max_p_chunk=512)
    jax.block_until_ready((images2, zbuf2))

    images2_ref, zbuf2_ref = _forward_ref(points2, features2, radius2, (H2, W2), K2)
    assert images2.shape == (N2, H2, W2, C2) and zbuf2.shape == (N2, H2, W2, K2)
    assert jnp.allclose(images2, images2_ref, atol=1e-5, rtol=1e-5)
    assert jnp.allclose(zbuf2, zbuf2_ref, atol=1e-6, rtol=1e-6)

    # Case 3: reduced-precision paths (looser tolerance, per the bf16 gating note).
    images_b, _ = point_renderer_with_depth(points, features, radius, (H, W), K,
                                            precision="bf16")
    jax.block_until_ready(images_b)
    assert jnp.allclose(images_b, images_ref, atol=3e-2, rtol=3e-2)

    images_m, _ = point_renderer_with_depth(points, features, radius, (H, W), K,
                                            precision="bf16_matmul")
    jax.block_until_ready(images_m)
    assert jnp.allclose(images_m, images_ref, atol=3e-2, rtol=3e-2)

    print("KERNEL_OK")
</pallas_src>

<mosaic_0001>
module attributes {stable_mosaic.version = 11 : i64} {
  func.func @_composite_kernel(%arg0: i32, %arg1: i32, %arg2: memref<256x16xi32, #tpu.memory_space<vmem>>, %arg3: memref<256x128xf32, #tpu.memory_space<vmem>>, %arg4: memref<256x128xf32, #tpu.memory_space<vmem>>) attributes {dimension_semantics = [#tpu.dimension_semantics<parallel>, #tpu.dimension_semantics<arbitrary>], iteration_bounds = array<i64: 2, 1>, scalar_prefetch = 0 : i64, scratch_operands = 0 : i64, tpu.core_type = #tpu.core_type<tc>, window_params = [{transform_indices = @transform_0, window_bounds = array<i64: 256, 16>}, {pipeline_mode = #tpu.pipeline_mode<synchronous>, transform_indices = @transform_1, window_bounds = array<i64: 256, 128>}, {transform_indices = @transform_2, window_bounds = array<i64: 256, 128>}]} {
    %c0 = arith.constant 0 : index
    %c0_0 = arith.constant 0 : index
    %0 = vector.load %arg2[%c0, %c0_0] : memref<256x16xi32, #tpu.memory_space<vmem>>, vector<256x16xi32>
    %1 = vector.extract_strided_slice %0 {offsets = [0, 0], sizes = [256, 8], strides = [1, 1]} : vector<256x16xi32> to vector<256x8xi32>
    %2 = vector.extract_strided_slice %0 {offsets = [0, 8], sizes = [256, 8], strides = [1, 1]} : vector<256x16xi32> to vector<256x8xi32>
    %3 = tpu.bitcast %2 : vector<256x8xi32> -> vector<256x8xf32>
    %cst = arith.constant 11.1111107 : f32
    %4 = vector.broadcast %cst : f32 to vector<256x8xf32>
    %5 = arith.mulf %3, %4 : vector<256x8xf32>
    %cst_1 = arith.constant 1.000000e+00 : f32
    %6 = vector.broadcast %cst_1 : f32 to vector<256x8xf32>
    %7 = arith.subf %6, %5 : vector<256x8xf32>
    %cst_2 = arith.constant 0.000000e+00 : f32
    %cst_3 = arith.constant 1.000000e+00 : f32
    %8 = vector.broadcast %cst_2 : f32 to vector<256x8xf32>
    %9 = arith.maximumf %8, %7 : vector<256x8xf32>
    %10 = vector.broadcast %cst_3 : f32 to vector<256x8xf32>
    %11 = arith.minimumf %10, %9 : vector<256x8xf32>
    %c0_i32 = arith.constant 0 : i32
    %12 = vector.broadcast %c0_i32 : i32 to vector<256x8xi32>
    %13 = arith.cmpi sge, %1, %12 : vector<256x8xi32>
    %cst_4 = arith.constant 0.000000e+00 : f32
    %14 = vector.broadcast %cst_4 : f32 to vector<256x8xf32>
    %15 = arith.select %13, %11, %14 : vector<256x8xi1>, vector<256x8xf32>
    %c256_i32 = arith.constant 256 : i32
    %16 = arith.muli %arg1, %c256_i32 : i32
    %cst_5 = arith.constant 1.000000e+00 : f32
    %17 = vector.broadcast %cst_5 : f32 to vector<256x1xf32>
    %18 = vector.extract_strided_slice %15 {offsets = [0, 0], sizes = [256, 1], strides = [1, 1]} : vector<256x8xf32> to vector<256x1xf32>
    %19 = arith.mulf %18, %17 : vector<256x1xf32>
    %20 = vector.extract_strided_slice %1 {offsets = [0, 0], sizes = [256, 1], strides = [1, 1]} : vector<256x8xi32> to vector<256x1xi32>
    %21 = vector.broadcast %16 : i32 to vector<256x1xi32>
    %22 = arith.subi %20, %21 : vector<256x1xi32>
    %cst_6 = arith.constant 1.000000e+00 : f32
    %23 = vector.broadcast %cst_6 : f32 to vector<256x1xf32>
    %24 = arith.subf %23, %18 : vector<256x1xf32>
    %25 = arith.mulf %17, %24 : vector<256x1xf32>
    %26 = vector.extract_strided_slice %15 {offsets = [0, 1], sizes = [256, 1], strides = [1, 1]} : vector<256x8xf32> to vector<256x1xf32>
    %27 = arith.mulf %26, %25 : vector<256x1xf32>
    %28 = vector.extract_strided_slice %1 {offsets = [0, 1], sizes = [256, 1], strides = [1, 1]} : vector<256x8xi32> to vector<256x1xi32>
    %29 = vector.broadcast %16 : i32 to vector<256x1xi32>
    %30 = arith.subi %28, %29 : vector<256x1xi32>
    %cst_7 = arith.constant 1.000000e+00 : f32
    %31 = vector.broadcast %cst_7 : f32 to vector<256x1xf32>
    %32 = arith.subf %31, %26 : vector<256x1xf32>
    %33 = arith.mulf %25, %32 : vector<256x1xf32>
    %34 = vector.extract_strided_slice %15 {offsets = [0, 2], sizes = [256, 1], strides = [1, 1]} : vector<256x8xf32> to vector<256x1xf32>
    %35 = arith.mulf %34, %33 : vector<256x1xf32>
    %36 = vector.extract_strided_slice %1 {offsets = [0, 2], sizes = [256, 1], strides = [1, 1]} : vector<256x8xi32> to vector<256x1xi32>
    %37 = vector.broadcast %16 : i32 to vector<256x1xi32>
    %38 = arith.subi %36, %37 : vector<256x1xi32>
    %cst_8 = arith.constant 1.000000e+00 : f32
    %39 = vector.broadcast %cst_8 : f32 to vector<256x1xf32>
    %40 = arith.subf %39, %34 : vector<256x1xf32>
    %41 = arith.mulf %33, %40 : vector<256x1xf32>
    %42 = vector.extract_strided_slice %15 {offsets = [0, 3], sizes = [256, 1], strides = [1, 1]} : vector<256x8xf32> to vector<256x1xf32>
    %43 = arith.mulf %42, %41 : vector<256x1xf32>
    %44 = vector.extract_strided_slice %1 {offsets = [0, 3], sizes = [256, 1], strides = [1, 1]} : vector<256x8xi32> to vector<256x1xi32>
    %45 = vector.broadcast %16 : i32 to vector<256x1xi32>
    %46 = arith.subi %44, %45 : vector<256x1xi32>
    %cst_9 = arith.constant 1.000000e+00 : f32
    %47 = vector.broadcast %cst_9 : f32 to vector<256x1xf32>
    %48 = arith.subf %47, %42 : vector<256x1xf32>
    %49 = arith.mulf %41, %48 : vector<256x1xf32>
    %50 = vector.extract_strided_slice %15 {offsets = [0, 4], sizes = [256, 1], strides = [1, 1]} : vector<256x8xf32> to vector<256x1xf32>
    %51 = arith.mulf %50, %49 : vector<256x1xf32>
    %52 = vector.extract_strided_slice %1 {offsets = [0, 4], sizes = [256, 1], strides = [1, 1]} : vector<256x8xi32> to vector<256x1xi32>
    %53 = vector.broadcast %16 : i32 to vector<256x1xi32>
    %54 = arith.subi %52, %53 : vector<256x1xi32>
    %cst_10 = arith.constant 1.000000e+00 : f32
    %55 = vector.broadcast %cst_10 : f32 to vector<256x1xf32>
    %56 = arith.subf %55, %50 : vector<256x1xf32>
    %57 = arith.mulf %49, %56 : vector<256x1xf32>
    %58 = vector.extract_strided_slice %15 {offsets = [0, 5], sizes = [256, 1], strides = [1, 1]} : vector<256x8xf32> to vector<256x1xf32>
    %59 = arith.mulf %58, %57 : vector<256x1xf32>
    %60 = vector.extract_strided_slice %1 {offsets = [0, 5], sizes = [256, 1], strides = [1, 1]} : vector<256x8xi32> to vector<256x1xi32>
    %61 = vector.broadcast %16 : i32 to vector<256x1xi32>
    %62 = arith.subi %60, %61 : vector<256x1xi32>
    %cst_11 = arith.constant 1.000000e+00 : f32
    %63 = vector.broadcast %cst_11 : f32 to vector<256x1xf32>
    %64 = arith.subf %63, %58 : vector<256x1xf32>
    %65 = arith.mulf %57, %64 : vector<256x1xf32>
    %66 = vector.extract_strided_slice %15 {offsets = [0, 6], sizes = [256, 1], strides = [1, 1]} : vector<256x8xf32> to vector<256x1xf32>
    %67 = arith.mulf %66, %65 : vector<256x1xf32>
    %68 = vector.extract_strided_slice %1 {offsets = [0, 6], sizes = [256, 1], strides = [1, 1]} : vector<256x8xi32> to vector<256x1xi32>
    %69 = vector.broadcast %16 : i32 to vector<256x1xi32>
    %70 = arith.subi %68, %69 : vector<256x1xi32>
    %cst_12 = arith.constant 1.000000e+00 : f32
    %71 = vector.broadcast %cst_12 : f32 to vector<256x1xf32>
    %72 = arith.subf %71, %66 : vector<256x1xf32>
    %73 = arith.mulf %65, %72 : vector<256x1xf32>
    %74 = vector.extract_strided_slice %15 {offsets = [0, 7], sizes = [256, 1], strides = [1, 1]} : vector<256x8xf32> to vector<256x1xf32>
    %75 = arith.mulf %74, %73 : vector<256x1xf32>
    %76 = vector.extract_strided_slice %1 {offsets = [0, 7], sizes = [256, 1], strides = [1, 1]} : vector<256x8xi32> to vector<256x1xi32>
    %77 = vector.broadcast %16 : i32 to vector<256x1xi32>
    %78 = arith.subi %76, %77 : vector<256x1xi32>
    %c0_i32_13 = arith.constant 0 : i32
    %79 = arith.cmpi eq, %arg1, %c0_i32_13 : i32
    %80 = arith.extui %79 : i1 to i32
    %c0_i32_14 = arith.constant 0 : i32
    %81 = arith.cmpi ne, %80, %c0_i32_14 : i32
    scf.if %81 {
      %cst_34 = arith.constant 0.000000e+00 : f32
      %166 = vector.broadcast %cst_34 : f32 to vector<256x128xf32>
      %c0_35 = arith.constant 0 : index
      %c0_36 = arith.constant 0 : index
      %167 = vector.load %arg4[%c0_35, %c0_36] : memref<256x128xf32, #tpu.memory_space<vmem>>, vector<256x128xf32>
      tpu.vector_store %arg4[%c0_35, %c0_36], %166 {strides = array<i32>} : memref<256x128xf32, #tpu.memory_space<vmem>>, vector<256x128xf32>,
    } else {
    }
    %82 = tpu.iota {dimensions = array<i32: 1>} : vector<256x256xi32>
    %c0_i32_15 = arith.constant 0 : i32
    %c1_i32 = arith.constant 1 : i32
    %83 = arith.muli %c0_i32_15, %c1_i32 : i32
    %c0_i32_16 = arith.constant 0 : i32
    %84 = arith.addi %c0_i32_16, %83 : i32
    %c256_i32_17 = arith.constant 256 : i32
    %85 = arith.muli %84, %c256_i32_17 : i32
    %86 = tpu.assume_multiple %85, 256 : i32
    %cst_18 = arith.constant 0.000000e+00 : f32
    %87 = vector.broadcast %cst_18 : f32 to vector<256x256xf32>
    %88 = vector.broadcast %86 : i32 to vector<256x1xi32>
    %89 = arith.subi %22, %88 : vector<256x1xi32>
    %90 = vector.broadcast %89 : vector<256x1xi32> to vector<256x256xi32>
    %91 = arith.cmpi eq, %90, %82 : vector<256x256xi32>
    %cst_19 = arith.constant 0.000000e+00 : f32
    %92 = vector.shape_cast %19 : vector<256x1xf32> to vector<256x1xf32>
    %93 = vector.broadcast %92 : vector<256x1xf32> to vector<256x256xf32>
    %94 = vector.broadcast %cst_19 : f32 to vector<256x256xf32>
    %95 = arith.select %91, %93, %94 : vector<256x256xi1>, vector<256x256xf32>
    %96 = arith.addf %87, %95 : vector<256x256xf32>
    %97 = vector.broadcast %86 : i32 to vector<256x1xi32>
    %98 = arith.subi %30, %97 : vector<256x1xi32>
    %99 = vector.broadcast %98 : vector<256x1xi32> to vector<256x256xi32>
    %100 = arith.cmpi eq, %99, %82 : vector<256x256xi32>
    %cst_20 = arith.constant 0.000000e+00 : f32
    %101 = vector.shape_cast %27 : vector<256x1xf32> to vector<256x1xf32>
    %102 = vector.broadcast %101 : vector<256x1xf32> to vector<256x256xf32>
    %103 = vector.broadcast %cst_20 : f32 to vector<256x256xf32>
    %104 = arith.select %100, %102, %103 : vector<256x256xi1>, vector<256x256xf32>
    %105 = arith.addf %96, %104 : vector<256x256xf32>
    %106 = vector.broadcast %86 : i32 to vector<256x1xi32>
    %107 = arith.subi %38, %106 : vector<256x1xi32>
    %108 = vector.broadcast %107 : vector<256x1xi32> to vector<256x256xi32>
    %109 = arith.cmpi eq, %108, %82 : vector<256x256xi32>
    %cst_21 = arith.constant 0.000000e+00 : f32
    %110 = vector.shape_cast %35 : vector<256x1xf32> to vector<256x1xf32>
    %111 = vector.broadcast %110 : vector<256x1xf32> to vector<256x256xf32>
    %112 = vector.broadcast %cst_21 : f32 to vector<256x256xf32>
    %113 = arith.select %109, %111, %112 : vector<256x256xi1>, vector<256x256xf32>
    %114 = arith.addf %105, %113 : vector<256x256xf32>
    %115 = vector.broadcast %86 : i32 to vector<256x1xi32>
    %116 = arith.subi %46, %115 : vector<256x1xi32>
    %117 = vector.broadcast %116 : vector<256x1xi32> to vector<256x256xi32>
    %118 = arith.cmpi eq, %117, %82 : vector<256x256xi32>
    %cst_22 = arith.constant 0.000000e+00 : f32
    %119 = vector.shape_cast %43 : vector<256x1xf32> to vector<256x1xf32>
    %120 = vector.broadcast %119 : vector<256x1xf32> to vector<256x256xf32>
    %121 = vector.broadcast %cst_22 : f32 to vector<256x256xf32>
    %122 = arith.select %118, %120, %121 : vector<256x256xi1>, vector<256x256xf32>
    %123 = arith.addf %114, %122 : vector<256x256xf32>
    %124 = vector.broadcast %86 : i32 to vector<256x1xi32>
    %125 = arith.subi %54, %124 : vector<256x1xi32>
    %126 = vector.broadcast %125 : vector<256x1xi32> to vector<256x256xi32>
    %127 = arith.cmpi eq, %126, %82 : vector<256x256xi32>
    %cst_23 = arith.constant 0.000000e+00 : f32
    %128 = vector.shape_cast %51 : vector<256x1xf32> to vector<256x1xf32>
    %129 = vector.broadcast %128 : vector<256x1xf32> to vector<256x256xf32>
    %130 = vector.broadcast %cst_23 : f32 to vector<256x256xf32>
    %131 = arith.select %127, %129, %130 : vector<256x256xi1>, vector<256x256xf32>
    %132 = arith.addf %123, %131 : vector<256x256xf32>
    %133 = vector.broadcast %86 : i32 to vector<256x1xi32>
    %134 = arith.subi %62, %133 : vector<256x1xi32>
    %135 = vector.broadcast %134 : vector<256x1xi32> to vector<256x256xi32>
    %136 = arith.cmpi eq, %135, %82 : vector<256x256xi32>
    %cst_24 = arith.constant 0.000000e+00 : f32
    %137 = vector.shape_cast %59 : vector<256x1xf32> to vector<256x1xf32>
    %138 = vector.broadcast %137 : vector<256x1xf32> to vector<256x256xf32>
    %139 = vector.broadcast %cst_24 : f32 to vector<256x256xf32>
    %140 = arith.select %136, %138, %139 : vector<256x256xi1>, vector<256x256xf32>
    %141 = arith.addf %132, %140 : vector<256x256xf32>
    %142 = vector.broadcast %86 : i32 to vector<256x1xi32>
    %143 = arith.subi %70, %142 : vector<256x1xi32>
    %144 = vector.broadcast %143 : vector<256x1xi32> to vector<256x256xi32>
    %145 = arith.cmpi eq, %144, %82 : vector<256x256xi32>
    %cst_25 = arith.constant 0.000000e+00 : f32
    %146 = vector.shape_cast %67 : vector<256x1xf32> to vector<256x1xf32>
    %147 = vector.broadcast %146 : vector<256x1xf32> to vector<256x256xf32>
    %148 = vector.broadcast %cst_25 : f32 to vector<256x256xf32>
    %149 = arith.select %145, %147, %148 : vector<256x256xi1>, vector<256x256xf32>
    %150 = arith.addf %141, %149 : vector<256x256xf32>
    %151 = vector.broadcast %86 : i32 to vector<256x1xi32>
    %152 = arith.subi %78, %151 : vector<256x1xi32>
    %153 = vector.broadcast %152 : vector<256x1xi32> to vector<256x256xi32>
    %154 = arith.cmpi eq, %153, %82 : vector<256x256xi32>
    %cst_26 = arith.constant 0.000000e+00 : f32
    %155 = vector.shape_cast %75 : vector<256x1xf32> to vector<256x1xf32>
    %156 = vector.broadcast %155 : vector<256x1xf32> to vector<256x256xf32>
    %157 = vector.broadcast %cst_26 : f32 to vector<256x256xf32>
    %158 = arith.select %154, %156, %157 : vector<256x256xi1>, vector<256x256xf32>
    %159 = arith.addf %150, %158 : vector<256x256xf32>
    %c0_27 = arith.constant 0 : index
    %c0_28 = arith.constant 0 : index
    %160 = vector.load %arg4[%c0_27, %c0_28] : memref<256x128xf32, #tpu.memory_space<vmem>>, vector<256x128xf32>
    %161 = arith.index_cast %86 : i32 to index
    %c0_29 = arith.constant 0 : index
    %162 = vector.load %arg3[%161, %c0_29] : memref<256x128xf32, #tpu.memory_space<vmem>>, vector<256x128xf32>
    %cst_30 = arith.constant dense<0.000000e+00> : vector<256x128xf32>
    %163 = tpu.matmul %159, %162, %cst_30 {dimension_numbers = #tpu.dot_dimension_numbers<[1], [0], [0], [1], [0, 0, 1, 1], [], []>} : vector<256x256xf32>, vector<256x128xf32>, vector<256x128xf32> -> vector<256x128xf32>
    %164 = arith.addf %160, %163 : vector<256x128xf32>
    %c0_31 = arith.constant 0 : index
    %c0_32 = arith.constant 0 : index
    %165 = vector.load %arg4[%c0_31, %c0_32] : memref<256x128xf32, #tpu.memory_space<vmem>>, vector<256x128xf32>
    tpu.vector_store %arg4[%c0_31, %c0_32], %164 {strides = array<i32>} : memref<256x128xf32, #tpu.memory_space<vmem>>, vector<256x128xf32>,
    %c1_i32_33 = arith.constant 1 : i32
    return
  }
  func.func @transform_0(%arg0: i32, %arg1: i32) -> (i32, i32) {
    %c0_i32 = arith.constant 0 : i32
    %c0_i32_0 = arith.constant 0 : i32
    return %arg0, %c0_i32 : i32, i32
  }
  func.func @transform_1(%arg0: i32, %arg1: i32) -> (i32, i32) {
    %c0_i32 = arith.constant 0 : i32
    %c0_i32_0 = arith.constant 0 : i32
    return %arg1, %c0_i32 : i32, i32
  }
  func.func @transform_2(%arg0: i32, %arg1: i32) -> (i32, i32) {
    %c0_i32 = arith.constant 0 : i32
    %c0_i32_0 = arith.constant 0 : i32
    return %arg0, %c0_i32 : i32, i32
  }
}

</mosaic_0001>

<bundles_post_ra>
// kernel: tpu_custom_call.1
= control target key start
LH: loop header
LB: loop body
LE: loop exit
PB: predicated region body
PF: predicated region fallthrough
CT: control target
= control target key end

     0   :  { %7 = vsyncpa [#allocation3], 0  ;;  %s14497_s0 = inlined_call_operand.vmem [shape: s32[512,16], index: 0, kind: input, shape index: {}]   ;;  %s14498_s1 = inlined_call_operand.vmem [shape: f32[256,128], index: 1, kind: input, shape index: {}]   ;;  %s14499_s2 = inlined_call_operand.hbm [shape: f32[512,128], index: 2, kind: output, shape index: {}]  }
   0x1   :  { %9 = vsyncpa [#allocation3 + $0x1], 0  ;;  %s6994_s9 = smov 0   ;;  %s6996_s10 = smov 0  }
   0x2   :  { %s6998_s11 = smov 0   ;;  %s7000_s12 = smov 0  }
   0x3   :  { %s7002_s13 = smov 0   ;;  %s7004_s14 = smov 0  }
   0x4 LB: > { %s6628_s15 = sadd.s32 4294967295, %s6953_s14   ;;  %s6629_s16 = sadd.s32 4294967294, %s6953_s14   ;;  %s6953_s14 = sphi %s7004_s14, %s15_s14   ;;  %s6949_s13 = sphi %s7002_s13, %s16858_s13   ;;  %s6945_s12 = sphi %s7000_s12, %s16857_s12   ;;  %s6941_s11 = sphi %s6998_s11, %s16856_s11   ;;  %s6937_s10 = sphi %s6996_s10, %s16855_s10   ;;  %s6933_s9 = sphi %s6994_s9, %s16854_s9  }
   0x5   : > { %s27_s17 = sadd.s32 1, %s6949_s13  ;;  %s86_s18 = sadd.s32 1, %s6941_s11 }
   0x6   : > { %p29_p0 = scmp.ge.s32.totalorder %s27_s17, 2  ;;  %p96_p1 = scmp.ne.s32.totalorder %s6941_s11, %s6937_s10 }
   0x7   : > { %p97_p2 = scmp.eq.s32.totalorder %s6628_s15, 1  ;;  %p102_p3 = scmp.ne.s32.totalorder %s6937_s10, %s6933_s9 }
   0x8   : > { %s16860_s17 = smov (%p29_p0, %s27_s17), 0  ;;  %p103_p5 = scmp.eq.s32.totalorder %s6629_s16, 1 }
   0x9   : > { %p7034_p4 = por %p97_p2, %p96_p1  ;;  %s83_s20 = ssub.s32 %s6949_s13, %s16860_s17 }
   0xa   : > { %p6633_p6 = scmp.ge.s32.totalorder %s6953_s14, 1  ;;  %p84_p7 = scmp.eq.s32.totalorder %s83_s20, 0 }
   0xb   : > { %p7041_p8 = por %p103_p5, %p102_p3  ;;  %p139_p9 = scmp.lt.s32.totalorder %s6953_s14, 3 }
   0xc   : > { %s7047_s22 = scalar_select %p84_p7, %s6941_s11, %s86_s18  }
   0xd   : > { %p140_p10 = pnand %p6633_p6, %p139_p9 }
   0xf   : > { %143 = sbr.rel (%p140_p10) target bundleno = 3105 (0xc21), region = 28 }
  0x14   : > { %s6635_s23 = sshll.u32 %s6945_s12, 5  ;;  %s6955_s28 = smov 120  }
  0x15   : > { %p167_p11 = scmp.lt.s32.totalorder %s6635_s23, 63  ;;  %s6956_s29 = smov 1  }
  0x16   : > { %s6957_s30 = smov 127   ;;  %s6958_s3 = smov 2  }
  0x17   : > { %s16862_s23 = smov (!%p167_p11, %s6635_s23), 63  ;;  %s6959_s4 = smov 126  }
  0x18   : > { %s6636_s24 = sshll.u32 %s16862_s23, 3  ;;  %s6960_s5 = smov 3  }
  0x19   : > { %s7053_s27 = scalar_lea.vmem %s14497_s0, %s6636_s24  ;;  %s6961_s6 = smov 125  }
  0x1a   : > { %v7056_v0 = vld [vmem:[%s7053_s27 + $0x10] sm:$0xff]  ;;  %v7059_v1 = vld [vmem:[%s7053_s27] sm:$0xff]  ;;  %v7062_v2 = vld [vmem:[%s7053_s27 + $0x18] sm:$0xff]  ;;  %s6962_s7 = smov 4   ;;  %s6963_s8 = smov 124  }
  0x1b   : > { %v245_v3 = vmul.f32 11.111111, %v7056_v0  ;;  %v243_v4 = vmul.f32 11.111111, %v7059_v1  ;;  %v246_v5 = vmul.f32 11.111111, %v7062_v2 }
  0x1c   : > { %v7068_v6 = vld [vmem:[%s7053_s27 + $0x8] sm:$0xff]  ;;  %v7071_v7 = vld [vmem:[%s7053_s27 + $0x20] sm:$0xff]  ;;  %v7076_v16 = vld [vmem:[%s7053_s27 + $0x30] sm:$0xff]  ;;  %vm373_vm0 = vcmp.ge.s32.totalorder %v7056_v0, 0  ;;  %vm371_vm1 = vcmp.ge.s32.totalorder %v7059_v1, 0  ;;  %vm374_vm3 = vcmp.ge.s32.totalorder %v7062_v2, 0 }
  0x1d   : > { %v277_v8 = vsub.f32 1.0, %v245_v3  ;;  %v275_v9 = vsub.f32 1.0, %v243_v4  ;;  %v244_v10 = vmul.f32 11.111111, %v7068_v6  ;;  %v247_v11 = vmul.f32 11.111111, %v7071_v7 }
  0x1e   : > { %v278_v14 = vsub.f32 1.0, %v246_v5  ;;  %v7079_v17 = vld [vmem:[%s7053_s27 + $0x38] sm:$0xff]  ;;  %v7082_v19 = vld [vmem:[%s7053_s27 + $0x28] sm:$0xff]  ;;  %v249_v22 = vmul.f32 11.111111, %v7076_v16  ;;  %v7090_v28 = vld [vmem:[%s7053_s27 + $0x40] sm:$0xff] }
  0x1f   : > { %v309_v12 = vmax.f32 %v277_v8, 0.0  ;;  %v307_v13 = vmax.f32 %v275_v9, 0.0  ;;  %v276_v15 = vsub.f32 1.0, %v244_v10  ;;  %v279_v18 = vsub.f32 1.0, %v247_v11  ;;  %v7095_v36 = vld [vmem:[%s7053_s27 + $0x48] sm:$0xff]  ;;  %v7098_v38 = vld [vmem:[%s7053_s27 + $0x50] sm:$0xff] }
  0x20   : > { %v250_v24 = vmul.f32 11.111111, %v7079_v17  ;;  %v310_v25 = vmax.f32 %v278_v14, 0.0  ;;  %v248_v27 = vmul.f32 11.111111, %v7082_v19  ;;  %v281_v31 = vsub.f32 1.0, %v249_v22 }
  0x21   : > { %v341_v20 = vmin.f32 %v309_v12, 1.0  ;;  %v339_v21 = vmin.f32 %v307_v13, 1.0  ;;  %v311_v23 = vmax.f32 %v279_v18, 0.0  ;;  %v308_v26 = vmax.f32 %v276_v15, 0.0  ;;  %v7105_v45 = vld [vmem:[%s7053_s27 + $0x58] sm:$0xff]  ;;  %v7110_v52 = vld [vmem:[%s7053_s27 + $0x60] sm:$0xff] }
  0x22   : > { %v280_v30 = vsub.f32 1.0, %v248_v27  ;;  %v251_v32 = vmul.f32 11.111111, %v7090_v28  ;;  %v342_v33 = vmin.f32 %v310_v25, 1.0  ;;  %v282_v35 = vsub.f32 1.0, %v250_v24  ;;  %v7113_v53 = vld [vmem:[%s7053_s27 + $0x68] sm:$0xff] }
  0x23   : > { %439 = vrot.lane.b32.xlu1 %v341_v20, %s6955_s28  ;;  %435 = vrot.lane.b32.xlu0 %v339_v21, %s6955_s28  ;;  %v343_v29 = vmin.f32 %v311_v23, 1.0  ;;  %v340_v34 = vmin.f32 %v308_v26, 1.0  ;;  %v252_v39 = vmul.f32 11.111111, %v7095_v36  ;;  %v313_v42 = vmax.f32 %v281_v31, 0.0  ;;  %v7120_v60 = vld [vmem:[%s7053_s27 + $0x70] sm:$0xff] }
  0x24   : > { %v312_v37 = vmax.f32 %v280_v30, 0.0  ;;  %v283_v41 = vsub.f32 1.0, %v251_v32  ;;  %v314_v43 = vmax.f32 %v282_v35, 0.0  ;;  %v253_v44 = vmul.f32 11.111111, %v7098_v38  ;;  %v7125_v8 = vld [vmem:[%s7053_s27 + $0x78] sm:$0xff] }
  0x25   : > { %443 = vrot.lane.b32.xlu2 %v343_v29, %s6955_s28  ;;  %v284_v46 = vsub.f32 1.0, %v252_v39  ;;  %v254_v48 = vmul.f32 11.111111, %v7105_v45  ;;  %v345_v49 = vmin.f32 %v313_v42, 1.0  ;;  %v255_v58 = vmul.f32 11.111111, %v7110_v52 }
  0x26   : > { %v344_v40 = vmin.f32 %v312_v37, 1.0  ;;  %v315_v47 = vmax.f32 %v283_v41, 0.0  ;;  %v346_v50 = vmin.f32 %v314_v43, 1.0  ;;  %v285_v51 = vsub.f32 1.0, %v253_v44  ;;  %v7128_v9 = vld [vmem:[%s7053_s27 + $0x80] sm:$0xff]  ;;  %v7135_v18 = vld [vmem:[%s7053_s27 + $0x88] sm:$0xff] }
  0x27   : > { %v316_v54 = vmax.f32 %v284_v46, 0.0  ;;  %v286_v56 = vsub.f32 1.0, %v254_v48  ;;  %v256_v59 = vmul.f32 11.111111, %v7113_v53  ;;  %v257_v62 = vmul.f32 11.111111, %v7120_v60 }
  0x28   : > { %v347_v55 = vmin.f32 %v315_v47, 1.0  ;;  %v317_v57 = vmax.f32 %v285_v51, 0.0  ;;  %v287_v4 = vsub.f32 1.0, %v255_v58  ;;  %v258_v10 = vmul.f32 11.111111, %v7125_v8  ;;  %v7140_v26 = vld [vmem:[%s7053_s27 + $0x90] sm:$0xff] }
  0x29   : > { %v318_v61 = vmax.f32 %v286_v56, 0.0  ;;  %v348_v63 = vmin.f32 %v316_v54, 1.0  ;;  %v288_v5 = vsub.f32 1.0, %v256_v59  ;;  %v289_v12 = vsub.f32 1.0, %v257_v62  ;;  %v7143_v27 = vld [vmem:[%s7053_s27 + $0x98] sm:$0xff]  ;;  %v7150_v35 = vld [vmem:[%s7053_s27 + $0xa0] sm:$0xff] }
  0x2a   : > { %v349_v3 = vmin.f32 %v317_v57, 1.0  ;;  %v319_v13 = vmax.f32 %v287_v4, 0.0  ;;  %v259_v15 = vmul.f32 11.111111, %v7128_v9  ;;  %v260_v21 = vmul.f32 11.111111, %v7135_v18 }
  0x2b   : > { %441 = vrot.lane.b32.xlu1 %v342_v33, %s6955_s28  ;;  %437 = vrot.lane.b32.xlu0 %v340_v34, %s6955_s28  ;;  %v350_v11 = vmin.f32 %v318_v61, 1.0  ;;  %v320_v14 = vmax.f32 %v288_v5, 0.0  ;;  %v321_v20 = vmax.f32 %v289_v12, 0.0  ;;  %v290_v24 = vsub.f32 1.0, %v258_v10  ;;  %v7155_v44 = vld [vmem:[%s7053_s27 + $0xa8] sm:$0xff]  ;;  %v7158_v46 = vld [vmem:[%s7053_s27 + $0xb0] sm:$0xff] }
  0x2c   : > { %v351_v22 = vmin.f32 %v319_v13, 1.0  ;;  %v291_v25 = vsub.f32 1.0, %v259_v15  ;;  %v261_v29 = vmul.f32 11.111111, %v7140_v26  ;;  %v292_v31 = vsub.f32 1.0, %v260_v21  ;;  %s6964_s15 = smov 5  }
  0x2d   : > { %445 = vrot.lane.b32.xlu2 %v344_v40, %s6955_s28  ;;  %v352_v23 = vmin.f32 %v320_v14, 1.0  ;;  %v353_v30 = vmin.f32 %v321_v20, 1.0  ;;  %v322_v32 = vmax.f32 %v290_v24, 0.0  ;;  %v262_v34 = vmul.f32 11.111111, %v7143_v27  ;;  %v7180_v14 = vld [vmem:[%s7053_s27 + $0xd0] sm:$0xff] }
  0x2e   : > { %v323_v33 = vmax.f32 %v291_v25, 0.0  ;;  %v293_v37 = vsub.f32 1.0, %v261_v29  ;;  %v324_v39 = vmax.f32 %v292_v31, 0.0  ;;  %v263_v40 = vmul.f32 11.111111, %v7150_v35  ;;  %v7185_v25 = vld [vmem:[%s7053_s27 + $0xd8] sm:$0xff] }
  0x2f   : > { %v354_v41 = vmin.f32 %v322_v32, 1.0  ;;  %v294_v43 = vsub.f32 1.0, %v262_v34  ;;  %v264_v51 = vmul.f32 11.111111, %v7155_v44  ;;  %v265_v54 = vmul.f32 11.111111, %v7158_v46 }
  0x30   : > { %v355_v42 = vmin.f32 %v323_v33, 1.0  ;;  %v325_v47 = vmax.f32 %v293_v37, 0.0  ;;  %v356_v48 = vmin.f32 %v324_v39, 1.0  ;;  %v269_v21 = vmul.f32 11.111111, %v7180_v14  ;;  %v7188_v29 = vld [vmem:[%s7053_s27 + $0xe0] sm:$0xff] }
  0x31   : > { %v296_v61 = vsub.f32 1.0, %v264_v51  ;;  %v297_v62 = vsub.f32 1.0, %v265_v54  ;;  %v270_v34 = vmul.f32 11.111111, %v7185_v25  ;;  %v271_v37 = vmul.f32 11.111111, %v7188_v29 }
  0x32   : > { %v357_v58 = vmin.f32 %v325_v47, 1.0  ;;  %v301_v32 = vsub.f32 1.0, %v269_v21  ;;  %v7195_v39 = vld [vmem:[%s7053_s27 + $0xe8] sm:$0xff]  ;;  %vm376_vm2 = vcmp.ge.s32.totalorder %v7082_v19, 0  ;;  %vm372_vm4 = vcmp.ge.s32.totalorder %v7068_v6, 0  ;;  %s6965_s16 = smov 123  }
  0x33   : > { %447 = vrot.lane.b32.xlu0 %v345_v49, %s6955_s28  ;;  %449 = vrot.lane.b32.xlu1 %v346_v50, %s6955_s28  ;;  %v295_v49 = vsub.f32 1.0, %v263_v40  ;;  %v326_v50 = vmax.f32 %v294_v43, 0.0  ;;  %v329_v12 = vmax.f32 %v297_v62, 0.0  ;;  %v302_v47 = vsub.f32 1.0, %v270_v34  ;;  %s6966_s18 = smov 6   ;;  %s6967_s20 = smov 122  }
  0x34   : > { %v333_v40 = vmax.f32 %v301_v32, 0.0  ;;  %vm379_vm5 = vcmp.ge.s32.totalorder %v7090_v28, 0  ;;  %vm375_vm6 = vcmp.ge.s32.totalorder %v7071_v7, 0  ;;  %vm377_vm7 = vcmp.ge.s32.totalorder %v7076_v16, 0  ;;  %s6968_s23 = smov 7  }
  0x35   : > { %451 = vrot.lane.b32.xlu2 %v347_v55, %s6955_s28  ;;  %v7165_v55 = vld [vmem:[%s7053_s27 + $0xb8] sm:$0xff]  ;;  %v327_v56 = vmax.f32 %v295_v49, 0.0  ;;  %v358_v59 = vmin.f32 %v326_v50, 1.0  ;;  %v7200_v49 = vld [vmem:[%s7053_s27 + $0xf0] sm:$0xff]  ;;  %vm382_vm8 = vcmp.ge.s32.totalorder %v7105_v45, 0  ;;  %vm378_vm9 = vcmp.ge.s32.totalorder %v7079_v17, 0 }
  0x36   : > { %v266_v57 = vmul.f32 11.111111, %v7165_v55  ;;  %v7203_v50 = vld [vmem:[%s7053_s27 + $0xf8] sm:$0xff]  ;;  %v365_v51 = vmin.f32 %v333_v40, 1.0  ;;  %vm380_vm10 = vcmp.ge.s32.totalorder %v7095_v36, 0  ;;  %vm385_vm11 = vcmp.ge.s32.totalorder %v7120_v60, 0 }
  0x37   : > { %v359_v5 = vmin.f32 %v327_v56, 1.0  ;;  %v334_v56 = vmax.f32 %v302_v47, 0.0  ;;  %vm381_vm12 = vcmp.ge.s32.totalorder %v7098_v38, 0  ;;  %vm383_vm13 = vcmp.ge.s32.totalorder %v7110_v52, 0 }
  0x38   : > { %v298_v10 = vsub.f32 1.0, %v266_v57  ;;  %vm388_vm14 = vcmp.ge.s32.totalorder %v7135_v18, 0  ;;  %vm384_vm15 = vcmp.ge.s32.totalorder %v7113_v53, 0 }
  0x39   : > { %v366_v62 = vmin.f32 %v334_v56, 1.0 }
  0x3a   : > { %v330_v20 = vmax.f32 %v298_v10, 0.0 }
  0x3b   : > { %453 = vrot.lane.b32.xlu0 %v348_v63, %s6955_s28  ;;  %455 = vrot.lane.b32.xlu1 %v349_v3, %s6955_s28  ;;  %v7170_v63 = vld [vmem:[%s7053_s27 + $0xc0] sm:$0xff]  ;;  %v7173_v3 = vld [vmem:[%s7053_s27 + $0xc8] sm:$0xff] }
  0x3c   : > { %v267_v4 = vmul.f32 11.111111, %v7170_v63  ;;  %v268_v13 = vmul.f32 11.111111, %v7173_v3  ;;  %v362_v31 = vmin.f32 %v330_v20, 1.0 }
  0x3d   : > { %457 = vrot.lane.b32.xlu2 %v350_v11, %s6955_s28  ;;  %v328_v11 = vmax.f32 %v296_v61, 0.0 }
  0x3e   : > { %v299_v15 = vsub.f32 1.0, %v267_v4  ;;  %v300_v24 = vsub.f32 1.0, %v268_v13 }
  0x40   : > { %v332_v33 = vmax.f32 %v300_v24, 0.0 }
  0x42   : > { %v364_v43 = vmin.f32 %v332_v33, 1.0 }
  0x43   : > { %459 = vrot.lane.b32.xlu0 %v351_v22, %s6955_s28  ;;  %461 = vrot.lane.b32.xlu1 %v352_v23, %s6955_s28  ;;  %v360_v22 = vmin.f32 %v328_v11, 1.0  ;;  %v361_v23 = vmin.f32 %v329_v12, 1.0 }
  0x45   : > { %463 = vrot.lane.b32.xlu2 %v353_v30, %s6955_s28  ;;  %v331_v30 = vmax.f32 %v299_v15, 0.0 }
  0x4b   : > { %465 = vrot.lane.b32.xlu0 %v354_v41, %s6955_s28  ;;  %467 = vrot.lane.b32.xlu1 %v355_v42, %s6955_s28  ;;  %v272_v41 = vmul.f32 11.111111, %v7195_v39  ;;  %v363_v42 = vmin.f32 %v331_v30, 1.0 }
  0x4d   : > { %469 = vrot.lane.b32.xlu2 %v356_v48, %s6955_s28  ;;  %v303_v48 = vsub.f32 1.0, %v271_v37  ;;  %v304_v54 = vsub.f32 1.0, %v272_v41 }
  0x4f   : > { %v335_v57 = vmax.f32 %v303_v48, 0.0  ;;  %v336_v61 = vmax.f32 %v304_v54, 0.0 }
  0x51   : > { %v367_v4 = vmin.f32 %v335_v57, 1.0  ;;  %v368_v11 = vmin.f32 %v336_v61, 1.0 }
  0x53   : > { %471 = vrot.lane.b32.xlu0 %v357_v58, %s6955_s28  ;;  %473 = vrot.lane.b32.xlu1 %v358_v59, %s6955_s28  ;;  %v273_v58 = vmul.f32 11.111111, %v7200_v49  ;;  %v274_v59 = vmul.f32 11.111111, %v7203_v50 }
  0x55   : > { %475 = vrot.lane.b32.xlu2 %v359_v5, %s6955_s28  ;;  %v305_v5 = vsub.f32 1.0, %v273_v58  ;;  %v306_v10 = vsub.f32 1.0, %v274_v59 }
  0x57   : > { %v337_v12 = vmax.f32 %v305_v5, 0.0  ;;  %v338_v13 = vmax.f32 %v306_v10, 0.0 }
  0x59   : > { %v369_v15 = vmin.f32 %v337_v12, 1.0  ;;  %v370_v20 = vmin.f32 %v338_v13, 1.0 }
  0x5b   : > { %477 = vrot.lane.b32.xlu0 %v360_v22, %s6955_s28  ;;  %479 = vrot.lane.b32.xlu1 %v361_v23, %s6955_s28 }
  0x5d   : > { %481 = vrot.lane.b32.xlu2 %v362_v31, %s6955_s28 }
  0x63   : > { %483 = vrot.lane.b32.xlu0 %v363_v42, %s6955_s28  ;;  %485 = vrot.lane.b32.xlu1 %v364_v43, %s6955_s28 }
  0x65   : > { %487 = vrot.lane.b32.xlu2 %v365_v51, %s6955_s28 }
  0x6b   : > { %489 = vrot.lane.b32.xlu0 %v366_v62, %s6955_s28  ;;  %491 = vrot.lane.b32.xlu1 %v367_v4, %s6955_s28 }
  0x6d   : > { %493 = vrot.lane.b32.xlu2 %v368_v11, %s6955_s28 }
  0x73   : > { %495 = vrot.lane.b32.xlu0 %v369_v15, %s6955_s28  ;;  %497 = vrot.lane.b32.xlu1 %v370_v20, %s6955_s28 }
  0x7f   : > { %v444_v21 = vpop.permute.xlu2 %443 }
  0x80   : > { %v7260_v48 = vsel %vm375_vm6, %v444_v21, 0.0  ;;  %vm392_vm6 = vcmp.ge.s32.totalorder %v7155_v44, 0 }
  0x81   : > { %15088 = vst [vmem:[#allocation12_spill] sm:$0xff] %v7260_v48  ;;  %v7272_v7 = vsub.f32 1.0, %v7260_v48 }
  0x87   : > { %v446_v22 = vpop.permute.xlu2 %445 }
  0x88   : > { %v7232_v0 = vsel %vm376_vm2, %v446_v22, 0.0  ;;  %vm387_vm2 = vcmp.ge.s32.totalorder %v7128_v9, 0 }
  0x89   : > { %15084 = vst [vmem:[#allocation8_spill] sm:$0xff] %v7232_v0  ;;  %v7237_v37 = vsub.f32 1.0, %v7232_v0 }
  0x8f   : > { %v452_v23 = vpop.permute.xlu2 %451 }
  0x90   : > { %v7257_v2 = vsel %vm379_vm5, %v452_v23, 0.0  ;;  %vm390_vm5 = vcmp.ge.s32.totalorder %v7143_v27, 0 }
  0x91   : > { %15087 = vst [vmem:[#allocation11_spill] sm:$0xff] %v7257_v2  ;;  %v7263_v28 = vsub.f32 1.0, %v7257_v2 }
  0x95   : > { %v440_v24 = vpop.permute.xlu1 %439  ;;  %v436_v30 = vpop.permute.xlu0 %435 }
  0x96   : > { %v7217_v31 = vsel %vm373_vm0, %v440_v24, 0.0  ;;  %v7219_v32 = vsel %vm371_vm1, %v436_v30, 0.0  ;;  %vm386_vm0 = vcmp.ge.s32.totalorder %v7125_v8, 0  ;;  %vm391_vm1 = vcmp.ge.s32.totalorder %v7150_v35, 0 }
  0x97   : > { %15081 = vst [vmem:[#allocation5_spill] sm:$0xff] %v7217_v31  ;;  %v7222_v33 = vsub.f32 1.0, %v7217_v31  ;;  %v7225_v34 = vsub.f32 1.0, %v7219_v32  ;;  %v458_v1 = vpop.permute.xlu2 %457 }
  0x98   : > { %15082 = vst [vmem:[#allocation6_spill] sm:$0xff] %v7219_v32  ;;  %v7281_v16 = vsel %vm382_vm8, %v458_v1, 0.0  ;;  %vm393_vm8 = vcmp.ge.s32.totalorder %v7158_v46, 0 }
  0x99   : > { %15083 = vst [vmem:[#allocation7_spill] sm:$0xff] %v7222_v33  ;;  %665 = vrot.lane.b32.xlu1 %v7222_v33, %s6956_s29  ;;  %661 = vrot.lane.b32.xlu2 %v7225_v34, %s6956_s29  ;;  %v7287_v45 = vsub.f32 1.0, %v7281_v16 }
  0x9a   : > { %15090 = vst [vmem:[#allocation14_spill] sm:$0xff] %v7281_v16 }
  0x9b   : > { %15092 = vst [vmem:[#allocation16_spill] sm:$0xff] %v7287_v45 }
  0x9d   : > { %v442_v40 = vpop.permute.xlu1 %441  ;;  %v438_v41 = vpop.permute.xlu0 %437 }
  0x9e   : > { %v7239_v19 = vsel %vm374_vm3, %v442_v40, 0.0  ;;  %v7241_v42 = vsel %vm372_vm4, %v438_v41, 0.0  ;;  %vm389_vm3 = vcmp.ge.s32.totalorder %v7140_v26, 0  ;;  %vm394_vm4 = vcmp.ge.s32.totalorder %v7165_v55, 0 }
  0x9f   : > { %15085 = vst [vmem:[#allocation9_spill] sm:$0xff] %v7239_v19  ;;  %v7244_v43 = vsub.f32 1.0, %v7239_v19  ;;  %v7247_v47 = vsub.f32 1.0, %v7241_v42  ;;  %v464_v6 = vpop.permute.xlu2 %463 }
  0xa0   : > { %15086 = vst [vmem:[#allocation10_spill] sm:$0xff] %v7241_v42  ;;  %v7305_v36 = vsel %vm385_vm11, %v464_v6, 0.0  ;;  %vm396_vm11 = vcmp.ge.s32.totalorder %v7173_v3, 0 }
  0xa1   : > { %671 = vrot.lane.b32.xlu1 %v7237_v37, %s6956_s29  ;;  %667 = vrot.lane.b32.xlu2 %v7244_v43, %s6956_s29  ;;  %15094 = vst [vmem:[#allocation18_spill] sm:$0xff] %v7305_v36  ;;  %v7311_v11 = vsub.f32 1.0, %v7305_v36 }
  0xa2   : > { %663 = vrot.lane.b32.xlu0 %v7247_v47, %s6956_s29 }
  0xa3   : > { %15096 = vst [vmem:[#allocation20_spill] sm:$0xff] %v7311_v11 }
  0xa5   : > { %v448_v51 = vpop.permute.xlu0 %447  ;;  %v450_v54 = vpop.permute.xlu1 %449 }
  0xa6   : > { %v7265_v56 = vsel %vm377_vm7, %v448_v51, 0.0  ;;  %v7283_v58 = vsel %vm378_vm9, %v450_v54, 0.0  ;;  %vm397_vm7 = vcmp.ge.s32.totalorder %v7180_v14, 0  ;;  %vm395_vm9 = vcmp.ge.s32.totalorder %v7170_v63, 0 }
  0xa7   : > { %15089 = vst [vmem:[#allocation13_spill] sm:$0xff] %v7265_v56  ;;  %v7268_v57 = vsub.f32 1.0, %v7265_v56  ;;  %v7290_v61 = vsub.f32 1.0, %v7283_v58  ;;  %v470_v4 = vpop.permute.xlu2 %469 }
  0xa8   : > { %15091 = vst [vmem:[#allocation15_spill] sm:$0xff] %v7283_v58  ;;  %v7329_v52 = vsel %vm388_vm14, %v470_v4, 0.0  ;;  %vm401_vm14 = vcmp.ge.s32.totalorder %v7200_v49, 0 }
  0xa9   : > { %677 = vrot.lane.b32.xlu1 %v7263_v28, %s6956_s29  ;;  %673 = vrot.lane.b32.xlu2 %v7268_v57, %s6956_s29  ;;  %15098 = vst [vmem:[#allocation22_spill] sm:$0xff] %v7329_v52  ;;  %v7335_v18 = vsub.f32 1.0, %v7329_v52 }
  0xaa   : > { %669 = vrot.lane.b32.xlu0 %v7272_v7, %s6956_s29 }
  0xab   : > { %15100 = vst [vmem:[#allocation24_spill] sm:$0xff] %v7335_v18 }
  0xad   : > { %v454_v59 = vpop.permute.xlu0 %453  ;;  %v456_v17 = vpop.permute.xlu1 %455 }
  0xae   : > { %v7292_v62 = vsel %vm380_vm10, %v454_v59, 0.0  ;;  %v7307_v10 = vsel %vm381_vm12, %v456_v17, 0.0  ;;  %vm400_vm10 = vcmp.ge.s32.totalorder %v7195_v39, 0  ;;  %vm398_vm12 = vcmp.ge.s32.totalorder %v7185_v25, 0 }
  0xaf   : > { %15093 = vst [vmem:[#allocation17_spill] sm:$0xff] %v7292_v62  ;;  %v7295_v5 = vsub.f32 1.0, %v7292_v62  ;;  %v7314_v12 = vsub.f32 1.0, %v7307_v10  ;;  %v476_v20 = vpop.permute.xlu2 %475 }
  0xb0   : > { %15095 = vst [vmem:[#allocation19_spill] sm:$0xff] %v7307_v10  ;;  %v7353_v8 = vsel %vm391_vm1, %v476_v20, 0.0 }
  0xb1   : > { %683 = vrot.lane.b32.xlu1 %v7287_v45, %s6956_s29  ;;  %679 = vrot.lane.b32.xlu2 %v7295_v5, %s6956_s29  ;;  %15103 = vst [vmem:[#allocation27_spill] sm:$0xff] %v7353_v8  ;;  %v7359_v35 = vsub.f32 1.0, %v7353_v8 }
  0xb2   : > { %675 = vrot.lane.b32.xlu0 %v7290_v61, %s6956_s29 }
  0xb3   : > { %15105 = vst [vmem:[#allocation29_spill] sm:$0xff] %v7359_v35 }
  0xb5   : > { %v460_v60 = vpop.permute.xlu0 %459  ;;  %v462_v38 = vpop.permute.xlu1 %461 }
  0xb6   : > { %v7316_v13 = vsel %vm383_vm13, %v460_v60, 0.0  ;;  %v7331_v21 = vsel %vm384_vm15, %v462_v38, 0.0  ;;  %vm399_vm13 = vcmp.ge.s32.totalorder %v7188_v29, 0  ;;  %vm402_vm15 = vcmp.ge.s32.totalorder %v7203_v50, 0 }
  0xb7   : > { %15097 = vst [vmem:[#allocation21_spill] sm:$0xff] %v7316_v13  ;;  %v7319_v15 = vsub.f32 1.0, %v7316_v13  ;;  %v7338_v23 = vsub.f32 1.0, %v7331_v21  ;;  %v482_v1 = vpop.permute.xlu2 %481 }
  0xb8   : > { %15099 = vst [vmem:[#allocation23_spill] sm:$0xff] %v7331_v21  ;;  %v7377_v26 = vsel %vm394_vm4, %v482_v1, 0.0 }
  0xb9   : > { %689 = vrot.lane.b32.xlu1 %v7311_v11, %s6956_s29  ;;  %685 = vrot.lane.b32.xlu2 %v7319_v15, %s6956_s29  ;;  %15101 = vst [vmem:[#allocation25_spill] sm:$0xff] %v7338_v23  ;;  %v7383_v55 = vsub.f32 1.0, %v7377_v26 }
  0xba   : > { %681 = vrot.lane.b32.xlu0 %v7314_v12, %s6956_s29  ;;  %15109 = vst [vmem:[#allocation33_spill] sm:$0xff] %v7377_v26 }
  0xbb   : > { %15111 = vst [vmem:[#allocation35_spill] sm:$0xff] %v7383_v55 }
  0xbd   : > { %v466_v53 = vpop.permute.xlu0 %465  ;;  %v468_v22 = vpop.permute.xlu1 %467 }
  0xbe   : > { %v7340_v24 = vsel %vm386_vm0, %v466_v53, 0.0  ;;  %v7355_v40 = vsel %vm387_vm2, %v468_v22, 0.0 }
  0xbf   : > { %15102 = vst [vmem:[#allocation26_spill] sm:$0xff] %v7340_v24  ;;  %v7343_v30 = vsub.f32 1.0, %v7340_v24  ;;  %v7362_v6 = vsub.f32 1.0, %v7355_v40  ;;  %v488_v17 = vpop.permute.xlu2 %487 }
  0xc0   : > { %15104 = vst [vmem:[#allocation28_spill] sm:$0xff] %v7355_v40  ;;  %v7401_v44 = vsel %vm397_vm7, %v488_v17, 0.0 }
  0xc1   : > { %695 = vrot.lane.b32.xlu1 %v7335_v18, %s6956_s29  ;;  %691 = vrot.lane.b32.xlu2 %v7343_v30, %s6956_s29  ;;  %15106 = vst [vmem:[#allocation30_spill] sm:$0xff] %v7362_v6  ;;  %v7407_v22 = vsub.f32 1.0, %v7401_v44 }
  0xc2   : > { %687 = vrot.lane.b32.xlu0 %v7338_v23, %s6956_s29  ;;  %15115 = vst [vmem:[#allocation39_spill] sm:$0xff] %v7401_v44 }
  0xc3   : > { %15117 = vst [vmem:[#allocation41_spill] sm:$0xff] %v7407_v22 }
  0xc5   : > { %v472_v9 = vpop.permute.xlu0 %471  ;;  %v474_v41 = vpop.permute.xlu1 %473 }
  0xc6   : > { %v7364_v51 = vsel %vm389_vm3, %v472_v9, 0.0  ;;  %v7379_v59 = vsel %vm390_vm5, %v474_v41, 0.0 }
  0xc7   : > { %15107 = vst [vmem:[#allocation31_spill] sm:$0xff] %v7364_v51  ;;  %v7367_v54 = vsub.f32 1.0, %v7364_v51  ;;  %v7386_v60 = vsub.f32 1.0, %v7379_v59  ;;  %v494_v17 = vpop.permute.xlu2 %493 }
  0xc8   : > { %15110 = vst [vmem:[#allocation34_spill] sm:$0xff] %v7379_v59  ;;  %v7425_v63 = vsel %vm400_vm10, %v494_v17, 0.0 }
  0xc9   : > { %15108 = vst [vmem:[#allocation32_spill] sm:$0xff] %v7367_v54  ;;  %701 = vrot.lane.b32.xlu1 %v7359_v35, %s6956_s29  ;;  %697 = vrot.lane.b32.xlu2 %v7367_v54, %s6956_s29  ;;  %v7431_v39 = vsub.f32 1.0, %v7425_v63 }
  0xca   : > { %693 = vrot.lane.b32.xlu0 %v7362_v6, %s6956_s29  ;;  %15112 = vst [vmem:[#allocation36_spill] sm:$0xff] %v7386_v60 }
  0xcb   : > { %15121 = vst [vmem:[#allocation45_spill] sm:$0xff] %v7425_v63 }
  0xcc   : > { %15123 = vst [vmem:[#allocation47_spill] sm:$0xff] %v7431_v39 }
  0xcd   : > { %v478_v27 = vpop.permute.xlu0 %477  ;;  %v480_v4 = vpop.permute.xlu1 %479 }
  0xce   : > { %v7388_v38 = vsel %vm392_vm6, %v478_v27, 0.0  ;;  %v7403_v53 = vsel %vm393_vm8, %v480_v4, 0.0 }
  0xcf   : > { %15113 = vst [vmem:[#allocation37_spill] sm:$0xff] %v7388_v38  ;;  %v7391_v20 = vsub.f32 1.0, %v7388_v38  ;;  %v7410_v1 = vsub.f32 1.0, %v7403_v53 }
  0xd0   : > { %15116 = vst [vmem:[#allocation40_spill] sm:$0xff] %v7403_v53 }
  0xd1   : > { %15114 = vst [vmem:[#allocation38_spill] sm:$0xff] %v7391_v20  ;;  %707 = vrot.lane.b32.xlu1 %v7383_v55, %s6956_s29  ;;  %703 = vrot.lane.b32.xlu2 %v7391_v20, %s6956_s29 }
  0xd2   : > { %699 = vrot.lane.b32.xlu0 %v7386_v60, %s6956_s29  ;;  %15118 = vst [vmem:[#allocation42_spill] sm:$0xff] %v7410_v1 }
  0xd5   : > { %v484_v14 = vpop.permute.xlu0 %483  ;;  %v486_v46 = vpop.permute.xlu1 %485 }
  0xd6   : > { %v7412_v9 = vsel %vm395_vm9, %v484_v14, 0.0  ;;  %v7427_v27 = vsel %vm396_vm11, %v486_v46, 0.0 }
  0xd7   : > { %15119 = vst [vmem:[#allocation43_spill] sm:$0xff] %v7412_v9  ;;  %v7415_v41 = vsub.f32 1.0, %v7412_v9  ;;  %v7434_v3 = vsub.f32 1.0, %v7427_v27 }
  0xd8   : > { %15122 = vst [vmem:[#allocation46_spill] sm:$0xff] %v7427_v27 }
  0xd9   : > { %15120 = vst [vmem:[#allocation44_spill] sm:$0xff] %v7415_v41  ;;  %713 = vrot.lane.b32.xlu1 %v7407_v22, %s6956_s29  ;;  %709 = vrot.lane.b32.xlu2 %v7415_v41, %s6956_s29 }
  0xda   : > { %705 = vrot.lane.b32.xlu0 %v7410_v1, %s6956_s29  ;;  %15124 = vst [vmem:[#allocation48_spill] sm:$0xff] %v7434_v3 }
  0xdd   : > { %v490_v4 = vpop.permute.xlu0 %489  ;;  %v492_v44 = vpop.permute.xlu1 %491 }
  0xde   : > { %v7436_v14 = vsel %vm398_vm12, %v490_v4, 0.0  ;;  %v7448_v25 = vsel %vm399_vm13, %v492_v44, 0.0 }
  0xdf   : > { %15125 = vst [vmem:[#allocation49_spill] sm:$0xff] %v7436_v14  ;;  %v7439_v26 = vsub.f32 1.0, %v7436_v14  ;;  %v7452_v17 = vsub.f32 1.0, %v7448_v25 }
  0xe0   : > { %15127 = vst [vmem:[#allocation51_spill] sm:$0xff] %v7448_v25 }
  0xe1   : > { %15126 = vst [vmem:[#allocation50_spill] sm:$0xff] %v7439_v26  ;;  %719 = vrot.lane.b32.xlu1 %v7431_v39, %s6956_s29  ;;  %715 = vrot.lane.b32.xlu2 %v7439_v26, %s6956_s29 }
  0xe2   : > { %711 = vrot.lane.b32.xlu0 %v7434_v3, %s6956_s29  ;;  %15128 = vst [vmem:[#allocation52_spill] sm:$0xff] %v7452_v17 }
  0xe5   : > { %v496_v46 = vpop.permute.xlu0 %495  ;;  %v498_v63 = vpop.permute.xlu1 %497 }
  0xe6   : > { %v7454_v4 = vsel %vm401_vm14, %v496_v46, 0.0  ;;  %v7466_v49 = vsel %vm402_vm15, %v498_v63, 0.0 }
  0xe7   : > { %15129 = vst [vmem:[#allocation53_spill] sm:$0xff] %v7454_v4  ;;  %v7457_v29 = vsub.f32 1.0, %v7454_v4  ;;  %v7469_v44 = vsub.f32 1.0, %v7466_v49 }
  0xe8   : > { %15131 = vst [vmem:[#allocation55_spill] sm:$0xff] %v7466_v49 }
  0xe9   : > { %15130 = vst [vmem:[#allocation54_spill] sm:$0xff] %v7457_v29  ;;  %789 = vrot.lane.b32.xlu1 %v7225_v34, %s6957_s30  ;;  %721 = vrot.lane.b32.xlu2 %v7457_v29, %s6956_s29 }
  0xea   : > { %717 = vrot.lane.b32.xlu0 %v7452_v17, %s6956_s29  ;;  %15132 = vst [vmem:[#allocation56_spill] sm:$0xff] %v7469_v44 }
  0xf1   : > { %795 = vrot.lane.b32.xlu1 %v7244_v43, %s6957_s30  ;;  %791 = vrot.lane.b32.xlu2 %v7247_v47, %s6957_s30 }
  0xf2   : > { %723 = vrot.lane.b32.xlu0 %v7469_v44, %s6956_s29 }
  0xf3   : > { %v7477_v50 = vpop.permute.xlu2 %661 }
  0xf4   : > { %15133 = vst [vmem:[#allocation57_spill] sm:$0xff] %v7477_v50 }
  0xf9   : > { %801 = vrot.lane.b32.xlu1 %v7268_v57, %s6957_s30  ;;  %797 = vrot.lane.b32.xlu2 %v7272_v7, %s6957_s30 }
  0xfa   : > { %793 = vrot.lane.b32.xlu0 %v7222_v33, %s6957_s30 }
  0xfb   : > { %v7485_v63 = vpop.permute.xlu2 %667 }
  0xfc   : > { %15134 = vst [vmem:[#allocation58_spill] sm:$0xff] %v7485_v63 }
 0x101   : > { %807 = vrot.lane.b32.xlu1 %v7295_v5, %s6957_s30  ;;  %803 = vrot.lane.b32.xlu2 %v7290_v61, %s6957_s30 }
 0x102   : > { %799 = vrot.lane.b32.xlu0 %v7237_v37, %s6957_s30 }
 0x103   : > { %v7493_v46 = vpop.permute.xlu2 %673 }
 0x104   : > { %15135 = vst [vmem:[#allocation59_spill] sm:$0xff] %v7493_v46 }
 0x109   : > { %813 = vrot.lane.b32.xlu1 %v7319_v15, %s6957_s30  ;;  %809 = vrot.lane.b32.xlu2 %v7314_v12, %s6957_s30 }
 0x10a   : > { %805 = vrot.lane.b32.xlu0 %v7263_v28, %s6957_s30 }
 0x10b   : > { %v7501_v63 = vpop.permute.xlu1 %665  ;;  %v7503_v50 = vpop.permute.xlu2 %679 }
 0x10c   : > { %15136 = vst [vmem:[#allocation60_spill] sm:$0xff] %v7501_v63 }
 0x10d   : > { %15137 = vst [vmem:[#allocation61_spill] sm:$0xff] %v7503_v50 }
 0x111   : > { %819 = vrot.lane.b32.xlu1 %v7343_v30, %s6957_s30  ;;  %815 = vrot.lane.b32.xlu2 %v7338_v23, %s6957_s30 }
 0x112   : > { %811 = vrot.lane.b32.xlu0 %v7287_v45, %s6957_s30 }
 0x113   : > { %v7511_v46 = vpop.permute.xlu1 %671  ;;  %v7513_v49 = vpop.permute.xlu2 %685 }
 0x114   : > { %15138 = vst [vmem:[#allocation62_spill] sm:$0xff] %v7511_v46  ;;  %v7515_v25 = vpop.permute.xlu0 %663 }
 0x115   : > { %15139 = vst [vmem:[#allocation63_spill] sm:$0xff] %v7513_v49 }
 0x116   : > { %15140 = vst [vmem:[#allocation64_spill] sm:$0xff] %v7515_v25 }
 0x119   : > { %825 = vrot.lane.b32.xlu1 %v7367_v54, %s6957_s30  ;;  %821 = vrot.lane.b32.xlu2 %v7362_v6, %s6957_s30 }
 0x11a   : > { %817 = vrot.lane.b32.xlu0 %v7311_v11, %s6957_s30 }
 0x11b   : > { %v7523_v50 = vpop.permute.xlu1 %677  ;;  %v7525_v63 = vpop.permute.xlu2 %691 }
 0x11c   : > { %15141 = vst [vmem:[#allocation65_spill] sm:$0xff] %v7523_v50  ;;  %v7527_v4 = vpop.permute.xlu0 %669 }
 0x11d   : > { %15142 = vst [vmem:[#allocation66_spill] sm:$0xff] %v7525_v63 }
 0x11e   : > { %15143 = vst [vmem:[#allocation67_spill] sm:$0xff] %v7527_v4 }
 0x121   : > { %831 = vrot.lane.b32.xlu1 %v7391_v20, %s6957_s30  ;;  %827 = vrot.lane.b32.xlu2 %v7386_v60, %s6957_s30 }
 0x122   : > { %823 = vrot.lane.b32.xlu0 %v7335_v18, %s6957_s30 }
 0x123   : > { %v7535_v49 = vpop.permute.xlu1 %683  ;;  %v7537_v46 = vpop.permute.xlu2 %697 }
 0x124   : > { %15144 = vst [vmem:[#allocation68_spill] sm:$0xff] %v7535_v49  ;;  %v7539_v25 = vpop.permute.xlu0 %675 }
 0x125   : > { %15145 = vst [vmem:[#allocation69_spill] sm:$0xff] %v7537_v46 }
 0x126   : > { %15146 = vst [vmem:[#allocation70_spill] sm:$0xff] %v7539_v25 }
 0x129   : > { %837 = vrot.lane.b32.xlu1 %v7415_v41, %s6957_s30  ;;  %833 = vrot.lane.b32.xlu2 %v7410_v1, %s6957_s30 }
 0x12a   : > { %829 = vrot.lane.b32.xlu0 %v7359_v35, %s6957_s30 }
 0x12b   : > { %v7547_v63 = vpop.permute.xlu1 %689  ;;  %v7549_v50 = vpop.permute.xlu2 %703 }
 0x12c   : > { %15147 = vst [vmem:[#allocation71_spill] sm:$0xff] %v7547_v63  ;;  %v7551_v4 = vpop.permute.xlu0 %681 }
 0x12d   : > { %15148 = vst [vmem:[#allocation72_spill] sm:$0xff] %v7549_v50 }
 0x12e   : > { %15149 = vst [vmem:[#allocation73_spill] sm:$0xff] %v7551_v4 }
 0x131   : > { %843 = vrot.lane.b32.xlu1 %v7439_v26, %s6957_s30  ;;  %839 = vrot.lane.b32.xlu2 %v7434_v3, %s6957_s30 }
 0x132   : > { %835 = vrot.lane.b32.xlu0 %v7383_v55, %s6957_s30 }
 0x133   : > { %v7559_v46 = vpop.permute.xlu1 %695  ;;  %v7561_v49 = vpop.permute.xlu2 %709 }
 0x134   : > { %15150 = vst [vmem:[#allocation74_spill] sm:$0xff] %v7559_v46  ;;  %v7563_v25 = vpop.permute.xlu0 %687 }
 0x135   : > { %15151 = vst [vmem:[#allocation75_spill] sm:$0xff] %v7561_v49 }
 0x136   : > { %15152 = vst [vmem:[#allocation76_spill] sm:$0xff] %v7563_v25 }
 0x139   : > { %849 = vrot.lane.b32.xlu1 %v7457_v29, %s6957_s30  ;;  %845 = vrot.lane.b32.xlu2 %v7452_v17, %s6957_s30 }
 0x13a   : > { %841 = vrot.lane.b32.xlu0 %v7407_v22, %s6957_s30 }
 0x13b   : > { %v7571_v50 = vpop.permute.xlu1 %701  ;;  %v7573_v63 = vpop.permute.xlu2 %715 }
 0x13c   : > { %15153 = vst [vmem:[#allocation77_spill] sm:$0xff] %v7571_v50  ;;  %v7575_v4 = vpop.permute.xlu0 %693 }
 0x13d   : > { %15154 = vst [vmem:[#allocation78_spill] sm:$0xff] %v7573_v63 }
 0x13e   : > { %15155 = vst [vmem:[#allocation79_spill] sm:$0xff] %v7575_v4 }
 0x141   : > { %851 = vrot.lane.b32.xlu2 %v7469_v44, %s6957_s30 }
 0x142   : > { %847 = vrot.lane.b32.xlu0 %v7431_v39, %s6957_s30 }
 0x143   : > { %v7581_v49 = vpop.permute.xlu1 %707  ;;  %v7583_v46 = vpop.permute.xlu2 %721 }
 0x144   : > { %15156 = vst [vmem:[#allocation80_spill] sm:$0xff] %v7581_v49  ;;  %v7585_v25 = vpop.permute.xlu0 %699 }
 0x145   : > { %15157 = vst [vmem:[#allocation81_spill] sm:$0xff] %v7583_v46 }
 0x146   : > { %15158 = vst [vmem:[#allocation82_spill] sm:$0xff] %v7585_v25 }
 0x14b   : > { %v7587_v27 = vpop.permute.xlu1 %713  ;;  %v792_v14 = vpop.permute.xlu2 %791 }
 0x14c   : > { %15159 = vst [vmem:[#allocation83_spill] sm:$0xff] %v7587_v27  ;;  %v7590_v50 = vmul.f32 %v792_v14, %v7247_v47  ;;  %v7592_v63 = vpop.permute.xlu0 %705 }
 0x14d   : > { %15160 = vst [vmem:[#allocation84_spill] sm:$0xff] %v7592_v63 }
 0x14e   : > { %951 = vrot.lane.b32.xlu1 %v7590_v50, %s6958_s3 }
 0x153   : > { %v7596_v4 = vpop.permute.xlu1 %719  ;;  %v798_v53 = vpop.permute.xlu2 %797 }
 0x154   : > { %15161 = vst [vmem:[#allocation85_spill] sm:$0xff] %v7596_v4  ;;  %v7599_v49 = vmul.f32 %v798_v53, %v7272_v7  ;;  %v7601_v46 = vpop.permute.xlu0 %711 }
 0x155   : > { %15162 = vst [vmem:[#allocation86_spill] sm:$0xff] %v7601_v46 }
 0x156   : > { %957 = vrot.lane.b32.xlu1 %v7599_v49, %s6958_s3 }
 0x15b   : > { %v790_v27 = vpop.permute.xlu1 %789  ;;  %v804_v14 = vpop.permute.xlu2 %803 }
 0x15c   : > { %v7606_v25 = vmul.f32 %v790_v27, %v7225_v34  ;;  %v7609_v63 = vmul.f32 %v804_v14, %v7290_v61  ;;  %v7611_v9 = vpop.permute.xlu0 %717 }
 0x15d   : > { %15163 = vst [vmem:[#allocation87_spill] sm:$0xff] %v7611_v9 }
 0x15e   : > { %949 = vrot.lane.b32.xlu0 %v7606_v25, %s6958_s3  ;;  %963 = vrot.lane.b32.xlu1 %v7609_v63, %s6958_s3 }
 0x163   : > { %v796_v53 = vpop.permute.xlu1 %795  ;;  %v810_v4 = vpop.permute.xlu2 %809 }
 0x164   : > { %v7618_v46 = vmul.f32 %v796_v53, %v7244_v43  ;;  %v7621_v8 = vmul.f32 %v810_v4, %v7314_v12  ;;  %v7623_v27 = vpop.permute.xlu0 %723 }
 0x165   : > { %15164 = vst [vmem:[#allocation88_spill] sm:$0xff] %v7623_v27 }
 0x166   : > { %955 = vrot.lane.b32.xlu0 %v7618_v46, %s6958_s3  ;;  %969 = vrot.lane.b32.xlu1 %v7621_v8, %s6958_s3 }
 0x16b   : > { %v802_v14 = vpop.permute.xlu1 %801  ;;  %v816_v9 = vpop.permute.xlu2 %815 }
 0x16c   : > { %v7630_v59 = vmul.f32 %v802_v14, %v7268_v57  ;;  %v7633_v38 = vmul.f32 %v816_v9, %v7338_v23  ;;  %v794_v53 = vpop.permute.xlu0 %793 }
 0x16d   : > { %v7636_v4 = vmul.f32 %v794_v53, %v7222_v33 }
 0x16e   : > { %961 = vrot.lane.b32.xlu0 %v7630_v59, %s6958_s3  ;;  %975 = vrot.lane.b32.xlu1 %v7633_v38, %s6958_s3 }
 0x16f   : > { %953 = vrot.lane.b32.xlu2 %v7636_v4, %s6958_s3 }
 0x173   : > { %v808_v27 = vpop.permute.xlu1 %807  ;;  %v822_v52 = vpop.permute.xlu2 %821 }
 0x174   : > { %v7645_v14 = vmul.f32 %v808_v27, %v7295_v5  ;;  %v7648_v9 = vmul.f32 %v822_v52, %v7362_v6  ;;  %v800_v40 = vpop.permute.xlu0 %799 }
 0x175   : > { %v7651_v53 = vmul.f32 %v800_v40, %v7237_v37 }
 0x176   : > { %967 = vrot.lane.b32.xlu0 %v7645_v14, %s6958_s3  ;;  %981 = vrot.lane.b32.xlu1 %v7648_v9, %s6958_s3 }
 0x177   : > { %959 = vrot.lane.b32.xlu2 %v7651_v53, %s6958_s3 }
 0x17b   : > { %v814_v51 = vpop.permute.xlu1 %813  ;;  %v828_v36 = vpop.permute.xlu2 %827 }
 0x17c   : > { %v7660_v27 = vmul.f32 %v814_v51, %v7319_v15  ;;  %v7663_v52 = vmul.f32 %v828_v36, %v7386_v60  ;;  %v806_v21 = vpop.permute.xlu0 %805 }
 0x17d   : > { %v7666_v40 = vmul.f32 %v806_v21, %v7263_v28 }
 0x17e   : > { %973 = vrot.lane.b32.xlu0 %v7660_v27, %s6958_s3  ;;  %987 = vrot.lane.b32.xlu1 %v7663_v52, %s6958_s3 }
 0x17f   : > { %965 = vrot.lane.b32.xlu2 %v7666_v40, %s6958_s3 }
 0x183   : > { %v820_v24 = vpop.permute.xlu1 %819  ;;  %v834_v16 = vpop.permute.xlu2 %833 }
 0x184   : > { %v7675_v51 = vmul.f32 %v820_v24, %v7343_v30  ;;  %v7678_v36 = vmul.f32 %v834_v16, %v7410_v1  ;;  %v812_v10 = vpop.permute.xlu0 %811 }
 0x185   : > { %v7681_v21 = vmul.f32 %v812_v10, %v7287_v45 }
 0x186   : > { %979 = vrot.lane.b32.xlu0 %v7675_v51, %s6958_s3  ;;  %993 = vrot.lane.b32.xlu1 %v7678_v36, %s6958_s3 }
 0x187   : > { %971 = vrot.lane.b32.xlu2 %v7681_v21, %s6958_s3 }
 0x18b   : > { %v826_v13 = vpop.permute.xlu1 %825  ;;  %v840_v2 = vpop.permute.xlu2 %839 }
 0x18c   : > { %v7690_v24 = vmul.f32 %v826_v13, %v7367_v54  ;;  %v7693_v16 = vmul.f32 %v840_v2, %v7434_v3  ;;  %v818_v58 = vpop.permute.xlu0 %817 }
 0x18d   : > { %v7696_v10 = vmul.f32 %v818_v58, %v7311_v11 }
 0x18e   : > { %985 = vrot.lane.b32.xlu0 %v7690_v24, %s6958_s3  ;;  %999 = vrot.lane.b32.xlu1 %v7693_v16, %s6958_s3 }
 0x18f   : > { %977 = vrot.lane.b32.xlu2 %v7696_v10, %s6958_s3 }
 0x193   : > { %v832_v62 = vpop.permute.xlu1 %831  ;;  %v846_v0 = vpop.permute.xlu2 %845 }
 0x194   : > { %v7705_v13 = vmul.f32 %v832_v62, %v7391_v20  ;;  %v7708_v2 = vmul.f32 %v846_v0, %v7452_v17  ;;  %v824_v48 = vpop.permute.xlu0 %823 }
 0x195   : > { %v7711_v58 = vmul.f32 %v824_v48, %v7335_v18 }
 0x196   : > { %15165 = vst [vmem:[#allocation89_spill] sm:$0xff] %v7708_v2  ;;  %991 = vrot.lane.b32.xlu0 %v7705_v13, %s6958_s3  ;;  %1005 = vrot.lane.b32.xlu1 %v7708_v2, %s6958_s3 }
 0x197   : > { %983 = vrot.lane.b32.xlu2 %v7711_v58, %s6958_s3 }
 0x19b   : > { %v838_v56 = vpop.permute.xlu1 %837  ;;  %v852_v31 = vpop.permute.xlu2 %851 }
 0x19c   : > { %v7720_v62 = vmul.f32 %v838_v56, %v7415_v41  ;;  %v7723_v0 = vmul.f32 %v852_v31, %v7469_v44  ;;  %v830_v42 = vpop.permute.xlu0 %829 }
 0x19d   : > { %v7726_v48 = vmul.f32 %v830_v42, %v7359_v35 }
 0x19e   : > { %15166 = vst [vmem:[#allocation90_spill] sm:$0xff] %v7723_v0  ;;  %997 = vrot.lane.b32.xlu0 %v7720_v62, %s6958_s3  ;;  %1011 = vrot.lane.b32.xlu1 %v7723_v0, %s6958_s3 }
 0x19f   : > { %989 = vrot.lane.b32.xlu2 %v7726_v48, %s6958_s3 }
 0x1a3   : > { %v844_v19 = vpop.permute.xlu1 %843 }
 0x1a4   : > { %v7735_v56 = vmul.f32 %v844_v19, %v7439_v26  ;;  %v836_v32 = vpop.permute.xlu0 %835 }
 0x1a5   : > { %v7738_v31 = vmul.f32 %v836_v32, %v7383_v55 }
 0x1a6   : > { %1003 = vrot.lane.b32.xlu0 %v7735_v56, %s6958_s3  ;;  %1081 = vrot.lane.b32.xlu1 %v7222_v33, %s6959_s4 }
 0x1a7   : > { %995 = vrot.lane.b32.xlu2 %v7738_v31, %s6958_s3 }
 0x1ab   : > { %v850_v42 = vpop.permute.xlu1 %849 }
 0x1ac   : > { %v7747_v0 = vmul.f32 %v850_v42, %v7457_v29  ;;  %v842_v19 = vpop.permute.xlu0 %841 }
 0x1ad   : > { %v7750_v2 = vmul.f32 %v842_v19, %v7407_v22 }
 0x1ae   : > { %1009 = vrot.lane.b32.xlu0 %v7747_v0, %s6958_s3  ;;  %1087 = vrot.lane.b32.xlu1 %v7237_v37, %s6959_s4 }
 0x1af   : > { %1001 = vrot.lane.b32.xlu2 %v7750_v2, %s6958_s3 }
 0x1b4   : > { %v848_v32 = vpop.permute.xlu0 %847 }
 0x1b5   : > { %v7759_v33 = vmul.f32 %v848_v32, %v7431_v39 }
 0x1b6   : > { %1079 = vrot.lane.b32.xlu0 %v7247_v47, %s6959_s4  ;;  %1093 = vrot.lane.b32.xlu1 %v7263_v28, %s6959_s4 }
 0x1b7   : > { %1007 = vrot.lane.b32.xlu2 %v7759_v33, %s6958_s3 }
 0x1be   : > { %1085 = vrot.lane.b32.xlu0 %v7272_v7, %s6959_s4  ;;  %1099 = vrot.lane.b32.xlu1 %v7287_v45, %s6959_s4 }
 0x1bf   : > { %1077 = vrot.lane.b32.xlu2 %v7225_v34, %s6959_s4 }
 0x1c0   : > { %v7773_v42 = vpop.permute.xlu1 %951 }
 0x1c1   : > { %15167 = vst [vmem:[#allocation91_spill] sm:$0xff] %v7773_v42 }
 0x1c6   : > { %1091 = vrot.lane.b32.xlu0 %v7290_v61, %s6959_s4  ;;  %1105 = vrot.lane.b32.xlu1 %v7311_v11, %s6959_s4 }
 0x1c7   : > { %1083 = vrot.lane.b32.xlu2 %v7244_v43, %s6959_s4 }
 0x1c8   : > { %v7781_v19 = vpop.permute.xlu1 %957 }
 0x1c9   : > { %15168 = vst [vmem:[#allocation92_spill] sm:$0xff] %v7781_v19  ;;  %v7783_v32 = vpop.permute.xlu2 %953 }
 0x1ca   : > { %15169 = vst [vmem:[#allocation93_spill] sm:$0xff] %v7783_v32 }
 0x1ce   : > { %1097 = vrot.lane.b32.xlu0 %v7314_v12, %s6959_s4  ;;  %1111 = vrot.lane.b32.xlu1 %v7335_v18, %s6959_s4 }
 0x1cf   : > { %1089 = vrot.lane.b32.xlu2 %v7268_v57, %s6959_s4 }
 0x1d0   : > { %v7791_v42 = vpop.permute.xlu1 %963  ;;  %v7793_v45 = vpop.permute.xlu0 %949 }
 0x1d1   : > { %15170 = vst [vmem:[#allocation94_spill] sm:$0xff] %v7791_v42  ;;  %v7795_v11 = vpop.permute.xlu2 %959 }
 0x1d2   : > { %15171 = vst [vmem:[#allocation95_spill] sm:$0xff] %v7793_v45 }
 0x1d3   : > { %15172 = vst [vmem:[#allocation96_spill] sm:$0xff] %v7795_v11 }
 0x1d6   : > { %1103 = vrot.lane.b32.xlu0 %v7338_v23, %s6959_s4  ;;  %1117 = vrot.lane.b32.xlu1 %v7359_v35, %s6959_s4 }
 0x1d7   : > { %1095 = vrot.lane.b32.xlu2 %v7295_v5, %s6959_s4 }
 0x1d8   : > { %v7803_v32 = vpop.permute.xlu1 %969  ;;  %v7805_v19 = vpop.permute.xlu0 %955 }
 0x1d9   : > { %15173 = vst [vmem:[#allocation97_spill] sm:$0xff] %v7803_v32  ;;  %v7807_v18 = vpop.permute.xlu2 %965 }
 0x1da   : > { %15174 = vst [vmem:[#allocation98_spill] sm:$0xff] %v7805_v19 }
 0x1db   : > { %15175 = vst [vmem:[#allocation99_spill] sm:$0xff] %v7807_v18 }
 0x1de   : > { %1109 = vrot.lane.b32.xlu0 %v7362_v6, %s6959_s4  ;;  %1123 = vrot.lane.b32.xlu1 %v7383_v55, %s6959_s4 }
 0x1df   : > { %1101 = vrot.lane.b32.xlu2 %v7319_v15, %s6959_s4 }
 0x1e0   : > { %v7815_v11 = vpop.permute.xlu1 %975  ;;  %v7817_v42 = vpop.permute.xlu0 %961 }
 0x1e1   : > { %15176 = vst [vmem:[#allocation100_spill] sm:$0xff] %v7815_v11  ;;  %v7819_v45 = vpop.permute.xlu2 %971 }
 0x1e2   : > { %15177 = vst [vmem:[#allocation101_spill] sm:$0xff] %v7817_v42 }
 0x1e3   : > { %15178 = vst [vmem:[#allocation102_spill] sm:$0xff] %v7819_v45 }
 0x1e6   : > { %1115 = vrot.lane.b32.xlu0 %v7386_v60, %s6959_s4  ;;  %1129 = vrot.lane.b32.xlu1 %v7407_v22, %s6959_s4 }
 0x1e7   : > { %1107 = vrot.lane.b32.xlu2 %v7343_v30, %s6959_s4 }
 0x1e8   : > { %v7827_v18 = vpop.permute.xlu1 %981  ;;  %v7829_v32 = vpop.permute.xlu0 %967 }
 0x1e9   : > { %15179 = vst [vmem:[#allocation103_spill] sm:$0xff] %v7827_v18  ;;  %v7831_v19 = vpop.permute.xlu2 %977 }
 0x1ea   : > { %15180 = vst [vmem:[#allocation104_spill] sm:$0xff] %v7829_v32 }
 0x1eb   : > { %15181 = vst [vmem:[#allocation105_spill] sm:$0xff] %v7831_v19 }
 0x1ee   : > { %1121 = vrot.lane.b32.xlu0 %v7410_v1, %s6959_s4  ;;  %1135 = vrot.lane.b32.xlu1 %v7431_v39, %s6959_s4 }
 0x1ef   : > { %1113 = vrot.lane.b32.xlu2 %v7367_v54, %s6959_s4 }
 0x1f0   : > { %v7839_v45 = vpop.permute.xlu1 %987  ;;  %v7841_v11 = vpop.permute.xlu0 %973 }
 0x1f1   : > { %15182 = vst [vmem:[#allocation106_spill] sm:$0xff] %v7839_v45  ;;  %v7843_v42 = vpop.permute.xlu2 %983 }
 0x1f2   : > { %15183 = vst [vmem:[#allocation107_spill] sm:$0xff] %v7841_v11 }
 0x1f3   : > { %15184 = vst [vmem:[#allocation108_spill] sm:$0xff] %v7843_v42 }
 0x1f6   : > { %1127 = vrot.lane.b32.xlu0 %v7434_v3, %s6959_s4 }
 0x1f7   : > { %1119 = vrot.lane.b32.xlu2 %v7391_v20, %s6959_s4 }
 0x1f8   : > { %v7849_v19 = vpop.permute.xlu1 %993  ;;  %v7851_v18 = vpop.permute.xlu0 %979 }
 0x1f9   : > { %15185 = vst [vmem:[#allocation109_spill] sm:$0xff] %v7849_v19  ;;  %v7853_v32 = vpop.permute.xlu2 %989 }
 0x1fa   : > { %15186 = vst [vmem:[#allocation110_spill] sm:$0xff] %v7851_v18 }
 0x1fb   : > { %15187 = vst [vmem:[#allocation111_spill] sm:$0xff] %v7853_v32 }
 0x1fe   : > { %1133 = vrot.lane.b32.xlu0 %v7452_v17, %s6959_s4 }
 0x1ff   : > { %1125 = vrot.lane.b32.xlu2 %v7415_v41, %s6959_s4 }
 0x200   : > { %v7859_v45 = vpop.permute.xlu1 %999  ;;  %v7861_v42 = vpop.permute.xlu0 %985 }
 0x201   : > { %15188 = vst [vmem:[#allocation112_spill] sm:$0xff] %v7859_v45  ;;  %v7863_v11 = vpop.permute.xlu2 %995 }
 0x202   : > { %15189 = vst [vmem:[#allocation113_spill] sm:$0xff] %v7861_v42 }
 0x203   : > { %15190 = vst [vmem:[#allocation114_spill] sm:$0xff] %v7863_v11 }
 0x206   : > { %1139 = vrot.lane.b32.xlu0 %v7469_v44, %s6959_s4 }
 0x207   : > { %1131 = vrot.lane.b32.xlu2 %v7439_v26, %s6959_s4 }
 0x208   : > { %v7869_v19 = vpop.permute.xlu1 %1005  ;;  %v7871_v32 = vpop.permute.xlu0 %991 }
 0x209   : > { %15191 = vst [vmem:[#allocation115_spill] sm:$0xff] %v7869_v19  ;;  %v7873_v18 = vpop.permute.xlu2 %1001 }
 0x20a   : > { %15192 = vst [vmem:[#allocation116_spill] sm:$0xff] %v7871_v32 }
 0x20b   : > { %15193 = vst [vmem:[#allocation117_spill] sm:$0xff] %v7873_v18 }
 0x20f   : > { %1137 = vrot.lane.b32.xlu2 %v7457_v29, %s6959_s4 }
 0x210   : > { %v7877_v45 = vpop.permute.xlu1 %1011  ;;  %v7879_v42 = vpop.permute.xlu0 %997 }
 0x211   : > { %15194 = vst [vmem:[#allocation118_spill] sm:$0xff] %v7877_v45  ;;  %v7881_v11 = vpop.permute.xlu2 %1007 }
 0x212   : > { %15195 = vst [vmem:[#allocation119_spill] sm:$0xff] %v7879_v42 }
 0x213   : > { %15196 = vst [vmem:[#allocation120_spill] sm:$0xff] %v7881_v11 }
 0x218   : > { %v1082_v39 = vpop.permute.xlu1 %1081  ;;  %v7883_v44 = vpop.permute.xlu0 %1003 }
 0x219   : > { %15197 = vst [vmem:[#allocation121_spill] sm:$0xff] %v7883_v44  ;;  %v7886_v22 = vmul.f32 %v1082_v39, %v7636_v4  ;;  %v1078_v19 = vpop.permute.xlu2 %1077 }
 0x21a   : > { %v7889_v32 = vmul.f32 %v1078_v19, %v7606_v25 }
 0x21b   : > { %1241 = vrot.lane.b32.xlu0 %v7886_v22, %s6960_s5 }
 0x21c   : > { %1237 = vrot.lane.b32.xlu1 %v7889_v32, %s6960_s5 }
 0x220   : > { %v1088_v45 = vpop.permute.xlu1 %1087  ;;  %v7895_v42 = vpop.permute.xlu0 %1009 }
 0x221   : > { %15198 = vst [vmem:[#allocation122_spill] sm:$0xff] %v7895_v42  ;;  %v7898_v11 = vmul.f32 %v1088_v45, %v7651_v53  ;;  %v1084_v44 = vpop.permute.xlu2 %1083 }
 0x222   : > { %v7901_v39 = vmul.f32 %v1084_v44, %v7618_v46 }
 0x223   : > { %1247 = vrot.lane.b32.xlu0 %v7898_v11, %s6960_s5 }
 0x224   : > { %1243 = vrot.lane.b32.xlu1 %v7901_v39, %s6960_s5 }
 0x228   : > { %v1094_v25 = vpop.permute.xlu1 %1093  ;;  %v1080_v4 = vpop.permute.xlu0 %1079 }
 0x229   : > { %v7908_v19 = vmul.f32 %v1094_v25, %v7666_v40  ;;  %v1090_v18 = vpop.permute.xlu2 %1089  ;;  %v7911_v42 = vmul.f32 %v1080_v4, %v7590_v50 }
 0x22a   : > { %v7914_v45 = vmul.f32 %v1090_v18, %v7630_v59 }
 0x22b   : > { %1253 = vrot.lane.b32.xlu0 %v7908_v19, %s6960_s5  ;;  %1239 = vrot.lane.b32.xlu2 %v7911_v42, %s6960_s5 }
 0x22c   : > { %1249 = vrot.lane.b32.xlu1 %v7914_v45, %s6960_s5 }
 0x230   : > { %v1100_v44 = vpop.permute.xlu1 %1099  ;;  %v1086_v46 = vpop.permute.xlu0 %1085 }
 0x231   : > { %v7923_v53 = vmul.f32 %v1100_v44, %v7681_v21  ;;  %v1096_v40 = vpop.permute.xlu2 %1095  ;;  %v7926_v50 = vmul.f32 %v1086_v46, %v7599_v49 }
 0x232   : > { %v7929_v18 = vmul.f32 %v1096_v40, %v7645_v14 }
 0x233   : > { %1259 = vrot.lane.b32.xlu0 %v7923_v53, %s6960_s5  ;;  %1245 = vrot.lane.b32.xlu2 %v7926_v50, %s6960_s5 }
 0x234   : > { %1255 = vrot.lane.b32.xlu1 %v7929_v18, %s6960_s5 }
 0x238   : > { %v1106_v59 = vpop.permute.xlu1 %1105  ;;  %v1092_v25 = vpop.permute.xlu0 %1091 }
 0x239   : > { %v7938_v21 = vmul.f32 %v1106_v59, %v7696_v10  ;;  %v1102_v4 = vpop.permute.xlu2 %1101  ;;  %v7941_v49 = vmul.f32 %v1092_v25, %v7609_v63 }
 0x23a   : > { %v7944_v14 = vmul.f32 %v1102_v4, %v7660_v27 }
 0x23b   : > { %1265 = vrot.lane.b32.xlu0 %v7938_v21, %s6960_s5  ;;  %1251 = vrot.lane.b32.xlu2 %v7941_v49, %s6960_s5 }
 0x23c   : > { %1261 = vrot.lane.b32.xlu1 %v7944_v14, %s6960_s5 }
 0x240   : > { %v1112_v44 = vpop.permute.xlu1 %1111  ;;  %v1098_v46 = vpop.permute.xlu0 %1097 }
 0x241   : > { %v7953_v10 = vmul.f32 %v1112_v44, %v7711_v58  ;;  %v1108_v40 = vpop.permute.xlu2 %1107  ;;  %v7956_v63 = vmul.f32 %v1098_v46, %v7621_v8 }
 0x242   : > { %v7959_v27 = vmul.f32 %v1108_v40, %v7675_v51 }
 0x243   : > { %1271 = vrot.lane.b32.xlu0 %v7953_v10, %s6960_s5  ;;  %1257 = vrot.lane.b32.xlu2 %v7956_v63, %s6960_s5 }
 0x244   : > { %1267 = vrot.lane.b32.xlu1 %v7959_v27, %s6960_s5 }
 0x248   : > { %v1118_v59 = vpop.permute.xlu1 %1117  ;;  %v1104_v25 = vpop.permute.xlu0 %1103 }
 0x249   : > { %v7968_v58 = vmul.f32 %v1118_v59, %v7726_v48  ;;  %v1114_v4 = vpop.permute.xlu2 %1113  ;;  %v7971_v8 = vmul.f32 %v1104_v25, %v7633_v38 }
 0x24a   : > { %v7974_v51 = vmul.f32 %v1114_v4, %v7690_v24 }
 0x24b   : > { %1277 = vrot.lane.b32.xlu0 %v7968_v58, %s6960_s5  ;;  %1263 = vrot.lane.b32.xlu2 %v7971_v8, %s6960_s5 }
 0x24c   : > { %1273 = vrot.lane.b32.xlu1 %v7974_v51, %s6960_s5 }
 0x250   : > { %v1124_v44 = vpop.permute.xlu1 %1123  ;;  %v1110_v46 = vpop.permute.xlu0 %1109 }
 0x251   : > { %v7983_v48 = vmul.f32 %v1124_v44, %v7738_v31  ;;  %v1120_v40 = vpop.permute.xlu2 %1119  ;;  %v7986_v38 = vmul.f32 %v1110_v46, %v7648_v9 }
 0x252   : > { %v7989_v24 = vmul.f32 %v1120_v40, %v7705_v13 }
 0x253   : > { %1283 = vrot.lane.b32.xlu0 %v7983_v48, %s6960_s5  ;;  %1269 = vrot.lane.b32.xlu2 %v7986_v38, %s6960_s5 }
 0x254   : > { %1279 = vrot.lane.b32.xlu1 %v7989_v24, %s6960_s5 }
 0x258   : > { %v1130_v59 = vpop.permute.xlu1 %1129  ;;  %v1116_v25 = vpop.permute.xlu0 %1115 }
 0x259   : > { %v7998_v31 = vmul.f32 %v1130_v59, %v7750_v2  ;;  %v1126_v4 = vpop.permute.xlu2 %1125  ;;  %v8001_v9 = vmul.f32 %v1116_v25, %v7663_v52 }
 0x25a   : > { %v8004_v13 = vmul.f32 %v1126_v4, %v7720_v62  ;;  %v15199_v4 = vld [vmem:[#allocation89_spill] sm:$0xff] }
 0x25b   : > { %1289 = vrot.lane.b32.xlu0 %v7998_v31, %s6960_s5  ;;  %1275 = vrot.lane.b32.xlu2 %v8001_v9, %s6960_s5 }
 0x25c   : > { %1285 = vrot.lane.b32.xlu1 %v8004_v13, %s6960_s5 }
 0x260   : > { %v1136_v44 = vpop.permute.xlu1 %1135  ;;  %v1122_v46 = vpop.permute.xlu0 %1121 }
 0x261   : > { %v8013_v2 = vmul.f32 %v1136_v44, %v7759_v33  ;;  %v1132_v40 = vpop.permute.xlu2 %1131  ;;  %v8016_v52 = vmul.f32 %v1122_v46, %v7678_v36 }
 0x262   : > { %v8019_v62 = vmul.f32 %v1132_v40, %v7735_v56  ;;  %v15201_v40 = vld [vmem:[#allocation7_spill] sm:$0xff] }
 0x263   : > { %1295 = vrot.lane.b32.xlu0 %v8013_v2, %s6960_s5  ;;  %1281 = vrot.lane.b32.xlu2 %v8016_v52, %s6960_s5 }
 0x264   : > { %1291 = vrot.lane.b32.xlu1 %v8019_v62, %s6960_s5 }
 0x268   : > { %v1128_v59 = vpop.permute.xlu0 %1127 }
 0x269   : > { %v1138_v25 = vpop.permute.xlu2 %1137  ;;  %v8028_v33 = vmul.f32 %v1128_v59, %v7693_v16 }
 0x26a   : > { %v8031_v36 = vmul.f32 %v1138_v25, %v7747_v0  ;;  %v15200_v0 = vld [vmem:[#allocation90_spill] sm:$0xff] }
 0x26b   : > { %1365 = vrot.lane.b32.xlu0 %v7225_v34, %s6961_s6  ;;  %1287 = vrot.lane.b32.xlu2 %v8028_v33, %s6960_s5 }
 0x26c   : > { %1297 = vrot.lane.b32.xlu1 %v8031_v36, %s6960_s5 }
 0x270   : > { %v1134_v56 = vpop.permute.xlu0 %1133 }
 0x271   : > { %v8040_v44 = vmul.f32 %v1134_v56, %v15199_v4 }
 0x273   : > { %1371 = vrot.lane.b32.xlu0 %v7244_v43, %s6961_s6  ;;  %1293 = vrot.lane.b32.xlu2 %v8040_v44, %s6960_s5 }
 0x274   : > { %1367 = vrot.lane.b32.xlu1 %v7247_v47, %s6961_s6 }
 0x278   : > { %v1140_v16 = vpop.permute.xlu0 %1139 }
 0x279   : > { %v8049_v46 = vmul.f32 %v1140_v16, %v15200_v0 }
 0x27b   : > { %1377 = vrot.lane.b32.xlu0 %v7268_v57, %s6961_s6  ;;  %1299 = vrot.lane.b32.xlu2 %v8049_v46, %s6960_s5  ;;  %s6895_s5 = scalar_lea.hbm %s14499_s2, 512 }
 0x27c   : > { %1373 = vrot.lane.b32.xlu1 %v7272_v7, %s6961_s6 }
 0x283   : > { %1383 = vrot.lane.b32.xlu0 %v7295_v5, %s6961_s6  ;;  %1369 = vrot.lane.b32.xlu2 %v15201_v40, %s6961_s6 }
 0x284   : > { %1379 = vrot.lane.b32.xlu1 %v7290_v61, %s6961_s6 }
 0x285   : > { %v8063_v59 = vpop.permute.xlu2 %1239 }
 0x286   : > { %15202 = vst [vmem:[#allocation89_spill] sm:$0xff] %v8063_v59 }
 0x28b   : > { %1389 = vrot.lane.b32.xlu0 %v7319_v15, %s6961_s6  ;;  %1375 = vrot.lane.b32.xlu2 %v7237_v37, %s6961_s6 }
 0x28c   : > { %1385 = vrot.lane.b32.xlu1 %v7314_v12, %s6961_s6 }
 0x28d   : > { %v8071_v25 = vpop.permute.xlu2 %1245  ;;  %v8073_v56 = vpop.permute.xlu0 %1241 }
 0x28e   : > { %15203 = vst [vmem:[#allocation90_spill] sm:$0xff] %v8071_v25  ;;  %v8075_v4 = vpop.permute.xlu1 %1237  ;;  %v15209_v25 = vld [vmem:[#allocation16_spill] sm:$0xff] }
 0x28f   : > { %15204 = vst [vmem:[#allocation7_spill] sm:$0xff] %v8073_v56 }
 0x290   : > { %15205 = vst [vmem:[#allocation123_spill] sm:$0xff] %v8075_v4 }
 0x293   : > { %1395 = vrot.lane.b32.xlu0 %v7343_v30, %s6961_s6  ;;  %1381 = vrot.lane.b32.xlu2 %v7263_v28, %s6961_s6 }
 0x294   : > { %1391 = vrot.lane.b32.xlu1 %v7338_v23, %s6961_s6 }
 0x295   : > { %v8083_v16 = vpop.permute.xlu2 %1251  ;;  %v8085_v0 = vpop.permute.xlu0 %1247 }
 0x296   : > { %15206 = vst [vmem:[#allocation124_spill] sm:$0xff] %v8083_v16  ;;  %v8087_v59 = vpop.permute.xlu1 %1243  ;;  %v15213_v16 = vld [vmem:[#allocation20_spill] sm:$0xff] }
 0x297   : > { %15207 = vst [vmem:[#allocation125_spill] sm:$0xff] %v8085_v0 }
 0x298   : > { %15208 = vst [vmem:[#allocation126_spill] sm:$0xff] %v8087_v59 }
 0x29b   : > { %1401 = vrot.lane.b32.xlu0 %v7367_v54, %s6961_s6  ;;  %1387 = vrot.lane.b32.xlu2 %v15209_v25, %s6961_s6 }
 0x29c   : > { %1397 = vrot.lane.b32.xlu1 %v7362_v6, %s6961_s6 }
 0x29d   : > { %v8095_v4 = vpop.permute.xlu2 %1257  ;;  %v8097_v56 = vpop.permute.xlu0 %1253 }
 0x29e   : > { %15210 = vst [vmem:[#allocation16_spill] sm:$0xff] %v8095_v4  ;;  %v8099_v23 = vpop.permute.xlu1 %1249  ;;  %v15217_v4 = vld [vmem:[#allocation24_spill] sm:$0xff] }
 0x29f   : > { %15211 = vst [vmem:[#allocation127_spill] sm:$0xff] %v8097_v56 }
 0x2a0   : > { %15212 = vst [vmem:[#allocation128_spill] sm:$0xff] %v8099_v23 }
 0x2a3   : > { %1407 = vrot.lane.b32.xlu0 %v7391_v20, %s6961_s6  ;;  %1393 = vrot.lane.b32.xlu2 %v15213_v16, %s6961_s6 }
 0x2a4   : > { %1403 = vrot.lane.b32.xlu1 %v7386_v60, %s6961_s6 }
 0x2a5   : > { %v8107_v59 = vpop.permute.xlu2 %1263  ;;  %v8109_v0 = vpop.permute.xlu0 %1259 }
 0x2a6   : > { %15214 = vst [vmem:[#allocation20_spill] sm:$0xff] %v8107_v59  ;;  %v8111_v6 = vpop.permute.xlu1 %1255 }
 0x2a7   : > { %15215 = vst [vmem:[#allocation129_spill] sm:$0xff] %v8109_v0 }
 0x2a8   : > { %15216 = vst [vmem:[#allocation130_spill] sm:$0xff] %v8111_v6 }
 0x2ab   : > { %1413 = vrot.lane.b32.xlu0 %v7415_v41, %s6961_s6  ;;  %1399 = vrot.lane.b32.xlu2 %v15217_v4, %s6961_s6 }
 0x2ac   : > { %1409 = vrot.lane.b32.xlu1 %v7410_v1, %s6961_s6 }
 0x2ad   : > { %v8119_v23 = vpop.permute.xlu2 %1269  ;;  %v8121_v56 = vpop.permute.xlu0 %1265 }
 0x2ae   : > { %15218 = vst [vmem:[#allocation24_spill] sm:$0xff] %v8119_v23  ;;  %v8123_v60 = vpop.permute.xlu1 %1261 }
 0x2af   : > { %15219 = vst [vmem:[#allocation131_spill] sm:$0xff] %v8121_v56 }
 0x2b0   : > { %15220 = vst [vmem:[#allocation132_spill] sm:$0xff] %v8123_v60 }
 0x2b3   : > { %1419 = vrot.lane.b32.xlu0 %v7439_v26, %s6961_s6  ;;  %1405 = vrot.lane.b32.xlu2 %v7359_v35, %s6961_s6 }
 0x2b4   : > { %1415 = vrot.lane.b32.xlu1 %v7434_v3, %s6961_s6 }
 0x2b5   : > { %v8131_v59 = vpop.permute.xlu2 %1275  ;;  %v8133_v6 = vpop.permute.xlu0 %1271 }
 0x2b6   : > { %15221 = vst [vmem:[#allocation133_spill] sm:$0xff] %v8131_v59  ;;  %v8135_v0 = vpop.permute.xlu1 %1267  ;;  %v15227_v59 = vld [vmem:[#allocation41_spill] sm:$0xff] }
 0x2b7   : > { %15222 = vst [vmem:[#allocation134_spill] sm:$0xff] %v8133_v6 }
 0x2b8   : > { %15223 = vst [vmem:[#allocation135_spill] sm:$0xff] %v8135_v0  ;;  %v15228_v0 = vld [vmem:[#allocation56_spill] sm:$0xff] }
 0x2bb   : > { %1425 = vrot.lane.b32.xlu0 %v7457_v29, %s6961_s6  ;;  %1411 = vrot.lane.b32.xlu2 %v7383_v55, %s6961_s6 }
 0x2bc   : > { %1421 = vrot.lane.b32.xlu1 %v7452_v17, %s6961_s6  ;;  %v15232_v17 = vld [vmem:[#allocation47_spill] sm:$0xff] }
 0x2bd   : > { %v8143_v23 = vpop.permute.xlu2 %1281  ;;  %v8145_v60 = vpop.permute.xlu0 %1277 }
 0x2be   : > { %15224 = vst [vmem:[#allocation136_spill] sm:$0xff] %v8143_v23  ;;  %v8147_v56 = vpop.permute.xlu1 %1273 }
 0x2bf   : > { %15225 = vst [vmem:[#allocation137_spill] sm:$0xff] %v8145_v60 }
 0x2c0   : > { %15226 = vst [vmem:[#allocation138_spill] sm:$0xff] %v8147_v56 }
 0x2c3   : > { %1417 = vrot.lane.b32.xlu2 %v15227_v59, %s6961_s6 }
 0x2c4   : > { %1427 = vrot.lane.b32.xlu1 %v15228_v0, %s6961_s6 }
 0x2c5   : > { %v8153_v6 = vpop.permute.xlu2 %1287  ;;  %v8155_v29 = vpop.permute.xlu0 %1283 }
 0x2c6   : > { %15229 = vst [vmem:[#allocation139_spill] sm:$0xff] %v8153_v6  ;;  %v8157_v55 = vpop.permute.xlu1 %1279 }
 0x2c7   : > { %15230 = vst [vmem:[#allocation140_spill] sm:$0xff] %v8155_v29 }
 0x2c8   : > { %15231 = vst [vmem:[#allocation141_spill] sm:$0xff] %v8157_v55 }
 0x2cb   : > { %1423 = vrot.lane.b32.xlu2 %v15232_v17, %s6961_s6 }
 0x2cd   : > { %v8161_v23 = vpop.permute.xlu2 %1293  ;;  %v8163_v60 = vpop.permute.xlu0 %1289 }
 0x2ce   : > { %15233 = vst [vmem:[#allocation142_spill] sm:$0xff] %v8161_v23  ;;  %v8165_v56 = vpop.permute.xlu1 %1285 }
 0x2cf   : > { %15234 = vst [vmem:[#allocation143_spill] sm:$0xff] %v8163_v60 }
 0x2d0   : > { %15235 = vst [vmem:[#allocation144_spill] sm:$0xff] %v8165_v56 }
 0x2d5   : > { %v8167_v3 = vpop.permute.xlu2 %1299  ;;  %v8169_v59 = vpop.permute.xlu0 %1295 }
 0x2d6   : > { %15236 = vst [vmem:[#allocation145_spill] sm:$0xff] %v8167_v3  ;;  %v8171_v0 = vpop.permute.xlu1 %1291 }
 0x2d7   : > { %15237 = vst [vmem:[#allocation146_spill] sm:$0xff] %v8169_v59 }
 0x2d8   : > { %15238 = vst [vmem:[#allocation147_spill] sm:$0xff] %v8171_v0 }
 0x2dd   : > { %v1370_v6 = vpop.permute.xlu2 %1369  ;;  %v1366_v26 = vpop.permute.xlu0 %1365 }
 0x2de   : > { %v8173_v29 = vpop.permute.xlu1 %1297  ;;  %v8176_v55 = vmul.f32 %v1370_v6, %v7886_v22  ;;  %v8179_v17 = vmul.f32 %v1366_v26, %v7889_v32 }
 0x2df   : > { %15239 = vst [vmem:[#allocation148_spill] sm:$0xff] %v8173_v29 }
 0x2e0   : > { %1529 = vrot.lane.b32.xlu1 %v8176_v55, %s6962_s7  ;;  %1525 = vrot.lane.b32.xlu2 %v8179_v17, %s6962_s7 }
 0x2e5   : > { %v1376_v3 = vpop.permute.xlu2 %1375  ;;  %v1372_v23 = vpop.permute.xlu0 %1371 }
 0x2e6   : > { %v1368_v0 = vpop.permute.xlu1 %1367  ;;  %v8186_v56 = vmul.f32 %v1376_v3, %v7898_v11  ;;  %v8189_v29 = vmul.f32 %v1372_v23, %v7901_v39 }
 0x2e7   : > { %v8192_v6 = vmul.f32 %v1368_v0, %v7911_v42 }
 0x2e8   : > { %1535 = vrot.lane.b32.xlu1 %v8186_v56, %s6962_s7  ;;  %1531 = vrot.lane.b32.xlu2 %v8189_v29, %s6962_s7 }
 0x2e9   : > { %1527 = vrot.lane.b32.xlu0 %v8192_v6, %s6962_s7 }
 0x2ed   : > { %v1382_v26 = vpop.permute.xlu2 %1381  ;;  %v1378_v22 = vpop.permute.xlu0 %1377 }
 0x2ee   : > { %v1374_v32 = vpop.permute.xlu1 %1373  ;;  %v8201_v11 = vmul.f32 %v1382_v26, %v7908_v19  ;;  %v8204_v23 = vmul.f32 %v1378_v22, %v7914_v45 }
 0x2ef   : > { %v8207_v3 = vmul.f32 %v1374_v32, %v7926_v50 }
 0x2f0   : > { %1541 = vrot.lane.b32.xlu1 %v8201_v11, %s6962_s7  ;;  %1537 = vrot.lane.b32.xlu2 %v8204_v23, %s6962_s7 }
 0x2f1   : > { %1533 = vrot.lane.b32.xlu0 %v8207_v3, %s6962_s7 }
 0x2f5   : > { %v1388_v42 = vpop.permute.xlu2 %1387  ;;  %v1384_v39 = vpop.permute.xlu0 %1383 }
 0x2f6   : > { %v1380_v0 = vpop.permute.xlu1 %1379  ;;  %v8216_v19 = vmul.f32 %v1388_v42, %v7923_v53  ;;  %v8219_v45 = vmul.f32 %v1384_v39, %v7929_v18 }
 0x2f7   : > { %v8222_v50 = vmul.f32 %v1380_v0, %v7941_v49 }
 0x2f8   : > { %1547 = vrot.lane.b32.xlu1 %v8216_v19, %s6962_s7  ;;  %1543 = vrot.lane.b32.xlu2 %v8219_v45, %s6962_s7 }
 0x2f9   : > { %1539 = vrot.lane.b32.xlu0 %v8222_v50, %s6962_s7 }
 0x2fd   : > { %v1394_v26 = vpop.permute.xlu2 %1393  ;;  %v1390_v22 = vpop.permute.xlu0 %1389 }
 0x2fe   : > { %v1386_v32 = vpop.permute.xlu1 %1385  ;;  %v8231_v53 = vmul.f32 %v1394_v26, %v7938_v21  ;;  %v8234_v18 = vmul.f32 %v1390_v22, %v7944_v14 }
 0x2ff   : > { %v8237_v49 = vmul.f32 %v1386_v32, %v7956_v63 }
 0x300   : > { %1553 = vrot.lane.b32.xlu1 %v8231_v53, %s6962_s7  ;;  %1549 = vrot.lane.b32.xlu2 %v8234_v18, %s6962_s7 }
 0x301   : > { %1545 = vrot.lane.b32.xlu0 %v8237_v49, %s6962_s7 }
 0x305   : > { %v1400_v42 = vpop.permute.xlu2 %1399  ;;  %v1396_v39 = vpop.permute.xlu0 %1395 }
 0x306   : > { %v1392_v0 = vpop.permute.xlu1 %1391  ;;  %v8246_v21 = vmul.f32 %v1400_v42, %v7953_v10  ;;  %v8249_v14 = vmul.f32 %v1396_v39, %v7959_v27 }
 0x307   : > { %v8252_v63 = vmul.f32 %v1392_v0, %v7971_v8 }
 0x308   : > { %1559 = vrot.lane.b32.xlu1 %v8246_v21, %s6962_s7  ;;  %1555 = vrot.lane.b32.xlu2 %v8249_v14, %s6962_s7 }
 0x309   : > { %1551 = vrot.lane.b32.xlu0 %v8252_v63, %s6962_s7 }
 0x30d   : > { %v1406_v26 = vpop.permute.xlu2 %1405  ;;  %v1402_v22 = vpop.permute.xlu0 %1401 }
 0x30e   : > { %v1398_v32 = vpop.permute.xlu1 %1397  ;;  %v8261_v10 = vmul.f32 %v1406_v26, %v7968_v58  ;;  %v8264_v27 = vmul.f32 %v1402_v22, %v7974_v51 }
 0x30f   : > { %v8267_v8 = vmul.f32 %v1398_v32, %v7986_v38 }
 0x310   : > { %1565 = vrot.lane.b32.xlu1 %v8261_v10, %s6962_s7  ;;  %1561 = vrot.lane.b32.xlu2 %v8264_v27, %s6962_s7 }
 0x311   : > { %1557 = vrot.lane.b32.xlu0 %v8267_v8, %s6962_s7 }
 0x315   : > { %v1412_v42 = vpop.permute.xlu2 %1411  ;;  %v1408_v39 = vpop.permute.xlu0 %1407 }
 0x316   : > { %v1404_v0 = vpop.permute.xlu1 %1403  ;;  %v8276_v58 = vmul.f32 %v1412_v42, %v7983_v48  ;;  %v8279_v51 = vmul.f32 %v1408_v39, %v7989_v24 }
 0x317   : > { %v8282_v38 = vmul.f32 %v1404_v0, %v8001_v9 }
 0x318   : > { %1571 = vrot.lane.b32.xlu1 %v8276_v58, %s6962_s7  ;;  %1567 = vrot.lane.b32.xlu2 %v8279_v51, %s6962_s7 }
 0x319   : > { %1563 = vrot.lane.b32.xlu0 %v8282_v38, %s6962_s7 }
 0x31d   : > { %v1418_v26 = vpop.permute.xlu2 %1417  ;;  %v1414_v22 = vpop.permute.xlu0 %1413 }
 0x31e   : > { %v1410_v32 = vpop.permute.xlu1 %1409  ;;  %v8291_v48 = vmul.f32 %v1418_v26, %v7998_v31  ;;  %v8294_v24 = vmul.f32 %v1414_v22, %v8004_v13 }
 0x31f   : > { %v8297_v9 = vmul.f32 %v1410_v32, %v8016_v52 }
 0x320   : > { %1577 = vrot.lane.b32.xlu1 %v8291_v48, %s6962_s7  ;;  %1573 = vrot.lane.b32.xlu2 %v8294_v24, %s6962_s7 }
 0x321   : > { %1569 = vrot.lane.b32.xlu0 %v8297_v9, %s6962_s7 }
 0x325   : > { %v1424_v42 = vpop.permute.xlu2 %1423  ;;  %v1420_v39 = vpop.permute.xlu0 %1419 }
 0x326   : > { %v1416_v0 = vpop.permute.xlu1 %1415  ;;  %v8306_v31 = vmul.f32 %v1424_v42, %v8013_v2  ;;  %v8309_v13 = vmul.f32 %v1420_v39, %v8019_v62 }
 0x327   : > { %v8312_v52 = vmul.f32 %v1416_v0, %v8028_v33  ;;  %v15245_v0 = vld [vmem:[#allocation25_spill] sm:$0xff] }
 0x328   : > { %1583 = vrot.lane.b32.xlu1 %v8306_v31, %s6962_s7  ;;  %1579 = vrot.lane.b32.xlu2 %v8309_v13, %s6962_s7 }
 0x329   : > { %1575 = vrot.lane.b32.xlu0 %v8312_v52, %s6962_s7 }
 0x32d   : > { %v1426_v26 = vpop.permute.xlu0 %1425 }
 0x32e   : > { %v1422_v22 = vpop.permute.xlu1 %1421  ;;  %v8321_v2 = vmul.f32 %v1426_v26, %v8031_v36 }
 0x32f   : > { %v8324_v62 = vmul.f32 %v1422_v22, %v8040_v44 }
 0x330   : > { %1653 = vrot.lane.b32.xlu1 %v7225_v34, %s6963_s8  ;;  %1585 = vrot.lane.b32.xlu2 %v8321_v2, %s6962_s7 }
 0x331   : > { %1581 = vrot.lane.b32.xlu0 %v8324_v62, %s6962_s7 }
 0x336   : > { %v1428_v33 = vpop.permute.xlu1 %1427 }
 0x337   : > { %v8333_v32 = vmul.f32 %v1428_v33, %v8049_v46 }
 0x338   : > { %1659 = vrot.lane.b32.xlu1 %v7244_v43, %s6963_s8  ;;  %1655 = vrot.lane.b32.xlu2 %v7247_v47, %s6963_s8 }
 0x339   : > { %1587 = vrot.lane.b32.xlu0 %v8333_v32, %s6962_s7 }
 0x33a   : > { %v8341_v36 = vpop.permute.xlu2 %1525 }
 0x33b   : > { %15240 = vst [vmem:[#allocation149_spill] sm:$0xff] %v8341_v36 }
 0x340   : > { %1665 = vrot.lane.b32.xlu1 %v7268_v57, %s6963_s8  ;;  %1661 = vrot.lane.b32.xlu2 %v7272_v7, %s6963_s8 }
 0x341   : > { %1657 = vrot.lane.b32.xlu0 %v15201_v40, %s6963_s8 }
 0x342   : > { %v8349_v44 = vpop.permute.xlu2 %1531 }
 0x343   : > { %15241 = vst [vmem:[#allocation150_spill] sm:$0xff] %v8349_v44 }
 0x348   : > { %1671 = vrot.lane.b32.xlu1 %v7295_v5, %s6963_s8  ;;  %1667 = vrot.lane.b32.xlu2 %v7290_v61, %s6963_s8 }
 0x349   : > { %1663 = vrot.lane.b32.xlu0 %v7237_v37, %s6963_s8 }
 0x34a   : > { %v8357_v46 = vpop.permute.xlu2 %1537 }
 0x34b   : > { %15242 = vst [vmem:[#allocation151_spill] sm:$0xff] %v8357_v46 }
 0x350   : > { %1677 = vrot.lane.b32.xlu1 %v7319_v15, %s6963_s8  ;;  %1673 = vrot.lane.b32.xlu2 %v7314_v12, %s6963_s8 }
 0x351   : > { %1669 = vrot.lane.b32.xlu0 %v7263_v28, %s6963_s8 }
 0x352   : > { %v8365_v42 = vpop.permute.xlu1 %1529  ;;  %v8367_v39 = vpop.permute.xlu2 %1543 }
 0x353   : > { %15243 = vst [vmem:[#allocation152_spill] sm:$0xff] %v8365_v42  ;;  %v15249_v42 = vld [vmem:[#allocation30_spill] sm:$0xff] }
 0x354   : > { %15244 = vst [vmem:[#allocation153_spill] sm:$0xff] %v8367_v39 }
 0x358   : > { %1683 = vrot.lane.b32.xlu1 %v7343_v30, %s6963_s8  ;;  %1679 = vrot.lane.b32.xlu2 %v15245_v0, %s6963_s8 }
 0x359   : > { %1675 = vrot.lane.b32.xlu0 %v15209_v25, %s6963_s8 }
 0x35a   : > { %v8375_v26 = vpop.permute.xlu1 %1535  ;;  %v8377_v22 = vpop.permute.xlu2 %1549 }
 0x35b   : > { %15246 = vst [vmem:[#allocation25_spill] sm:$0xff] %v8375_v26  ;;  %v8379_v33 = vpop.permute.xlu0 %1527  ;;  %v15253_v26 = vld [vmem:[#allocation36_spill] sm:$0xff] }
 0x35c   : > { %15247 = vst [vmem:[#allocation154_spill] sm:$0xff] %v8377_v22 }
 0x35d   : > { %15248 = vst [vmem:[#allocation155_spill] sm:$0xff] %v8379_v33 }
 0x360   : > { %1689 = vrot.lane.b32.xlu1 %v7367_v54, %s6963_s8  ;;  %1685 = vrot.lane.b32.xlu2 %v15249_v42, %s6963_s8 }
 0x361   : > { %1681 = vrot.lane.b32.xlu0 %v15213_v16, %s6963_s8 }
 0x362   : > { %v8387_v39 = vpop.permute.xlu1 %1541  ;;  %v8389_v46 = vpop.permute.xlu2 %1555 }
 0x363   : > { %15250 = vst [vmem:[#allocation30_spill] sm:$0xff] %v8387_v39  ;;  %v8391_v44 = vpop.permute.xlu0 %1533 }
 0x364   : > { %15251 = vst [vmem:[#allocation156_spill] sm:$0xff] %v8389_v46 }
 0x365   : > { %15252 = vst [vmem:[#allocation157_spill] sm:$0xff] %v8391_v44 }
 0x368   : > { %1695 = vrot.lane.b32.xlu1 %v7391_v20, %s6963_s8  ;;  %1691 = vrot.lane.b32.xlu2 %v15253_v26, %s6963_s8 }
 0x369   : > { %1687 = vrot.lane.b32.xlu0 %v15217_v4, %s6963_s8 }
 0x36a   : > { %v8399_v22 = vpop.permute.xlu1 %1547  ;;  %v8401_v33 = vpop.permute.xlu2 %1561 }
 0x36b   : > { %15254 = vst [vmem:[#allocation36_spill] sm:$0xff] %v8399_v22  ;;  %v8403_v36 = vpop.permute.xlu0 %1539  ;;  %v15260_v22 = vld [vmem:[#allocation50_spill] sm:$0xff] }
 0x36c   : > { %15255 = vst [vmem:[#allocation158_spill] sm:$0xff] %v8401_v33  ;;  %v15261_v33 = vld [vmem:[#allocation48_spill] sm:$0xff] }
 0x36d   : > { %15256 = vst [vmem:[#allocation159_spill] sm:$0xff] %v8403_v36  ;;  %v15262_v36 = vld [vmem:[#allocation35_spill] sm:$0xff] }
 0x370   : > { %1701 = vrot.lane.b32.xlu1 %v7415_v41, %s6963_s8  ;;  %1697 = vrot.lane.b32.xlu2 %v7410_v1, %s6963_s8 }
 0x371   : > { %1693 = vrot.lane.b32.xlu0 %v7359_v35, %s6963_s8 }
 0x372   : > { %v8411_v39 = vpop.permute.xlu1 %1553  ;;  %v8413_v46 = vpop.permute.xlu2 %1567 }
 0x373   : > { %15257 = vst [vmem:[#allocation160_spill] sm:$0xff] %v8411_v39  ;;  %v8415_v44 = vpop.permute.xlu0 %1545  ;;  %v15266_v39 = vld [vmem:[#allocation54_spill] sm:$0xff] }
 0x374   : > { %15258 = vst [vmem:[#allocation161_spill] sm:$0xff] %v8413_v46  ;;  %v15267_v46 = vld [vmem:[#allocation52_spill] sm:$0xff] }
 0x375   : > { %15259 = vst [vmem:[#allocation162_spill] sm:$0xff] %v8415_v44  ;;  %v15268_v44 = vld [vmem:[#allocation41_spill] sm:$0xff] }
 0x378   : > { %1707 = vrot.lane.b32.xlu1 %v15260_v22, %s6963_s8  ;;  %1703 = vrot.lane.b32.xlu2 %v15261_v33, %s6963_s8 }
 0x379   : > { %1699 = vrot.lane.b32.xlu0 %v15262_v36, %s6963_s8 }
 0x37a   : > { %v8423_v59 = vpop.permute.xlu1 %1559  ;;  %v8425_v60 = vpop.permute.xlu2 %1573 }
 0x37b   : > { %15263 = vst [vmem:[#allocation163_spill] sm:$0xff] %v8423_v59  ;;  %v8427_v41 = vpop.permute.xlu0 %1551  ;;  %v15272_v59 = vld [vmem:[#allocation56_spill] sm:$0xff] }
 0x37c   : > { %15264 = vst [vmem:[#allocation164_spill] sm:$0xff] %v8425_v60  ;;  %v15273_v60 = vld [vmem:[#allocation47_spill] sm:$0xff] }
 0x37d   : > { %15265 = vst [vmem:[#allocation165_spill] sm:$0xff] %v8427_v41 }
 0x380   : > { %1713 = vrot.lane.b32.xlu1 %v15266_v39, %s6963_s8  ;;  %1709 = vrot.lane.b32.xlu2 %v15267_v46, %s6963_s8 }
 0x381   : > { %1705 = vrot.lane.b32.xlu0 %v15268_v44, %s6963_s8 }
 0x382   : > { %v8435_v22 = vpop.permute.xlu1 %1565  ;;  %v8437_v20 = vpop.permute.xlu2 %1579 }
 0x383   : > { %15269 = vst [vmem:[#allocation166_spill] sm:$0xff] %v8435_v22  ;;  %v8439_v33 = vpop.permute.xlu0 %1557 }
 0x384   : > { %15270 = vst [vmem:[#allocation167_spill] sm:$0xff] %v8437_v20 }
 0x385   : > { %15271 = vst [vmem:[#allocation168_spill] sm:$0xff] %v8439_v33 }
 0x388   : > { %1715 = vrot.lane.b32.xlu2 %v15272_v59, %s6963_s8 }
 0x389   : > { %1711 = vrot.lane.b32.xlu0 %v15273_v60, %s6963_s8 }
 0x38a   : > { %v8445_v41 = vpop.permute.xlu1 %1571  ;;  %v8447_v39 = vpop.permute.xlu2 %1585 }
 0x38b   : > { %15274 = vst [vmem:[#allocation169_spill] sm:$0xff] %v8445_v41  ;;  %v8449_v46 = vpop.permute.xlu0 %1563 }
 0x38c   : > { %15275 = vst [vmem:[#allocation170_spill] sm:$0xff] %v8447_v39 }
 0x38d   : > { %15276 = vst [vmem:[#allocation171_spill] sm:$0xff] %v8449_v46 }
 0x392   : > { %v8451_v54 = vpop.permute.xlu1 %1577  ;;  %v1656_v1 = vpop.permute.xlu2 %1655 }
 0x393   : > { %15277 = vst [vmem:[#allocation172_spill] sm:$0xff] %v8451_v54  ;;  %v8454_v22 = vmul.f32 %v1656_v1, %v8192_v6  ;;  %v8456_v20 = vpop.permute.xlu0 %1569 }
 0x394   : > { %15278 = vst [vmem:[#allocation173_spill] sm:$0xff] %v8456_v20 }
 0x395   : > { %1815 = vrot.lane.b32.xlu1 %v8454_v22, %s6964_s15 }
 0x39a   : > { %v8460_v33 = vpop.permute.xlu1 %1583  ;;  %v1662_v59 = vpop.permute.xlu2 %1661 }
 0x39b   : > { %15279 = vst [vmem:[#allocation174_spill] sm:$0xff] %v8460_v33  ;;  %v8463_v41 = vmul.f32 %v1662_v59, %v8207_v3  ;;  %v8465_v39 = vpop.permute.xlu0 %1575 }
 0x39c   : > { %15280 = vst [vmem:[#allocation175_spill] sm:$0xff] %v8465_v39 }
 0x39d   : > { %1821 = vrot.lane.b32.xlu1 %v8463_v41, %s6964_s15 }
 0x3a2   : > { %v1654_v54 = vpop.permute.xlu1 %1653  ;;  %v1668_v1 = vpop.permute.xlu2 %1667 }
 0x3a3   : > { %v8470_v6 = vmul.f32 %v1654_v54, %v8179_v17  ;;  %v8473_v20 = vmul.f32 %v1668_v1, %v8222_v50  ;;  %v8475_v46 = vpop.permute.xlu0 %1581 }
 0x3a4   : > { %15281 = vst [vmem:[#allocation176_spill] sm:$0xff] %v8475_v46 }
 0x3a5   : > { %1813 = vrot.lane.b32.xlu0 %v8470_v6, %s6964_s15  ;;  %1827 = vrot.lane.b32.xlu1 %v8473_v20, %s6964_s15 }
 0x3aa   : > { %v1660_v59 = vpop.permute.xlu1 %1659  ;;  %v1674_v3 = vpop.permute.xlu2 %1673 }
 0x3ab   : > { %v8482_v33 = vmul.f32 %v1660_v59, %v8189_v29  ;;  %v8485_v39 = vmul.f32 %v1674_v3, %v8237_v49  ;;  %v8487_v54 = vpop.permute.xlu0 %1587 }
 0x3ac   : > { %15282 = vst [vmem:[#allocation177_spill] sm:$0xff] %v8487_v54 }
 0x3ad   : > { %1819 = vrot.lane.b32.xlu0 %v8482_v33, %s6964_s15  ;;  %1833 = vrot.lane.b32.xlu1 %v8485_v39, %s6964_s15 }
 0x3b2   : > { %v1666_v17 = vpop.permute.xlu1 %1665  ;;  %v1680_v50 = vpop.permute.xlu2 %1679 }
 0x3b3   : > { %v8494_v1 = vmul.f32 %v1666_v17, %v8204_v23  ;;  %v8497_v46 = vmul.f32 %v1680_v50, %v8252_v63  ;;  %v1658_v29 = vpop.permute.xlu0 %1657 }
 0x3b4   : > { %v8500_v49 = vmul.f32 %v1658_v29, %v8176_v55 }
 0x3b5   : > { %1825 = vrot.lane.b32.xlu0 %v8494_v1, %s6964_s15  ;;  %1839 = vrot.lane.b32.xlu1 %v8497_v46, %s6964_s15 }
 0x3b6   : > { %1817 = vrot.lane.b32.xlu2 %v8500_v49, %s6964_s15 }
 0x3ba   : > { %v1672_v59 = vpop.permute.xlu1 %1671  ;;  %v1686_v3 = vpop.permute.xlu2 %1685 }
 0x3bb   : > { %v8509_v23 = vmul.f32 %v1672_v59, %v8219_v45  ;;  %v8512_v63 = vmul.f32 %v1686_v3, %v8267_v8  ;;  %v1664_v17 = vpop.permute.xlu0 %1663 }
 0x3bc   : > { %v8515_v55 = vmul.f32 %v1664_v17, %v8186_v56 }
 0x3bd   : > { %1831 = vrot.lane.b32.xlu0 %v8509_v23, %s6964_s15  ;;  %1845 = vrot.lane.b32.xlu1 %v8512_v63, %s6964_s15 }
 0x3be   : > { %1823 = vrot.lane.b32.xlu2 %v8515_v55, %s6964_s15 }
 0x3c2   : > { %v1678_v50 = vpop.permute.xlu1 %1677  ;;  %v1692_v29 = vpop.permute.xlu2 %1691 }
 0x3c3   : > { %v8524_v45 = vmul.f32 %v1678_v50, %v8234_v18  ;;  %v8527_v8 = vmul.f32 %v1692_v29, %v8282_v38  ;;  %v1670_v59 = vpop.permute.xlu0 %1669 }
 0x3c4   : > { %v8530_v56 = vmul.f32 %v1670_v59, %v8201_v11 }
 0x3c5   : > { %1837 = vrot.lane.b32.xlu0 %v8524_v45, %s6964_s15  ;;  %1851 = vrot.lane.b32.xlu1 %v8527_v8, %s6964_s15 }
 0x3c6   : > { %1829 = vrot.lane.b32.xlu2 %v8530_v56, %s6964_s15 }
 0x3ca   : > { %v1684_v3 = vpop.permute.xlu1 %1683  ;;  %v1698_v17 = vpop.permute.xlu2 %1697 }
 0x3cb   : > { %v8539_v18 = vmul.f32 %v1684_v3, %v8249_v14  ;;  %v8542_v38 = vmul.f32 %v1698_v17, %v8297_v9  ;;  %v1676_v50 = vpop.permute.xlu0 %1675 }
 0x3cc   : > { %v8545_v11 = vmul.f32 %v1676_v50, %v8216_v19 }
 0x3cd   : > { %1843 = vrot.lane.b32.xlu0 %v8539_v18, %s6964_s15  ;;  %1857 = vrot.lane.b32.xlu1 %v8542_v38, %s6964_s15 }
 0x3ce   : > { %1835 = vrot.lane.b32.xlu2 %v8545_v11, %s6964_s15 }
 0x3d2   : > { %v1690_v29 = vpop.permute.xlu1 %1689  ;;  %v1704_v59 = vpop.permute.xlu2 %1703 }
 0x3d3   : > { %v8554_v14 = vmul.f32 %v1690_v29, %v8264_v27  ;;  %v8557_v9 = vmul.f32 %v1704_v59, %v8312_v52  ;;  %v1682_v3 = vpop.permute.xlu0 %1681 }
 0x3d4   : > { %v8560_v19 = vmul.f32 %v1682_v3, %v8231_v53 }
 0x3d5   : > { %1849 = vrot.lane.b32.xlu0 %v8554_v14, %s6964_s15  ;;  %1863 = vrot.lane.b32.xlu1 %v8557_v9, %s6964_s15 }
 0x3d6   : > { %1841 = vrot.lane.b32.xlu2 %v8560_v19, %s6964_s15 }
 0x3da   : > { %v1696_v17 = vpop.permute.xlu1 %1695  ;;  %v1710_v50 = vpop.permute.xlu2 %1709 }
 0x3db   : > { %v8569_v27 = vmul.f32 %v1696_v17, %v8279_v51  ;;  %v8572_v52 = vmul.f32 %v1710_v50, %v8324_v62  ;;  %v1688_v29 = vpop.permute.xlu0 %1687 }
 0x3dc   : > { %v8575_v53 = vmul.f32 %v1688_v29, %v8246_v21 }
 0x3dd   : > { %1855 = vrot.lane.b32.xlu0 %v8569_v27, %s6964_s15  ;;  %1869 = vrot.lane.b32.xlu1 %v8572_v52, %s6964_s15 }
 0x3de   : > { %1847 = vrot.lane.b32.xlu2 %v8575_v53, %s6964_s15 }
 0x3e2   : > { %v1702_v59 = vpop.permute.xlu1 %1701  ;;  %v1716_v3 = vpop.permute.xlu2 %1715 }
 0x3e3   : > { %v8584_v51 = vmul.f32 %v1702_v59, %v8294_v24  ;;  %v8587_v62 = vmul.f32 %v1716_v3, %v8333_v32  ;;  %v1694_v17 = vpop.permute.xlu0 %1693 }
 0x3e4   : > { %v8590_v21 = vmul.f32 %v1694_v17, %v8261_v10 }
 0x3e5   : > { %1861 = vrot.lane.b32.xlu0 %v8584_v51, %s6964_s15  ;;  %1875 = vrot.lane.b32.xlu1 %v8587_v62, %s6964_s15 }
 0x3e6   : > { %1853 = vrot.lane.b32.xlu2 %v8590_v21, %s6964_s15 }
 0x3ea   : > { %v1708_v50 = vpop.permute.xlu1 %1707 }
 0x3eb   : > { %v8599_v24 = vmul.f32 %v1708_v50, %v8309_v13  ;;  %v1700_v29 = vpop.permute.xlu0 %1699 }
 0x3ec   : > { %v8602_v32 = vmul.f32 %v1700_v29, %v8276_v58 }
 0x3ed   : > { %1867 = vrot.lane.b32.xlu0 %v8599_v24, %s6964_s15  ;;  %1945 = vrot.lane.b32.xlu1 %v15201_v40, %s6965_s16 }
 0x3ee   : > { %1859 = vrot.lane.b32.xlu2 %v8602_v32, %s6964_s15 }
 0x3f2   : > { %v1714_v10 = vpop.permute.xlu1 %1713 }
 0x3f3   : > { %v8611_v59 = vmul.f32 %v1714_v10, %v8321_v2  ;;  %v1706_v13 = vpop.permute.xlu0 %1705 }
 0x3f4   : > { %v8614_v3 = vmul.f32 %v1706_v13, %v8291_v48 }
 0x3f5   : > { %1951 = vrot.lane.b32.xlu1 %v7237_v37, %s6965_s16  ;;  %1873 = vrot.lane.b32.xlu0 %v8611_v59, %s6964_s15 }
 0x3f6   : > { %1865 = vrot.lane.b32.xlu2 %v8614_v3, %s6964_s15 }
 0x3fb   : > { %v1712_v58 = vpop.permute.xlu0 %1711 }
 0x3fc   : > { %v8623_v17 = vmul.f32 %v1712_v58, %v8306_v31 }
 0x3fd   : > { %1957 = vrot.lane.b32.xlu1 %v7263_v28, %s6965_s16  ;;  %1943 = vrot.lane.b32.xlu0 %v7247_v47, %s6965_s16 }
 0x3fe   : > { %1871 = vrot.lane.b32.xlu2 %v8623_v17, %s6964_s15 }
 0x405   : > { %1963 = vrot.lane.b32.xlu1 %v15209_v25, %s6965_s16  ;;  %1949 = vrot.lane.b32.xlu0 %v7272_v7, %s6965_s16 }
 0x406   : > { %1941 = vrot.lane.b32.xlu2 %v7225_v34, %s6965_s16 }
 0x407   : > { %v8637_v48 = vpop.permute.xlu1 %1815 }
 0x408   : > { %15283 = vst [vmem:[#allocation178_spill] sm:$0xff] %v8637_v48 }
 0x40d   : > { %1969 = vrot.lane.b32.xlu1 %v15213_v16, %s6965_s16  ;;  %1955 = vrot.lane.b32.xlu0 %v7290_v61, %s6965_s16 }
 0x40e   : > { %1947 = vrot.lane.b32.xlu2 %v7244_v43, %s6965_s16 }
 0x40f   : > { %v8645_v31 = vpop.permute.xlu1 %1821 }
 0x410   : > { %15284 = vst [vmem:[#allocation179_spill] sm:$0xff] %v8645_v31  ;;  %v8647_v2 = vpop.permute.xlu2 %1817 }
 0x411   : > { %15285 = vst [vmem:[#allocation180_spill] sm:$0xff] %v8647_v2 }
 0x415   : > { %1975 = vrot.lane.b32.xlu1 %v15217_v4, %s6965_s16  ;;  %1961 = vrot.lane.b32.xlu0 %v7314_v12, %s6965_s16 }
 0x416   : > { %1953 = vrot.lane.b32.xlu2 %v7268_v57, %s6965_s16 }
 0x417   : > { %v8655_v50 = vpop.permute.xlu1 %1827  ;;  %v8657_v29 = vpop.permute.xlu0 %1813 }
 0x418   : > { %15286 = vst [vmem:[#allocation181_spill] sm:$0xff] %v8655_v50  ;;  %v8659_v10 = vpop.permute.xlu2 %1823 }
 0x419   : > { %15287 = vst [vmem:[#allocation182_spill] sm:$0xff] %v8657_v29 }
 0x41a   : > { %15288 = vst [vmem:[#allocation183_spill] sm:$0xff] %v8659_v10 }
 0x41d   : > { %1981 = vrot.lane.b32.xlu1 %v7359_v35, %s6965_s16  ;;  %1967 = vrot.lane.b32.xlu0 %v15245_v0, %s6965_s16  ;;  %v15318_v35 = vld [vmem:[#allocation54_spill] sm:$0xff] }
 0x41e   : > { %1959 = vrot.lane.b32.xlu2 %v7295_v5, %s6965_s16 }
 0x41f   : > { %v8667_v13 = vpop.permute.xlu1 %1833  ;;  %v8669_v58 = vpop.permute.xlu0 %1819 }
 0x420   : > { %15289 = vst [vmem:[#allocation184_spill] sm:$0xff] %v8667_v13  ;;  %v8671_v2 = vpop.permute.xlu2 %1829 }
 0x421   : > { %15290 = vst [vmem:[#allocation185_spill] sm:$0xff] %v8669_v58 }
 0x422   : > { %15291 = vst [vmem:[#allocation186_spill] sm:$0xff] %v8671_v2 }
 0x425   : > { %1987 = vrot.lane.b32.xlu1 %v15262_v36, %s6965_s16  ;;  %1973 = vrot.lane.b32.xlu0 %v15249_v42, %s6965_s16 }
 0x426   : > { %1965 = vrot.lane.b32.xlu2 %v7319_v15, %s6965_s16 }
 0x427   : > { %v8679_v10 = vpop.permute.xlu1 %1839  ;;  %v8681_v29 = vpop.permute.xlu0 %1825 }
 0x428   : > { %15292 = vst [vmem:[#allocation187_spill] sm:$0xff] %v8679_v10  ;;  %v8683_v50 = vpop.permute.xlu2 %1835 }
 0x429   : > { %15293 = vst [vmem:[#allocation188_spill] sm:$0xff] %v8681_v29  ;;  %v15299_v29 = vld [vmem:[#allocation32_spill] sm:$0xff] }
 0x42a   : > { %15294 = vst [vmem:[#allocation189_spill] sm:$0xff] %v8683_v50  ;;  %v15298_v50 = vld [vmem:[#allocation42_spill] sm:$0xff] }
 0x42d   : > { %1993 = vrot.lane.b32.xlu1 %v15268_v44, %s6965_s16  ;;  %1979 = vrot.lane.b32.xlu0 %v15253_v26, %s6965_s16  ;;  %v15308_v44 = vld [vmem:[#allocation52_spill] sm:$0xff] }
 0x42e   : > { %1971 = vrot.lane.b32.xlu2 %v7343_v30, %s6965_s16 }
 0x42f   : > { %v8691_v2 = vpop.permute.xlu1 %1845  ;;  %v8693_v58 = vpop.permute.xlu0 %1831 }
 0x430   : > { %15295 = vst [vmem:[#allocation190_spill] sm:$0xff] %v8691_v2  ;;  %v8695_v13 = vpop.permute.xlu2 %1841  ;;  %v15303_v2 = vld [vmem:[#allocation48_spill] sm:$0xff] }
 0x431   : > { %15296 = vst [vmem:[#allocation191_spill] sm:$0xff] %v8693_v58 }
 0x432   : > { %15297 = vst [vmem:[#allocation192_spill] sm:$0xff] %v8695_v13  ;;  %v15304_v13 = vld [vmem:[#allocation38_spill] sm:$0xff] }
 0x435   : > { %1999 = vrot.lane.b32.xlu1 %v15273_v60, %s6965_s16  ;;  %1985 = vrot.lane.b32.xlu0 %v15298_v50, %s6965_s16 }
 0x436   : > { %1977 = vrot.lane.b32.xlu2 %v15299_v29, %s6965_s16 }
 0x437   : > { %v8703_v10 = vpop.permute.xlu1 %1851  ;;  %v8705_v31 = vpop.permute.xlu0 %1837 }
 0x438   : > { %15300 = vst [vmem:[#allocation32_spill] sm:$0xff] %v8703_v10  ;;  %v8707_v48 = vpop.permute.xlu2 %1847  ;;  %v15309_v10 = vld [vmem:[#allocation44_spill] sm:$0xff] }
 0x439   : > { %15301 = vst [vmem:[#allocation193_spill] sm:$0xff] %v8705_v31 }
 0x43a   : > { %15302 = vst [vmem:[#allocation194_spill] sm:$0xff] %v8707_v48 }
 0x43d   : > { %1991 = vrot.lane.b32.xlu0 %v15303_v2, %s6965_s16  ;;  %v15313_v2 = vld [vmem:[#allocation56_spill] sm:$0xff] }
 0x43e   : > { %1983 = vrot.lane.b32.xlu2 %v15304_v13, %s6965_s16 }
 0x43f   : > { %v8713_v58 = vpop.permute.xlu1 %1857  ;;  %v8715_v54 = vpop.permute.xlu0 %1843 }
 0x440   : > { %15305 = vst [vmem:[#allocation38_spill] sm:$0xff] %v8713_v58  ;;  %v8717_v60 = vpop.permute.xlu2 %1853  ;;  %v15314_v58 = vld [vmem:[#allocation50_spill] sm:$0xff] }
 0x441   : > { %15306 = vst [vmem:[#allocation195_spill] sm:$0xff] %v8715_v54 }
 0x442   : > { %15307 = vst [vmem:[#allocation196_spill] sm:$0xff] %v8717_v60 }
 0x445   : > { %1997 = vrot.lane.b32.xlu0 %v15308_v44, %s6965_s16 }
 0x446   : > { %1989 = vrot.lane.b32.xlu2 %v15309_v10, %s6965_s16 }
 0x447   : > { %v8723_v31 = vpop.permute.xlu1 %1863  ;;  %v8725_v48 = vpop.permute.xlu0 %1849 }
 0x448   : > { %15310 = vst [vmem:[#allocation44_spill] sm:$0xff] %v8723_v31  ;;  %v8727_v36 = vpop.permute.xlu2 %1859 }
 0x449   : > { %15311 = vst [vmem:[#allocation197_spill] sm:$0xff] %v8725_v48 }
 0x44a   : > { %15312 = vst [vmem:[#allocation198_spill] sm:$0xff] %v8727_v36 }
 0x44d   : > { %2003 = vrot.lane.b32.xlu0 %v15313_v2, %s6965_s16 }
 0x44e   : > { %1995 = vrot.lane.b32.xlu2 %v15314_v58, %s6965_s16 }
 0x44f   : > { %v8733_v54 = vpop.permute.xlu1 %1869  ;;  %v8735_v60 = vpop.permute.xlu0 %1855 }
 0x450   : > { %15315 = vst [vmem:[#allocation199_spill] sm:$0xff] %v8733_v54  ;;  %v8737_v44 = vpop.permute.xlu2 %1865 }
 0x451   : > { %15316 = vst [vmem:[#allocation200_spill] sm:$0xff] %v8735_v60 }
 0x452   : > { %15317 = vst [vmem:[#allocation201_spill] sm:$0xff] %v8737_v44 }
 0x456   : > { %2001 = vrot.lane.b32.xlu2 %v15318_v35, %s6965_s16 }
 0x457   : > { %v8741_v31 = vpop.permute.xlu1 %1875  ;;  %v8743_v48 = vpop.permute.xlu0 %1861 }
 0x458   : > { %15319 = vst [vmem:[#allocation54_spill] sm:$0xff] %v8741_v31  ;;  %v8745_v36 = vpop.permute.xlu2 %1871 }
 0x459   : > { %15320 = vst [vmem:[#allocation202_spill] sm:$0xff] %v8743_v48 }
 0x45a   : > { %15321 = vst [vmem:[#allocation203_spill] sm:$0xff] %v8745_v36 }
 0x45f   : > { %v1946_v50 = vpop.permute.xlu1 %1945  ;;  %v8747_v2 = vpop.permute.xlu0 %1867 }
 0x460   : > { %15322 = vst [vmem:[#allocation204_spill] sm:$0xff] %v8747_v2  ;;  %v8750_v58 = vmul.f32 %v1946_v50, %v8500_v49  ;;  %v1942_v54 = vpop.permute.xlu2 %1941 }
 0x461   : > { %v8753_v60 = vmul.f32 %v1942_v54, %v8470_v6 }
 0x462   : > { %2105 = vrot.lane.b32.xlu0 %v8750_v58, %s6966_s18 }
 0x463   : > { %2101 = vrot.lane.b32.xlu1 %v8753_v60, %s6966_s18 }
 0x467   : > { %v1952_v48 = vpop.permute.xlu1 %1951  ;;  %v8759_v44 = vpop.permute.xlu0 %1873 }
 0x468   : > { %15323 = vst [vmem:[#allocation205_spill] sm:$0xff] %v8759_v44  ;;  %v8762_v36 = vmul.f32 %v1952_v48, %v8515_v55  ;;  %v1948_v2 = vpop.permute.xlu2 %1947 }
 0x469   : > { %v8765_v49 = vmul.f32 %v1948_v2, %v8482_v33 }
 0x46a   : > { %2111 = vrot.lane.b32.xlu0 %v8762_v36, %s6966_s18 }
 0x46b   : > { %2107 = vrot.lane.b32.xlu1 %v8765_v49, %s6966_s18 }
 0x46f   : > { %v1958_v6 = vpop.permute.xlu1 %1957  ;;  %v1944_v54 = vpop.permute.xlu0 %1943 }
 0x470   : > { %v8772_v50 = vmul.f32 %v1958_v6, %v8530_v56  ;;  %v1954_v31 = vpop.permute.xlu2 %1953  ;;  %v8775_v44 = vmul.f32 %v1944_v54, %v8454_v22 }
 0x471   : > { %v8778_v55 = vmul.f32 %v1954_v31, %v8494_v1 }
 0x472   : > { %2117 = vrot.lane.b32.xlu0 %v8772_v50, %s6966_s18  ;;  %2103 = vrot.lane.b32.xlu2 %v8775_v44, %s6966_s18 }
 0x473   : > { %2113 = vrot.lane.b32.xlu1 %v8778_v55, %s6966_s18 }
 0x477   : > { %v1964_v33 = vpop.permute.xlu1 %1963  ;;  %v1950_v48 = vpop.permute.xlu0 %1949 }
 0x478   : > { %v8787_v56 = vmul.f32 %v1964_v33, %v8545_v11  ;;  %v1960_v2 = vpop.permute.xlu2 %1959  ;;  %v8790_v22 = vmul.f32 %v1950_v48, %v8463_v41 }
 0x479   : > { %v8793_v1 = vmul.f32 %v1960_v2, %v8509_v23 }
 0x47a   : > { %2123 = vrot.lane.b32.xlu0 %v8787_v56, %s6966_s18  ;;  %2109 = vrot.lane.b32.xlu2 %v8790_v22, %s6966_s18 }
 0x47b   : > { %2119 = vrot.lane.b32.xlu1 %v8793_v1, %s6966_s18 }
 0x47f   : > { %v1970_v31 = vpop.permute.xlu1 %1969  ;;  %v1956_v6 = vpop.permute.xlu0 %1955 }
 0x480   : > { %v8802_v11 = vmul.f32 %v1970_v31, %v8560_v19  ;;  %v1966_v54 = vpop.permute.xlu2 %1965  ;;  %v8805_v41 = vmul.f32 %v1956_v6, %v8473_v20 }
 0x481   : > { %v8808_v23 = vmul.f32 %v1966_v54, %v8524_v45 }
 0x482   : > { %2129 = vrot.lane.b32.xlu0 %v8802_v11, %s6966_s18  ;;  %2115 = vrot.lane.b32.xlu2 %v8805_v41, %s6966_s18 }
 0x483   : > { %2125 = vrot.lane.b32.xlu1 %v8808_v23, %s6966_s18 }
 0x487   : > { %v1976_v33 = vpop.permute.xlu1 %1975  ;;  %v1962_v48 = vpop.permute.xlu0 %1961 }
 0x488   : > { %v8817_v19 = vmul.f32 %v1976_v33, %v8575_v53  ;;  %v1972_v2 = vpop.permute.xlu2 %1971  ;;  %v8820_v20 = vmul.f32 %v1962_v48, %v8485_v39 }
 0x489   : > { %v8823_v45 = vmul.f32 %v1972_v2, %v8539_v18 }
 0x48a   : > { %2135 = vrot.lane.b32.xlu0 %v8817_v19, %s6966_s18  ;;  %2121 = vrot.lane.b32.xlu2 %v8820_v20, %s6966_s18 }
 0x48b   : > { %2131 = vrot.lane.b32.xlu1 %v8823_v45, %s6966_s18 }
 0x48f   : > { %v1982_v31 = vpop.permute.xlu1 %1981  ;;  %v1968_v6 = vpop.permute.xlu0 %1967 }
 0x490   : > { %v8832_v53 = vmul.f32 %v1982_v31, %v8590_v21  ;;  %v1978_v54 = vpop.permute.xlu2 %1977  ;;  %v8835_v39 = vmul.f32 %v1968_v6, %v8497_v46 }
 0x491   : > { %v8838_v18 = vmul.f32 %v1978_v54, %v8554_v14 }
 0x492   : > { %2141 = vrot.lane.b32.xlu0 %v8832_v53, %s6966_s18  ;;  %2127 = vrot.lane.b32.xlu2 %v8835_v39, %s6966_s18 }
 0x493   : > { %2137 = vrot.lane.b32.xlu1 %v8838_v18, %s6966_s18 }
 0x497   : > { %v1988_v33 = vpop.permute.xlu1 %1987  ;;  %v1974_v48 = vpop.permute.xlu0 %1973 }
 0x498   : > { %v8847_v21 = vmul.f32 %v1988_v33, %v8602_v32  ;;  %v1984_v2 = vpop.permute.xlu2 %1983  ;;  %v8850_v46 = vmul.f32 %v1974_v48, %v8512_v63 }
 0x499   : > { %v8853_v14 = vmul.f32 %v1984_v2, %v8569_v27 }
 0x49a   : > { %2147 = vrot.lane.b32.xlu0 %v8847_v21, %s6966_s18  ;;  %2133 = vrot.lane.b32.xlu2 %v8850_v46, %s6966_s18 }
 0x49b   : > { %2143 = vrot.lane.b32.xlu1 %v8853_v14, %s6966_s18 }
 0x49f   : > { %v1994_v31 = vpop.permute.xlu1 %1993  ;;  %v1980_v6 = vpop.permute.xlu0 %1979 }
 0x4a0   : > { %v8862_v32 = vmul.f32 %v1994_v31, %v8614_v3  ;;  %v1990_v54 = vpop.permute.xlu2 %1989  ;;  %v8865_v63 = vmul.f32 %v1980_v6, %v8527_v8 }
 0x4a1   : > { %v8868_v27 = vmul.f32 %v1990_v54, %v8584_v51 }
 0x4a2   : > { %2153 = vrot.lane.b32.xlu0 %v8862_v32, %s6966_s18  ;;  %2139 = vrot.lane.b32.xlu2 %v8865_v63, %s6966_s18 }
 0x4a3   : > { %2149 = vrot.lane.b32.xlu1 %v8868_v27, %s6966_s18 }
 0x4a7   : > { %v2000_v33 = vpop.permute.xlu1 %1999  ;;  %v1986_v48 = vpop.permute.xlu0 %1985 }
 0x4a8   : > { %v8877_v3 = vmul.f32 %v2000_v33, %v8623_v17  ;;  %v1996_v2 = vpop.permute.xlu2 %1995  ;;  %v8880_v8 = vmul.f32 %v1986_v48, %v8542_v38  ;;  %v15348_v33 = vld [vmem:[#allocation52_spill] sm:$0xff] }
 0x4a9   : > { %v8883_v51 = vmul.f32 %v1996_v2, %v8599_v24 }
 0x4aa   : > { %2159 = vrot.lane.b32.xlu0 %v8877_v3, %s6966_s18  ;;  %2145 = vrot.lane.b32.xlu2 %v8880_v8, %s6966_s18 }
 0x4ab   : > { %2155 = vrot.lane.b32.xlu1 %v8883_v51, %s6966_s18 }
 0x4af   : > { %v1992_v31 = vpop.permute.xlu0 %1991 }
 0x4b0   : > { %v2002_v6 = vpop.permute.xlu2 %2001  ;;  %v8892_v17 = vmul.f32 %v1992_v31, %v8557_v9 }
 0x4b1   : > { %v8895_v38 = vmul.f32 %v2002_v6, %v8611_v59  ;;  %v15343_v59 = vld [vmem:[#allocation48_spill] sm:$0xff]  ;;  %v15352_v6 = vld [vmem:[#allocation41_spill] sm:$0xff] }
 0x4b2   : > { %2229 = vrot.lane.b32.xlu0 %v7225_v34, %s6967_s20  ;;  %2151 = vrot.lane.b32.xlu2 %v8892_v17, %s6966_s18 }
 0x4b3   : > { %2161 = vrot.lane.b32.xlu1 %v8895_v38, %s6966_s18 }
 0x4b7   : > { %v1998_v24 = vpop.permute.xlu0 %1997 }
 0x4b8   : > { %v8904_v54 = vmul.f32 %v1998_v24, %v8572_v52  ;;  %v15341_v52 = vld [vmem:[#allocation50_spill] sm:$0xff]  ;;  %v15353_v24 = vld [vmem:[#allocation56_spill] sm:$0xff] }
 0x4ba   : > { %2235 = vrot.lane.b32.xlu0 %v7244_v43, %s6967_s20  ;;  %2157 = vrot.lane.b32.xlu2 %v8904_v54, %s6966_s18 }
 0x4bb   : > { %2231 = vrot.lane.b32.xlu1 %v7247_v47, %s6967_s20 }
 0x4bf   : > { %v2004_v34 = vpop.permute.xlu0 %2003 }
 0x4c0   : > { %v8913_v9 = vmul.f32 %v2004_v34, %v8587_v62  ;;  %v15342_v62 = vld [vmem:[#allocation29_spill] sm:$0xff] }
 0x4c2   : > { %2241 = vrot.lane.b32.xlu0 %v7268_v57, %s6967_s20  ;;  %2163 = vrot.lane.b32.xlu2 %v8913_v9, %s6966_s18 }
 0x4c3   : > { %2237 = vrot.lane.b32.xlu1 %v7272_v7, %s6967_s20 }
 0x4ca   : > { %2247 = vrot.lane.b32.xlu0 %v7295_v5, %s6967_s20  ;;  %2233 = vrot.lane.b32.xlu2 %v15201_v40, %s6967_s20 }
 0x4cb   : > { %2243 = vrot.lane.b32.xlu1 %v7290_v61, %s6967_s20 }
 0x4cc   : > { %v8927_v43 = vpop.permute.xlu2 %2103 }
 0x4cd   : > { %15324 = vst [vmem:[#allocation206_spill] sm:$0xff] %v8927_v43  ;;  %v15434_v43 = vld [vmem:[#allocation34_spill] sm:$0xff] }
 0x4d2   : > { %2253 = vrot.lane.b32.xlu0 %v7319_v15, %s6967_s20  ;;  %2239 = vrot.lane.b32.xlu2 %v7237_v37, %s6967_s20 }
 0x4d3   : > { %2249 = vrot.lane.b32.xlu1 %v7314_v12, %s6967_s20 }
 0x4d4   : > { %v8935_v47 = vpop.permute.xlu2 %2109  ;;  %v8937_v57 = vpop.permute.xlu0 %2105 }
 0x4d5   : > { %15325 = vst [vmem:[#allocation207_spill] sm:$0xff] %v8935_v47  ;;  %v8939_v7 = vpop.permute.xlu1 %2101 }
 0x4d6   : > { %15326 = vst [vmem:[#allocation208_spill] sm:$0xff] %v8937_v57  ;;  %v15445_v57 = vld [vmem:[#allocation49_spill] sm:$0xff] }
 0x4d7   : > { %15327 = vst [vmem:[#allocation209_spill] sm:$0xff] %v8939_v7  ;;  %v15433_v7 = vld [vmem:[#allocation37_spill] sm:$0xff] }
 0x4da   : > { %2259 = vrot.lane.b32.xlu0 %v7343_v30, %s6967_s20  ;;  %2245 = vrot.lane.b32.xlu2 %v7263_v28, %s6967_s20 }
 0x4db   : > { %2255 = vrot.lane.b32.xlu1 %v15245_v0, %s6967_s20 }
 0x4dc   : > { %v8947_v61 = vpop.permute.xlu2 %2115  ;;  %v8949_v37 = vpop.permute.xlu0 %2111 }
 0x4dd   : > { %15328 = vst [vmem:[#allocation210_spill] sm:$0xff] %v8947_v61  ;;  %v8951_v5 = vpop.permute.xlu1 %2107  ;;  %v15427_v61 = vld [vmem:[#allocation31_spill] sm:$0xff] }
 0x4de   : > { %15329 = vst [vmem:[#allocation211_spill] sm:$0xff] %v8949_v37 }
 0x4df   : > { %15330 = vst [vmem:[#allocation212_spill] sm:$0xff] %v8951_v5  ;;  %v15428_v5 = vld [vmem:[#allocation28_spill] sm:$0xff] }
 0x4e2   : > { %2265 = vrot.lane.b32.xlu0 %v15299_v29, %s6967_s20  ;;  %2251 = vrot.lane.b32.xlu2 %v15209_v25, %s6967_s20 }
 0x4e3   : > { %2261 = vrot.lane.b32.xlu1 %v15249_v42, %s6967_s20  ;;  %v15337_v42 = vld [vmem:[#allocation42_spill] sm:$0xff] }
 0x4e4   : > { %v8959_v12 = vpop.permute.xlu2 %2121  ;;  %v8961_v28 = vpop.permute.xlu0 %2117 }
 0x4e5   : > { %15331 = vst [vmem:[#allocation213_spill] sm:$0xff] %v8959_v12  ;;  %v8963_v15 = vpop.permute.xlu1 %2113  ;;  %v15422_v12 = vld [vmem:[#allocation23_spill] sm:$0xff] }
 0x4e6   : > { %15332 = vst [vmem:[#allocation214_spill] sm:$0xff] %v8961_v28  ;;  %v15440_v28 = vld [vmem:[#allocation40_spill] sm:$0xff] }
 0x4e7   : > { %15333 = vst [vmem:[#allocation215_spill] sm:$0xff] %v8963_v15 }
 0x4ea   : > { %2271 = vrot.lane.b32.xlu0 %v15304_v13, %s6967_s20  ;;  %2257 = vrot.lane.b32.xlu2 %v15213_v16, %s6967_s20  ;;  %v15347_v13 = vld [vmem:[#allocation35_spill] sm:$0xff] }
 0x4eb   : > { %2267 = vrot.lane.b32.xlu1 %v15253_v26, %s6967_s20 }
 0x4ec   : > { %v8971_v30 = vpop.permute.xlu2 %2127  ;;  %v8973_v40 = vpop.permute.xlu0 %2123 }
 0x4ed   : > { %15334 = vst [vmem:[#allocation216_spill] sm:$0xff] %v8971_v30  ;;  %v8975_v25 = vpop.permute.xlu1 %2119 }
 0x4ee   : > { %15335 = vst [vmem:[#allocation217_spill] sm:$0xff] %v8973_v40  ;;  %v15439_v40 = vld [vmem:[#allocation43_spill] sm:$0xff] }
 0x4ef   : > { %15336 = vst [vmem:[#allocation218_spill] sm:$0xff] %v8975_v25  ;;  %v15421_v25 = vld [vmem:[#allocation26_spill] sm:$0xff] }
 0x4f2   : > { %2277 = vrot.lane.b32.xlu0 %v15309_v10, %s6967_s20  ;;  %2263 = vrot.lane.b32.xlu2 %v15217_v4, %s6967_s20 }
 0x4f3   : > { %2273 = vrot.lane.b32.xlu1 %v15337_v42, %s6967_s20 }
 0x4f4   : > { %v8983_v0 = vpop.permute.xlu2 %2133  ;;  %v8985_v16 = vpop.permute.xlu0 %2129 }
 0x4f5   : > { %15338 = vst [vmem:[#allocation42_spill] sm:$0xff] %v8983_v0  ;;  %v8987_v26 = vpop.permute.xlu1 %2125  ;;  %v15415_v0 = vld [vmem:[#allocation21_spill] sm:$0xff] }
 0x4f6   : > { %15339 = vst [vmem:[#allocation219_spill] sm:$0xff] %v8985_v16 }
 0x4f7   : > { %15340 = vst [vmem:[#allocation220_spill] sm:$0xff] %v8987_v26  ;;  %v15416_v26 = vld [vmem:[#allocation19_spill] sm:$0xff] }
 0x4fa   : > { %2283 = vrot.lane.b32.xlu0 %v15341_v52, %s6967_s20  ;;  %2269 = vrot.lane.b32.xlu2 %v15342_v62, %s6967_s20  ;;  %v15357_v52 = vld [vmem:[#allocation47_spill] sm:$0xff] }
 0x4fb   : > { %2279 = vrot.lane.b32.xlu1 %v15343_v59, %s6967_s20 }
 0x4fc   : > { %v8995_v29 = vpop.permute.xlu2 %2139  ;;  %v8997_v4 = vpop.permute.xlu0 %2135 }
 0x4fd   : > { %15344 = vst [vmem:[#allocation50_spill] sm:$0xff] %v8995_v29  ;;  %v8999_v10 = vpop.permute.xlu1 %2131  ;;  %v15410_v29 = vld [vmem:[#allocation15_spill] sm:$0xff] }
 0x4fe   : > { %15345 = vst [vmem:[#allocation29_spill] sm:$0xff] %v8997_v4  ;;  %v15409_v4 = vld [vmem:[#allocation17_spill] sm:$0xff] }
 0x4ff   : > { %15346 = vst [vmem:[#allocation48_spill] sm:$0xff] %v8999_v10 }
 0x502   : > { %2289 = vrot.lane.b32.xlu0 %v15318_v35, %s6967_s20  ;;  %2275 = vrot.lane.b32.xlu2 %v15347_v13, %s6967_s20 }
 0x503   : > { %2285 = vrot.lane.b32.xlu1 %v15348_v33, %s6967_s20 }
 0x504   : > { %v9007_v48 = vpop.permute.xlu2 %2145  ;;  %v9009_v2 = vpop.permute.xlu0 %2141 }
 0x505   : > { %15349 = vst [vmem:[#allocation35_spill] sm:$0xff] %v9007_v48  ;;  %v9011_v31 = vpop.permute.xlu1 %2137 }
 0x506   : > { %15350 = vst [vmem:[#allocation52_spill] sm:$0xff] %v9009_v2 }
 0x507   : > { %15351 = vst [vmem:[#allocation221_spill] sm:$0xff] %v9011_v31  ;;  %v15404_v31 = vld [vmem:[#allocation12_spill] sm:$0xff] }
 0x50a   : > { %2281 = vrot.lane.b32.xlu2 %v15352_v6, %s6967_s20 }
 0x50b   : > { %2291 = vrot.lane.b32.xlu1 %v15353_v24, %s6967_s20 }
 0x50c   : > { %v9017_v34 = vpop.permute.xlu2 %2151  ;;  %v9019_v35 = vpop.permute.xlu0 %2147 }
 0x50d   : > { %15354 = vst [vmem:[#allocation41_spill] sm:$0xff] %v9017_v34  ;;  %v9021_v42 = vpop.permute.xlu1 %2143 }
 0x50e   : > { %15355 = vst [vmem:[#allocation56_spill] sm:$0xff] %v9019_v35 }
 0x50f   : > { %15356 = vst [vmem:[#allocation222_spill] sm:$0xff] %v9021_v42 }
 0x512   : > { %2287 = vrot.lane.b32.xlu2 %v15357_v52, %s6967_s20  ;;  %s6642_s20 = sshll.u32 %s6945_s12, 8 }
 0x513   : > { %s6539_s25 = scalar_lea.hbm %s14499_s2, %s6642_s20 }
 0x514   : > { %v9025_v62 = vpop.permute.xlu2 %2157  ;;  %v9027_v59 = vpop.permute.xlu0 %2153  ;;  %s6542_s28 = sshll.u32 %s6539_s25, 4  ;;  %s6543_s28 = int_to_ptr.hbm [resolvable:$true] %s6542_s28 }
 0x515   : > { %15358 = vst [vmem:[#allocation47_spill] sm:$0xff] %v9025_v62  ;;  %v9029_v13 = vpop.permute.xlu1 %2149  ;;  %s6889_s29 = sshra.s32 %s6543_s28, 4  ;;  %s6890_s29 = int_to_ptr.hbm [resolvable:$true] %s6889_s29 }
 0x516   : > { %15359 = vst [vmem:[#allocation223_spill] sm:$0xff] %v9027_v59  ;;  %s6891_s30 = scalar_lea.hbm %s6890_s29, 256  ;;  %p6896_p1 = scmp.lt.s32.totalorder %s6890_s29, %s14499_s2 }
 0x517   : > { %15360 = vst [vmem:[#allocation224_spill] sm:$0xff] %v9029_v13  ;;  %p6892_p12 = scmp.ne.s32.totalorder %s6890_s29, %s6891_s30  ;;  %p6897_p2 = scmp.lt.s32.totalorder %s6895_s5, %s6891_s30 }
 0x519   : > { %p6893_p13 = pnand %p6892_p12, %p7034_p4  ;;  %p6898_p3 = por %p6897_p2, %p6896_p1 }
 0x51b   : > { %p6894_p0 = pneg %p6893_p13 }
 0x51c   : > { %v9031_v33 = vpop.permute.xlu2 %2163  ;;  %v9033_v6 = vpop.permute.xlu0 %2159 }
 0x51d   : > { %15361 = vst [vmem:[#allocation225_spill] sm:$0xff] %v9031_v33  ;;  %v9035_v24 = vpop.permute.xlu1 %2155  ;;  %p6899_p5 = pnand %p6898_p3, %p6894_p0 }
 0x51e   : > { %15362 = vst [vmem:[#allocation226_spill] sm:$0xff] %v9033_v6 }
 0x51f   : > { %15363 = vst [vmem:[#allocation227_spill] sm:$0xff] %v9035_v24 }
 0x524   : > { %v2234_v34 = vpop.permute.xlu2 %2233  ;;  %v2230_v2 = vpop.permute.xlu0 %2229 }
 0x525   : > { %v9037_v35 = vpop.permute.xlu1 %2161  ;;  %v2327_v42 = vmul.f32 %v2234_v34, %v8750_v58  ;;  %v2325_v52 = vmul.f32 %v2230_v2, %v8753_v60 }
 0x526   : > { %15364 = vst [vmem:[#allocation228_spill] sm:$0xff] %v9037_v35  ;;  %v15403_v35 = vld [vmem:[#allocation13_spill] sm:$0xff] }
 0x527   : > { %2393 = vrot.lane.b32.xlu1 %v2327_v42, %s6968_s23  ;;  %2389 = vrot.lane.b32.xlu2 %v2325_v52, %s6968_s23 }
 0x52c   : > { %v2240_v13 = vpop.permute.xlu2 %2239  ;;  %v2236_v59 = vpop.permute.xlu0 %2235 }
 0x52d   : > { %v2232_v33 = vpop.permute.xlu1 %2231  ;;  %v2330_v6 = vmul.f32 %v2240_v13, %v8762_v36  ;;  %v2328_v24 = vmul.f32 %v2236_v59, %v8765_v49 }
 0x52e   : > { %v2326_v62 = vmul.f32 %v2232_v33, %v8775_v44 }
 0x52f   : > { %2399 = vrot.lane.b32.xlu1 %v2330_v6, %s6968_s23  ;;  %2395 = vrot.lane.b32.xlu2 %v2328_v24, %s6968_s23 }
 0x530   : > { %2391 = vrot.lane.b32.xlu0 %v2326_v62, %s6968_s23 }
 0x534   : > { %v2246_v60 = vpop.permute.xlu2 %2245  ;;  %v2242_v58 = vpop.permute.xlu0 %2241 }
 0x535   : > { %v2238_v2 = vpop.permute.xlu1 %2237  ;;  %v2333_v34 = vmul.f32 %v2246_v60, %v8772_v50  ;;  %v2331_v42 = vmul.f32 %v2242_v58, %v8778_v55 }
 0x536   : > { %v2329_v52 = vmul.f32 %v2238_v2, %v8790_v22 }
 0x537   : > { %2405 = vrot.lane.b32.xlu1 %v2333_v34, %s6968_s23  ;;  %2401 = vrot.lane.b32.xlu2 %v2331_v42, %s6968_s23 }
 0x538   : > { %2397 = vrot.lane.b32.xlu0 %v2329_v52, %s6968_s23 }
 0x53c   : > { %v2252_v36 = vpop.permute.xlu2 %2251  ;;  %v2248_v44 = vpop.permute.xlu0 %2247 }
 0x53d   : > { %v2244_v49 = vpop.permute.xlu1 %2243  ;;  %v2336_v62 = vmul.f32 %v2252_v36, %v8787_v56  ;;  %v2334_v59 = vmul.f32 %v2248_v44, %v8793_v1 }
 0x53e   : > { %v2332_v13 = vmul.f32 %v2244_v49, %v8805_v41 }
 0x53f   : > { %2411 = vrot.lane.b32.xlu1 %v2336_v62, %s6968_s23  ;;  %2407 = vrot.lane.b32.xlu2 %v2334_v59, %s6968_s23 }
 0x540   : > { %2403 = vrot.lane.b32.xlu0 %v2332_v13, %s6968_s23 }
 0x544   : > { %v2258_v50 = vpop.permute.xlu2 %2257  ;;  %v2254_v55 = vpop.permute.xlu0 %2253 }
 0x545   : > { %v2250_v22 = vpop.permute.xlu1 %2249  ;;  %v2339_v33 = vmul.f32 %v2258_v50, %v8802_v11  ;;  %v2337_v6 = vmul.f32 %v2254_v55, %v8808_v23 }
 0x546   : > { %v2335_v24 = vmul.f32 %v2250_v22, %v8820_v20 }
 0x547   : > { %2417 = vrot.lane.b32.xlu1 %v2339_v33, %s6968_s23  ;;  %2413 = vrot.lane.b32.xlu2 %v2337_v6, %s6968_s23  ;;  %v9100_v6 = vld [vmem:[%s7053_s27] sm:$0xff] }
 0x548   : > { %2409 = vrot.lane.b32.xlu0 %v2335_v24, %s6968_s23  ;;  %v9107_v24 = vld [vmem:[%s7053_s27 + $0x18] sm:$0xff] }
 0x54c   : > { %v2264_v56 = vpop.permute.xlu2 %2263  ;;  %v2260_v1 = vpop.permute.xlu0 %2259 }
 0x54d   : > { %v2256_v41 = vpop.permute.xlu1 %2255  ;;  %v2342_v60 = vmul.f32 %v2264_v56, %v8817_v19  ;;  %v2340_v58 = vmul.f32 %v2260_v1, %v8823_v45  ;;  %v6969_v19 = vmov 0   ;;  %v9118_v56 = vld [vmem:[%s7053_s27 + $0x28] sm:$0xff]  ;;  %v9126_v1 = vld [vmem:[%s7053_s27 + $0x10] sm:$0xff] }
 0x54e   : > { %v2338_v2 = vmul.f32 %v2256_v41, %v8835_v39  ;;  %6755 = vset.pattern.permute.xlu1 %v6969_v19  ;;  %6756 = vset.pattern.permute.xlu2 %v6969_v19 }
 0x54f   : > { %2423 = vrot.lane.b32.xlu1 %v2342_v60, %s6968_s23  ;;  %2419 = vrot.lane.b32.xlu2 %v2340_v58, %s6968_s23  ;;  %v9132_v60 = vld [vmem:[%s7053_s27 + $0x40] sm:$0xff]  ;;  %v9136_v58 = vld [vmem:[%s7053_s27 + $0x30] sm:$0xff] }
 0x550   : > { %2415 = vrot.lane.b32.xlu0 %v2338_v2, %s6968_s23  ;;  %v9140_v2 = vld [vmem:[%s7053_s27 + $0x38] sm:$0xff] }
 0x551   : > { %6757 = vset.pattern.permute.xlu0 %v6969_v19  ;;  %v9162_v19 = vld [vmem:[%s7053_s27 + $0x70] sm:$0xff] }
 0x554   : > { %v2270_v11 = vpop.permute.xlu2 %2269  ;;  %v2266_v23 = vpop.permute.xlu0 %2265 }
 0x555   : > { %v2262_v20 = vpop.permute.xlu1 %2261  ;;  %v2345_v34 = vmul.f32 %v2270_v11, %v8832_v53  ;;  %v2343_v42 = vmul.f32 %v2266_v23, %v8838_v18  ;;  %v9146_v23 = vld [vmem:[%s7053_s27 + $0x58] sm:$0xff] }
 0x556   : > { %v2341_v52 = vmul.f32 %v2262_v20, %v8850_v46  ;;  %v9150_v20 = vld [vmem:[%s7053_s27 + $0x48] sm:$0xff] }
 0x557   : > { %2429 = vrot.lane.b32.xlu1 %v2345_v34, %s6968_s23  ;;  %2425 = vrot.lane.b32.xlu2 %v2343_v42, %s6968_s23  ;;  %v9154_v34 = vld [vmem:[%s7053_s27 + $0x50] sm:$0xff] }
 0x558   : > { %2421 = vrot.lane.b32.xlu0 %v2341_v52, %s6968_s23 }
 0x55c   : > { %v2276_v45 = vpop.permute.xlu2 %2275  ;;  %v2272_v39 = vpop.permute.xlu0 %2271 }
 0x55d   : > { %v2268_v36 = vpop.permute.xlu1 %2267  ;;  %v2348_v44 = vmul.f32 %v2276_v45, %v8847_v21  ;;  %v2346_v53 = vmul.f32 %v2272_v39, %v8853_v14  ;;  %v9166_v45 = vld [vmem:[%s7053_s27 + $0x60] sm:$0xff]  ;;  %v9170_v39 = vld [vmem:[%s7053_s27 + $0x68] sm:$0xff] }
 0x55e   : > { %v2344_v18 = vmul.f32 %v2268_v36, %v8865_v63 }
 0x55f   : > { %2435 = vrot.lane.b32.xlu1 %v2348_v44, %s6968_s23  ;;  %2431 = vrot.lane.b32.xlu2 %v2346_v53, %s6968_s23 }
 0x560   : > { %2427 = vrot.lane.b32.xlu0 %v2344_v18, %s6968_s23  ;;  %v9180_v18 = vld [vmem:[%s7053_s27 + $0x88] sm:$0xff] }
 0x564   : > { %v2282_v46 = vpop.permute.xlu2 %2281  ;;  %v2278_v49 = vpop.permute.xlu0 %2277 }
 0x565   : > { %v2274_v62 = vpop.permute.xlu1 %2273  ;;  %v2351_v59 = vmul.f32 %v2282_v46, %v8862_v32  ;;  %v2349_v13 = vmul.f32 %v2278_v49, %v8868_v27  ;;  %v9184_v46 = vld [vmem:[%s7053_s27 + $0x78] sm:$0xff]  ;;  %v9188_v49 = vld [vmem:[%s7053_s27 + $0x80] sm:$0xff] }
 0x566   : > { %v2347_v50 = vmul.f32 %v2274_v62, %v8880_v8 }
 0x567   : > { %2441 = vrot.lane.b32.xlu1 %v2351_v59, %s6968_s23  ;;  %2437 = vrot.lane.b32.xlu2 %v2349_v13, %s6968_s23 }
 0x568   : > { %2433 = vrot.lane.b32.xlu0 %v2347_v50, %s6968_s23  ;;  %v9198_v50 = vld [vmem:[%s7053_s27 + $0xa0] sm:$0xff] }
 0x56c   : > { %v2288_v21 = vpop.permute.xlu2 %2287  ;;  %v2284_v14 = vpop.permute.xlu0 %2283 }
 0x56d   : > { %v2280_v63 = vpop.permute.xlu1 %2279  ;;  %v2354_v55 = vmul.f32 %v2288_v21, %v8877_v3  ;;  %v2352_v22 = vmul.f32 %v2284_v14, %v8883_v51  ;;  %v9202_v21 = vld [vmem:[%s7053_s27 + $0x90] sm:$0xff]  ;;  %v9206_v14 = vld [vmem:[%s7053_s27 + $0x98] sm:$0xff] }
 0x56e   : > { %v2350_v32 = vmul.f32 %v2280_v63, %v8892_v17 }
 0x56f   : > { %2447 = vrot.lane.b32.xlu1 %v2354_v55, %s6968_s23  ;;  %2443 = vrot.lane.b32.xlu2 %v2352_v22, %s6968_s23 }
 0x570   : > { %2439 = vrot.lane.b32.xlu0 %v2350_v32, %s6968_s23  ;;  %v9216_v32 = vld [vmem:[%s7053_s27 + $0xb8] sm:$0xff] }
 0x574   : > { %v2290_v27 = vpop.permute.xlu0 %2289 }
 0x575   : > { %v2286_v8 = vpop.permute.xlu1 %2285  ;;  %v2355_v33 = vmul.f32 %v2290_v27, %v8895_v38  ;;  %v9111_v38 = vld [vmem:[%s7053_s27 + $0x8] sm:$0xff] }
 0x576   : > { %v2353_v3 = vmul.f32 %v2286_v8, %v8904_v54  ;;  %v9220_v27 = vld [vmem:[%s7053_s27 + $0xa8] sm:$0xff]  ;;  %v9224_v8 = vld [vmem:[%s7053_s27 + $0xb0] sm:$0xff] }
 0x577   : > { %2590 = vperm.xlu1 %6755, %v9100_v6   ;;  %2449 = vrot.lane.b32.xlu2 %v2355_v33, %s6968_s23 }
 0x578   : > { %2445 = vrot.lane.b32.xlu0 %v2353_v3, %s6968_s23 }
 0x57d   : > { %v2292_v51 = vpop.permute.xlu1 %2291 }
 0x57e   : > { %v2356_v17 = vmul.f32 %v2292_v51, %v8913_v9  ;;  %v9122_v9 = vld [vmem:[%s7053_s27 + $0x20] sm:$0xff] }
 0x57f   : > { %2599 = vperm.xlu1 %6755, %v9107_v24   ;;  %2593 = vperm.xlu2 %6756, %v9111_v38  }
 0x580   : > { %2451 = vrot.lane.b32.xlu0 %v2356_v17, %s6968_s23  ;;  %v9234_v17 = vld [vmem:[%s7053_s27 + $0xd0] sm:$0xff] }
 0x581   : > { %v9115_v54 = vpop.permute.xlu2 %2389  ;;  %15382 = vst [vmem:[#allocation246_spill] sm:$0xff] %v9234_v17 }
 0x582   : > { %15365 = vst [vmem:[#allocation229_spill] sm:$0xff] %v9115_v54 }
 0x587   : > { %2605 = vperm.xlu1 %6755, %v9118_v56   ;;  %2602 = vperm.xlu2 %6756, %v9122_v9  }
 0x588   : > { %2596 = vperm.xlu0 %6757, %v9126_v1  }
 0x589   : > { %v9129_v41 = vpop.permute.xlu2 %2395 }
 0x58a   : > { %15366 = vst [vmem:[#allocation230_spill] sm:$0xff] %v9129_v41 }
 0x58f   : > { %2614 = vperm.xlu1 %6755, %v9132_v60   ;;  %2608 = vperm.xlu2 %6756, %v9136_v58  }
 0x590   : > { %2611 = vperm.xlu0 %6757, %v9140_v2  }
 0x591   : > { %v9143_v11 = vpop.permute.xlu2 %2401 }
 0x592   : > { %15367 = vst [vmem:[#allocation231_spill] sm:$0xff] %v9143_v11 }
 0x597   : > { %2623 = vperm.xlu1 %6755, %v9146_v23   ;;  %2617 = vperm.xlu2 %6756, %v9150_v20  }
 0x598   : > { %2620 = vperm.xlu0 %6757, %v9154_v34  }
 0x599   : > { %v9157_v42 = vpop.permute.xlu1 %2393  ;;  %v9159_v52 = vpop.permute.xlu2 %2407 }
 0x59a   : > { %15368 = vst [vmem:[#allocation232_spill] sm:$0xff] %v9157_v42 }
 0x59b   : > { %15369 = vst [vmem:[#allocation233_spill] sm:$0xff] %v9159_v52 }
 0x59f   : > { %2632 = vperm.xlu1 %6755, %v9162_v19   ;;  %2626 = vperm.xlu2 %6756, %v9166_v45  }
 0x5a0   : > { %2629 = vperm.xlu0 %6757, %v9170_v39  }
 0x5a1   : > { %v9173_v36 = vpop.permute.xlu1 %2399  ;;  %v9175_v44 = vpop.permute.xlu2 %2413 }
 0x5a2   : > { %15370 = vst [vmem:[#allocation234_spill] sm:$0xff] %v9173_v36  ;;  %v9177_v53 = vpop.permute.xlu0 %2391 }
 0x5a3   : > { %15371 = vst [vmem:[#allocation235_spill] sm:$0xff] %v9175_v44  ;;  %v9275_v44 = vld [vmem:[%s7053_s27 + $0xf8] sm:$0xff] }
 0x5a4   : > { %15372 = vst [vmem:[#allocation236_spill] sm:$0xff] %v9177_v53 }
 0x5a7   : > { %2641 = vperm.xlu1 %6755, %v9180_v18   ;;  %2635 = vperm.xlu2 %6756, %v9184_v46  }
 0x5a8   : > { %2638 = vperm.xlu0 %6757, %v9188_v49  }
 0x5a9   : > { %v9191_v62 = vpop.permute.xlu1 %2405  ;;  %v9193_v59 = vpop.permute.xlu2 %2419 }
 0x5aa   : > { %15373 = vst [vmem:[#allocation237_spill] sm:$0xff] %v9191_v62  ;;  %v9195_v13 = vpop.permute.xlu0 %2397 }
 0x5ab   : > { %15374 = vst [vmem:[#allocation238_spill] sm:$0xff] %v9193_v59  ;;  %v9260_v59 = vld [vmem:[%s7053_s27 + $0xe0] sm:$0xff] }
 0x5ac   : > { %15375 = vst [vmem:[#allocation239_spill] sm:$0xff] %v9195_v13  ;;  %v9256_v13 = vld [vmem:[%s7053_s27 + $0xd8] sm:$0xff] }
 0x5ad   : > { %15387 = vst [vmem:[#allocation251_spill] sm:$0xff] %v9256_v13 }
 0x5ae   : > { %15388 = vst [vmem:[#allocation252_spill] sm:$0xff] %v9260_v59 }
 0x5af   : > { %2650 = vperm.xlu1 %6755, %v9198_v50   ;;  %2644 = vperm.xlu2 %6756, %v9202_v21  }
 0x5b0   : > { %2647 = vperm.xlu0 %6757, %v9206_v14  }
 0x5b1   : > { %v9209_v63 = vpop.permute.xlu1 %2411  ;;  %v9211_v55 = vpop.permute.xlu2 %2425 }
 0x5b2   : > { %15376 = vst [vmem:[#allocation240_spill] sm:$0xff] %v9209_v63  ;;  %v9213_v22 = vpop.permute.xlu0 %2403 }
 0x5b3   : > { %15377 = vst [vmem:[#allocation241_spill] sm:$0xff] %v9211_v55  ;;  %v9242_v55 = vld [vmem:[%s7053_s27 + $0xc8] sm:$0xff] }
 0x5b4   : > { %15378 = vst [vmem:[#allocation242_spill] sm:$0xff] %v9213_v22  ;;  %v9238_v22 = vld [vmem:[%s7053_s27 + $0xc0] sm:$0xff] }
 0x5b7   : > { %2659 = vperm.xlu1 %6755, %v9216_v32   ;;  %2653 = vperm.xlu2 %6756, %v9220_v27  }
 0x5b8   : > { %2656 = vperm.xlu0 %6757, %v9224_v8  }
 0x5b9   : > { %v9227_v33 = vpop.permute.xlu1 %2417  ;;  %v9229_v3 = vpop.permute.xlu2 %2431 }
 0x5ba   : > { %15379 = vst [vmem:[#allocation243_spill] sm:$0xff] %v9227_v33  ;;  %v9231_v51 = vpop.permute.xlu0 %2409 }
 0x5bb   : > { %15380 = vst [vmem:[#allocation244_spill] sm:$0xff] %v9229_v3 }
 0x5bc   : > { %15381 = vst [vmem:[#allocation245_spill] sm:$0xff] %v9231_v51  ;;  %v9252_v51 = vld [vmem:[%s7053_s27 + $0xe8] sm:$0xff] }
 0x5bd   : > { %15386 = vst [vmem:[#allocation250_spill] sm:$0xff] %v9252_v51 }
 0x5bf   : > { %2668 = vperm.xlu1 %6755, %v9234_v17   ;;  %2662 = vperm.xlu2 %6756, %v9238_v22  }
 0x5c0   : > { %2665 = vperm.xlu0 %6757, %v9242_v55  }
 0x5c1   : > { %v9245_v33 = vpop.permute.xlu1 %2423  ;;  %v9247_v63 = vpop.permute.xlu2 %2437 }
 0x5c2   : > { %15383 = vst [vmem:[#allocation247_spill] sm:$0xff] %v9245_v33  ;;  %v9249_v3 = vpop.permute.xlu0 %2415 }
 0x5c3   : > { %15384 = vst [vmem:[#allocation248_spill] sm:$0xff] %v9247_v63  ;;  %v15392_v63 = vld [vmem:[#allocation6_spill] sm:$0xff] }
 0x5c4   : > { %15385 = vst [vmem:[#allocation249_spill] sm:$0xff] %v9249_v3  ;;  %v9271_v3 = vld [vmem:[%s7053_s27 + $0xf0] sm:$0xff] }
 0x5c5   : > { %15393 = vst [vmem:[#allocation256_spill] sm:$0xff] %v9271_v3 }
 0x5c7   : > { %2677 = vperm.xlu1 %6755, %v9252_v51   ;;  %2671 = vperm.xlu2 %6756, %v9256_v13  }
 0x5c8   : > { %2674 = vperm.xlu0 %6757, %v9260_v59  }
 0x5c9   : > { %v9263_v62 = vpop.permute.xlu1 %2429  ;;  %v9265_v53 = vpop.permute.xlu2 %2443 }
 0x5ca   : > { %15389 = vst [vmem:[#allocation253_spill] sm:$0xff] %v9263_v62  ;;  %v9267_v33 = vpop.permute.xlu0 %2421  ;;  %v15397_v62 = vld [vmem:[#allocation9_spill] sm:$0xff] }
 0x5cb   : > { %15390 = vst [vmem:[#allocation254_spill] sm:$0xff] %v9265_v53  ;;  %v15398_v53 = vld [vmem:[#allocation10_spill] sm:$0xff] }
 0x5cc   : > { %15391 = vst [vmem:[#allocation255_spill] sm:$0xff] %v9267_v33  ;;  %v15399_v33 = vld [vmem:[#allocation5_spill] sm:$0xff] }
 0x5cf   : > { %2751 = vperm.xlu1 %6755, %v15392_v63   ;;  %2680 = vperm.xlu2 %6756, %v9271_v3  }
 0x5d0   : > { %2683 = vperm.xlu0 %6757, %v9275_v44  }
 0x5d1   : > { %v9278_v36 = vpop.permute.xlu1 %2435  ;;  %v9280_v52 = vpop.permute.xlu2 %2449 }
 0x5d2   : > { %15394 = vst [vmem:[#allocation257_spill] sm:$0xff] %v9278_v36  ;;  %v9282_v42 = vpop.permute.xlu0 %2427  ;;  %v15405_v36 = vld [vmem:[#allocation8_spill] sm:$0xff] }
 0x5d3   : > { %15395 = vst [vmem:[#allocation258_spill] sm:$0xff] %v9280_v52 }
 0x5d4   : > { %15396 = vst [vmem:[#allocation259_spill] sm:$0xff] %v9282_v42 }
 0x5d7   : > { %2766 = vperm.xlu1 %6755, %v15397_v62   ;;  %2756 = vperm.xlu2 %6756, %v15398_v53  }
 0x5d8   : > { %2761 = vperm.xlu0 %6757, %v15399_v33  }
 0x5d9   : > { %v9287_v11 = vpop.permute.xlu1 %2441  ;;  %v9289_v41 = vpop.permute.xlu2 %2593 }
 0x5da   : > { %15400 = vst [vmem:[#allocation260_spill] sm:$0xff] %v9287_v11  ;;  %v9291_v54 = vpop.permute.xlu0 %2433  ;;  %v15411_v11 = vld [vmem:[#allocation11_spill] sm:$0xff] }
 0x5db   : > { %15401 = vst [vmem:[#allocation261_spill] sm:$0xff] %v9289_v41 }
 0x5dc   : > { %15402 = vst [vmem:[#allocation262_spill] sm:$0xff] %v9291_v54 }
 0x5df   : > { %2781 = vperm.xlu1 %6755, %v15403_v35   ;;  %2771 = vperm.xlu2 %6756, %v15404_v31  }
 0x5e0   : > { %2776 = vperm.xlu0 %6757, %v15405_v36  }
 0x5e1   : > { %v9296_v52 = vpop.permute.xlu1 %2447  ;;  %v9298_v42 = vpop.permute.xlu2 %2602 }
 0x5e2   : > { %15406 = vst [vmem:[#allocation8_spill] sm:$0xff] %v9296_v52  ;;  %v9300_v48 = vpop.permute.xlu0 %2439  ;;  %v15417_v52 = vld [vmem:[#allocation14_spill] sm:$0xff] }
 0x5e3   : > { %15407 = vst [vmem:[#allocation263_spill] sm:$0xff] %v9298_v42 }
 0x5e4   : > { %15408 = vst [vmem:[#allocation264_spill] sm:$0xff] %v9300_v48 }
 0x5e7   : > { %2796 = vperm.xlu1 %6755, %v15409_v4   ;;  %2786 = vperm.xlu2 %6756, %v15410_v29  }
 0x5e8   : > { %2791 = vperm.xlu0 %6757, %v15411_v11  }
 0x5e9   : > { %v9305_v41 = vpop.permute.xlu1 %2590  ;;  %v9307_v54 = vpop.permute.xlu2 %2608 }
 0x5ea   : > { %15412 = vst [vmem:[#allocation11_spill] sm:$0xff] %v9305_v41  ;;  %v9309_v10 = vpop.permute.xlu0 %2445  ;;  %v15423_v41 = vld [vmem:[#allocation18_spill] sm:$0xff] }
 0x5eb   : > { %15413 = vst [vmem:[#allocation265_spill] sm:$0xff] %v9307_v54 }
 0x5ec   : > { %15414 = vst [vmem:[#allocation266_spill] sm:$0xff] %v9309_v10 }
 0x5ef   : > { %2811 = vperm.xlu1 %6755, %v15415_v0   ;;  %2801 = vperm.xlu2 %6756, %v15416_v26  }
 0x5f0   : > { %2806 = vperm.xlu0 %6757, %v15417_v52  }
 0x5f1   : > { %v9314_v42 = vpop.permute.xlu1 %2599  ;;  %v9316_v48 = vpop.permute.xlu2 %2617 }
 0x5f2   : > { %15418 = vst [vmem:[#allocation14_spill] sm:$0xff] %v9314_v42  ;;  %v9318_v30 = vpop.permute.xlu0 %2451  ;;  %v15429_v42 = vld [vmem:[#allocation22_spill] sm:$0xff] }
 0x5f3   : > { %15419 = vst [vmem:[#allocation267_spill] sm:$0xff] %v9316_v48 }
 0x5f4   : > { %15420 = vst [vmem:[#allocation268_spill] sm:$0xff] %v9318_v30 }
 0x5f7   : > { %2826 = vperm.xlu1 %6755, %v15421_v25   ;;  %2816 = vperm.xlu2 %6756, %v15422_v12  }
 0x5f8   : > { %2821 = vperm.xlu0 %6757, %v15423_v41  }
 0x5f9   : > { %v9323_v54 = vpop.permute.xlu1 %2605  ;;  %v9325_v10 = vpop.permute.xlu2 %2626 }
 0x5fa   : > { %15424 = vst [vmem:[#allocation18_spill] sm:$0xff] %v9323_v54  ;;  %v9327_v15 = vpop.permute.xlu0 %2596  ;;  %v15435_v54 = vld [vmem:[#allocation27_spill] sm:$0xff] }
 0x5fb   : > { %15425 = vst [vmem:[#allocation269_spill] sm:$0xff] %v9325_v10 }
 0x5fc   : > { %15426 = vst [vmem:[#allocation270_spill] sm:$0xff] %v9327_v15 }
 0x5ff   : > { %2841 = vperm.xlu1 %6755, %v15427_v61   ;;  %2831 = vperm.xlu2 %6756, %v15428_v5  }
 0x600   : > { %2836 = vperm.xlu0 %6757, %v15429_v42  }
 0x601   : > { %v9332_v48 = vpop.permute.xlu1 %2614  ;;  %v9334_v30 = vpop.permute.xlu2 %2635 }
 0x602   : > { %15430 = vst [vmem:[#allocation271_spill] sm:$0xff] %v9332_v48  ;;  %v9336_v47 = vpop.permute.xlu0 %2611  ;;  %v15441_v48 = vld [vmem:[#allocation33_spill] sm:$0xff] }
 0x603   : > { %15431 = vst [vmem:[#allocation272_spill] sm:$0xff] %v9334_v30 }
 0x604   : > { %15432 = vst [vmem:[#allocation273_spill] sm:$0xff] %v9336_v47 }
 0x607   : > { %2856 = vperm.xlu1 %6755, %v15433_v7   ;;  %2846 = vperm.xlu2 %6756, %v15434_v43  }
 0x608   : > { %2851 = vperm.xlu0 %6757, %v15435_v54   ;;  %v15446_v54 = vld [vmem:[#allocation46_spill] sm:$0xff] }
 0x609   : > { %v9341_v10 = vpop.permute.xlu1 %2623  ;;  %v9343_v15 = vpop.permute.xlu2 %2644 }
 0x60a   : > { %15436 = vst [vmem:[#allocation274_spill] sm:$0xff] %v9341_v10  ;;  %v9345_v16 = vpop.permute.xlu0 %2620  ;;  %v15447_v10 = vld [vmem:[#allocation39_spill] sm:$0xff] }
 0x60b   : > { %15437 = vst [vmem:[#allocation275_spill] sm:$0xff] %v9343_v15 }
 0x60c   : > { %15438 = vst [vmem:[#allocation276_spill] sm:$0xff] %v9345_v16 }
 0x60f   : > { %2871 = vperm.xlu1 %6755, %v15439_v40   ;;  %2861 = vperm.xlu2 %6756, %v15440_v28   ;;  %v15451_v28 = vld [vmem:[#allocation53_spill] sm:$0xff] }
 0x610   : > { %2866 = vperm.xlu0 %6757, %v15441_v48   ;;  %v15452_v48 = vld [vmem:[#allocation51_spill] sm:$0xff] }
 0x611   : > { %v9350_v30 = vpop.permute.xlu1 %2632  ;;  %v9352_v47 = vpop.permute.xlu2 %2653 }
 0x612   : > { %15442 = vst [vmem:[#allocation277_spill] sm:$0xff] %v9350_v30  ;;  %v9354_v37 = vpop.permute.xlu0 %2629  ;;  %v15453_v30 = vld [vmem:[#allocation45_spill] sm:$0xff] }
 0x613   : > { %15443 = vst [vmem:[#allocation278_spill] sm:$0xff] %v9352_v47 }
 0x614   : > { %15444 = vst [vmem:[#allocation279_spill] sm:$0xff] %v9354_v37 }
 0x617   : > { %2886 = vperm.xlu1 %6755, %v15445_v57   ;;  %2876 = vperm.xlu2 %6756, %v15446_v54   ;;  %v6970_v54 = vmov 1  }
 0x618   : > { %2881 = vperm.xlu0 %6757, %v15447_v10   ;;  %v15457_v10 = vld [vmem:[#allocation55_spill] sm:$0xff] }
 0x619   : > { %v9359_v15 = vpop.permute.xlu1 %2641  ;;  %v9361_v16 = vpop.permute.xlu2 %2662 }
 0x61a   : > { %15448 = vst [vmem:[#allocation280_spill] sm:$0xff] %v9359_v15  ;;  %v9363_v40 = vpop.permute.xlu0 %2638 }
 0x61b   : > { %15449 = vst [vmem:[#allocation281_spill] sm:$0xff] %v9361_v16 }
 0x61c   : > { %15450 = vst [vmem:[#allocation282_spill] sm:$0xff] %v9363_v40 }
 0x61f   : > { %2901 = vperm.xlu1 %6755, %v15451_v28   ;;  %2891 = vperm.xlu2 %6756, %v15452_v48  }
 0x620   : > { %2896 = vperm.xlu0 %6757, %v15453_v30  }
 0x621   : > { %v9368_v47 = vpop.permute.xlu1 %2650  ;;  %v9370_v37 = vpop.permute.xlu2 %2671 }
 0x622   : > { %15454 = vst [vmem:[#allocation53_spill] sm:$0xff] %v9368_v47  ;;  %v9372_v57 = vpop.permute.xlu0 %2647 }
 0x623   : > { %15455 = vst [vmem:[#allocation51_spill] sm:$0xff] %v9370_v37 }
 0x624   : > { %15456 = vst [vmem:[#allocation45_spill] sm:$0xff] %v9372_v57 }
 0x627   : > { %6759 = vset.pattern.permute.xlu1 %v6970_v54  ;;  %2906 = vperm.xlu2 %6756, %v15457_v10  }
 0x628   : > { %6758 = vset.pattern.permute.xlu0 %v6970_v54  ;;  %3041 = vperm.xlu1 %6759, %v9111_v38  }
 0x629   : > { %3038 = vperm.xlu0 %6758, %v9100_v6   ;;  %v9377_v16 = vpop.permute.xlu1 %2659  ;;  %v9379_v15 = vpop.permute.xlu2 %2680 }
 0x62a   : > { %15458 = vst [vmem:[#allocation55_spill] sm:$0xff] %v9377_v16  ;;  %v9381_v40 = vpop.permute.xlu0 %2656 }
 0x62b   : > { %15459 = vst [vmem:[#allocation283_spill] sm:$0xff] %v9379_v15 }
 0x62c   : > { %15460 = vst [vmem:[#allocation284_spill] sm:$0xff] %v9381_v40  ;;  %v15488_v40 = vld [vmem:[#allocation57_spill] sm:$0xff] }
 0x62f   : > { %6760 = vset.pattern.permute.xlu2 %v6970_v54 }
 0x630   : > { %3047 = vperm.xlu1 %6759, %v9107_v24   ;;  %3044 = vperm.xlu2 %6760, %v9126_v1  }
 0x631   : > { %3053 = vperm.xlu0 %6758, %v9118_v56   ;;  %v9386_v37 = vpop.permute.xlu1 %2668  ;;  %v9388_v47 = vpop.permute.xlu2 %2756 }
 0x632   : > { %15461 = vst [vmem:[#allocation285_spill] sm:$0xff] %v9386_v37  ;;  %v9390_v57 = vpop.permute.xlu0 %2665 }
 0x633   : > { %15462 = vst [vmem:[#allocation286_spill] sm:$0xff] %v9388_v47 }
 0x634   : > { %15463 = vst [vmem:[#allocation287_spill] sm:$0xff] %v9390_v57 }
 0x638   : > { %3056 = vperm.xlu1 %6759, %v9136_v58   ;;  %3050 = vperm.xlu2 %6760, %v9122_v9  }
 0x639   : > { %3062 = vperm.xlu0 %6758, %v9132_v60   ;;  %v9395_v15 = vpop.permute.xlu1 %2677  ;;  %v9397_v54 = vpop.permute.xlu2 %2771 }
 0x63a   : > { %15464 = vst [vmem:[#allocation288_spill] sm:$0xff] %v9395_v15  ;;  %v9399_v16 = vpop.permute.xlu0 %2674 }
 0x63b   : > { %15465 = vst [vmem:[#allocation289_spill] sm:$0xff] %v9397_v54 }
 0x63c   : > { %15466 = vst [vmem:[#allocation290_spill] sm:$0xff] %v9399_v16 }
 0x640   : > { %3065 = vperm.xlu1 %6759, %v9150_v20   ;;  %3059 = vperm.xlu2 %6760, %v9140_v2  }
 0x641   : > { %3071 = vperm.xlu0 %6758, %v9146_v23   ;;  %v9404_v37 = vpop.permute.xlu1 %2751  ;;  %v9406_v57 = vpop.permute.xlu2 %2786 }
 0x642   : > { %15467 = vst [vmem:[#allocation291_spill] sm:$0xff] %v9404_v37  ;;  %v9408_v47 = vpop.permute.xlu0 %2683 }
 0x643   : > { %15468 = vst [vmem:[#allocation292_spill] sm:$0xff] %v9406_v57 }
 0x644   : > { %15469 = vst [vmem:[#allocation293_spill] sm:$0xff] %v9408_v47 }
 0x648   : > { %3074 = vperm.xlu1 %6759, %v9166_v45   ;;  %3068 = vperm.xlu2 %6760, %v9154_v34  }
 0x649   : > { %3080 = vperm.xlu0 %6758, %v9162_v19   ;;  %v9413_v15 = vpop.permute.xlu1 %2766  ;;  %v9415_v16 = vpop.permute.xlu2 %2801 }
 0x64a   : > { %15470 = vst [vmem:[#allocation294_spill] sm:$0xff] %v9413_v15  ;;  %v9417_v54 = vpop.permute.xlu0 %2761 }
 0x64b   : > { %15471 = vst [vmem:[#allocation295_spill] sm:$0xff] %v9415_v16 }
 0x64c   : > { %15472 = vst [vmem:[#allocation296_spill] sm:$0xff] %v9417_v54 }
 0x650   : > { %3083 = vperm.xlu1 %6759, %v9184_v46   ;;  %3077 = vperm.xlu2 %6760, %v9170_v39  }
 0x651   : > { %3089 = vperm.xlu0 %6758, %v9180_v18   ;;  %v9422_v57 = vpop.permute.xlu1 %2781  ;;  %v9424_v47 = vpop.permute.xlu2 %2816 }
 0x652   : > { %15473 = vst [vmem:[#allocation297_spill] sm:$0xff] %v9422_v57  ;;  %v9426_v37 = vpop.permute.xlu0 %2776 }
 0x653   : > { %15474 = vst [vmem:[#allocation298_spill] sm:$0xff] %v9424_v47 }
 0x654   : > { %15475 = vst [vmem:[#allocation299_spill] sm:$0xff] %v9426_v37 }
 0x658   : > { %3092 = vperm.xlu1 %6759, %v9202_v21   ;;  %3086 = vperm.xlu2 %6760, %v9188_v49  }
 0x659   : > { %3098 = vperm.xlu0 %6758, %v9198_v50   ;;  %v9431_v16 = vpop.permute.xlu1 %2796  ;;  %v9433_v54 = vpop.permute.xlu2 %2831 }
 0x65a   : > { %15476 = vst [vmem:[#allocation300_spill] sm:$0xff] %v9431_v16  ;;  %v9435_v15 = vpop.permute.xlu0 %2791 }
 0x65b   : > { %15477 = vst [vmem:[#allocation301_spill] sm:$0xff] %v9433_v54 }
 0x65c   : > { %15478 = vst [vmem:[#allocation302_spill] sm:$0xff] %v9435_v15 }
 0x660   : > { %3101 = vperm.xlu1 %6759, %v9220_v27   ;;  %3095 = vperm.xlu2 %6760, %v9206_v14  }
 0x661   : > { %3107 = vperm.xlu0 %6758, %v9216_v32   ;;  %v9440_v57 = vpop.permute.xlu1 %2811  ;;  %v9442_v37 = vpop.permute.xlu2 %2846 }
 0x662   : > { %15479 = vst [vmem:[#allocation303_spill] sm:$0xff] %v9440_v57  ;;  %v9444_v47 = vpop.permute.xlu0 %2806 }
 0x663   : > { %15480 = vst [vmem:[#allocation304_spill] sm:$0xff] %v9442_v37 }
 0x664   : > { %15481 = vst [vmem:[#allocation305_spill] sm:$0xff] %v9444_v47 }
 0x668   : > { %3110 = vperm.xlu1 %6759, %v9238_v22   ;;  %3104 = vperm.xlu2 %6760, %v9224_v8  }
 0x669   : > { %3116 = vperm.xlu0 %6758, %v9234_v17   ;;  %v9449_v16 = vpop.permute.xlu1 %2826  ;;  %v9451_v15 = vpop.permute.xlu2 %2861  ;;  %v757_v17 = vmul.f32 %v15488_v40, %v15392_v63 }
 0x66a   : > { %15482 = vst [vmem:[#allocation306_spill] sm:$0xff] %v9449_v16  ;;  %v9453_v54 = vpop.permute.xlu0 %2821 }
 0x66b   : > { %15483 = vst [vmem:[#allocation307_spill] sm:$0xff] %v9451_v15 }
 0x66c   : > { %15484 = vst [vmem:[#allocation308_spill] sm:$0xff] %v9453_v54 }
 0x670   : > { %3119 = vperm.xlu1 %6759, %v9256_v13   ;;  %3113 = vperm.xlu2 %6760, %v9242_v55  }
 0x671   : > { %3125 = vperm.xlu0 %6758, %v9252_v51   ;;  %v9458_v57 = vpop.permute.xlu1 %2841  ;;  %v9460_v47 = vpop.permute.xlu2 %2876 }
 0x672   : > { %15485 = vst [vmem:[#allocation309_spill] sm:$0xff] %v9458_v57  ;;  %v9462_v37 = vpop.permute.xlu0 %2836  ;;  %v15492_v57 = vld [vmem:[#allocation64_spill] sm:$0xff] }
 0x673   : > { %15486 = vst [vmem:[#allocation310_spill] sm:$0xff] %v9460_v47  ;;  %v758_v51 = vmul.f32 %v15492_v57, %v15398_v53  ;;  %v15493_v47 = vld [vmem:[#allocation58_spill] sm:$0xff]  ;;  %v15499_v57 = vld [vmem:[#allocation59_spill] sm:$0xff] }
 0x674   : > { %15487 = vst [vmem:[#allocation311_spill] sm:$0xff] %v9462_v37  ;;  %v760_v37 = vmul.f32 %v15493_v47, %v15397_v62  ;;  %v763_v53 = vmul.f32 %v15499_v57, %v15403_v35  ;;  %v15509_v57 = vld [vmem:[#allocation65_spill] sm:$0xff] }
 0x678   : > { %3128 = vperm.xlu1 %6759, %v9271_v3   ;;  %3122 = vperm.xlu2 %6760, %v9260_v59  }
 0x679   : > { %3199 = vperm.xlu0 %6758, %v757_v17   ;;  %v9468_v54 = vpop.permute.xlu1 %2856  ;;  %v9470_v15 = vpop.permute.xlu2 %2891 }
 0x67a   : > { %15489 = vst [vmem:[#allocation57_spill] sm:$0xff] %v9468_v54  ;;  %v9472_v16 = vpop.permute.xlu0 %2851 }
 0x67b   : > { %15490 = vst [vmem:[#allocation312_spill] sm:$0xff] %v9470_v15  ;;  %v15497_v15 = vld [vmem:[#allocation60_spill] sm:$0xff] }
 0x67c   : > { %15491 = vst [vmem:[#allocation313_spill] sm:$0xff] %v9472_v16  ;;  %v759_v54 = vmul.f32 %v15497_v15, %v15399_v33  ;;  %v15498_v16 = vld [vmem:[#allocation67_spill] sm:$0xff]  ;;  %v15504_v15 = vld [vmem:[#allocation70_spill] sm:$0xff] }
 0x67d   : > { %v761_v59 = vmul.f32 %v15498_v16, %v15404_v31  ;;  %v15505_v16 = vld [vmem:[#allocation61_spill] sm:$0xff] }
 0x67e   : > { %v766_v62 = vmul.f32 %v15505_v16, %v15409_v4  ;;  %v15515_v16 = vld [vmem:[#allocation68_spill] sm:$0xff] }
 0x680   : > { %3204 = vperm.xlu1 %6759, %v758_v51   ;;  %3131 = vperm.xlu2 %6760, %v9275_v44  }
 0x681   : > { %3214 = vperm.xlu0 %6758, %v760_v37   ;;  %v9479_v40 = vpop.permute.xlu1 %2871  ;;  %v9481_v63 = vpop.permute.xlu2 %2906 }
 0x682   : > { %15494 = vst [vmem:[#allocation64_spill] sm:$0xff] %v9479_v40  ;;  %v9483_v17 = vpop.permute.xlu0 %2866  ;;  %v764_v40 = vmul.f32 %v15504_v15, %v15410_v29  ;;  %v15511_v15 = vld [vmem:[#allocation63_spill] sm:$0xff] }
 0x683   : > { %15495 = vst [vmem:[#allocation58_spill] sm:$0xff] %v9481_v63 }
 0x684   : > { %15496 = vst [vmem:[#allocation314_spill] sm:$0xff] %v9483_v17  ;;  %v15503_v17 = vld [vmem:[#allocation62_spill] sm:$0xff] }
 0x685   : > { %v762_v63 = vmul.f32 %v15503_v17, %v15405_v36  ;;  %v15510_v17 = vld [vmem:[#allocation73_spill] sm:$0xff] }
 0x688   : > { %3219 = vperm.xlu1 %6759, %v761_v59   ;;  %3209 = vperm.xlu2 %6760, %v759_v54  }
 0x689   : > { %3229 = vperm.xlu0 %6758, %v763_v53   ;;  %v9491_v47 = vpop.permute.xlu1 %2886 }
 0x68a   : > { %15500 = vst [vmem:[#allocation60_spill] sm:$0xff] %v9491_v47  ;;  %v9493_v37 = vpop.permute.xlu0 %2881  ;;  %v9495_v51 = vpop.permute.xlu2 %3044  ;;  %v769_v47 = vmul.f32 %v15511_v15, %v15415_v0  ;;  %v15521_v15 = vld [vmem:[#allocation71_spill] sm:$0xff] }
 0x68b   : > { %15501 = vst [vmem:[#allocation67_spill] sm:$0xff] %v9493_v37  ;;  %v767_v37 = vmul.f32 %v15510_v17, %v15416_v26  ;;  %v15517_v17 = vld [vmem:[#allocation66_spill] sm:$0xff] }
 0x68c   : > { %15502 = vst [vmem:[#allocation59_spill] sm:$0xff] %v9495_v51  ;;  %v765_v51 = vmul.f32 %v15509_v57, %v15411_v11  ;;  %v15516_v57 = vld [vmem:[#allocation76_spill] sm:$0xff] }
 0x690   : > { %3234 = vperm.xlu1 %6759, %v764_v40   ;;  %3224 = vperm.xlu2 %6760, %v762_v63  }
 0x691   : > { %3244 = vperm.xlu0 %6758, %v766_v62   ;;  %v9503_v59 = vpop.permute.xlu1 %2901 }
 0x692   : > { %15506 = vst [vmem:[#allocation62_spill] sm:$0xff] %v9503_v59  ;;  %v9505_v53 = vpop.permute.xlu0 %2896  ;;  %v9507_v54 = vpop.permute.xlu2 %3050  ;;  %v770_v59 = vmul.f32 %v15516_v57, %v15422_v12  ;;  %v15523_v57 = vld [vmem:[#allocation69_spill] sm:$0xff] }
 0x693   : > { %15507 = vst [vmem:[#allocation70_spill] sm:$0xff] %v9505_v53  ;;  %v772_v53 = vmul.f32 %v15517_v17, %v15421_v25  ;;  %v15527_v17 = vld [vmem:[#allocation74_spill] sm:$0xff]  ;;  %v15537_v25 = vld [vmem:[#allocation43_spill] sm:$0xff] }
 0x694   : > { %15508 = vst [vmem:[#allocation61_spill] sm:$0xff] %v9507_v54  ;;  %v768_v54 = vmul.f32 %v15515_v16, %v15417_v52  ;;  %v15522_v16 = vld [vmem:[#allocation79_spill] sm:$0xff] }
 0x698   : > { %3249 = vperm.xlu1 %6759, %v767_v37   ;;  %3239 = vperm.xlu2 %6760, %v765_v51  }
 0x699   : > { %3259 = vperm.xlu0 %6758, %v769_v47  }
 0x69a   : > { %v9515_v63 = vpop.permute.xlu1 %3041  ;;  %v9517_v62 = vpop.permute.xlu2 %3059 }
 0x69b   : > { %15512 = vst [vmem:[#allocation65_spill] sm:$0xff] %v9515_v63  ;;  %v9519_v40 = vpop.permute.xlu0 %3038  ;;  %v775_v63 = vmul.f32 %v15523_v57, %v15427_v61  ;;  %v15533_v57 = vld [vmem:[#allocation27_spill] sm:$0xff] }
 0x69c   : > { %15513 = vst [vmem:[#allocation73_spill] sm:$0xff] %v9517_v62  ;;  %v771_v62 = vmul.f32 %v15521_v15, %v15423_v41  ;;  %v15528_v15 = vld [vmem:[#allocation82_spill] sm:$0xff] }
 0x69d   : > { %15514 = vst [vmem:[#allocation63_spill] sm:$0xff] %v9519_v40  ;;  %v773_v40 = vmul.f32 %v15522_v16, %v15428_v5  ;;  %v15529_v16 = vld [vmem:[#allocation72_spill] sm:$0xff] }
 0x6a0   : > { %3264 = vperm.xlu1 %6759, %v770_v59   ;;  %3254 = vperm.xlu2 %6760, %v768_v54  }
 0x6a1   : > { %3274 = vperm.xlu0 %6758, %v772_v53  }
 0x6a2   : > { %v9527_v37 = vpop.permute.xlu1 %3047  ;;  %v9529_v47 = vpop.permute.xlu2 %3068 }
 0x6a3   : > { %15518 = vst [vmem:[#allocation68_spill] sm:$0xff] %v9527_v37  ;;  %v9531_v51 = vpop.permute.xlu0 %3053  ;;  %v776_v37 = vmul.f32 %v15528_v15, %v15434_v43  ;;  %v15538_v15 = vld [vmem:[#allocation75_spill] sm:$0xff] }
 0x6a4   : > { %15519 = vst [vmem:[#allocation76_spill] sm:$0xff] %v9529_v47  ;;  %v778_v47 = vmul.f32 %v15529_v16, %v15433_v7  ;;  %v15542_v16 = vld [vmem:[#allocation33_spill] sm:$0xff] }
 0x6a5   : > { %15520 = vst [vmem:[#allocation66_spill] sm:$0xff] %v9531_v51  ;;  %v774_v51 = vmul.f32 %v15527_v17, %v15429_v42  ;;  %v15536_v17 = vld [vmem:[#allocation84_spill] sm:$0xff]  ;;  %v781_v42 = vmul.f32 %v15538_v15, %v15537_v25  ;;  %v15551_v15 = vld [vmem:[#allocation39_spill] sm:$0xff] }
 0x6a8   : > { %3279 = vperm.xlu1 %6759, %v773_v40   ;;  %3269 = vperm.xlu2 %6760, %v771_v62  }
 0x6a9   : > { %3289 = vperm.xlu0 %6758, %v775_v63  }
 0x6aa   : > { %v9539_v59 = vpop.permute.xlu1 %3056  ;;  %v9541_v53 = vpop.permute.xlu2 %3077 }
 0x6ab   : > { %15524 = vst [vmem:[#allocation71_spill] sm:$0xff] %v9539_v59  ;;  %v9543_v54 = vpop.permute.xlu0 %3062 }
 0x6ac   : > { %15525 = vst [vmem:[#allocation79_spill] sm:$0xff] %v9541_v53  ;;  %v15535_v53 = vld [vmem:[#allocation40_spill] sm:$0xff] }
 0x6ad   : > { %15526 = vst [vmem:[#allocation69_spill] sm:$0xff] %v9543_v54  ;;  %v15534_v54 = vld [vmem:[#allocation77_spill] sm:$0xff]  ;;  %v779_v61 = vmul.f32 %v15536_v17, %v15535_v53  ;;  %v15547_v17 = vld [vmem:[#allocation78_spill] sm:$0xff] }
 0x6ae   : > { %v777_v59 = vmul.f32 %v15534_v54, %v15533_v57  ;;  %v15545_v54 = vld [vmem:[#allocation86_spill] sm:$0xff]  ;;  %v15546_v57 = vld [vmem:[#allocation49_spill] sm:$0xff] }
 0x6af   : > { %v784_v53 = vmul.f32 %v15547_v17, %v15546_v57  ;;  %v15558_v17 = vld [vmem:[#allocation85_spill] sm:$0xff] }
 0x6b0   : > { %3294 = vperm.xlu1 %6759, %v776_v37   ;;  %3284 = vperm.xlu2 %6760, %v774_v51  }
 0x6b1   : > { %3304 = vperm.xlu0 %6758, %v778_v47  }
 0x6b2   : > { %v9551_v62 = vpop.permute.xlu1 %3065  ;;  %v9553_v63 = vpop.permute.xlu2 %3086 }
 0x6b3   : > { %15530 = vst [vmem:[#allocation74_spill] sm:$0xff] %v9551_v62  ;;  %v9555_v40 = vpop.permute.xlu0 %3071 }
 0x6b4   : > { %15531 = vst [vmem:[#allocation82_spill] sm:$0xff] %v9553_v63  ;;  %v15544_v63 = vld [vmem:[#allocation46_spill] sm:$0xff] }
 0x6b5   : > { %15532 = vst [vmem:[#allocation72_spill] sm:$0xff] %v9555_v40  ;;  %v15543_v40 = vld [vmem:[#allocation80_spill] sm:$0xff]  ;;  %v782_v7 = vmul.f32 %v15545_v54, %v15544_v63  ;;  %v15554_v54 = vld [vmem:[#allocation81_spill] sm:$0xff] }
 0x6b6   : > { %v780_v62 = vmul.f32 %v15543_v40, %v15542_v16  ;;  %v15553_v40 = vld [vmem:[#allocation87_spill] sm:$0xff]  ;;  %v787_v25 = vmul.f32 %v15554_v54, %v15451_v28 }
 0x6b8   : > { %3309 = vperm.xlu1 %6759, %v779_v61   ;;  %3299 = vperm.xlu2 %6760, %v777_v59  }
 0x6b9   : > { %3319 = vperm.xlu0 %6758, %v781_v42  }
 0x6ba   : > { %v9563_v37 = vpop.permute.xlu1 %3074  ;;  %v9565_v47 = vpop.permute.xlu2 %3095 }
 0x6bb   : > { %15539 = vst [vmem:[#allocation77_spill] sm:$0xff] %v9563_v37  ;;  %v9567_v51 = vpop.permute.xlu0 %3080 }
 0x6bc   : > { %15540 = vst [vmem:[#allocation84_spill] sm:$0xff] %v9565_v47  ;;  %v785_v47 = vmul.f32 %v15553_v40, %v15452_v48  ;;  %v6971_v40 = vmov 2  }
 0x6bd   : > { %15541 = vst [vmem:[#allocation75_spill] sm:$0xff] %v9567_v51  ;;  %v15552_v51 = vld [vmem:[#allocation83_spill] sm:$0xff] }
 0x6be   : > { %v783_v37 = vmul.f32 %v15552_v51, %v15551_v15  ;;  %v15559_v51 = vld [vmem:[#allocation88_spill] sm:$0xff] }
 0x6c0   : > { %3324 = vperm.xlu1 %6759, %v782_v7   ;;  %3314 = vperm.xlu2 %6760, %v780_v62  }
 0x6c1   : > { %3334 = vperm.xlu0 %6758, %v784_v53  }
 0x6c2   : > { %v9575_v61 = vpop.permute.xlu1 %3083  ;;  %v9577_v42 = vpop.permute.xlu2 %3104 }
 0x6c3   : > { %15548 = vst [vmem:[#allocation33_spill] sm:$0xff] %v9575_v61  ;;  %v9579_v59 = vpop.permute.xlu0 %3089 }
 0x6c4   : > { %15549 = vst [vmem:[#allocation80_spill] sm:$0xff] %v9577_v42  ;;  %v786_v42 = vmul.f32 %v15558_v17, %v15453_v30 }
 0x6c5   : > { %15550 = vst [vmem:[#allocation86_spill] sm:$0xff] %v9579_v59  ;;  %v788_v59 = vmul.f32 %v15559_v51, %v15457_v10 }
 0x6c8   : > { %3339 = vperm.xlu1 %6759, %v785_v47   ;;  %3329 = vperm.xlu2 %6760, %v783_v37  }
 0x6c9   : > { %3349 = vperm.xlu0 %6758, %v787_v25  }
 0x6ca   : > { %v9587_v7 = vpop.permute.xlu1 %3092  ;;  %v9589_v53 = vpop.permute.xlu2 %3113 }
 0x6cb   : > { %15555 = vst [vmem:[#allocation49_spill] sm:$0xff] %v9587_v7  ;;  %v9591_v62 = vpop.permute.xlu0 %3098 }
 0x6cc   : > { %15556 = vst [vmem:[#allocation78_spill] sm:$0xff] %v9589_v53 }
 0x6cd   : > { %15557 = vst [vmem:[#allocation39_spill] sm:$0xff] %v9591_v62 }
 0x6d0   : > { %3354 = vperm.xlu1 %6759, %v788_v59   ;;  %3344 = vperm.xlu2 %6760, %v786_v42  }
 0x6d1   : > { %6762 = vset.pattern.permute.xlu0 %v6971_v40 }
 0x6d2   : > { %3489 = vperm.xlu0 %6762, %v9111_v38   ;;  %v9598_v37 = vpop.permute.xlu1 %3101  ;;  %v9600_v25 = vpop.permute.xlu2 %3122 }
 0x6d3   : > { %15560 = vst [vmem:[#allocation83_spill] sm:$0xff] %v9598_v37  ;;  %v9602_v47 = vpop.permute.xlu0 %3107 }
 0x6d4   : > { %15561 = vst [vmem:[#allocation87_spill] sm:$0xff] %v9600_v25 }
 0x6d5   : > { %15562 = vst [vmem:[#allocation81_spill] sm:$0xff] %v9602_v47  ;;  %v15591_v47 = vld [vmem:[#allocation91_spill] sm:$0xff] }
 0x6d8   : > { %6763 = vset.pattern.permute.xlu1 %v6971_v40  ;;  %6761 = vset.pattern.permute.xlu2 %v6971_v40 }
 0x6d9   : > { %3492 = vperm.xlu1 %6763, %v9126_v1   ;;  %3486 = vperm.xlu2 %6761, %v9100_v6  }
 0x6da   : > { %3504 = vperm.xlu0 %6762, %v9136_v58   ;;  %v9607_v59 = vpop.permute.xlu1 %3110  ;;  %v9609_v42 = vpop.permute.xlu2 %3131 }
 0x6db   : > { %15563 = vst [vmem:[#allocation85_spill] sm:$0xff] %v9607_v59  ;;  %v9611_v54 = vpop.permute.xlu0 %3116 }
 0x6dc   : > { %15564 = vst [vmem:[#allocation88_spill] sm:$0xff] %v9609_v42 }
 0x6dd   : > { %15565 = vst [vmem:[#allocation315_spill] sm:$0xff] %v9611_v54  ;;  %v15590_v54 = vld [vmem:[#allocation10_spill] sm:$0xff] }
 0x6de   : > { %v1046_v37 = vmul.f32 %v15591_v47, %v15590_v54  ;;  %v15604_v54 = vld [vmem:[#allocation95_spill] sm:$0xff] }
 0x6e1   : > { %3498 = vperm.xlu1 %6763, %v9122_v9   ;;  %3495 = vperm.xlu2 %6761, %v9107_v24  }
 0x6e2   : > { %3513 = vperm.xlu0 %6762, %v9150_v20   ;;  %v9616_v17 = vpop.permute.xlu1 %3119  ;;  %v9618_v51 = vpop.permute.xlu2 %3209 }
 0x6e3   : > { %15566 = vst [vmem:[#allocation316_spill] sm:$0xff] %v9616_v17  ;;  %v9620_v40 = vpop.permute.xlu0 %3125 }
 0x6e4   : > { %15567 = vst [vmem:[#allocation317_spill] sm:$0xff] %v9618_v51 }
 0x6e5   : > { %15568 = vst [vmem:[#allocation318_spill] sm:$0xff] %v9620_v40 }
 0x6e9   : > { %3507 = vperm.xlu1 %6763, %v9140_v2   ;;  %3501 = vperm.xlu2 %6761, %v9118_v56  }
 0x6ea   : > { %3522 = vperm.xlu0 %6762, %v9166_v45   ;;  %v9625_v42 = vpop.permute.xlu1 %3128  ;;  %v9627_v25 = vpop.permute.xlu2 %3224 }
 0x6eb   : > { %15569 = vst [vmem:[#allocation319_spill] sm:$0xff] %v9625_v42  ;;  %v9629_v53 = vpop.permute.xlu0 %3199 }
 0x6ec   : > { %15570 = vst [vmem:[#allocation320_spill] sm:$0xff] %v9627_v25 }
 0x6ed   : > { %15571 = vst [vmem:[#allocation321_spill] sm:$0xff] %v9629_v53 }
 0x6f1   : > { %3516 = vperm.xlu1 %6763, %v9154_v34   ;;  %3510 = vperm.xlu2 %6761, %v9132_v60  }
 0x6f2   : > { %3531 = vperm.xlu0 %6762, %v9184_v46   ;;  %v9634_v51 = vpop.permute.xlu1 %3204  ;;  %v9636_v17 = vpop.permute.xlu2 %3239 }
 0x6f3   : > { %15572 = vst [vmem:[#allocation322_spill] sm:$0xff] %v9634_v51  ;;  %v9638_v59 = vpop.permute.xlu0 %3214 }
 0x6f4   : > { %15573 = vst [vmem:[#allocation323_spill] sm:$0xff] %v9636_v17 }
 0x6f5   : > { %15574 = vst [vmem:[#allocation324_spill] sm:$0xff] %v9638_v59 }
 0x6f9   : > { %3525 = vperm.xlu1 %6763, %v9170_v39   ;;  %3519 = vperm.xlu2 %6761, %v9146_v23  }
 0x6fa   : > { %3540 = vperm.xlu0 %6762, %v9202_v21   ;;  %v9643_v25 = vpop.permute.xlu1 %3219  ;;  %v9645_v53 = vpop.permute.xlu2 %3254 }
 0x6fb   : > { %15575 = vst [vmem:[#allocation325_spill] sm:$0xff] %v9643_v25  ;;  %v9647_v42 = vpop.permute.xlu0 %3229 }
 0x6fc   : > { %15576 = vst [vmem:[#allocation326_spill] sm:$0xff] %v9645_v53 }
 0x6fd   : > { %15577 = vst [vmem:[#allocation327_spill] sm:$0xff] %v9647_v42 }
 0x701   : > { %3534 = vperm.xlu1 %6763, %v9188_v49   ;;  %3528 = vperm.xlu2 %6761, %v9162_v19  }
 0x702   : > { %3549 = vperm.xlu0 %6762, %v9220_v27   ;;  %v9652_v17 = vpop.permute.xlu1 %3234  ;;  %v9654_v59 = vpop.permute.xlu2 %3269 }
 0x703   : > { %15578 = vst [vmem:[#allocation328_spill] sm:$0xff] %v9652_v17  ;;  %v9656_v51 = vpop.permute.xlu0 %3244 }
 0x704   : > { %15579 = vst [vmem:[#allocation329_spill] sm:$0xff] %v9654_v59 }
 0x705   : > { %15580 = vst [vmem:[#allocation330_spill] sm:$0xff] %v9656_v51 }
 0x709   : > { %3543 = vperm.xlu1 %6763, %v9206_v14   ;;  %3537 = vperm.xlu2 %6761, %v9180_v18  }
 0x70a   : > { %3558 = vperm.xlu0 %6762, %v9238_v22   ;;  %v9661_v53 = vpop.permute.xlu1 %3249  ;;  %v9663_v42 = vpop.permute.xlu2 %3284 }
 0x70b   : > { %15581 = vst [vmem:[#allocation331_spill] sm:$0xff] %v9661_v53  ;;  %v9665_v25 = vpop.permute.xlu0 %3259 }
 0x70c   : > { %15582 = vst [vmem:[#allocation332_spill] sm:$0xff] %v9663_v42 }
 0x70d   : > { %15583 = vst [vmem:[#allocation333_spill] sm:$0xff] %v9665_v25 }
 0x711   : > { %3552 = vperm.xlu1 %6763, %v9224_v8   ;;  %3546 = vperm.xlu2 %6761, %v9198_v50  }
 0x712   : > { %3567 = vperm.xlu0 %6762, %v9256_v13   ;;  %v9670_v59 = vpop.permute.xlu1 %3264  ;;  %v9672_v51 = vpop.permute.xlu2 %3299  ;;  %v15610_v13 = vld [vmem:[#allocation9_spill] sm:$0xff] }
 0x713   : > { %15584 = vst [vmem:[#allocation334_spill] sm:$0xff] %v9670_v59  ;;  %v9674_v17 = vpop.permute.xlu0 %3274  ;;  %v15592_v59 = vld [vmem:[#allocation252_spill] sm:$0xff] }
 0x714   : > { %15585 = vst [vmem:[#allocation335_spill] sm:$0xff] %v9672_v51  ;;  %v15593_v51 = vld [vmem:[#allocation246_spill] sm:$0xff] }
 0x715   : > { %15586 = vst [vmem:[#allocation336_spill] sm:$0xff] %v9674_v17 }
 0x719   : > { %3561 = vperm.xlu1 %6763, %v9242_v55   ;;  %3555 = vperm.xlu2 %6761, %v9216_v32  }
 0x71a   : > { %3576 = vperm.xlu0 %6762, %v9271_v3   ;;  %v9679_v42 = vpop.permute.xlu1 %3279  ;;  %v9681_v25 = vpop.permute.xlu2 %3314  ;;  %v15605_v3 = vld [vmem:[#allocation94_spill] sm:$0xff] }
 0x71b   : > { %15587 = vst [vmem:[#allocation337_spill] sm:$0xff] %v9679_v42  ;;  %v9683_v40 = vpop.permute.xlu0 %3289  ;;  %v15597_v42 = vld [vmem:[#allocation92_spill] sm:$0xff] }
 0x71c   : > { %15588 = vst [vmem:[#allocation338_spill] sm:$0xff] %v9681_v25  ;;  %v1049_v7 = vmul.f32 %v15597_v42, %v15404_v31  ;;  %v1052_v42 = vmul.f32 %v15605_v3, %v15410_v29 }
 0x71d   : > { %15589 = vst [vmem:[#allocation339_spill] sm:$0xff] %v9683_v40  ;;  %v15598_v40 = vld [vmem:[#allocation250_spill] sm:$0xff] }
 0x721   : > { %3570 = vperm.xlu1 %6763, %v15592_v59   ;;  %3564 = vperm.xlu2 %6761, %v15593_v51  }
 0x722   : > { %3652 = vperm.xlu0 %6762, %v1046_v37   ;;  %v9689_v17 = vpop.permute.xlu1 %3294  ;;  %v9691_v62 = vpop.permute.xlu2 %3329  ;;  %v15602_v37 = vld [vmem:[#allocation93_spill] sm:$0xff] }
 0x723   : > { %15594 = vst [vmem:[#allocation91_spill] sm:$0xff] %v9689_v17  ;;  %v9693_v53 = vpop.permute.xlu0 %3304  ;;  %v1047_v17 = vmul.f32 %v15602_v37, %v15399_v33  ;;  %v15611_v37 = vld [vmem:[#allocation98_spill] sm:$0xff] }
 0x724   : > { %15595 = vst [vmem:[#allocation252_spill] sm:$0xff] %v9691_v62  ;;  %v15603_v62 = vld [vmem:[#allocation6_spill] sm:$0xff] }
 0x725   : > { %15596 = vst [vmem:[#allocation246_spill] sm:$0xff] %v9693_v53  ;;  %v1045_v53 = vmul.f32 %v15604_v54, %v15603_v62  ;;  %v15612_v54 = vld [vmem:[#allocation97_spill] sm:$0xff] }
 0x726   : > { %v1055_v62 = vmul.f32 %v15612_v54, %v15416_v26  ;;  %v15622_v54 = vld [vmem:[#allocation102_spill] sm:$0xff] }
 0x729   : > { %3579 = vperm.xlu1 %6763, %v9275_v44   ;;  %3573 = vperm.xlu2 %6761, %v15598_v40   ;;  %v1048_v40 = vmul.f32 %v15611_v37, %v15610_v13  ;;  %v15618_v37 = vld [vmem:[#allocation100_spill] sm:$0xff] }
 0x72a   : > { %3667 = vperm.xlu0 %6762, %v1049_v7   ;;  %v9699_v47 = vpop.permute.xlu1 %3309  ;;  %v9701_v25 = vpop.permute.xlu2 %3344 }
 0x72b   : > { %15599 = vst [vmem:[#allocation92_spill] sm:$0xff] %v9699_v47  ;;  %v9703_v61 = vpop.permute.xlu0 %3319 }
 0x72c   : > { %15600 = vst [vmem:[#allocation340_spill] sm:$0xff] %v9701_v25 }
 0x72d   : > { %15601 = vst [vmem:[#allocation341_spill] sm:$0xff] %v9703_v61  ;;  %v15609_v61 = vld [vmem:[#allocation96_spill] sm:$0xff] }
 0x72e   : > { %v1050_v25 = vmul.f32 %v15609_v61, %v15405_v36  ;;  %v15617_v61 = vld [vmem:[#allocation101_spill] sm:$0xff] }
 0x731   : > { %3657 = vperm.xlu1 %6763, %v1047_v17   ;;  %3647 = vperm.xlu2 %6761, %v1045_v53  }
 0x732   : > { %3682 = vperm.xlu0 %6762, %v1052_v42   ;;  %v9711_v31 = vpop.permute.xlu1 %3324  ;;  %v15616_v42 = vld [vmem:[#allocation99_spill] sm:$0xff] }
 0x733   : > { %15606 = vst [vmem:[#allocation93_spill] sm:$0xff] %v9711_v31  ;;  %v9713_v7 = vpop.permute.xlu0 %3334  ;;  %v9715_v47 = vpop.permute.xlu2 %3486  ;;  %v1058_v31 = vmul.f32 %v15618_v37, %v15422_v12  ;;  %v15628_v37 = vld [vmem:[#allocation105_spill] sm:$0xff]  ;;  %v15638_v12 = vld [vmem:[#allocation40_spill] sm:$0xff] }
 0x734   : > { %15607 = vst [vmem:[#allocation95_spill] sm:$0xff] %v9713_v7  ;;  %v1051_v7 = vmul.f32 %v15617_v61, %v15403_v35  ;;  %v15624_v61 = vld [vmem:[#allocation103_spill] sm:$0xff] }
 0x735   : > { %15608 = vst [vmem:[#allocation94_spill] sm:$0xff] %v9715_v47  ;;  %v1053_v47 = vmul.f32 %v15616_v42, %v15411_v11  ;;  %v15623_v42 = vld [vmem:[#allocation104_spill] sm:$0xff] }
 0x739   : > { %3672 = vperm.xlu1 %6763, %v1050_v25   ;;  %3662 = vperm.xlu2 %6761, %v1048_v40  }
 0x73a   : > { %3697 = vperm.xlu0 %6762, %v1055_v62   ;;  %v9723_v3 = vpop.permute.xlu1 %3339 }
 0x73b   : > { %15613 = vst [vmem:[#allocation96_spill] sm:$0xff] %v9723_v3  ;;  %v9725_v53 = vpop.permute.xlu0 %3349  ;;  %v9727_v17 = vpop.permute.xlu2 %3495  ;;  %v1061_v3 = vmul.f32 %v15624_v61, %v15428_v5  ;;  %v15634_v61 = vld [vmem:[#allocation22_spill] sm:$0xff] }
 0x73c   : > { %15614 = vst [vmem:[#allocation98_spill] sm:$0xff] %v9725_v53  ;;  %v1054_v53 = vmul.f32 %v15623_v42, %v15409_v4  ;;  %v15630_v42 = vld [vmem:[#allocation106_spill] sm:$0xff] }
 0x73d   : > { %15615 = vst [vmem:[#allocation97_spill] sm:$0xff] %v9727_v17  ;;  %v1056_v17 = vmul.f32 %v15622_v54, %v15417_v52  ;;  %v15629_v54 = vld [vmem:[#allocation107_spill] sm:$0xff] }
 0x741   : > { %3687 = vperm.xlu1 %6763, %v1053_v47   ;;  %3677 = vperm.xlu2 %6761, %v1051_v7  }
 0x742   : > { %3712 = vperm.xlu0 %6762, %v1058_v31   ;;  %v9735_v25 = vpop.permute.xlu1 %3354 }
 0x743   : > { %15619 = vst [vmem:[#allocation99_spill] sm:$0xff] %v9735_v25  ;;  %v9737_v62 = vpop.permute.xlu2 %3501  ;;  %v1064_v25 = vmul.f32 %v15630_v42, %v15434_v43  ;;  %v15643_v42 = vld [vmem:[#allocation27_spill] sm:$0xff] }
 0x744   : > { %15620 = vst [vmem:[#allocation101_spill] sm:$0xff] %v9737_v62  ;;  %v9739_v40 = vpop.permute.xlu0 %3489  ;;  %v1059_v62 = vmul.f32 %v15628_v37, %v15423_v41  ;;  %v15637_v37 = vld [vmem:[#allocation110_spill] sm:$0xff] }
 0x745   : > { %15621 = vst [vmem:[#allocation100_spill] sm:$0xff] %v9739_v40  ;;  %v1057_v40 = vmul.f32 %v15629_v54, %v15415_v0  ;;  %v15639_v54 = vld [vmem:[#allocation109_spill] sm:$0xff] }
 0x746   : > { %v1067_v0 = vmul.f32 %v15639_v54, %v15638_v12  ;;  %v15651_v54 = vld [vmem:[#allocation114_spill] sm:$0xff] }
 0x749   : > { %3702 = vperm.xlu1 %6763, %v1056_v17   ;;  %3692 = vperm.xlu2 %6761, %v1054_v53  }
 0x74a   : > { %3727 = vperm.xlu0 %6762, %v1061_v3  }
 0x74b   : > { %v9747_v47 = vpop.permute.xlu1 %3492  ;;  %v9749_v31 = vpop.permute.xlu2 %3510 }
 0x74c   : > { %15625 = vst [vmem:[#allocation102_spill] sm:$0xff] %v9747_v47  ;;  %v9751_v7 = vpop.permute.xlu0 %3504  ;;  %v15636_v47 = vld [vmem:[#allocation26_spill] sm:$0xff] }
 0x74d   : > { %15626 = vst [vmem:[#allocation104_spill] sm:$0xff] %v9749_v31  ;;  %v15635_v31 = vld [vmem:[#allocation108_spill] sm:$0xff]  ;;  %v1060_v5 = vmul.f32 %v15637_v37, %v15636_v47 }
 0x74e   : > { %15627 = vst [vmem:[#allocation103_spill] sm:$0xff] %v9751_v7  ;;  %v1062_v7 = vmul.f32 %v15635_v31, %v15634_v61  ;;  %v15646_v31 = vld [vmem:[#allocation113_spill] sm:$0xff]  ;;  %v15647_v37 = vld [vmem:[#allocation112_spill] sm:$0xff] }
 0x74f   : > { %v1070_v47 = vmul.f32 %v15647_v37, %v15544_v63  ;;  %v15658_v37 = vld [vmem:[#allocation117_spill] sm:$0xff] }
 0x751   : > { %3717 = vperm.xlu1 %6763, %v1059_v62   ;;  %3707 = vperm.xlu2 %6761, %v1057_v40  }
 0x752   : > { %3742 = vperm.xlu0 %6762, %v1064_v25  }
 0x753   : > { %v9759_v53 = vpop.permute.xlu1 %3498  ;;  %v9761_v3 = vpop.permute.xlu2 %3519 }
 0x754   : > { %15631 = vst [vmem:[#allocation105_spill] sm:$0xff] %v9759_v53  ;;  %v9763_v17 = vpop.permute.xlu0 %3513  ;;  %v15645_v53 = vld [vmem:[#allocation31_spill] sm:$0xff] }
 0x755   : > { %15632 = vst [vmem:[#allocation107_spill] sm:$0xff] %v9761_v3  ;;  %v15644_v3 = vld [vmem:[#allocation111_spill] sm:$0xff]  ;;  %v1063_v43 = vmul.f32 %v15646_v31, %v15645_v53 }
 0x756   : > { %15633 = vst [vmem:[#allocation106_spill] sm:$0xff] %v9763_v17  ;;  %v1065_v17 = vmul.f32 %v15644_v3, %v15643_v42  ;;  %v15653_v3 = vld [vmem:[#allocation116_spill] sm:$0xff]  ;;  %v15654_v31 = vld [vmem:[#allocation115_spill] sm:$0xff] }
 0x757   : > { %v1073_v12 = vmul.f32 %v15654_v31, %v15452_v48  ;;  %v15665_v31 = vld [vmem:[#allocation120_spill] sm:$0xff] }
 0x759   : > { %3732 = vperm.xlu1 %6763, %v1062_v7   ;;  %3722 = vperm.xlu2 %6761, %v1060_v5  }
 0x75a   : > { %3757 = vperm.xlu0 %6762, %v1067_v0  }
 0x75b   : > { %v9771_v62 = vpop.permute.xlu1 %3507  ;;  %v9773_v25 = vpop.permute.xlu2 %3528 }
 0x75c   : > { %15640 = vst [vmem:[#allocation22_spill] sm:$0xff] %v9771_v62  ;;  %v9775_v40 = vpop.permute.xlu0 %3522 }
 0x75d   : > { %15641 = vst [vmem:[#allocation108_spill] sm:$0xff] %v9773_v25  ;;  %v1068_v25 = vmul.f32 %v15651_v54, %v15542_v16  ;;  %v15660_v54 = vld [vmem:[#allocation119_spill] sm:$0xff] }
 0x75e   : > { %15642 = vst [vmem:[#allocation110_spill] sm:$0xff] %v9775_v40  ;;  %v15652_v40 = vld [vmem:[#allocation37_spill] sm:$0xff] }
 0x75f   : > { %v1066_v62 = vmul.f32 %v15653_v3, %v15652_v40  ;;  %v15661_v3 = vld [vmem:[#allocation118_spill] sm:$0xff] }
 0x760   : > { %v1076_v63 = vmul.f32 %v15661_v3, %v15457_v10  ;;  %v15670_v3 = vld [vmem:[#allocation122_spill] sm:$0xff] }
 0x761   : > { %3747 = vperm.xlu1 %6763, %v1065_v17   ;;  %3737 = vperm.xlu2 %6761, %v1063_v43  }
 0x762   : > { %3772 = vperm.xlu0 %6762, %v1070_v47  }
 0x763   : > { %v9783_v5 = vpop.permute.xlu1 %3516  ;;  %v9785_v0 = vpop.permute.xlu2 %3537 }
 0x764   : > { %15648 = vst [vmem:[#allocation109_spill] sm:$0xff] %v9783_v5  ;;  %v9787_v7 = vpop.permute.xlu0 %3531 }
 0x765   : > { %15649 = vst [vmem:[#allocation27_spill] sm:$0xff] %v9785_v0  ;;  %v1071_v0 = vmul.f32 %v15658_v37, %v15551_v15  ;;  %v15666_v37 = vld [vmem:[#allocation121_spill] sm:$0xff] }
 0x766   : > { %15650 = vst [vmem:[#allocation111_spill] sm:$0xff] %v9787_v7  ;;  %v15659_v7 = vld [vmem:[#allocation43_spill] sm:$0xff] }
 0x767   : > { %v1069_v5 = vmul.f32 %v15660_v54, %v15659_v7  ;;  %v6972_v54 = vmov 3  }
 0x769   : > { %3762 = vperm.xlu1 %6763, %v1068_v25   ;;  %3752 = vperm.xlu2 %6761, %v1066_v62  }
 0x76a   : > { %3787 = vperm.xlu0 %6762, %v1073_v12  }
 0x76b   : > { %v9795_v43 = vpop.permute.xlu1 %3525  ;;  %v9797_v47 = vpop.permute.xlu2 %3546 }
 0x76c   : > { %15655 = vst [vmem:[#allocation31_spill] sm:$0xff] %v9795_v43  ;;  %v9799_v17 = vpop.permute.xlu0 %3540  ;;  %v10206_v43 = vld [vmem:[%s7053_s27 + $0xc0] sm:$0xff] }
 0x76d   : > { %15656 = vst [vmem:[#allocation113_spill] sm:$0xff] %v9797_v47  ;;  %v1074_v47 = vmul.f32 %v15665_v31, %v15453_v30 }
 0x76e   : > { %15657 = vst [vmem:[#allocation112_spill] sm:$0xff] %v9799_v17  ;;  %v1072_v17 = vmul.f32 %v15666_v37, %v15546_v57 }
 0x771   : > { %3777 = vperm.xlu1 %6763, %v1071_v0   ;;  %3767 = vperm.xlu2 %6761, %v1069_v5  }
 0x772   : > { %3802 = vperm.xlu0 %6762, %v1076_v63  }
 0x773   : > { %v9807_v62 = vpop.permute.xlu1 %3534  ;;  %v9809_v12 = vpop.permute.xlu2 %3555 }
 0x774   : > { %15662 = vst [vmem:[#allocation114_spill] sm:$0xff] %v9807_v62  ;;  %v9811_v25 = vpop.permute.xlu0 %3549 }
 0x775   : > { %15663 = vst [vmem:[#allocation37_spill] sm:$0xff] %v9809_v12  ;;  %v1075_v12 = vmul.f32 %v15670_v3, %v15451_v28 }
 0x776   : > { %15664 = vst [vmem:[#allocation116_spill] sm:$0xff] %v9811_v25  ;;  %v10194_v25 = vld [vmem:[%s7053_s27 + $0x98] sm:$0xff] }
 0x779   : > { %3792 = vperm.xlu1 %6763, %v1074_v47   ;;  %3782 = vperm.xlu2 %6761, %v1072_v17  }
 0x77a   : > { %6766 = vset.pattern.permute.xlu0 %v6972_v54 }
 0x77b   : > { %3940 = vperm.xlu0 %6766, %v9126_v1   ;;  %v9818_v5 = vpop.permute.xlu1 %3543  ;;  %v9820_v63 = vpop.permute.xlu2 %3564 }
 0x77c   : > { %15667 = vst [vmem:[#allocation115_spill] sm:$0xff] %v9818_v5  ;;  %v9822_v0 = vpop.permute.xlu0 %3558  ;;  %v10190_v5 = vld [vmem:[%s7053_s27 + $0xa8] sm:$0xff] }
 0x77d   : > { %15668 = vst [vmem:[#allocation117_spill] sm:$0xff] %v9820_v63  ;;  %v10124_v63 = vld [vmem:[%s7053_s27 + $0xa0] sm:$0xff] }
 0x77e   : > { %15669 = vst [vmem:[#allocation43_spill] sm:$0xff] %v9822_v0 }
 0x77f   : > { %15791 = vst [vmem:[#allocation375_spill] sm:$0xff] %v10124_v63 }
 0x781   : > { %6764 = vset.pattern.permute.xlu1 %v6972_v54  ;;  %3797 = vperm.xlu2 %6761, %v1075_v12  }
 0x782   : > { %3934 = vperm.xlu1 %6764, %v9100_v6  }
 0x783   : > { %3955 = vperm.xlu0 %6766, %v9140_v2   ;;  %v9828_v47 = vpop.permute.xlu1 %3552  ;;  %v9830_v17 = vpop.permute.xlu2 %3573 }
 0x784   : > { %15671 = vst [vmem:[#allocation119_spill] sm:$0xff] %v9828_v47  ;;  %v9832_v1 = vpop.permute.xlu0 %3567 }
 0x785   : > { %15672 = vst [vmem:[#allocation118_spill] sm:$0xff] %v9830_v17  ;;  %v10106_v17 = vld [vmem:[%s7053_s27 + $0x88] sm:$0xff] }
 0x786   : > { %15673 = vst [vmem:[#allocation120_spill] sm:$0xff] %v9832_v1  ;;  %v10174_v1 = vld [vmem:[%s7053_s27 + $0x80] sm:$0xff] }
 0x789   : > { %6765 = vset.pattern.permute.xlu2 %v6972_v54 }
 0x78a   : > { %3943 = vperm.xlu1 %6764, %v9107_v24   ;;  %3937 = vperm.xlu2 %6765, %v9111_v38  }
 0x78b   : > { %3964 = vperm.xlu0 %6766, %v9154_v34   ;;  %v9837_v31 = vpop.permute.xlu1 %3561  ;;  %v9839_v12 = vpop.permute.xlu2 %3647 }
 0x78c   : > { %15674 = vst [vmem:[#allocation121_spill] sm:$0xff] %v9837_v31  ;;  %v9841_v6 = vpop.permute.xlu0 %3576  ;;  %v10156_v31 = vld [vmem:[%s7053_s27 + $0x68] sm:$0xff] }
 0x78d   : > { %15675 = vst [vmem:[#allocation122_spill] sm:$0xff] %v9839_v12  ;;  %v15723_v12 = vld [vmem:[#allocation90_spill] sm:$0xff] }
 0x78e   : > { %15676 = vst [vmem:[#allocation342_spill] sm:$0xff] %v9841_v6 }
 0x792   : > { %3949 = vperm.xlu1 %6764, %v9118_v56   ;;  %3946 = vperm.xlu2 %6765, %v9122_v9  }
 0x793   : > { %3973 = vperm.xlu0 %6766, %v9170_v39   ;;  %v9846_v2 = vpop.permute.xlu1 %3570  ;;  %v9848_v37 = vpop.permute.xlu2 %3662 }
 0x794   : > { %15677 = vst [vmem:[#allocation343_spill] sm:$0xff] %v9846_v2  ;;  %v9850_v24 = vpop.permute.xlu0 %3652  ;;  %v10134_v2 = vld [vmem:[%s7053_s27 + $0x60] sm:$0xff] }
 0x795   : > { %15678 = vst [vmem:[#allocation344_spill] sm:$0xff] %v9848_v37 }
 0x796   : > { %15679 = vst [vmem:[#allocation345_spill] sm:$0xff] %v9850_v24 }
 0x79a   : > { %3958 = vperm.xlu1 %6764, %v9132_v60   ;;  %3952 = vperm.xlu2 %6765, %v9136_v58  }
 0x79b   : > { %3982 = vperm.xlu0 %6766, %v9188_v49   ;;  %v9855_v38 = vpop.permute.xlu1 %3579  ;;  %v9857_v34 = vpop.permute.xlu2 %3677 }
 0x79c   : > { %15680 = vst [vmem:[#allocation346_spill] sm:$0xff] %v9855_v38  ;;  %v9859_v56 = vpop.permute.xlu0 %3667  ;;  %v10120_v38 = vld [vmem:[%s7053_s27 + $0x38] sm:$0xff] }
 0x79d   : > { %15681 = vst [vmem:[#allocation347_spill] sm:$0xff] %v9857_v34  ;;  %v15717_v34 = vld [vmem:[#allocation126_spill] sm:$0xff] }
 0x79e   : > { %15682 = vst [vmem:[#allocation348_spill] sm:$0xff] %v9859_v56  ;;  %v1336_v24 = vmul.f32 %v15717_v34, %v15610_v13  ;;  %v15725_v34 = vld [vmem:[#allocation131_spill] sm:$0xff] }
 0x7a2   : > { %3967 = vperm.xlu1 %6764, %v9146_v23   ;;  %3961 = vperm.xlu2 %6765, %v9150_v20  }
 0x7a3   : > { %3991 = vperm.xlu0 %6766, %v9206_v14   ;;  %v9864_v9 = vpop.permute.xlu1 %3657  ;;  %v9866_v39 = vpop.permute.xlu2 %3692 }
 0x7a4   : > { %15683 = vst [vmem:[#allocation349_spill] sm:$0xff] %v9864_v9  ;;  %v9868_v60 = vpop.permute.xlu0 %3682  ;;  %v15716_v9 = vld [vmem:[#allocation89_spill] sm:$0xff] }
 0x7a5   : > { %15684 = vst [vmem:[#allocation350_spill] sm:$0xff] %v9866_v39 }
 0x7a6   : > { %15685 = vst [vmem:[#allocation351_spill] sm:$0xff] %v9868_v60  ;;  %v15711_v60 = vld [vmem:[#allocation256_spill] sm:$0xff] }
 0x7aa   : > { %3976 = vperm.xlu1 %6764, %v9162_v19   ;;  %3970 = vperm.xlu2 %6765, %v9166_v45  }
 0x7ab   : > { %4000 = vperm.xlu0 %6766, %v9224_v8   ;;  %v9873_v58 = vpop.permute.xlu1 %3672  ;;  %v9875_v49 = vpop.permute.xlu2 %3707 }
 0x7ac   : > { %15686 = vst [vmem:[#allocation352_spill] sm:$0xff] %v9873_v58  ;;  %v9877_v23 = vpop.permute.xlu0 %3697 }
 0x7ad   : > { %15687 = vst [vmem:[#allocation353_spill] sm:$0xff] %v9875_v49  ;;  %v15704_v49 = vld [vmem:[#allocation251_spill] sm:$0xff] }
 0x7ae   : > { %15688 = vst [vmem:[#allocation354_spill] sm:$0xff] %v9877_v23  ;;  %v10178_v23 = vld [vmem:[%s7053_s27 + $0xe8] sm:$0xff] }
 0x7af   : > { %15803 = vst [vmem:[#allocation387_spill] sm:$0xff] %v10178_v23 }
 0x7b2   : > { %3985 = vperm.xlu1 %6764, %v9180_v18   ;;  %3979 = vperm.xlu2 %6765, %v9184_v46  }
 0x7b3   : > { %4009 = vperm.xlu0 %6766, %v9242_v55   ;;  %v9882_v20 = vpop.permute.xlu1 %3687  ;;  %v9884_v14 = vpop.permute.xlu2 %3722 }
 0x7b4   : > { %15689 = vst [vmem:[#allocation355_spill] sm:$0xff] %v9882_v20  ;;  %v9886_v19 = vpop.permute.xlu0 %3712  ;;  %v15710_v20 = vld [vmem:[#allocation127_spill] sm:$0xff] }
 0x7b5   : > { %15690 = vst [vmem:[#allocation356_spill] sm:$0xff] %v9884_v14  ;;  %v1341_v58 = vmul.f32 %v15710_v20, %v15411_v11  ;;  %v15722_v20 = vld [vmem:[#allocation12_spill] sm:$0xff] }
 0x7b6   : > { %15691 = vst [vmem:[#allocation357_spill] sm:$0xff] %v9886_v19  ;;  %v10160_v19 = vld [vmem:[%s7053_s27 + $0xd0] sm:$0xff] }
 0x7b7   : > { %15799 = vst [vmem:[#allocation383_spill] sm:$0xff] %v10160_v19 }
 0x7ba   : > { %3994 = vperm.xlu1 %6764, %v9198_v50   ;;  %3988 = vperm.xlu2 %6765, %v9202_v21   ;;  %v15698_v21 = vld [vmem:[#allocation7_spill] sm:$0xff] }
 0x7bb   : > { %4018 = vperm.xlu0 %6766, %v15592_v59   ;;  %v9891_v45 = vpop.permute.xlu1 %3702  ;;  %v9893_v8 = vpop.permute.xlu2 %3737  ;;  %v1335_v59 = vmul.f32 %v15698_v21, %v15399_v33 }
 0x7bc   : > { %15692 = vst [vmem:[#allocation358_spill] sm:$0xff] %v9891_v45  ;;  %v9895_v18 = vpop.permute.xlu0 %3727  ;;  %v15709_v45 = vld [vmem:[#allocation123_spill] sm:$0xff] }
 0x7bd   : > { %15693 = vst [vmem:[#allocation359_spill] sm:$0xff] %v9893_v8  ;;  %v10152_v8 = vld [vmem:[%s7053_s27 + $0x78] sm:$0xff] }
 0x7be   : > { %15694 = vst [vmem:[#allocation360_spill] sm:$0xff] %v9895_v18  ;;  %v10142_v18 = vld [vmem:[%s7053_s27 + $0xb8] sm:$0xff] }
 0x7bf   : > { %15795 = vst [vmem:[#allocation379_spill] sm:$0xff] %v10142_v18 }
 0x7c2   : > { %4003 = vperm.xlu1 %6764, %v9216_v32   ;;  %3997 = vperm.xlu2 %6765, %v9220_v27  }
 0x7c3   : > { %4027 = vperm.xlu0 %6766, %v9275_v44   ;;  %v9900_v46 = vpop.permute.xlu1 %3717  ;;  %v9902_v55 = vpop.permute.xlu2 %3752  ;;  %v15702_v44 = vld [vmem:[#allocation125_spill] sm:$0xff] }
 0x7c4   : > { %15695 = vst [vmem:[#allocation361_spill] sm:$0xff] %v9900_v46  ;;  %v9904_v50 = vpop.permute.xlu0 %3742  ;;  %v1338_v3 = vmul.f32 %v15702_v44, %v15405_v36  ;;  %v15703_v46 = vld [vmem:[#allocation250_spill] sm:$0xff] }
 0x7c5   : > { %15696 = vst [vmem:[#allocation362_spill] sm:$0xff] %v9902_v55  ;;  %v10138_v55 = vld [vmem:[%s7053_s27 + $0x50] sm:$0xff] }
 0x7c6   : > { %15697 = vst [vmem:[#allocation363_spill] sm:$0xff] %v9904_v50  ;;  %v10116_v50 = vld [vmem:[%s7053_s27 + $0x48] sm:$0xff] }
 0x7ca   : > { %4012 = vperm.xlu1 %6764, %v15593_v51   ;;  %4006 = vperm.xlu2 %6765, %v9238_v22  }
 0x7cb   : > { %4105 = vperm.xlu0 %6766, %v1335_v59   ;;  %v9910_v54 = vpop.permute.xlu1 %3732  ;;  %v9912_v32 = vpop.permute.xlu2 %3767  ;;  %v15708_v59 = vld [vmem:[#allocation6_spill] sm:$0xff] }
 0x7cc   : > { %15699 = vst [vmem:[#allocation7_spill] sm:$0xff] %v9910_v54  ;;  %v9914_v27 = vpop.permute.xlu0 %3757  ;;  %v1333_v39 = vmul.f32 %v15709_v45, %v15708_v59  ;;  %v15718_v45 = vld [vmem:[#allocation129_spill] sm:$0xff] }
 0x7cd   : > { %15700 = vst [vmem:[#allocation364_spill] sm:$0xff] %v9912_v32  ;;  %v1344_v37 = vmul.f32 %v15718_v45, %v15417_v52  ;;  %v15729_v45 = vld [vmem:[#allocation124_spill] sm:$0xff]  ;;  %v10102_v54 = vld [vmem:[%s7053_s27 + $0x20] sm:$0xff] }
 0x7ce   : > { %15701 = vst [vmem:[#allocation365_spill] sm:$0xff] %v9914_v27  ;;  %v15777_v32 = vld [vmem:[#allocation148_spill] sm:$0xff] }
 0x7d2   : > { %4021 = vperm.xlu1 %6764, %v15703_v46   ;;  %4015 = vperm.xlu2 %6765, %v15704_v49  }
 0x7d3   : > { %4120 = vperm.xlu0 %6766, %v1338_v3   ;;  %v9920_v21 = vpop.permute.xlu1 %3747  ;;  %v9922_v51 = vpop.permute.xlu2 %3782  ;;  %v15715_v3 = vld [vmem:[#allocation10_spill] sm:$0xff] }
 0x7d4   : > { %15705 = vst [vmem:[#allocation125_spill] sm:$0xff] %v9920_v21  ;;  %v9924_v22 = vpop.permute.xlu0 %3772  ;;  %v1334_v56 = vmul.f32 %v15716_v9, %v15715_v3  ;;  %v15724_v9 = vld [vmem:[#allocation128_spill] sm:$0xff] }
 0x7d5   : > { %15706 = vst [vmem:[#allocation250_spill] sm:$0xff] %v9922_v51  ;;  %v1339_v6 = vmul.f32 %v15724_v9, %v15403_v35  ;;  %v15731_v9 = vld [vmem:[#allocation134_spill] sm:$0xff] }
 0x7d6   : > { %15707 = vst [vmem:[#allocation251_spill] sm:$0xff] %v9924_v22 }
 0x7da   : > { %4095 = vperm.xlu1 %6764, %v1333_v39   ;;  %4024 = vperm.xlu2 %6765, %v15711_v60  }
 0x7db   : > { %4135 = vperm.xlu0 %6766, %v1341_v58   ;;  %v9931_v46 = vpop.permute.xlu1 %3762  ;;  %v9933_v49 = vpop.permute.xlu2 %3797 }
 0x7dc   : > { %15712 = vst [vmem:[#allocation123_spill] sm:$0xff] %v9931_v46  ;;  %v9935_v44 = vpop.permute.xlu0 %3787 }
 0x7dd   : > { %15713 = vst [vmem:[#allocation127_spill] sm:$0xff] %v9933_v49  ;;  %v1337_v49 = vmul.f32 %v15723_v12, %v15722_v20  ;;  %v15730_v12 = vld [vmem:[#allocation130_spill] sm:$0xff] }
 0x7de   : > { %15714 = vst [vmem:[#allocation256_spill] sm:$0xff] %v9935_v44  ;;  %v1347_v44 = vmul.f32 %v15725_v34, %v15423_v41  ;;  %v15735_v34 = vld [vmem:[#allocation16_spill] sm:$0xff] }
 0x7e2   : > { %4110 = vperm.xlu1 %6764, %v1336_v24   ;;  %4100 = vperm.xlu2 %6765, %v1334_v56  }
 0x7e3   : > { %4150 = vperm.xlu0 %6766, %v1344_v37   ;;  %v9943_v39 = vpop.permute.xlu1 %3777 }
 0x7e4   : > { %15719 = vst [vmem:[#allocation89_spill] sm:$0xff] %v9943_v39  ;;  %v9945_v60 = vpop.permute.xlu0 %3802  ;;  %v9947_v58 = vpop.permute.xlu2 %3937  ;;  %v1350_v39 = vmul.f32 %v15731_v9, %v15634_v61  ;;  %v15742_v9 = vld [vmem:[#allocation23_spill] sm:$0xff] }
 0x7e5   : > { %15720 = vst [vmem:[#allocation126_spill] sm:$0xff] %v9945_v60  ;;  %v1342_v60 = vmul.f32 %v15730_v12, %v15409_v4  ;;  %v15738_v12 = vld [vmem:[#allocation137_spill] sm:$0xff] }
 0x7e6   : > { %15721 = vst [vmem:[#allocation129_spill] sm:$0xff] %v9947_v58  ;;  %v1340_v58 = vmul.f32 %v15729_v45, %v15410_v29  ;;  %v15737_v45 = vld [vmem:[#allocation132_spill] sm:$0xff]  ;;  %v1353_v46 = vmul.f32 %v15738_v12, %v15643_v42 }
 0x7e7   : > { %v15750_v12 = vld [vmem:[#allocation28_spill] sm:$0xff] }
 0x7ea   : > { %4125 = vperm.xlu1 %6764, %v1339_v6   ;;  %4115 = vperm.xlu2 %6765, %v1337_v49  }
 0x7eb   : > { %4165 = vperm.xlu0 %6766, %v1347_v44   ;;  %v9955_v24 = vpop.permute.xlu1 %3792 }
 0x7ec   : > { %15726 = vst [vmem:[#allocation90_spill] sm:$0xff] %v9955_v24  ;;  %v9957_v37 = vpop.permute.xlu2 %3946 }
 0x7ed   : > { %15727 = vst [vmem:[#allocation128_spill] sm:$0xff] %v9957_v37  ;;  %v9959_v56 = vpop.permute.xlu0 %3940  ;;  %v15736_v37 = vld [vmem:[#allocation21_spill] sm:$0xff] }
 0x7ee   : > { %15728 = vst [vmem:[#allocation131_spill] sm:$0xff] %v9959_v56  ;;  %v1343_v56 = vmul.f32 %v15735_v34, %v15416_v26  ;;  %v1345_v24 = vmul.f32 %v15737_v45, %v15736_v37  ;;  %v15745_v34 = vld [vmem:[#allocation135_spill] sm:$0xff]  ;;  %v15746_v45 = vld [vmem:[#allocation140_spill] sm:$0xff] }
 0x7ef   : > { %v1356_v51 = vmul.f32 %v15746_v45, %v15542_v16  ;;  %v15757_v45 = vld [vmem:[#allocation34_spill] sm:$0xff] }
 0x7f2   : > { %4140 = vperm.xlu1 %6764, %v1342_v60   ;;  %4130 = vperm.xlu2 %6765, %v1340_v58  }
 0x7f3   : > { %4180 = vperm.xlu0 %6766, %v1350_v39  }
 0x7f4   : > { %v9967_v6 = vpop.permute.xlu1 %3934  ;;  %v9969_v49 = vpop.permute.xlu2 %3952 }
 0x7f5   : > { %15732 = vst [vmem:[#allocation124_spill] sm:$0xff] %v9967_v6  ;;  %v9971_v44 = vpop.permute.xlu0 %3955  ;;  %v15744_v6 = vld [vmem:[#allocation26_spill] sm:$0xff] }
 0x7f6   : > { %15733 = vst [vmem:[#allocation130_spill] sm:$0xff] %v9969_v49  ;;  %v1348_v22 = vmul.f32 %v15745_v34, %v15744_v6  ;;  %v15753_v34 = vld [vmem:[#allocation143_spill] sm:$0xff] }
 0x7f7   : > { %15734 = vst [vmem:[#allocation134_spill] sm:$0xff] %v9971_v44  ;;  %v15743_v44 = vld [vmem:[#allocation20_spill] sm:$0xff]  ;;  %v1359_v21 = vmul.f32 %v15753_v34, %v15551_v15 }
 0x7f8   : > { %v1346_v49 = vmul.f32 %v15743_v44, %v15742_v9  ;;  %v15752_v44 = vld [vmem:[#allocation138_spill] sm:$0xff]  ;;  %v15764_v34 = vld [vmem:[#allocation40_spill] sm:$0xff] }
 0x7fa   : > { %4155 = vperm.xlu1 %6764, %v1345_v24   ;;  %4145 = vperm.xlu2 %6765, %v1343_v56  }
 0x7fb   : > { %4195 = vperm.xlu0 %6766, %v1353_v46  }
 0x7fc   : > { %v9979_v60 = vpop.permute.xlu1 %3943  ;;  %v9981_v39 = vpop.permute.xlu2 %3961 }
 0x7fd   : > { %15739 = vst [vmem:[#allocation16_spill] sm:$0xff] %v9979_v60  ;;  %v9983_v58 = vpop.permute.xlu0 %3964 }
 0x7fe   : > { %15740 = vst [vmem:[#allocation132_spill] sm:$0xff] %v9981_v39  ;;  %v15751_v39 = vld [vmem:[#allocation24_spill] sm:$0xff] }
 0x7ff   : > { %15741 = vst [vmem:[#allocation137_spill] sm:$0xff] %v9983_v58  ;;  %v1349_v60 = vmul.f32 %v15751_v39, %v15750_v12  ;;  %v1351_v58 = vmul.f32 %v15752_v44, %v15645_v53  ;;  %v15759_v39 = vld [vmem:[#allocation141_spill] sm:$0xff]  ;;  %v15760_v44 = vld [vmem:[#allocation146_spill] sm:$0xff] }
 0x800   : > { %v1362_v27 = vmul.f32 %v15760_v44, %v15453_v30 }
 0x802   : > { %4170 = vperm.xlu1 %6764, %v1348_v22   ;;  %4160 = vperm.xlu2 %6765, %v1346_v49  }
 0x803   : > { %4210 = vperm.xlu0 %6766, %v1356_v51  }
 0x804   : > { %v9991_v24 = vpop.permute.xlu1 %3949  ;;  %v9993_v46 = vpop.permute.xlu2 %3970 }
 0x805   : > { %15747 = vst [vmem:[#allocation20_spill] sm:$0xff] %v9991_v24  ;;  %v9995_v56 = vpop.permute.xlu0 %3973 }
 0x806   : > { %15748 = vst [vmem:[#allocation26_spill] sm:$0xff] %v9993_v46  ;;  %v15758_v46 = vld [vmem:[#allocation133_spill] sm:$0xff] }
 0x807   : > { %15749 = vst [vmem:[#allocation135_spill] sm:$0xff] %v9995_v56  ;;  %v1352_v24 = vmul.f32 %v15758_v46, %v15757_v45  ;;  %v1354_v56 = vmul.f32 %v15759_v39, %v15652_v40  ;;  %v15766_v46 = vld [vmem:[#allocation144_spill] sm:$0xff]  ;;  %v6973_v39 = vmov 4  }
 0x80a   : > { %4185 = vperm.xlu1 %6764, %v1351_v58   ;;  %4175 = vperm.xlu2 %6765, %v1349_v60  }
 0x80b   : > { %4225 = vperm.xlu0 %6766, %v1359_v21  }
 0x80c   : > { %v10003_v22 = vpop.permute.xlu1 %3958  ;;  %v10005_v51 = vpop.permute.xlu2 %3979 }
 0x80d   : > { %15754 = vst [vmem:[#allocation140_spill] sm:$0xff] %v10003_v22  ;;  %v10007_v49 = vpop.permute.xlu0 %3982  ;;  %v15765_v22 = vld [vmem:[#allocation136_spill] sm:$0xff] }
 0x80e   : > { %15755 = vst [vmem:[#allocation24_spill] sm:$0xff] %v10005_v51  ;;  %v1355_v51 = vmul.f32 %v15765_v22, %v15764_v34  ;;  %v15771_v22 = vld [vmem:[#allocation139_spill] sm:$0xff] }
 0x80f   : > { %15756 = vst [vmem:[#allocation138_spill] sm:$0xff] %v10007_v49  ;;  %v1357_v49 = vmul.f32 %v15766_v46, %v15659_v7  ;;  %v15772_v46 = vld [vmem:[#allocation147_spill] sm:$0xff] }
 0x812   : > { %4200 = vperm.xlu1 %6764, %v1354_v56   ;;  %4190 = vperm.xlu2 %6765, %v1352_v24   ;;  %v10026_v56 = vld [vmem:[%s7053_s27] sm:$0xff] }
 0x813   : > { %4240 = vperm.xlu0 %6766, %v1362_v27  }
 0x814   : > { %v10015_v21 = vpop.permute.xlu1 %3967  ;;  %v10017_v60 = vpop.permute.xlu2 %3988 }
 0x815   : > { %15761 = vst [vmem:[#allocation143_spill] sm:$0xff] %v10015_v21  ;;  %v10019_v58 = vpop.permute.xlu0 %3991  ;;  %v15770_v21 = vld [vmem:[#allocation46_spill] sm:$0xff] }
 0x816   : > { %15762 = vst [vmem:[#allocation133_spill] sm:$0xff] %v10017_v60  ;;  %v1358_v60 = vmul.f32 %v15771_v22, %v15770_v21 }
 0x817   : > { %15763 = vst [vmem:[#allocation141_spill] sm:$0xff] %v10019_v58 }
 0x81a   : > { %4215 = vperm.xlu1 %6764, %v1357_v49   ;;  %4205 = vperm.xlu2 %6765, %v1355_v51   ;;  %v1360_v49 = vmul.f32 %v15772_v46, %v15546_v57  ;;  %v10040_v51 = vld [vmem:[%s7053_s27 + $0x28] sm:$0xff]  ;;  %v1363_v46 = vmul.f32 %v15777_v32, %v15451_v28 }
 0x81b   : > { %6767 = vset.pattern.permute.xlu0 %v6973_v39  ;;  %v10066_v32 = vld [vmem:[%s7053_s27 + $0x8] sm:$0xff] }
 0x81c   : > { %4382 = vperm.xlu0 %6767, %v10026_v56   ;;  %v10029_v27 = vpop.permute.xlu1 %3976  ;;  %v10031_v24 = vpop.permute.xlu2 %3997 }
 0x81d   : > { %15767 = vst [vmem:[#allocation146_spill] sm:$0xff] %v10029_v27  ;;  %v10033_v44 = vpop.permute.xlu0 %4000 }
 0x81e   : > { %15768 = vst [vmem:[#allocation136_spill] sm:$0xff] %v10031_v24 }
 0x81f   : > { %15769 = vst [vmem:[#allocation144_spill] sm:$0xff] %v10033_v44  ;;  %v15776_v44 = vld [vmem:[#allocation142_spill] sm:$0xff] }
 0x820   : > { %v1361_v22 = vmul.f32 %v15776_v44, %v15452_v48 }
 0x822   : > { %4230 = vperm.xlu1 %6764, %v1360_v49   ;;  %4220 = vperm.xlu2 %6765, %v1358_v60   ;;  %v10054_v60 = vld [vmem:[%s7053_s27 + $0x40] sm:$0xff] }
 0x824   : > { %4397 = vperm.xlu0 %6767, %v10040_v51   ;;  %v10043_v58 = vpop.permute.xlu1 %3985  ;;  %v10045_v27 = vpop.permute.xlu2 %4006 }
 0x825   : > { %15773 = vst [vmem:[#allocation46_spill] sm:$0xff] %v10043_v58  ;;  %v10047_v24 = vpop.permute.xlu0 %4009 }
 0x826   : > { %15774 = vst [vmem:[#allocation139_spill] sm:$0xff] %v10045_v27 }
 0x827   : > { %15775 = vst [vmem:[#allocation147_spill] sm:$0xff] %v10047_v24  ;;  %v15781_v24 = vld [vmem:[#allocation145_spill] sm:$0xff] }
 0x828   : > { %v1364_v44 = vmul.f32 %v15781_v24, %v15457_v10  ;;  %v10080_v24 = vld [vmem:[%s7053_s27 + $0x18] sm:$0xff] }
 0x82a   : > { %4245 = vperm.xlu1 %6764, %v1363_v46   ;;  %4235 = vperm.xlu2 %6765, %v1361_v22   ;;  %v10070_v22 = vld [vmem:[%s7053_s27 + $0x58] sm:$0xff] }
 0x82c   : > { %4406 = vperm.xlu0 %6767, %v10054_v60   ;;  %v10057_v49 = vpop.permute.xlu1 %3994  ;;  %v10059_v27 = vpop.permute.xlu2 %4015 }
 0x82d   : > { %15778 = vst [vmem:[#allocation142_spill] sm:$0xff] %v10057_v49  ;;  %v10061_v58 = vpop.permute.xlu0 %4018  ;;  %v10088_v49 = vld [vmem:[%s7053_s27 + $0x70] sm:$0xff] }
 0x82e   : > { %15779 = vst [vmem:[#allocation148_spill] sm:$0xff] %v10059_v27 }
 0x82f   : > { %15780 = vst [vmem:[#allocation366_spill] sm:$0xff] %v10061_v58 }
 0x832   : > { %6768 = vset.pattern.permute.xlu1 %v6973_v39  ;;  %4250 = vperm.xlu2 %6765, %v1364_v44   ;;  %v10084_v44 = vld [vmem:[%s7053_s27 + $0x10] sm:$0xff] }
 0x833   : > { %4385 = vperm.xlu1 %6768, %v10066_v32  }
 0x834   : > { %4415 = vperm.xlu0 %6767, %v10070_v22   ;;  %v10073_v46 = vpop.permute.xlu1 %4003  ;;  %v10075_v27 = vpop.permute.xlu2 %4024 }
 0x835   : > { %15782 = vst [vmem:[#allocation145_spill] sm:$0xff] %v10073_v46  ;;  %v10077_v58 = vpop.permute.xlu0 %4027 }
 0x836   : > { %15783 = vst [vmem:[#allocation367_spill] sm:$0xff] %v10075_v27 }
 0x837   : > { %15784 = vst [vmem:[#allocation368_spill] sm:$0xff] %v10077_v58  ;;  %v10098_v58 = vld [vmem:[%s7053_s27 + $0x30] sm:$0xff] }
 0x83a   : > { %6769 = vset.pattern.permute.xlu2 %v6973_v39 }
 0x83b   : > { %4391 = vperm.xlu1 %6768, %v10080_v24   ;;  %4388 = vperm.xlu2 %6769, %v10084_v44  }
 0x83c   : > { %4424 = vperm.xlu0 %6767, %v10088_v49   ;;  %v10091_v46 = vpop.permute.xlu1 %4012  ;;  %v10093_v27 = vpop.permute.xlu2 %4100 }
 0x83d   : > { %15785 = vst [vmem:[#allocation369_spill] sm:$0xff] %v10091_v46  ;;  %v10095_v39 = vpop.permute.xlu0 %4105 }
 0x83e   : > { %15786 = vst [vmem:[#allocation370_spill] sm:$0xff] %v10093_v27 }
 0x83f   : > { %15787 = vst [vmem:[#allocation371_spill] sm:$0xff] %v10095_v39 }
 0x843   : > { %4400 = vperm.xlu1 %6768, %v10098_v58   ;;  %4394 = vperm.xlu2 %6769, %v10102_v54  }
 0x844   : > { %4433 = vperm.xlu0 %6767, %v10106_v17   ;;  %v10109_v46 = vpop.permute.xlu1 %4021  ;;  %v10111_v27 = vpop.permute.xlu2 %4115 }
 0x845   : > { %15788 = vst [vmem:[#allocation372_spill] sm:$0xff] %v10109_v46  ;;  %v10113_v39 = vpop.permute.xlu0 %4120 }
 0x846   : > { %15789 = vst [vmem:[#allocation373_spill] sm:$0xff] %v10111_v27 }
 0x847   : > { %15790 = vst [vmem:[#allocation374_spill] sm:$0xff] %v10113_v39 }
 0x84b   : > { %4409 = vperm.xlu1 %6768, %v10116_v50   ;;  %4403 = vperm.xlu2 %6769, %v10120_v38  }
 0x84c   : > { %4442 = vperm.xlu0 %6767, %v10124_v63   ;;  %v10127_v46 = vpop.permute.xlu1 %4095  ;;  %v10129_v27 = vpop.permute.xlu2 %4130 }
 0x84d   : > { %15792 = vst [vmem:[#allocation376_spill] sm:$0xff] %v10127_v46  ;;  %v10131_v39 = vpop.permute.xlu0 %4135 }
 0x84e   : > { %15793 = vst [vmem:[#allocation377_spill] sm:$0xff] %v10129_v27 }
 0x84f   : > { %15794 = vst [vmem:[#allocation378_spill] sm:$0xff] %v10131_v39 }
 0x853   : > { %4418 = vperm.xlu1 %6768, %v10134_v2   ;;  %4412 = vperm.xlu2 %6769, %v10138_v55  }
 0x854   : > { %4451 = vperm.xlu0 %6767, %v10142_v18   ;;  %v10145_v46 = vpop.permute.xlu1 %4110  ;;  %v10147_v27 = vpop.permute.xlu2 %4145 }
 0x855   : > { %15796 = vst [vmem:[#allocation380_spill] sm:$0xff] %v10145_v46  ;;  %v10149_v39 = vpop.permute.xlu0 %4150 }
 0x856   : > { %15797 = vst [vmem:[#allocation381_spill] sm:$0xff] %v10147_v27 }
 0x857   : > { %15798 = vst [vmem:[#allocation382_spill] sm:$0xff] %v10149_v39  ;;  %v10170_v39 = vld [vmem:[%s7053_s27 + $0x90] sm:$0xff] }
 0x85b   : > { %4427 = vperm.xlu1 %6768, %v10152_v8   ;;  %4421 = vperm.xlu2 %6769, %v10156_v31  }
 0x85c   : > { %4460 = vperm.xlu0 %6767, %v10160_v19   ;;  %v10163_v46 = vpop.permute.xlu1 %4125  ;;  %v10165_v14 = vpop.permute.xlu2 %4160 }
 0x85d   : > { %15800 = vst [vmem:[#allocation384_spill] sm:$0xff] %v10163_v46  ;;  %v10167_v27 = vpop.permute.xlu0 %4165 }
 0x85e   : > { %15801 = vst [vmem:[#allocation385_spill] sm:$0xff] %v10165_v14 }
 0x85f   : > { %15802 = vst [vmem:[#allocation386_spill] sm:$0xff] %v10167_v27  ;;  %v15807_v27 = vld [vmem:[#allocation149_spill] sm:$0xff] }
 0x860   : > { %v1621_v0 = vmul.f32 %v15807_v27, %v15708_v59  ;;  %v10210_v59 = vld [vmem:[%s7053_s27 + $0xb0] sm:$0xff] }
 0x863   : > { %4436 = vperm.xlu1 %6768, %v10170_v39   ;;  %4430 = vperm.xlu2 %6769, %v10174_v1  }
 0x864   : > { %4469 = vperm.xlu0 %6767, %v10178_v23   ;;  %v10181_v47 = vpop.permute.xlu1 %4140  ;;  %v10183_v46 = vpop.permute.xlu2 %4175  ;;  %v10226_v23 = vld [vmem:[%s7053_s27 + $0xc8] sm:$0xff] }
 0x865   : > { %15804 = vst [vmem:[#allocation388_spill] sm:$0xff] %v10181_v47  ;;  %v10185_v14 = vpop.permute.xlu0 %4180 }
 0x866   : > { %15805 = vst [vmem:[#allocation389_spill] sm:$0xff] %v10183_v46 }
 0x867   : > { %15806 = vst [vmem:[#allocation390_spill] sm:$0xff] %v10185_v14  ;;  %v15811_v14 = vld [vmem:[#allocation150_spill] sm:$0xff] }
 0x868   : > { %v1624_v27 = vmul.f32 %v15811_v14, %v15610_v13  ;;  %15812 = vst [vmem:[#allocation150_spill] sm:$0xff] %v10206_v43  ;;  %v10222_v13 = vld [vmem:[%s7053_s27 + $0xd8] sm:$0xff] }
 0x869   : > { %15818 = vst [vmem:[#allocation396_spill] sm:$0xff] %v10226_v23 }
 0x86b   : > { %4445 = vperm.xlu1 %6768, %v10190_v5   ;;  %4439 = vperm.xlu2 %6769, %v10194_v25  }
 0x86c   : > { %4543 = vperm.xlu0 %6767, %v1621_v0   ;;  %v10197_v62 = vpop.permute.xlu1 %4155  ;;  %v10199_v47 = vpop.permute.xlu2 %4190 }
 0x86d   : > { %15808 = vst [vmem:[#allocation149_spill] sm:$0xff] %v10197_v62  ;;  %v10201_v46 = vpop.permute.xlu0 %4195 }
 0x86e   : > { %15809 = vst [vmem:[#allocation391_spill] sm:$0xff] %v10199_v47 }
 0x86f   : > { %15810 = vst [vmem:[#allocation392_spill] sm:$0xff] %v10201_v46  ;;  %v15816_v46 = vld [vmem:[#allocation151_spill] sm:$0xff] }
 0x870   : > { %v1627_v14 = vmul.f32 %v15816_v46, %v15403_v35  ;;  %15817 = vst [vmem:[#allocation151_spill] sm:$0xff] %v10222_v13  ;;  %v10238_v46 = vld [vmem:[%s7053_s27 + $0xf0] sm:$0xff]  ;;  %v10242_v35 = vld [vmem:[%s7053_s27 + $0xe0] sm:$0xff] }
 0x871   : > { %15824 = vst [vmem:[#allocation400_spill] sm:$0xff] %v10242_v35 }
 0x873   : > { %4454 = vperm.xlu1 %6768, %v10206_v43   ;;  %4448 = vperm.xlu2 %6769, %v10210_v59  }
 0x874   : > { %4558 = vperm.xlu0 %6767, %v1624_v27   ;;  %v10213_v0 = vpop.permute.xlu1 %4170  ;;  %v10215_v62 = vpop.permute.xlu2 %4205 }
 0x875   : > { %15813 = vst [vmem:[#allocation393_spill] sm:$0xff] %v10213_v0  ;;  %v10217_v47 = vpop.permute.xlu0 %4210 }
 0x876   : > { %15814 = vst [vmem:[#allocation394_spill] sm:$0xff] %v10215_v62 }
 0x877   : > { %15815 = vst [vmem:[#allocation395_spill] sm:$0xff] %v10217_v47  ;;  %v15822_v47 = vld [vmem:[#allocation153_spill] sm:$0xff] }
 0x878   : > { %v1630_v19 = vmul.f32 %v15822_v47, %v15409_v4  ;;  %15823 = vst [vmem:[#allocation153_spill] sm:$0xff] %v10238_v46  ;;  %v15829_v47 = vld [vmem:[#allocation154_spill] sm:$0xff] }
 0x879   : > { %v1633_v4 = vmul.f32 %v15829_v47, %v15736_v37  ;;  %v15836_v47 = vld [vmem:[#allocation156_spill] sm:$0xff] }
 0x87b   : > { %4463 = vperm.xlu1 %6768, %v10222_v13   ;;  %4457 = vperm.xlu2 %6769, %v10226_v23   ;;  %v10256_v23 = vld [vmem:[%s7053_s27 + $0xf8] sm:$0xff] }
 0x87c   : > { %4573 = vperm.xlu0 %6767, %v1627_v14   ;;  %v10229_v27 = vpop.permute.xlu1 %4185  ;;  %v10231_v0 = vpop.permute.xlu2 %4220 }
 0x87d   : > { %15819 = vst [vmem:[#allocation397_spill] sm:$0xff] %v10229_v27  ;;  %v10233_v62 = vpop.permute.xlu0 %4225 }
 0x87e   : > { %15820 = vst [vmem:[#allocation398_spill] sm:$0xff] %v10231_v0 }
 0x87f   : > { %15821 = vst [vmem:[#allocation399_spill] sm:$0xff] %v10233_v62  ;;  %v15828_v62 = vld [vmem:[#allocation155_spill] sm:$0xff] }
 0x880   : > { %v1622_v0 = vmul.f32 %v15828_v62, %v15715_v3  ;;  %15830 = vst [vmem:[#allocation155_spill] sm:$0xff] %v10256_v23  ;;  %v15835_v62 = vld [vmem:[#allocation157_spill] sm:$0xff] }
 0x881   : > { %v1625_v63 = vmul.f32 %v15835_v62, %v15722_v20  ;;  %v15842_v62 = vld [vmem:[#allocation158_spill] sm:$0xff] }
 0x883   : > { %4472 = vperm.xlu1 %6768, %v10238_v46   ;;  %4466 = vperm.xlu2 %6769, %v10242_v35  }
 0x884   : > { %4588 = vperm.xlu0 %6767, %v1630_v19   ;;  %v10245_v14 = vpop.permute.xlu1 %4200  ;;  %v10247_v18 = vpop.permute.xlu2 %4235 }
 0x885   : > { %15825 = vst [vmem:[#allocation401_spill] sm:$0xff] %v10245_v14  ;;  %v10249_v27 = vpop.permute.xlu0 %4240 }
 0x886   : > { %15826 = vst [vmem:[#allocation402_spill] sm:$0xff] %v10247_v18 }
 0x887   : > { %15827 = vst [vmem:[#allocation403_spill] sm:$0xff] %v10249_v27  ;;  %v15834_v27 = vld [vmem:[#allocation152_spill] sm:$0xff] }
 0x888   : > { %v1623_v18 = vmul.f32 %v15834_v27, %v15399_v33  ;;  %v15841_v27 = vld [vmem:[#allocation159_spill] sm:$0xff] }
 0x889   : > { %v1628_v33 = vmul.f32 %v15841_v27, %v15410_v29  ;;  %v15848_v27 = vld [vmem:[#allocation161_spill] sm:$0xff] }
 0x88b   : > { %4548 = vperm.xlu1 %6768, %v1622_v0   ;;  %4475 = vperm.xlu2 %6769, %v10256_v23   ;;  %v1636_v0 = vmul.f32 %v15836_v47, %v15744_v6  ;;  %v1639_v23 = vmul.f32 %v15842_v62, %v15645_v53  ;;  %v15852_v62 = vld [vmem:[#allocation36_spill] sm:$0xff] }
 0x88c   : > { %4603 = vperm.xlu0 %6767, %v1633_v4   ;;  %v10259_v35 = vpop.permute.xlu1 %4215  ;;  %v10261_v19 = vpop.permute.xlu2 %4250 }
 0x88d   : > { %15831 = vst [vmem:[#allocation154_spill] sm:$0xff] %v10259_v35 }
 0x88e   : > { %15832 = vst [vmem:[#allocation404_spill] sm:$0xff] %v10261_v19  ;;  %v10263_v14 = vpop.permute.xlu0 %4382 }
 0x88f   : > { %15833 = vst [vmem:[#allocation405_spill] sm:$0xff] %v10263_v14  ;;  %v15840_v14 = vld [vmem:[#allocation25_spill] sm:$0xff] }
 0x890   : > { %v1626_v19 = vmul.f32 %v15840_v14, %v15405_v36  ;;  %v15847_v14 = vld [vmem:[#allocation162_spill] sm:$0xff] }
 0x893   : > { %4563 = vperm.xlu1 %6768, %v1625_v63   ;;  %4553 = vperm.xlu2 %6769, %v1623_v18  }
 0x894   : > { %4618 = vperm.xlu0 %6767, %v1636_v0   ;;  %v10271_v37 = vpop.permute.xlu1 %4230  ;;  %v15846_v0 = vld [vmem:[#allocation30_spill] sm:$0xff] }
 0x895   : > { %15837 = vst [vmem:[#allocation152_spill] sm:$0xff] %v10271_v37  ;;  %v10273_v4 = vpop.permute.xlu2 %4388  ;;  %v1642_v37 = vmul.f32 %v15848_v27, %v15652_v40  ;;  %v15858_v27 = vld [vmem:[#allocation160_spill] sm:$0xff] }
 0x896   : > { %15838 = vst [vmem:[#allocation157_spill] sm:$0xff] %v10273_v4  ;;  %v10275_v35 = vpop.permute.xlu0 %4397  ;;  %v1631_v4 = vmul.f32 %v15847_v14, %v15416_v26  ;;  %v15854_v14 = vld [vmem:[#allocation164_spill] sm:$0xff] }
 0x897   : > { %15839 = vst [vmem:[#allocation156_spill] sm:$0xff] %v10275_v35  ;;  %v1629_v35 = vmul.f32 %v15846_v0, %v15411_v11  ;;  %v15853_v0 = vld [vmem:[#allocation165_spill] sm:$0xff] }
 0x89b   : > { %4578 = vperm.xlu1 %6768, %v1628_v33   ;;  %4568 = vperm.xlu2 %6769, %v1626_v19  }
 0x89c   : > { %4633 = vperm.xlu0 %6767, %v1639_v23   ;;  %v10283_v63 = vpop.permute.xlu1 %4245 }
 0x89d   : > { %15843 = vst [vmem:[#allocation25_spill] sm:$0xff] %v10283_v63  ;;  %v10285_v18 = vpop.permute.xlu2 %4394  ;;  %v1645_v63 = vmul.f32 %v15854_v14, %v15659_v7  ;;  %v15864_v14 = vld [vmem:[#allocation163_spill] sm:$0xff] }
 0x89e   : > { %15844 = vst [vmem:[#allocation159_spill] sm:$0xff] %v10285_v18  ;;  %v10287_v47 = vpop.permute.xlu0 %4406  ;;  %v1634_v18 = vmul.f32 %v15853_v0, %v15742_v9  ;;  %v15860_v0 = vld [vmem:[#allocation167_spill] sm:$0xff] }
 0x89f   : > { %15845 = vst [vmem:[#allocation158_spill] sm:$0xff] %v10287_v47  ;;  %v1632_v47 = vmul.f32 %v15852_v62, %v15417_v52  ;;  %v15859_v62 = vld [vmem:[#allocation168_spill] sm:$0xff] }
 0x8a3   : > { %4593 = vperm.xlu1 %6768, %v1631_v4   ;;  %4583 = vperm.xlu2 %6769, %v1629_v35  }
 0x8a4   : > { %4648 = vperm.xlu0 %6767, %v1642_v37  }
 0x8a5   : > { %v10295_v33 = vpop.permute.xlu1 %4385  ;;  %v10297_v23 = vpop.permute.xlu2 %4403 }
 0x8a6   : > { %15849 = vst [vmem:[#allocation30_spill] sm:$0xff] %v10295_v33  ;;  %v10299_v19 = vpop.permute.xlu0 %4415  ;;  %v1648_v33 = vmul.f32 %v15860_v0, %v15546_v57  ;;  %v15870_v0 = vld [vmem:[#allocation166_spill] sm:$0xff] }
 0x8a7   : > { %15850 = vst [vmem:[#allocation162_spill] sm:$0xff] %v10297_v23  ;;  %v1637_v23 = vmul.f32 %v15859_v62, %v15750_v12  ;;  %v15866_v62 = vld [vmem:[#allocation170_spill] sm:$0xff] }
 0x8a8   : > { %15851 = vst [vmem:[#allocation161_spill] sm:$0xff] %v10299_v19  ;;  %v1635_v19 = vmul.f32 %v15858_v27, %v15423_v41  ;;  %v15865_v27 = vld [vmem:[#allocation171_spill] sm:$0xff] }
 0x8ab   : > { %4608 = vperm.xlu1 %6768, %v1634_v18   ;;  %4598 = vperm.xlu2 %6769, %v1632_v47  }
 0x8ac   : > { %4663 = vperm.xlu0 %6767, %v1645_v63  }
 0x8ad   : > { %v10307_v35 = vpop.permute.xlu1 %4391  ;;  %v10309_v37 = vpop.permute.xlu2 %4412 }
 0x8ae   : > { %15855 = vst [vmem:[#allocation36_spill] sm:$0xff] %v10307_v35  ;;  %v10311_v4 = vpop.permute.xlu0 %4424  ;;  %v1640_v35 = vmul.f32 %v15865_v27, %v15757_v45  ;;  %v6974_v27 = vmov 5  }
 0x8af   : > { %15856 = vst [vmem:[#allocation165_spill] sm:$0xff] %v10309_v37  ;;  %v1651_v37 = vmul.f32 %v15866_v62, %v15451_v28  ;;  %v15875_v62 = vld [vmem:[#allocation169_spill] sm:$0xff] }
 0x8b0   : > { %15857 = vst [vmem:[#allocation164_spill] sm:$0xff] %v10311_v4  ;;  %v1638_v4 = vmul.f32 %v15864_v14, %v15634_v61  ;;  %v15871_v14 = vld [vmem:[#allocation173_spill] sm:$0xff] }
 0x8b3   : > { %4623 = vperm.xlu1 %6768, %v1637_v23   ;;  %4613 = vperm.xlu2 %6769, %v1635_v19  }
 0x8b4   : > { %4678 = vperm.xlu0 %6767, %v1648_v33  }
 0x8b5   : > { %v10319_v18 = vpop.permute.xlu1 %4400  ;;  %v10321_v63 = vpop.permute.xlu2 %4421 }
 0x8b6   : > { %15861 = vst [vmem:[#allocation160_spill] sm:$0xff] %v10319_v18  ;;  %v10323_v47 = vpop.permute.xlu0 %4433  ;;  %v1641_v18 = vmul.f32 %v15870_v0, %v15643_v42  ;;  %v15876_v0 = vld [vmem:[#allocation175_spill] sm:$0xff] }
 0x8b7   : > { %15862 = vst [vmem:[#allocation168_spill] sm:$0xff] %v10321_v63 }
 0x8b8   : > { %15863 = vst [vmem:[#allocation167_spill] sm:$0xff] %v10323_v47  ;;  %v1643_v47 = vmul.f32 %v15871_v14, %v15764_v34 }
 0x8bb   : > { %4638 = vperm.xlu1 %6768, %v1640_v35   ;;  %4628 = vperm.xlu2 %6769, %v1638_v4  }
 0x8bc   : > { %4693 = vperm.xlu0 %6767, %v1651_v37  }
 0x8bd   : > { %v10331_v23 = vpop.permute.xlu1 %4409  ;;  %v10333_v33 = vpop.permute.xlu2 %4430 }
 0x8be   : > { %15867 = vst [vmem:[#allocation163_spill] sm:$0xff] %v10331_v23  ;;  %v10335_v19 = vpop.permute.xlu0 %4442  ;;  %v1644_v23 = vmul.f32 %v15875_v62, %v15542_v16 }
 0x8bf   : > { %15868 = vst [vmem:[#allocation171_spill] sm:$0xff] %v10333_v33 }
 0x8c0   : > { %15869 = vst [vmem:[#allocation170_spill] sm:$0xff] %v10335_v19  ;;  %v1646_v19 = vmul.f32 %v15876_v0, %v15770_v21  ;;  %v15885_v0 = vld [vmem:[#allocation174_spill] sm:$0xff] }
 0x8c3   : > { %4653 = vperm.xlu1 %6768, %v1643_v47   ;;  %4643 = vperm.xlu2 %6769, %v1641_v18  }
 0x8c4   : > { %6771 = vset.pattern.permute.xlu0 %v6974_v27 }
 0x8c5   : > { %4833 = vperm.xlu0 %6771, %v10066_v32   ;;  %v10342_v35 = vpop.permute.xlu1 %4418  ;;  %v10344_v37 = vpop.permute.xlu2 %4439 }
 0x8c6   : > { %15872 = vst [vmem:[#allocation166_spill] sm:$0xff] %v10342_v35  ;;  %v10346_v4 = vpop.permute.xlu0 %4451  ;;  %v15880_v35 = vld [vmem:[#allocation172_spill] sm:$0xff] }
 0x8c7   : > { %15873 = vst [vmem:[#allocation173_spill] sm:$0xff] %v10344_v37  ;;  %v1647_v37 = vmul.f32 %v15880_v35, %v15551_v15 }
 0x8c8   : > { %15874 = vst [vmem:[#allocation406_spill] sm:$0xff] %v10346_v4  ;;  %v15881_v4 = vld [vmem:[#allocation176_spill] sm:$0xff] }
 0x8c9   : > { %v1649_v33 = vmul.f32 %v15881_v4, %v15452_v48 }
 0x8cb   : > { %4668 = vperm.xlu1 %6768, %v1646_v19   ;;  %4658 = vperm.xlu2 %6769, %v1644_v23  }
 0x8cd   : > { %4848 = vperm.xlu0 %6771, %v10098_v58   ;;  %v10353_v18 = vpop.permute.xlu1 %4427  ;;  %v10355_v47 = vpop.permute.xlu2 %4448 }
 0x8ce   : > { %15877 = vst [vmem:[#allocation169_spill] sm:$0xff] %v10353_v18  ;;  %v10357_v14 = vpop.permute.xlu0 %4460 }
 0x8cf   : > { %15878 = vst [vmem:[#allocation175_spill] sm:$0xff] %v10355_v47  ;;  %v1650_v47 = vmul.f32 %v15885_v0, %v15453_v30 }
 0x8d0   : > { %15879 = vst [vmem:[#allocation407_spill] sm:$0xff] %v10357_v14  ;;  %v15886_v14 = vld [vmem:[#allocation177_spill] sm:$0xff] }
 0x8d1   : > { %v1652_v63 = vmul.f32 %v15886_v14, %v15457_v10 }
 0x8d3   : > { %4683 = vperm.xlu1 %6768, %v1649_v33   ;;  %4673 = vperm.xlu2 %6769, %v1647_v37  }
 0x8d5   : > { %4857 = vperm.xlu0 %6771, %v10116_v50   ;;  %v10364_v19 = vpop.permute.xlu1 %4436  ;;  %v10366_v23 = vpop.permute.xlu2 %4457 }
 0x8d6   : > { %15882 = vst [vmem:[#allocation172_spill] sm:$0xff] %v10364_v19  ;;  %v10368_v62 = vpop.permute.xlu0 %4469 }
 0x8d7   : > { %15883 = vst [vmem:[#allocation176_spill] sm:$0xff] %v10366_v23 }
 0x8d8   : > { %15884 = vst [vmem:[#allocation408_spill] sm:$0xff] %v10368_v62 }
 0x8db   : > { %4698 = vperm.xlu1 %6768, %v1652_v63   ;;  %4688 = vperm.xlu2 %6769, %v1650_v47  }
 0x8dd   : > { %4866 = vperm.xlu0 %6771, %v10134_v2   ;;  %v10375_v33 = vpop.permute.xlu1 %4445  ;;  %v10377_v35 = vpop.permute.xlu2 %4466 }
 0x8de   : > { %15887 = vst [vmem:[#allocation174_spill] sm:$0xff] %v10375_v33  ;;  %v10379_v37 = vpop.permute.xlu0 %4543 }
 0x8df   : > { %15888 = vst [vmem:[#allocation177_spill] sm:$0xff] %v10377_v35 }
 0x8e0   : > { %15889 = vst [vmem:[#allocation409_spill] sm:$0xff] %v10379_v37 }
 0x8e3   : > { %6772 = vset.pattern.permute.xlu1 %v6974_v27  ;;  %6770 = vset.pattern.permute.xlu2 %v6974_v27 }
 0x8e4   : > { %4836 = vperm.xlu1 %6772, %v10084_v44   ;;  %4830 = vperm.xlu2 %6770, %v10026_v56  }
 0x8e5   : > { %4875 = vperm.xlu0 %6771, %v10152_v8   ;;  %v10384_v4 = vpop.permute.xlu1 %4454  ;;  %v10386_v63 = vpop.permute.xlu2 %4475 }
 0x8e6   : > { %15890 = vst [vmem:[#allocation410_spill] sm:$0xff] %v10384_v4  ;;  %v10388_v47 = vpop.permute.xlu0 %4558  ;;  %v15908_v4 = vld [vmem:[#allocation178_spill] sm:$0xff] }
 0x8e7   : > { %15891 = vst [vmem:[#allocation411_spill] sm:$0xff] %v10386_v63  ;;  %v1910_v35 = vmul.f32 %v15908_v4, %v15715_v3  ;;  %v15938_v3 = vld [vmem:[#allocation182_spill] sm:$0xff] }
 0x8e8   : > { %15892 = vst [vmem:[#allocation412_spill] sm:$0xff] %v10388_v47 }
 0x8ec   : > { %4842 = vperm.xlu1 %6772, %v10102_v54   ;;  %4839 = vperm.xlu2 %6770, %v10080_v24  }
 0x8ed   : > { %4884 = vperm.xlu0 %6771, %v10170_v39   ;;  %v10393_v14 = vpop.permute.xlu1 %4463  ;;  %v10395_v27 = vpop.permute.xlu2 %4553 }
 0x8ee   : > { %15893 = vst [vmem:[#allocation413_spill] sm:$0xff] %v10393_v14  ;;  %v10397_v0 = vpop.permute.xlu0 %4573 }
 0x8ef   : > { %15894 = vst [vmem:[#allocation414_spill] sm:$0xff] %v10395_v27 }
 0x8f0   : > { %15895 = vst [vmem:[#allocation415_spill] sm:$0xff] %v10397_v0 }
 0x8f4   : > { %4851 = vperm.xlu1 %6772, %v10120_v38   ;;  %4845 = vperm.xlu2 %6770, %v10040_v51  }
 0x8f5   : > { %4893 = vperm.xlu0 %6771, %v10190_v5   ;;  %v10402_v37 = vpop.permute.xlu1 %4472  ;;  %v10404_v47 = vpop.permute.xlu2 %4568 }
 0x8f6   : > { %15896 = vst [vmem:[#allocation416_spill] sm:$0xff] %v10402_v37  ;;  %v10406_v63 = vpop.permute.xlu0 %4588 }
 0x8f7   : > { %15897 = vst [vmem:[#allocation417_spill] sm:$0xff] %v10404_v47 }
 0x8f8   : > { %15898 = vst [vmem:[#allocation418_spill] sm:$0xff] %v10406_v63 }
 0x8fc   : > { %4860 = vperm.xlu1 %6772, %v10138_v55   ;;  %4854 = vperm.xlu2 %6770, %v10054_v60  }
 0x8fd   : > { %4902 = vperm.xlu0 %6771, %v10206_v43   ;;  %v10411_v27 = vpop.permute.xlu1 %4548  ;;  %v10413_v0 = vpop.permute.xlu2 %4583 }
 0x8fe   : > { %15899 = vst [vmem:[#allocation419_spill] sm:$0xff] %v10411_v27  ;;  %v10415_v14 = vpop.permute.xlu0 %4603 }
 0x8ff   : > { %15900 = vst [vmem:[#allocation420_spill] sm:$0xff] %v10413_v0 }
 0x900   : > { %15901 = vst [vmem:[#allocation421_spill] sm:$0xff] %v10415_v14 }
 0x904   : > { %4869 = vperm.xlu1 %6772, %v10156_v31   ;;  %4863 = vperm.xlu2 %6770, %v10070_v22  }
 0x905   : > { %4911 = vperm.xlu0 %6771, %v10222_v13   ;;  %v10420_v47 = vpop.permute.xlu1 %4563  ;;  %v10422_v63 = vpop.permute.xlu2 %4598  ;;  %v15939_v13 = vld [vmem:[#allocation190_spill] sm:$0xff] }
 0x906   : > { %15902 = vst [vmem:[#allocation422_spill] sm:$0xff] %v10420_v47  ;;  %v10424_v37 = vpop.permute.xlu0 %4618 }
 0x907   : > { %15903 = vst [vmem:[#allocation423_spill] sm:$0xff] %v10422_v63 }
 0x908   : > { %15904 = vst [vmem:[#allocation424_spill] sm:$0xff] %v10424_v37 }
 0x90c   : > { %4878 = vperm.xlu1 %6772, %v10174_v1   ;;  %4872 = vperm.xlu2 %6770, %v10088_v49  }
 0x90d   : > { %4920 = vperm.xlu0 %6771, %v10238_v46   ;;  %v10429_v0 = vpop.permute.xlu1 %4578  ;;  %v10431_v14 = vpop.permute.xlu2 %4613 }
 0x90e   : > { %15905 = vst [vmem:[#allocation425_spill] sm:$0xff] %v10429_v0  ;;  %v10433_v27 = vpop.permute.xlu0 %4633  ;;  %v15912_v0 = vld [vmem:[#allocation179_spill] sm:$0xff] }
 0x90f   : > { %15906 = vst [vmem:[#allocation426_spill] sm:$0xff] %v10431_v14  ;;  %v1913_v23 = vmul.f32 %v15912_v0, %v15722_v20  ;;  %v15913_v14 = vld [vmem:[#allocation375_spill] sm:$0xff] }
 0x910   : > { %15907 = vst [vmem:[#allocation427_spill] sm:$0xff] %v10433_v27 }
 0x914   : > { %4887 = vperm.xlu1 %6772, %v10194_v25   ;;  %4881 = vperm.xlu2 %6770, %v10106_v17  }
 0x915   : > { %4996 = vperm.xlu0 %6771, %v1910_v35   ;;  %v10439_v63 = vpop.permute.xlu1 %4593  ;;  %v10441_v47 = vpop.permute.xlu2 %4628  ;;  %v15917_v35 = vld [vmem:[#allocation181_spill] sm:$0xff] }
 0x916   : > { %15909 = vst [vmem:[#allocation178_spill] sm:$0xff] %v10439_v63  ;;  %v10443_v33 = vpop.permute.xlu0 %4648  ;;  %v1916_v62 = vmul.f32 %v15917_v35, %v15410_v29 }
 0x917   : > { %15910 = vst [vmem:[#allocation428_spill] sm:$0xff] %v10441_v47  ;;  %v15918_v47 = vld [vmem:[#allocation396_spill] sm:$0xff] }
 0x918   : > { %15911 = vst [vmem:[#allocation429_spill] sm:$0xff] %v10443_v33  ;;  %v15919_v33 = vld [vmem:[#allocation379_spill] sm:$0xff] }
 0x91c   : > { %4896 = vperm.xlu1 %6772, %v10210_v59   ;;  %4890 = vperm.xlu2 %6770, %v15913_v14  }
 0x91d   : > { %5011 = vperm.xlu0 %6771, %v1913_v23   ;;  %v10449_v4 = vpop.permute.xlu1 %4608  ;;  %v10451_v27 = vpop.permute.xlu2 %4643  ;;  %v15923_v23 = vld [vmem:[#allocation184_spill] sm:$0xff] }
 0x91e   : > { %15914 = vst [vmem:[#allocation179_spill] sm:$0xff] %v10449_v4  ;;  %v10453_v19 = vpop.permute.xlu0 %4663  ;;  %v1919_v4 = vmul.f32 %v15923_v23, %v15416_v26 }
 0x91f   : > { %15915 = vst [vmem:[#allocation375_spill] sm:$0xff] %v10451_v27  ;;  %v15924_v27 = vld [vmem:[#allocation400_spill] sm:$0xff] }
 0x920   : > { %15916 = vst [vmem:[#allocation430_spill] sm:$0xff] %v10453_v19  ;;  %v15925_v19 = vld [vmem:[#allocation383_spill] sm:$0xff] }
 0x924   : > { %4905 = vperm.xlu1 %6772, %v15918_v47   ;;  %4899 = vperm.xlu2 %6770, %v15919_v33  }
 0x925   : > { %5026 = vperm.xlu0 %6771, %v1916_v62   ;;  %v10459_v0 = vpop.permute.xlu1 %4623  ;;  %v10461_v63 = vpop.permute.xlu2 %4658  ;;  %v15929_v62 = vld [vmem:[#allocation187_spill] sm:$0xff] }
 0x926   : > { %15920 = vst [vmem:[#allocation181_spill] sm:$0xff] %v10459_v0  ;;  %v10463_v37 = vpop.permute.xlu0 %4678  ;;  %v1922_v0 = vmul.f32 %v15929_v62, %v15742_v9  ;;  %v1925_v62 = vmul.f32 %v15939_v13, %v15750_v12 }
 0x927   : > { %15921 = vst [vmem:[#allocation396_spill] sm:$0xff] %v10461_v63  ;;  %v15930_v63 = vld [vmem:[#allocation155_spill] sm:$0xff] }
 0x928   : > { %15922 = vst [vmem:[#allocation379_spill] sm:$0xff] %v10463_v37  ;;  %v15931_v37 = vld [vmem:[#allocation387_spill] sm:$0xff] }
 0x92c   : > { %4914 = vperm.xlu1 %6772, %v15924_v27   ;;  %4908 = vperm.xlu2 %6770, %v15925_v19  }
 0x92d   : > { %5041 = vperm.xlu0 %6771, %v1919_v4   ;;  %v10469_v35 = vpop.permute.xlu1 %4638  ;;  %v10471_v18 = vpop.permute.xlu2 %4673  ;;  %v15935_v4 = vld [vmem:[#allocation5_spill] sm:$0xff] }
 0x92e   : > { %15926 = vst [vmem:[#allocation184_spill] sm:$0xff] %v10469_v35  ;;  %v10473_v46 = vpop.permute.xlu0 %4693  ;;  %v15936_v35 = vld [vmem:[#allocation180_spill] sm:$0xff] }
 0x92f   : > { %15927 = vst [vmem:[#allocation400_spill] sm:$0xff] %v10471_v18  ;;  %v1911_v20 = vmul.f32 %v15936_v35, %v15935_v4  ;;  %v15937_v18 = vld [vmem:[#allocation6_spill] sm:$0xff]  ;;  %v15945_v35 = vld [vmem:[#allocation185_spill] sm:$0xff] }
 0x930   : > { %15928 = vst [vmem:[#allocation383_spill] sm:$0xff] %v10473_v46  ;;  %v1909_v46 = vmul.f32 %v15938_v3, %v15937_v18  ;;  %v15946_v3 = vld [vmem:[#allocation32_spill] sm:$0xff] }
 0x931   : > { %v1928_v18 = vmul.f32 %v15946_v3, %v15757_v45  ;;  %v15957_v3 = vld [vmem:[#allocation189_spill] sm:$0xff] }
 0x934   : > { %4923 = vperm.xlu1 %6772, %v15930_v63   ;;  %4917 = vperm.xlu2 %6770, %v15931_v37   ;;  %v15944_v37 = vld [vmem:[#allocation9_spill] sm:$0xff] }
 0x935   : > { %5056 = vperm.xlu0 %6771, %v1922_v0   ;;  %v10479_v23 = vpop.permute.xlu1 %4653  ;;  %v10481_v26 = vpop.permute.xlu2 %4688  ;;  %v1912_v43 = vmul.f32 %v15945_v35, %v15944_v37  ;;  %v15953_v35 = vld [vmem:[#allocation38_spill] sm:$0xff] }
 0x936   : > { %15932 = vst [vmem:[#allocation187_spill] sm:$0xff] %v10479_v23  ;;  %v1931_v12 = vmul.f32 %v15953_v35, %v15764_v34  ;;  %v15964_v35 = vld [vmem:[#allocation192_spill] sm:$0xff] }
 0x937   : > { %15933 = vst [vmem:[#allocation155_spill] sm:$0xff] %v10481_v26  ;;  %v10483_v29 = vpop.permute.xlu0 %4833 }
 0x938   : > { %15934 = vst [vmem:[#allocation431_spill] sm:$0xff] %v10483_v29  ;;  %v15943_v29 = vld [vmem:[#allocation183_spill] sm:$0xff] }
 0x939   : > { %v1914_v26 = vmul.f32 %v15943_v29, %v15405_v36  ;;  %v15952_v29 = vld [vmem:[#allocation188_spill] sm:$0xff] }
 0x93c   : > { %5001 = vperm.xlu1 %6772, %v1911_v20   ;;  %4991 = vperm.xlu2 %6770, %v1909_v46  }
 0x93d   : > { %5071 = vperm.xlu0 %6771, %v1925_v62   ;;  %v10491_v9 = vpop.permute.xlu1 %4668  ;;  %v15950_v62 = vld [vmem:[#allocation186_spill] sm:$0xff] }
 0x93e   : > { %15940 = vst [vmem:[#allocation5_spill] sm:$0xff] %v10491_v9  ;;  %v10493_v0 = vpop.permute.xlu2 %4830 }
 0x93f   : > { %15941 = vst [vmem:[#allocation180_spill] sm:$0xff] %v10493_v0  ;;  %v10495_v23 = vpop.permute.xlu0 %4848  ;;  %v15951_v0 = vld [vmem:[#allocation13_spill] sm:$0xff] }
 0x940   : > { %15942 = vst [vmem:[#allocation182_spill] sm:$0xff] %v10495_v23  ;;  %v1917_v23 = vmul.f32 %v15950_v62, %v15411_v11  ;;  %v1915_v9 = vmul.f32 %v15952_v29, %v15951_v0  ;;  %v15959_v62 = vld [vmem:[#allocation191_spill] sm:$0xff]  ;;  %v15960_v29 = vld [vmem:[#allocation44_spill] sm:$0xff] }
 0x941   : > { %v1934_v45 = vmul.f32 %v15960_v29, %v15770_v21  ;;  %v15971_v29 = vld [vmem:[#allocation194_spill] sm:$0xff] }
 0x944   : > { %5016 = vperm.xlu1 %6772, %v1914_v26   ;;  %5006 = vperm.xlu2 %6770, %v1912_v43  }
 0x945   : > { %5086 = vperm.xlu0 %6771, %v1928_v18   ;;  %v10503_v13 = vpop.permute.xlu1 %4683 }
 0x946   : > { %15947 = vst [vmem:[#allocation190_spill] sm:$0xff] %v10503_v13  ;;  %v10505_v20 = vpop.permute.xlu2 %4839 }
 0x947   : > { %15948 = vst [vmem:[#allocation183_spill] sm:$0xff] %v10505_v20  ;;  %v10507_v46 = vpop.permute.xlu0 %4857  ;;  %v15958_v20 = vld [vmem:[#allocation17_spill] sm:$0xff] }
 0x948   : > { %15949 = vst [vmem:[#allocation9_spill] sm:$0xff] %v10507_v46  ;;  %v1920_v46 = vmul.f32 %v15957_v3, %v15417_v52  ;;  %v1918_v13 = vmul.f32 %v15959_v62, %v15958_v20  ;;  %v15966_v3 = vld [vmem:[#allocation193_spill] sm:$0xff]  ;;  %v15967_v62 = vld [vmem:[#allocation199_spill] sm:$0xff] }
 0x949   : > { %v1937_v34 = vmul.f32 %v15967_v62, %v15452_v48  ;;  %v15977_v62 = vld [vmem:[#allocation196_spill] sm:$0xff] }
 0x94c   : > { %5031 = vperm.xlu1 %6772, %v1917_v23   ;;  %5021 = vperm.xlu2 %6770, %v1915_v9  }
 0x94d   : > { %5101 = vperm.xlu0 %6771, %v1931_v12   ;;  %v10515_v26 = vpop.permute.xlu1 %4698 }
 0x94e   : > { %15954 = vst [vmem:[#allocation185_spill] sm:$0xff] %v10515_v26  ;;  %v10517_v43 = vpop.permute.xlu2 %4845 }
 0x94f   : > { %15955 = vst [vmem:[#allocation32_spill] sm:$0xff] %v10517_v43  ;;  %v10519_v18 = vpop.permute.xlu0 %4866  ;;  %v15965_v43 = vld [vmem:[#allocation21_spill] sm:$0xff] }
 0x950   : > { %15956 = vst [vmem:[#allocation186_spill] sm:$0xff] %v10519_v18  ;;  %v1923_v18 = vmul.f32 %v15964_v35, %v15423_v41  ;;  %v1921_v26 = vmul.f32 %v15966_v3, %v15965_v43  ;;  %v15972_v35 = vld [vmem:[#allocation195_spill] sm:$0xff]  ;;  %v15973_v3 = vld [vmem:[#allocation54_spill] sm:$0xff] }
 0x954   : > { %5046 = vperm.xlu1 %6772, %v1920_v46   ;;  %5036 = vperm.xlu2 %6770, %v1918_v13  }
 0x955   : > { %5116 = vperm.xlu0 %6771, %v1934_v45  }
 0x956   : > { %v10527_v9 = vpop.permute.xlu1 %4836  ;;  %v10529_v12 = vpop.permute.xlu2 %4854 }
 0x957   : > { %15961 = vst [vmem:[#allocation13_spill] sm:$0xff] %v10527_v9  ;;  %v10531_v23 = vpop.permute.xlu0 %4875  ;;  %v1924_v9 = vmul.f32 %v15972_v35, %v15744_v6  ;;  %v6975_v35 = vmov 6  }
 0x958   : > { %15962 = vst [vmem:[#allocation188_spill] sm:$0xff] %v10529_v12  ;;  %v1926_v12 = vmul.f32 %v15971_v29, %v15634_v61  ;;  %v15978_v29 = vld [vmem:[#allocation197_spill] sm:$0xff] }
 0x959   : > { %15963 = vst [vmem:[#allocation38_spill] sm:$0xff] %v10531_v23  ;;  %v1940_v23 = vmul.f32 %v15973_v3, %v15457_v10  ;;  %v15982_v3 = vld [vmem:[#allocation198_spill] sm:$0xff] }
 0x95c   : > { %5061 = vperm.xlu1 %6772, %v1923_v18   ;;  %5051 = vperm.xlu2 %6770, %v1921_v26  }
 0x95d   : > { %5131 = vperm.xlu0 %6771, %v1937_v34  }
 0x95e   : > { %v10539_v13 = vpop.permute.xlu1 %4842  ;;  %v10541_v45 = vpop.permute.xlu2 %4863 }
 0x95f   : > { %15968 = vst [vmem:[#allocation189_spill] sm:$0xff] %v10539_v13  ;;  %v10543_v46 = vpop.permute.xlu0 %4884  ;;  %v1927_v13 = vmul.f32 %v15978_v29, %v15645_v53  ;;  %v15987_v29 = vld [vmem:[#allocation201_spill] sm:$0xff] }
 0x960   : > { %15969 = vst [vmem:[#allocation17_spill] sm:$0xff] %v10541_v45  ;;  %v1929_v45 = vmul.f32 %v15977_v62, %v15643_v42  ;;  %v15983_v62 = vld [vmem:[#allocation200_spill] sm:$0xff] }
 0x961   : > { %15970 = vst [vmem:[#allocation191_spill] sm:$0xff] %v10543_v46 }
 0x964   : > { %5076 = vperm.xlu1 %6772, %v1926_v12   ;;  %5066 = vperm.xlu2 %6770, %v1924_v9  }
 0x965   : > { %5146 = vperm.xlu0 %6771, %v1940_v23  }
 0x966   : > { %v10551_v26 = vpop.permute.xlu1 %4851  ;;  %v10553_v34 = vpop.permute.xlu2 %4872 }
 0x967   : > { %15974 = vst [vmem:[#allocation44_spill] sm:$0xff] %v10551_v26  ;;  %v10555_v18 = vpop.permute.xlu0 %4893  ;;  %v1930_v26 = vmul.f32 %v15983_v62, %v15652_v40 }
 0x968   : > { %15975 = vst [vmem:[#allocation192_spill] sm:$0xff] %v10553_v34  ;;  %v1932_v34 = vmul.f32 %v15982_v3, %v15542_v16  ;;  %v15992_v3 = vld [vmem:[#allocation203_spill] sm:$0xff] }
 0x969   : > { %15976 = vst [vmem:[#allocation21_spill] sm:$0xff] %v10555_v18  ;;  %v1935_v18 = vmul.f32 %v15987_v29, %v15551_v15  ;;  %v1938_v62 = vmul.f32 %v15992_v3, %v15453_v30 }
 0x96c   : > { %5091 = vperm.xlu1 %6772, %v1929_v45   ;;  %5081 = vperm.xlu2 %6770, %v1927_v13  }
 0x96d   : > { %6775 = vset.pattern.permute.xlu0 %v6975_v35 }
 0x96e   : > { %5284 = vperm.xlu0 %6775, %v10084_v44   ;;  %v10562_v9 = vpop.permute.xlu1 %4860  ;;  %v10564_v12 = vpop.permute.xlu2 %4881 }
 0x96f   : > { %15979 = vst [vmem:[#allocation193_spill] sm:$0xff] %v10562_v9  ;;  %v10566_v23 = vpop.permute.xlu0 %4902  ;;  %v16079_v9 = vld [vmem:[#allocation225_spill] sm:$0xff] }
 0x970   : > { %15980 = vst [vmem:[#allocation199_spill] sm:$0xff] %v10564_v12  ;;  %v16077_v12 = vld [vmem:[#allocation227_spill] sm:$0xff] }
 0x971   : > { %15981 = vst [vmem:[#allocation194_spill] sm:$0xff] %v10566_v23  ;;  %v15988_v23 = vld [vmem:[#allocation202_spill] sm:$0xff] }
 0x972   : > { %v1933_v46 = vmul.f32 %v15988_v23, %v15659_v7  ;;  %v15997_v23 = vld [vmem:[#allocation205_spill] sm:$0xff] }
 0x973   : > { %v1939_v29 = vmul.f32 %v15997_v23, %v15451_v28 }
 0x974   : > { %5106 = vperm.xlu1 %6772, %v1932_v34   ;;  %5096 = vperm.xlu2 %6770, %v1930_v26  }
 0x976   : > { %5299 = vperm.xlu0 %6775, %v10120_v38   ;;  %v10573_v13 = vpop.permute.xlu1 %4869  ;;  %v10575_v45 = vpop.permute.xlu2 %4890 }
 0x977   : > { %15984 = vst [vmem:[#allocation195_spill] sm:$0xff] %v10573_v13  ;;  %v10577_v44 = vpop.permute.xlu0 %4911 }
 0x978   : > { %15985 = vst [vmem:[#allocation54_spill] sm:$0xff] %v10575_v45  ;;  %v16074_v45 = vld [vmem:[#allocation223_spill] sm:$0xff] }
 0x979   : > { %15986 = vst [vmem:[#allocation196_spill] sm:$0xff] %v10577_v44  ;;  %v15993_v44 = vld [vmem:[#allocation204_spill] sm:$0xff] }
 0x97a   : > { %v1936_v13 = vmul.f32 %v15993_v44, %v15546_v57 }
 0x97c   : > { %5121 = vperm.xlu1 %6772, %v1935_v18   ;;  %5111 = vperm.xlu2 %6770, %v1933_v46  }
 0x97e   : > { %5308 = vperm.xlu0 %6775, %v10138_v55   ;;  %v10584_v34 = vpop.permute.xlu1 %4878  ;;  %v10586_v26 = vpop.permute.xlu2 %4899 }
 0x97f   : > { %15989 = vst [vmem:[#allocation197_spill] sm:$0xff] %v10584_v34  ;;  %v10588_v38 = vpop.permute.xlu0 %4920 }
 0x980   : > { %15990 = vst [vmem:[#allocation198_spill] sm:$0xff] %v10586_v26  ;;  %v16069_v26 = vld [vmem:[#allocation222_spill] sm:$0xff] }
 0x981   : > { %15991 = vst [vmem:[#allocation200_spill] sm:$0xff] %v10588_v38  ;;  %v16046_v38 = vld [vmem:[#allocation210_spill] sm:$0xff] }
 0x984   : > { %5136 = vperm.xlu1 %6772, %v1938_v62   ;;  %5126 = vperm.xlu2 %6770, %v1936_v13  }
 0x986   : > { %5317 = vperm.xlu0 %6775, %v10156_v31   ;;  %v10595_v18 = vpop.permute.xlu1 %4887  ;;  %v10597_v46 = vpop.permute.xlu2 %4908 }
 0x987   : > { %15994 = vst [vmem:[#allocation201_spill] sm:$0xff] %v10595_v18  ;;  %v10599_v55 = vpop.permute.xlu0 %4996 }
 0x988   : > { %15995 = vst [vmem:[#allocation202_spill] sm:$0xff] %v10597_v46  ;;  %v16066_v46 = vld [vmem:[#allocation52_spill] sm:$0xff] }
 0x989   : > { %15996 = vst [vmem:[#allocation203_spill] sm:$0xff] %v10599_v55  ;;  %v2217_v34 = vmul.f32 %v16066_v46, %v15643_v42  ;;  %v10786_v46 = vmul.f32 %v16074_v45, %v15551_v15 }
 0x98c   : > { %6773 = vset.pattern.permute.xlu1 %v6975_v35  ;;  %5141 = vperm.xlu2 %6770, %v1939_v29  }
 0x98d   : > { %5278 = vperm.xlu1 %6773, %v10026_v56  }
 0x98e   : > { %5326 = vperm.xlu0 %6775, %v10174_v1   ;;  %v10605_v44 = vpop.permute.xlu1 %4896  ;;  %v10607_v13 = vpop.permute.xlu2 %4917 }
 0x98f   : > { %15998 = vst [vmem:[#allocation204_spill] sm:$0xff] %v10605_v44  ;;  %v10609_v31 = vpop.permute.xlu0 %5011 }
 0x990   : > { %15999 = vst [vmem:[#allocation205_spill] sm:$0xff] %v10607_v13  ;;  %v16062_v13 = vld [vmem:[#allocation40_spill] sm:$0xff] }
 0x991   : > { %16000 = vst [vmem:[#allocation432_spill] sm:$0xff] %v10609_v31  ;;  %v16040_v31 = vld [vmem:[#allocation12_spill] sm:$0xff] }
 0x994   : > { %6774 = vset.pattern.permute.xlu2 %v6975_v35 }
 0x995   : > { %5287 = vperm.xlu1 %6773, %v10080_v24   ;;  %5281 = vperm.xlu2 %6774, %v10066_v32  }
 0x996   : > { %5335 = vperm.xlu0 %6775, %v10194_v25   ;;  %v10614_v3 = vpop.permute.xlu1 %4905  ;;  %v10616_v62 = vpop.permute.xlu2 %4991 }
 0x997   : > { %16001 = vst [vmem:[#allocation433_spill] sm:$0xff] %v10614_v3  ;;  %v10618_v56 = vpop.permute.xlu0 %5026  ;;  %v16055_v3 = vld [vmem:[#allocation42_spill] sm:$0xff] }
 0x998   : > { %16002 = vst [vmem:[#allocation434_spill] sm:$0xff] %v10616_v62 }
 0x999   : > { %16003 = vst [vmem:[#allocation435_spill] sm:$0xff] %v10618_v56  ;;  %v16035_v56 = vld [vmem:[#allocation151_spill] sm:$0xff] }
 0x99d   : > { %5293 = vperm.xlu1 %6773, %v10040_v51   ;;  %5290 = vperm.xlu2 %6774, %v10102_v54  }
 0x99e   : > { %5344 = vperm.xlu0 %6775, %v10210_v59   ;;  %v10623_v1 = vpop.permute.xlu1 %4914  ;;  %v10625_v35 = vpop.permute.xlu2 %5006 }
 0x99f   : > { %16004 = vst [vmem:[#allocation436_spill] sm:$0xff] %v10623_v1  ;;  %v10627_v24 = vpop.permute.xlu0 %5041  ;;  %v16052_v1 = vld [vmem:[#allocation216_spill] sm:$0xff] }
 0x9a0   : > { %16005 = vst [vmem:[#allocation437_spill] sm:$0xff] %v10625_v35  ;;  %v16041_v35 = vld [vmem:[#allocation207_spill] sm:$0xff] }
 0x9a1   : > { %16006 = vst [vmem:[#allocation438_spill] sm:$0xff] %v10627_v24  ;;  %v16072_v24 = vld [vmem:[#allocation47_spill] sm:$0xff] }
 0x9a5   : > { %5302 = vperm.xlu1 %6773, %v10054_v60   ;;  %5296 = vperm.xlu2 %6774, %v10098_v58  }
 0x9a6   : > { %5353 = vperm.xlu0 %6775, %v15918_v47   ;;  %v10632_v25 = vpop.permute.xlu1 %4923  ;;  %v10634_v32 = vpop.permute.xlu2 %5021 }
 0x9a7   : > { %16007 = vst [vmem:[#allocation439_spill] sm:$0xff] %v10632_v25  ;;  %v10636_v51 = vpop.permute.xlu0 %5056  ;;  %v16048_v25 = vld [vmem:[#allocation19_spill] sm:$0xff] }
 0x9a8   : > { %16008 = vst [vmem:[#allocation440_spill] sm:$0xff] %v10634_v32  ;;  %v16036_v32 = vld [vmem:[#allocation10_spill] sm:$0xff] }
 0x9a9   : > { %16009 = vst [vmem:[#allocation441_spill] sm:$0xff] %v10636_v51 }
 0x9ad   : > { %5311 = vperm.xlu1 %6773, %v10070_v22   ;;  %5305 = vperm.xlu2 %6774, %v10116_v50   ;;  %v16016_v50 = vld [vmem:[#allocation208_spill] sm:$0xff] }
 0x9ae   : > { %5362 = vperm.xlu0 %6775, %v15924_v27   ;;  %v10641_v54 = vpop.permute.xlu1 %5001  ;;  %v10643_v59 = vpop.permute.xlu2 %5036  ;;  %v2199_v27 = vmul.f32 %v16016_v50, %v15935_v4 }
 0x9af   : > { %16010 = vst [vmem:[#allocation442_spill] sm:$0xff] %v10641_v54  ;;  %v10645_v60 = vpop.permute.xlu0 %5071  ;;  %v10708_v54 = vmul.f32 %v16041_v35, %v16040_v31  ;;  %v16049_v35 = vld [vmem:[#allocation213_spill] sm:$0xff] }
 0x9b0   : > { %16011 = vst [vmem:[#allocation443_spill] sm:$0xff] %v10643_v59  ;;  %v16029_v59 = vld [vmem:[#allocation150_spill] sm:$0xff] }
 0x9b1   : > { %16012 = vst [vmem:[#allocation444_spill] sm:$0xff] %v10645_v60 }
 0x9b5   : > { %5320 = vperm.xlu1 %6773, %v10088_v49   ;;  %5314 = vperm.xlu2 %6774, %v10134_v2  }
 0x9b6   : > { %5371 = vperm.xlu0 %6775, %v15930_v63   ;;  %v10650_v58 = vpop.permute.xlu1 %5016  ;;  %v10652_v47 = vpop.permute.xlu2 %5051  ;;  %v16020_v63 = vld [vmem:[#allocation211_spill] sm:$0xff] }
 0x9b7   : > { %16013 = vst [vmem:[#allocation445_spill] sm:$0xff] %v10650_v58  ;;  %v10654_v22 = vpop.permute.xlu0 %5086  ;;  %v2202_v29 = vmul.f32 %v16020_v63, %v15405_v36 }
 0x9b8   : > { %16014 = vst [vmem:[#allocation446_spill] sm:$0xff] %v10652_v47 }
 0x9b9   : > { %16015 = vst [vmem:[#allocation447_spill] sm:$0xff] %v10654_v22 }
 0x9bd   : > { %5329 = vperm.xlu1 %6773, %v10106_v17   ;;  %5323 = vperm.xlu2 %6774, %v10152_v8  }
 0x9be   : > { %5449 = vperm.xlu0 %6775, %v2199_v27   ;;  %v10660_v23 = vpop.permute.xlu1 %5031  ;;  %v10662_v49 = vpop.permute.xlu2 %5066  ;;  %v16024_v27 = vld [vmem:[#allocation214_spill] sm:$0xff] }
 0x9bf   : > { %16017 = vst [vmem:[#allocation208_spill] sm:$0xff] %v10660_v23  ;;  %v10664_v2 = vpop.permute.xlu0 %5101  ;;  %v2205_v47 = vmul.f32 %v16024_v27, %v15411_v11  ;;  %v16034_v23 = vld [vmem:[#allocation387_spill] sm:$0xff] }
 0x9c0   : > { %16018 = vst [vmem:[#allocation448_spill] sm:$0xff] %v10662_v49  ;;  %v16059_v49 = vld [vmem:[#allocation50_spill] sm:$0xff] }
 0x9c1   : > { %16019 = vst [vmem:[#allocation449_spill] sm:$0xff] %v10664_v2 }
 0x9c5   : > { %5338 = vperm.xlu1 %6773, %v15913_v14   ;;  %5332 = vperm.xlu2 %6774, %v10170_v39  }
 0x9c6   : > { %5464 = vperm.xlu0 %6775, %v2202_v29   ;;  %v10670_v50 = vpop.permute.xlu1 %5046  ;;  %v10672_v17 = vpop.permute.xlu2 %5081  ;;  %v16028_v29 = vld [vmem:[#allocation217_spill] sm:$0xff] }
 0x9c7   : > { %16021 = vst [vmem:[#allocation211_spill] sm:$0xff] %v10670_v50  ;;  %v10674_v8 = vpop.permute.xlu0 %5116  ;;  %v2208_v50 = vmul.f32 %v16028_v29, %v15417_v52  ;;  %v16037_v29 = vld [vmem:[#allocation206_spill] sm:$0xff] }
 0x9c8   : > { %16022 = vst [vmem:[#allocation450_spill] sm:$0xff] %v10672_v17  ;;  %v10702_v58 = vmul.f32 %v16037_v29, %v16036_v32 }
 0x9c9   : > { %16023 = vst [vmem:[#allocation451_spill] sm:$0xff] %v10674_v8  ;;  %v16054_v8 = vld [vmem:[#allocation28_spill] sm:$0xff] }
 0x9cd   : > { %5347 = vperm.xlu1 %6773, %v15919_v33   ;;  %5341 = vperm.xlu2 %6774, %v10190_v5  }
 0x9ce   : > { %5479 = vperm.xlu0 %6775, %v2205_v47   ;;  %v10680_v63 = vpop.permute.xlu1 %5061  ;;  %v10682_v14 = vpop.permute.xlu2 %5096  ;;  %v16033_v47 = vld [vmem:[#allocation219_spill] sm:$0xff] }
 0x9cf   : > { %16025 = vst [vmem:[#allocation214_spill] sm:$0xff] %v10680_v63  ;;  %v10684_v39 = vpop.permute.xlu0 %5131  ;;  %v2211_v63 = vmul.f32 %v16033_v47, %v15423_v41 }
 0x9d0   : > { %16026 = vst [vmem:[#allocation452_spill] sm:$0xff] %v10682_v14  ;;  %v16053_v14 = vld [vmem:[#allocation220_spill] sm:$0xff] }
 0x9d1   : > { %16027 = vst [vmem:[#allocation453_spill] sm:$0xff] %v10684_v39 }
 0x9d5   : > { %5356 = vperm.xlu1 %6773, %v15925_v19   ;;  %5350 = vperm.xlu2 %6774, %v16029_v59   ;;  %v16038_v19 = vld [vmem:[#allocation6_spill] sm:$0xff]  ;;  %v16039_v59 = vld [vmem:[#allocation209_spill] sm:$0xff] }
 0x9d6   : > { %5494 = vperm.xlu0 %6775, %v2208_v50   ;;  %v10690_v27 = vpop.permute.xlu1 %5076  ;;  %v10692_v33 = vpop.permute.xlu2 %5111  ;;  %v2197_v50 = vmul.f32 %v16039_v59, %v16038_v19 }
 0x9d7   : > { %16030 = vst [vmem:[#allocation217_spill] sm:$0xff] %v10690_v27  ;;  %v10694_v5 = vpop.permute.xlu0 %5146 }
 0x9d8   : > { %16031 = vst [vmem:[#allocation150_spill] sm:$0xff] %v10692_v33  ;;  %v10728_v33 = vmul.f32 %v16049_v35, %v16048_v25  ;;  %v16057_v35 = vld [vmem:[#allocation48_spill] sm:$0xff] }
 0x9d9   : > { %16032 = vst [vmem:[#allocation454_spill] sm:$0xff] %v10694_v5  ;;  %v16047_v5 = vld [vmem:[#allocation215_spill] sm:$0xff]  ;;  %v10750_v2 = vmul.f32 %v16057_v35, %v15744_v6  ;;  %v16067_v35 = vld [vmem:[#allocation41_spill] sm:$0xff] }
 0x9da   : > { %v10724_v59 = vmul.f32 %v16047_v5, %v15951_v0  ;;  %v10744_v5 = vmul.f32 %v16055_v3, %v16054_v8  ;;  %v16065_v3 = vld [vmem:[#allocation221_spill] sm:$0xff]  ;;  %v10770_v51 = vmul.f32 %v16067_v35, %v15770_v21  ;;  %v16075_v35 = vld [vmem:[#allocation224_spill] sm:$0xff] }
 0x9db   : > { %v10764_v60 = vmul.f32 %v16065_v3, %v15645_v53  ;;  %v10782_v3 = vmul.f32 %v16072_v24, %v15452_v48  ;;  %v10790_v27 = vmul.f32 %v16075_v35, %v15659_v7 }
 0x9dc   : > { %16068 = vst [vmem:[#allocation6_spill] sm:$0xff] %v10770_v51  ;;  %v16084_v51 = vld [vmem:[#allocation229_spill] sm:$0xff] }
 0x9dd   : > { %5365 = vperm.xlu1 %6773, %v16034_v23   ;;  %5359 = vperm.xlu2 %6774, %v16035_v56   ;;  %v16044_v23 = vld [vmem:[#allocation212_spill] sm:$0xff]  ;;  %v16045_v56 = vld [vmem:[#allocation15_spill] sm:$0xff]  ;;  %16073 = vst [vmem:[#allocation12_spill] sm:$0xff] %v10782_v3  ;;  %v10810_v35 = vmul.f32 %v16084_v51, %v16038_v19  ;;  %v16097_v19 = vld [vmem:[#allocation234_spill] sm:$0xff] }
 0x9de   : > { %5509 = vperm.xlu0 %6775, %v2211_v63   ;;  %v10710_v55 = vpop.permute.xlu1 %5091  ;;  %v10712_v62 = vpop.permute.xlu2 %5126  ;;  %v10716_v47 = vmul.f32 %v16044_v23, %v15944_v37  ;;  %v10720_v29 = vmul.f32 %v16046_v38, %v16045_v56  ;;  %v16050_v63 = vld [vmem:[#allocation218_spill] sm:$0xff]  ;;  %v10740_v38 = vmul.f32 %v16053_v14, %v15965_v43  ;;  %v16063_v14 = vld [vmem:[#allocation35_spill] sm:$0xff]  ;;  %16076 = vst [vmem:[#allocation207_spill] sm:$0xff] %v10790_v27  ;;  %v16082_v3 = vld [vmem:[#allocation228_spill] sm:$0xff] }
 0x9df   : > { %16042 = vst [vmem:[#allocation219_spill] sm:$0xff] %v10710_v55  ;;  %v10732_v39 = vmul.f32 %v16050_v63, %v15958_v20  ;;  %v16058_v63 = vld [vmem:[#allocation34_spill] sm:$0xff]  ;;  %v10760_v18 = vmul.f32 %v16063_v14, %v16062_v13  ;;  %v10774_v55 = vmul.f32 %v16069_v26, %v15652_v40  ;;  %v10794_v26 = vmul.f32 %v16077_v12, %v15546_v57 }
 0x9e0   : > { %16043 = vst [vmem:[#allocation387_spill] sm:$0xff] %v10712_v62  ;;  %v16051_v62 = vld [vmem:[#allocation23_spill] sm:$0xff]  ;;  %v10746_v17 = vpop.permute.xlu0 %5284  ;;  %v10754_v44 = vmul.f32 %v16059_v49, %v16058_v63  ;;  %v2553_v49 = vlaneseq  ;;  %v10806_v45 = vmul.f32 %v16082_v3, %v15451_v28  ;;  %v16093_v3 = vld [vmem:[#allocation233_spill] sm:$0xff] }
 0x9e1   : > { %v10736_v23 = vmul.f32 %v16052_v1, %v16051_v62  ;;  %16056 = vst [vmem:[#allocation151_spill] sm:$0xff] %v10746_v17  ;;  %v16061_v1 = vld [vmem:[#allocation29_spill] sm:$0xff]  ;;  %v16081_v17 = vld [vmem:[#allocation226_spill] sm:$0xff] }
 0x9e2   : > { %16060 = vst [vmem:[#allocation10_spill] sm:$0xff] %v10754_v44  ;;  %v2214_v22 = vmul.f32 %v16061_v1, %v15634_v61  ;;  %v16071_v1 = vld [vmem:[#allocation56_spill] sm:$0xff]  ;;  %v10802_v24 = vmul.f32 %v16081_v17, %v15453_v30  ;;  %v10829_v51 = vand.u32 127, %v2553_v49 }
 0x9e3   : > { %16064 = vst [vmem:[#allocation206_spill] sm:$0xff] %v10760_v18  ;;  %v10778_v14 = vmul.f32 %v16071_v1, %v15542_v16  ;;  %v10798_v1 = vmul.f32 %v16079_v9, %v15457_v10  ;;  %v16086_v18 = vld [vmem:[#allocation230_spill] sm:$0xff]  ;;  %v16089_v9 = vld [vmem:[#allocation231_spill] sm:$0xff]  ;;  %v16091_v17 = vld [vmem:[#allocation232_spill] sm:$0xff] }
 0x9e4   : > { %16070 = vst [vmem:[#allocation209_spill] sm:$0xff] %v10774_v55  ;;  %v10814_v12 = vmul.f32 %v16086_v18, %v15944_v37  ;;  %v10823_v27 = vmul.f32 %v16091_v17, %v15935_v4  ;;  %v16101_v4 = vld [vmem:[#allocation236_spill] sm:$0xff]  ;;  %v16257_v55 = vld [vmem:[#allocation334_spill] sm:$0xff] }
 0x9e5   : > { %16078 = vst [vmem:[#allocation212_spill] sm:$0xff] %v10794_v26  ;;  %5439 = vperm.xlu1 %6773, %v2197_v50   ;;  %v16088_v26 = vld [vmem:[#allocation153_spill] sm:$0xff]  ;;  %v10837_v50 = vmul.f32 %v16097_v19, %v15405_v36  ;;  %v16109_v19 = vld [vmem:[#allocation240_spill] sm:$0xff] }
 0x9e6   : > { %16080 = vst [vmem:[#allocation15_spill] sm:$0xff] %v10798_v1  ;;  %5368 = vperm.xlu2 %6774, %v16088_v26   ;;  %v10819_v1 = vmul.f32 %v16089_v9, %v15951_v0  ;;  %5524 = vperm.xlu0 %6775, %v2214_v22   ;;  %v10831_v37 = vpop.permute.xlu1 %5106  ;;  %v10833_v18 = vpop.permute.xlu2 %5141  ;;  %v16099_v0 = vld [vmem:[#allocation235_spill] sm:$0xff]  ;;  %v10845_v9 = vmul.f32 %v16101_v4, %v16036_v32  ;;  %v16105_v22 = vld [vmem:[#allocation238_spill] sm:$0xff] }
 0x9e7   : > { %16083 = vst [vmem:[#allocation210_spill] sm:$0xff] %v10806_v45  ;;  %v10827_v45 = vmul.f32 %v16093_v3, %v15958_v20  ;;  %v10841_v26 = vmul.f32 %v16099_v0, %v15965_v43  ;;  %v16103_v20 = vld [vmem:[#allocation237_spill] sm:$0xff]  ;;  %v10853_v17 = vmul.f32 %v16105_v22, %v15744_v6  ;;  %v16107_v3 = vld [vmem:[#allocation239_spill] sm:$0xff]  ;;  %v10861_v43 = vmul.f32 %v16109_v19, %v15417_v52 }
 0x9e8   : > { %16085 = vst [vmem:[#allocation215_spill] sm:$0xff] %v10810_v35  ;;  %v10849_v49 = vmul.f32 %v16103_v20, %v15411_v11  ;;  %v10857_v36 = vmul.f32 %v16107_v3, %v16040_v31  ;;  %v16111_v0 = vld [vmem:[#allocation241_spill] sm:$0xff]  ;;  %v10867_v4 = vpop.permute.xlu0 %5299  ;;  %v16114_v11 = vld [vmem:[#allocation242_spill] sm:$0xff]  ;;  %v16116_v6 = vld [vmem:[#allocation243_spill] sm:$0xff] }
 0x9e9   : > { %16087 = vst [vmem:[#allocation19_spill] sm:$0xff] %v10814_v12  ;;  %v10865_v32 = vmul.f32 %v16111_v0, %v15645_v53  ;;  %v10871_v20 = vmul.f32 %v16114_v11, %v16045_v56  ;;  %v10875_v22 = vmul.f32 %v16116_v6, %v15423_v41  ;;  %v16118_v31 = vld [vmem:[#allocation244_spill] sm:$0xff]  ;;  %v16120_v52 = vld [vmem:[#allocation245_spill] sm:$0xff]  ;;  %v16122_v53 = vld [vmem:[#allocation247_spill] sm:$0xff]  ;;  %v10898_v6 = vadd.s32 128, %v10829_v51 }
 0x9ea   : > { %16090 = vst [vmem:[#allocation213_spill] sm:$0xff] %v10819_v1  ;;  %v10879_v3 = vmul.f32 %v16118_v31, %v15652_v40  ;;  %v10883_v19 = vmul.f32 %v16120_v52, %v16048_v25  ;;  %v10887_v0 = vmul.f32 %v16122_v53, %v15634_v61  ;;  %v16126_v11 = vld [vmem:[#allocation249_spill] sm:$0xff]  ;;  %v16130_v25 = vld [vmem:[#allocation254_spill] sm:$0xff]  ;;  %v16132_v61 = vld [vmem:[#allocation255_spill] sm:$0xff] }
 0x9eb   : > { %16092 = vst [vmem:[#allocation218_spill] sm:$0xff] %v10823_v27  ;;  %v10895_v41 = vmul.f32 %v16126_v11, %v16051_v62  ;;  %v16128_v40 = vld [vmem:[#allocation253_spill] sm:$0xff]  ;;  %v10906_v52 = vmul.f32 %v16130_v25, %v15546_v57  ;;  %v10910_v53 = vmul.f32 %v16132_v61, %v16054_v8  ;;  %v16136_v62 = vld [vmem:[#allocation258_spill] sm:$0xff] }
 0x9ec   : > { %16094 = vst [vmem:[#allocation23_spill] sm:$0xff] %v10827_v45  ;;  %v10902_v31 = vmul.f32 %v16128_v40, %v15643_v42  ;;  %v10918_v11 = vmul.f32 %v16136_v62, %v15451_v28  ;;  %v16140_v40 = vld [vmem:[#allocation260_spill] sm:$0xff]  ;;  %v16142_v25 = vld [vmem:[#allocation261_spill] sm:$0xff]  ;;  %v16204_v1 = vld [vmem:[#allocation306_spill] sm:$0xff] }
 0x9ed   : > { %16095 = vst [vmem:[#allocation216_spill] sm:$0xff] %v10831_v37  ;;  %v10926_v57 = vmul.f32 %v16140_v40, %v15551_v15  ;;  %vm2687_vm0 = vcmp.eq.s32.totalorder %v16142_v25, %v10829_v51  ;;  %vm2688_vm1 = vcmp.eq.s32.totalorder %v16142_v25, %v10898_v6  ;;  %v16145_v28 = vld [vmem:[#allocation8_spill] sm:$0xff]  ;;  %5454 = vperm.xlu1 %6773, %v10716_v47   ;;  %v16147_v15 = vld [vmem:[#allocation263_spill] sm:$0xff]  ;;  %v16175_v45 = vld [vmem:[#allocation289_spill] sm:$0xff] }
 0x9ee   : > { %16096 = vst [vmem:[#allocation220_spill] sm:$0xff] %v10833_v18  ;;  %v10938_v61 = vmul.f32 %v16145_v28, %v15453_v30  ;;  %5444 = vperm.xlu2 %6774, %v10702_v58   ;;  %vm2693_vm2 = vcmp.eq.s32.totalorder %v16147_v15, %v10829_v51  ;;  %vm2694_vm3 = vcmp.eq.s32.totalorder %v16147_v15, %v10898_v6  ;;  %v10952_v30 = vpop.permute.xlu1 %5121  ;;  %v16152_v58 = vld [vmem:[#allocation266_spill] sm:$0xff]  ;;  %v16155_v62 = vld [vmem:[#allocation268_spill] sm:$0xff]  ;;  %v16249_v37 = vld [vmem:[#allocation39_spill] sm:$0xff] }
 0x9ef   : > { %16098 = vst [vmem:[#allocation28_spill] sm:$0xff] %v10837_v50  ;;  %5539 = vperm.xlu0 %6775, %v2217_v34   ;;  %v10958_v47 = vmul.f32 %v16152_v58, %v15452_v48  ;;  %v10966_v40 = vpop.permute.xlu2 %5281  ;;  %v16158_v34 = vld [vmem:[#allocation272_spill] sm:$0xff]  ;;  %v16164_v58 = vld [vmem:[#allocation282_spill] sm:$0xff]  ;;  %v11044_v25 = vsel %vm2694_vm3, %v16175_v45, 0.0  ;;  %v16210_v50 = vld [vmem:[#allocation309_spill] sm:$0xff] }
 0x9f0   : > { %16100 = vst [vmem:[#allocation42_spill] sm:$0xff] %v10841_v26  ;;  %v16160_v48 = vld [vmem:[#allocation276_spill] sm:$0xff]  ;;  %v10978_v28 = vpop.permute.xlu0 %5308  ;;  %vm2718_vm15 = vcmp.eq.s32.totalorder %v16164_v58, %v10898_v6  ;;  %v16169_v26 = vld [vmem:[#allocation53_spill] sm:$0xff] }
 0x9f1   : > { %16102 = vst [vmem:[#allocation48_spill] sm:$0xff] %v10845_v9  ;;  %vm16195_vm14 = vcmp.eq.s32.totalorder %v16160_v48, %v10898_v6  ;;  %v16202_v18 = vld [vmem:[#allocation304_spill] sm:$0xff] }
 0x9f2   : > { %16104 = vst [vmem:[#allocation34_spill] sm:$0xff] %v10849_v49 }
 0x9f3   : > { %16106 = vst [vmem:[#allocation50_spill] sm:$0xff] %v10853_v17  ;;  %v16124_v17 = vld [vmem:[#allocation248_spill] sm:$0xff] }
 0x9f4   : > { %16108 = vst [vmem:[#allocation29_spill] sm:$0xff] %v10857_v36  ;;  %v10891_v56 = vmul.f32 %v16124_v17, %v15659_v7  ;;  %v16134_v7 = vld [vmem:[#allocation257_spill] sm:$0xff] }
 0x9f5   : > { %16110 = vst [vmem:[#allocation40_spill] sm:$0xff] %v10861_v43  ;;  %v10914_v17 = vmul.f32 %v16134_v7, %v15542_v16  ;;  %v16143_v16 = vld [vmem:[#allocation262_spill] sm:$0xff]  ;;  %5469 = vperm.xlu1 %6773, %v10724_v59  }
 0x9f6   : > { %16112 = vst [vmem:[#allocation35_spill] sm:$0xff] %v10865_v32  ;;  %v10934_v8 = vmul.f32 %v16143_v16, %v16062_v13  ;;  %v16150_v13 = vld [vmem:[#allocation11_spill] sm:$0xff]  ;;  %v16154_v7 = vld [vmem:[#allocation14_spill] sm:$0xff]  ;;  %v16159_v16 = vld [vmem:[#allocation273_spill] sm:$0xff]  ;;  %5459 = vperm.xlu2 %6774, %v10708_v54  }
 0x9f7   : > { %16113 = vst [vmem:[#allocation221_spill] sm:$0xff] %v10867_v4  ;;  %vm2685_vm4 = vcmp.eq.s32.totalorder %v16150_v13, %v10829_v51  ;;  %vm2686_vm5 = vcmp.eq.s32.totalorder %v16150_v13, %v10898_v6  ;;  %vm2691_vm6 = vcmp.eq.s32.totalorder %v16154_v7, %v10829_v51  ;;  %vm2699_vm9 = vcmp.eq.s32.totalorder %v16159_v16, %v10829_v51  ;;  %v16187_v13 = vld [vmem:[#allocation288_spill] sm:$0xff]  ;;  %v16189_v54 = vld [vmem:[#allocation293_spill] sm:$0xff]  ;;  %v16190_v59 = vld [vmem:[#allocation294_spill] sm:$0xff] }
 0x9f8   : > { %16115 = vst [vmem:[#allocation52_spill] sm:$0xff] %v10871_v20  ;;  %vm2700_vm10 = vcmp.eq.s32.totalorder %v16159_v16, %v10898_v6  ;;  %vm2748_vm3 = vcmp.eq.s32.totalorder %v16189_v54, %v10898_v6  ;;  %5554 = vperm.xlu0 %6775, %v10778_v14   ;;  %v16200_v20 = vld [vmem:[#allocation301_spill] sm:$0xff]  ;;  %v16251_v4 = vld [vmem:[#allocation83_spill] sm:$0xff] }
 0x9f9   : > { %16117 = vst [vmem:[#allocation41_spill] sm:$0xff] %v10875_v22  ;;  %v16186_v22 = vld [vmem:[#allocation285_spill] sm:$0xff] }
 0x9fa   : > { %16119 = vst [vmem:[#allocation222_spill] sm:$0xff] %v10879_v3 }
 0x9fb   : > { %16121 = vst [vmem:[#allocation56_spill] sm:$0xff] %v10883_v19  ;;  %v16173_v19 = vld [vmem:[#allocation287_spill] sm:$0xff] }
 0x9fc   : > { %16123 = vst [vmem:[#allocation47_spill] sm:$0xff] %v10887_v0  ;;  %vm2735_vm12 = vcmp.eq.s32.totalorder %v16173_v19, %v10829_v51 }
 0x9fd   : > { %16125 = vst [vmem:[#allocation223_spill] sm:$0xff] %v10891_v56  ;;  %v11129_v56 = vpop.permute.xlu2 %5290  ;;  %5484 = vperm.xlu1 %6773, %v10732_v39  }
 0x9fe   : > { %16127 = vst [vmem:[#allocation224_spill] sm:$0xff] %v10895_v41  ;;  %v16138_v41 = vld [vmem:[#allocation259_spill] sm:$0xff]  ;;  %5474 = vperm.xlu2 %6774, %v10720_v29  }
 0x9ff   : > { %16129 = vst [vmem:[#allocation227_spill] sm:$0xff] %v10902_v31  ;;  %v10922_v42 = vmul.f32 %v16138_v41, %v16058_v63  ;;  %v16148_v63 = vld [vmem:[#allocation264_spill] sm:$0xff]  ;;  %v16233_v29 = vld [vmem:[#allocation67_spill] sm:$0xff] }
 0xa00   : > { %16131 = vst [vmem:[#allocation225_spill] sm:$0xff] %v10906_v52  ;;  %v10948_v41 = vmul.f32 %v16148_v63, %v15770_v21  ;;  %v10964_v21 = vmul.f32 %v16155_v62, %v15457_v10  ;;  %v16162_v10 = vld [vmem:[#allocation275_spill] sm:$0xff]  ;;  %v16165_v62 = vld [vmem:[#allocation278_spill] sm:$0xff]  ;;  %5569 = vperm.xlu0 %6775, %v10786_v46  }
 0xa01   : > { %16133 = vst [vmem:[#allocation226_spill] sm:$0xff] %v10910_v53  ;;  %v16163_v63 = vld [vmem:[#allocation279_spill] sm:$0xff]  ;;  %v16248_v53 = vld [vmem:[#allocation84_spill] sm:$0xff] }
 0xa02   : > { %16135 = vst [vmem:[#allocation228_spill] sm:$0xff] %v10914_v17  ;;  %v11155_v17 = vpop.permute.xlu0 %5317 }
 0xa03   : > { %16137 = vst [vmem:[#allocation229_spill] sm:$0xff] %v10918_v11  ;;  %v16167_v11 = vld [vmem:[#allocation45_spill] sm:$0xff] }
 0xa04   : > { %16139 = vst [vmem:[#allocation230_spill] sm:$0xff] %v10922_v42  ;;  %vm2723_vm8 = vcmp.eq.s32.totalorder %v16167_v11, %v10829_v51  ;;  %vm2724_vm7 = vcmp.eq.s32.totalorder %v16167_v11, %v10898_v6 }
 0xa05   : > { %16141 = vst [vmem:[#allocation153_spill] sm:$0xff] %v10926_v57  ;;  %v16174_v57 = vld [vmem:[#allocation281_spill] sm:$0xff]  ;;  %v11330_v0 = vpop.permute.xlu2 %5296  ;;  %5499 = vperm.xlu1 %6773, %v10740_v38   ;;  %v16260_v38 = vld [vmem:[#allocation336_spill] sm:$0xff] }
 0xa06   : > { %16144 = vst [vmem:[#allocation231_spill] sm:$0xff] %v10934_v8  ;;  %v16207_v8 = vld [vmem:[#allocation307_spill] sm:$0xff]  ;;  %5489 = vperm.xlu2 %6774, %v10728_v33  }
 0xa07   : > { %16146 = vst [vmem:[#allocation232_spill] sm:$0xff] %v10938_v61  ;;  %v16168_v61 = vld [vmem:[#allocation284_spill] sm:$0xff] }
 0xa08   : > { %16149 = vst [vmem:[#allocation233_spill] sm:$0xff] %v10948_v41  ;;  %v16180_v41 = vld [vmem:[#allocation55_spill] sm:$0xff]  ;;  %5584 = vperm.xlu0 %6775, %v10802_v24  }
 0xa09   : > { %16151 = vst [vmem:[#allocation234_spill] sm:$0xff] %v10952_v30  ;;  %vm2731_vm13 = vcmp.eq.s32.totalorder %v16180_v41, %v10829_v51  ;;  %v16245_v30 = vld [vmem:[#allocation86_spill] sm:$0xff] }
 0xa0a   : > { %16153 = vst [vmem:[#allocation235_spill] sm:$0xff] %v10958_v47  ;;  %v16170_v47 = vld [vmem:[#allocation286_spill] sm:$0xff]  ;;  %v11340_v35 = vpop.permute.xlu0 %5326 }
 0xa0b   : > { %16156 = vst [vmem:[#allocation236_spill] sm:$0xff] %v10964_v21  ;;  %v16166_v21 = vld [vmem:[#allocation280_spill] sm:$0xff]  ;;  %v11018_v43 = vsel %vm2687_vm0, %v16170_v47, 0.0  ;;  %v11024_v52 = vsel %vm2688_vm1, %v16170_v47, 0.0  ;;  %v16178_v47 = vld [vmem:[#allocation290_spill] sm:$0xff] }
 0xa0c   : > { %16157 = vst [vmem:[#allocation237_spill] sm:$0xff] %v10966_v40  ;;  %vm2741_vm0 = vcmp.eq.s32.totalorder %v16178_v47, %v10829_v51  ;;  %vm2742_vm11 = vcmp.eq.s32.totalorder %v16178_v47, %v10898_v6  ;;  %v16253_v40 = vld [vmem:[#allocation315_spill] sm:$0xff] }
 0xa0d   : > { %16161 = vst [vmem:[#allocation238_spill] sm:$0xff] %v10978_v28  ;;  %5514 = vperm.xlu1 %6773, %v10750_v2  }
 0xa0e   : > { %16171 = vst [vmem:[#allocation239_spill] sm:$0xff] %v11018_v43  ;;  %v11038_v43 = vsel %vm2693_vm2, %v16175_v45, 0.0  ;;  %vm2732_vm2 = vcmp.eq.s32.totalorder %v16180_v41, %v10898_v6  ;;  %v16181_v45 = vld [vmem:[#allocation291_spill] sm:$0xff]  ;;  %5504 = vperm.xlu2 %6774, %v10736_v23  }
 0xa0f   : > { %16172 = vst [vmem:[#allocation240_spill] sm:$0xff] %v11024_v52  ;;  %v16179_v52 = vld [vmem:[#allocation51_spill] sm:$0xff]  ;;  %v11062_v15 = vsel %vm2685_vm4, %v16181_v45, 0.0  ;;  %vm2738_vm4 = vcmp.eq.s32.totalorder %v16186_v22, %v10898_v6 }
 0xa10   : > { %16176 = vst [vmem:[#allocation241_spill] sm:$0xff] %v11038_v43  ;;  %vm2739_vm1 = vcmp.eq.s32.totalorder %v16179_v52, %v10829_v51  ;;  %v16184_v43 = vld [vmem:[#allocation292_spill] sm:$0xff] }
 0xa11   : > { %16177 = vst [vmem:[#allocation242_spill] sm:$0xff] %v11044_v25  ;;  %v11068_v25 = vsel %vm2686_vm5, %v16181_v45, 0.0  ;;  %v11074_v49 = vsel %vm2699_vm9, %v16184_v43, 0.0  ;;  %v11090_v45 = vsel %vm2700_vm10, %v16184_v43, 0.0  ;;  %vm2747_vm9 = vcmp.eq.s32.totalorder %v16189_v54, %v10829_v51 }
 0xa12   : > { %16182 = vst [vmem:[#allocation243_spill] sm:$0xff] %v11062_v15  ;;  %v16193_v15 = vld [vmem:[#allocation295_spill] sm:$0xff]  ;;  %vm16194_vm10 = vcmp.eq.s32.totalorder %v16160_v48, %v10829_v51  ;;  %vm16198_vm5 = vcmp.eq.s32.totalorder %v16163_v63, %v10898_v6 }
 0xa13   : > { %16183 = vst [vmem:[#allocation244_spill] sm:$0xff] %v11068_v25  ;;  %v11103_v25 = vpop.permute.xlu1 %5136  ;;  %v11109_v43 = vsel %vm16194_vm10, %v16193_v15, 0.0  ;;  %v11115_v16 = vsel %vm16195_vm14, %v16193_v15, 0.0  ;;  %vm16201_vm10 = vcmp.eq.s32.totalorder %v16164_v58, %v10829_v51  ;;  %v11141_v15 = vsel %vm2718_vm15, %v16200_v20, 0.0 }
 0xa14   : > { %16185 = vst [vmem:[#allocation245_spill] sm:$0xff] %v11074_v49  ;;  %v11100_v49 = vsel %vm2691_vm6, %v16190_v59, 0.0  ;;  %vm16197_vm6 = vcmp.eq.s32.totalorder %v16163_v63, %v10829_v51  ;;  %v11135_v48 = vsel %vm16201_vm10, %v16200_v20, 0.0  ;;  %v11147_v63 = vsel %vm2723_vm8, %v16202_v18, 0.0  ;;  %v16256_v59 = vld [vmem:[#allocation332_spill] sm:$0xff] }
 0xa15   : > { %16188 = vst [vmem:[#allocation247_spill] sm:$0xff] %v11090_v45  ;;  %v16196_v45 = vld [vmem:[#allocation298_spill] sm:$0xff]  ;;  %vm16205_vm14 = vcmp.eq.s32.totalorder %v16158_v34, %v10829_v51  ;;  %vm16206_vm15 = vcmp.eq.s32.totalorder %v16158_v34, %v10898_v6  ;;  %vm16208_vm8 = vcmp.eq.s32.totalorder %v16168_v61, %v10829_v51  ;;  %vm16214_vm10 = vcmp.eq.s32.totalorder %v16173_v19, %v10898_v6 }
 0xa16   : > { %16191 = vst [vmem:[#allocation248_spill] sm:$0xff] %v11100_v49  ;;  %v11121_v49 = vsel %vm16197_vm6, %v16196_v45, 0.0  ;;  %v11127_v14 = vsel %vm16198_vm5, %v16196_v45, 0.0  ;;  %v11153_v45 = vsel %vm2724_vm7, %v16202_v18, 0.0  ;;  %v11161_v20 = vsel %vm16205_vm14, %v16204_v1, 0.0  ;;  %v16213_v34 = vld [vmem:[#allocation310_spill] sm:$0xff]  ;;  %5529 = vperm.xlu1 %6773, %v10764_v60   ;;  %5519 = vperm.xlu2 %6774, %v10744_v5  }
 0xa17   : > { %16192 = vst [vmem:[#allocation249_spill] sm:$0xff] %v11103_v25  ;;  %v11167_v58 = vsel %vm16206_vm15, %v16204_v1, 0.0  ;;  %v11173_v18 = vsel %vm16208_vm8, %v16207_v8, 0.0  ;;  %vm16209_vm7 = vcmp.eq.s32.totalorder %v16168_v61, %v10898_v6  ;;  %vm16211_vm5 = vcmp.eq.s32.totalorder %v16162_v10, %v10829_v51  ;;  %v16215_v61 = vld [vmem:[#allocation311_spill] sm:$0xff]  ;;  %v16231_v25 = vld [vmem:[#allocation60_spill] sm:$0xff]  ;;  %v16303_v60 = vld [vmem:[#allocation109_spill] sm:$0xff] }
 0xa18   : > { %16199 = vst [vmem:[#allocation253_spill] sm:$0xff] %v11129_v56  ;;  %v11179_v11 = vsel %vm16209_vm7, %v16207_v8, 0.0  ;;  %v11185_v3 = vsel %vm16211_vm5, %v16210_v50, 0.0  ;;  %vm16212_vm6 = vcmp.eq.s32.totalorder %v16162_v10, %v10898_v6  ;;  %v11197_v36 = vsel %vm2735_vm12, %v16213_v34, 0.0  ;;  %v16218_v10 = vld [vmem:[#allocation57_spill] sm:$0xff]  ;;  %v6844_v5 = vld [vmem:[%s7053_s27 + $0x28] sm:$0xff] }
 0xa19   : > { %16203 = vst [vmem:[#allocation254_spill] sm:$0xff] %v11155_v17  ;;  %v11191_v1 = vsel %vm16212_vm6, %v16210_v50, 0.0  ;;  %v11203_v8 = vsel %vm16214_vm10, %v16213_v34, 0.0  ;;  %vm16216_vm14 = vcmp.eq.s32.totalorder %v16166_v21, %v10829_v51  ;;  %vm16217_vm15 = vcmp.eq.s32.totalorder %v16166_v21, %v10898_v6  ;;  %v16221_v34 = vld [vmem:[#allocation312_spill] sm:$0xff]  ;;  %v16252_v56 = vld [vmem:[#allocation81_spill] sm:$0xff] }
 0xa1a   : > { %v11209_v31 = vsel %vm16216_vm14, %v16215_v61, 0.0  ;;  %v11215_v50 = vsel %vm16217_vm15, %v16215_v61, 0.0  ;;  %vm16219_vm12 = vcmp.eq.s32.totalorder %v16165_v62, %v10829_v51  ;;  %vm16220_vm8 = vcmp.eq.s32.totalorder %v16165_v62, %v10898_v6  ;;  %v16222_v61 = vld [vmem:[#allocation313_spill] sm:$0xff]  ;;  %16239 = vst [vmem:[#allocation258_spill] sm:$0xff] %v11330_v0  ;;  %v16247_v0 = vld [vmem:[#allocation331_spill] sm:$0xff] }
 0xa1b   : > { %v11221_v12 = vsel %vm16219_vm12, %v16218_v10, 0.0  ;;  %v11227_v19 = vsel %vm16220_vm8, %v16218_v10, 0.0  ;;  %v11233_v42 = vsel %vm2741_vm0, %v16221_v34, 0.0  ;;  %v11239_v21 = vsel %vm2742_vm11, %v16221_v34, 0.0  ;;  %v16225_v10 = vld [vmem:[#allocation64_spill] sm:$0xff]  ;;  %v16228_v34 = vld [vmem:[#allocation58_spill] sm:$0xff] }
 0xa1c   : > { %vm16223_vm7 = vcmp.eq.s32.totalorder %v16169_v26, %v10829_v51  ;;  %vm16224_vm5 = vcmp.eq.s32.totalorder %v16169_v26, %v10898_v6  ;;  %vm16226_vm0 = vcmp.eq.s32.totalorder %v16174_v57, %v10829_v51  ;;  %vm16227_vm11 = vcmp.eq.s32.totalorder %v16174_v57, %v10898_v6  ;;  %16242 = vst [vmem:[#allocation259_spill] sm:$0xff] %v11340_v35  ;;  %v16246_v35 = vld [vmem:[#allocation49_spill] sm:$0xff] }
 0xa1d   : > { %v11245_v27 = vsel %vm16223_vm7, %v16222_v61, 0.0  ;;  %v11251_v62 = vsel %vm16224_vm5, %v16222_v61, 0.0  ;;  %v11257_v32 = vsel %vm16226_vm0, %v16225_v10, 0.0  ;;  %v11263_v47 = vsel %vm16227_vm11, %v16225_v10, 0.0  ;;  %v16230_v61 = vld [vmem:[#allocation314_spill] sm:$0xff] }
 0xa1e   : > { %v11269_v9 = vsel %vm2747_vm9, %v16228_v34, 0.0  ;;  %v11275_v26 = vsel %vm2748_vm3, %v16228_v34, 0.0  ;;  %v11283_v57 = vsel %vm2731_vm13, %v16230_v61, 0.0  ;;  %v11289_v10 = vsel %vm2732_vm2, %v16230_v61, 0.0  ;;  %v16235_v61 = vld [vmem:[#allocation70_spill] sm:$0xff] }
 0xa1f   : > { %16229 = vst [vmem:[#allocation255_spill] sm:$0xff] %v11275_v26  ;;  %v11295_v54 = vsel %vm2739_vm1, %v16231_v25, 0.0  ;;  %vm16232_vm3 = vcmp.eq.s32.totalorder %v16179_v52, %v10898_v6  ;;  %vm16234_vm13 = vcmp.eq.s32.totalorder %v16186_v22, %v10829_v51  ;;  %v11314_v34 = vsel %vm2738_vm4, %v16233_v29, 0.0  ;;  %v16240_v22 = vld [vmem:[#allocation76_spill] sm:$0xff] }
 0xa20   : > { %v11301_v39 = vsel %vm16232_vm3, %v16231_v25, 0.0  ;;  %v11308_v41 = vsel %vm16234_vm13, %v16233_v29, 0.0  ;;  %vm16236_vm1 = vcmp.eq.s32.totalorder %v16187_v13, %v10829_v51  ;;  %vm16237_vm2 = vcmp.eq.s32.totalorder %v16187_v13, %v10898_v6  ;;  %v11328_v25 = vpop.permute.xlu1 %5278  ;;  %v16241_v29 = vld [vmem:[#allocation79_spill] sm:$0xff]  ;;  %v16243_v13 = vld [vmem:[#allocation82_spill] sm:$0xff] }
 0xa21   : > { %v11320_v52 = vsel %vm16236_vm1, %v16235_v61, 0.0  ;;  %v11326_v46 = vsel %vm16237_vm2, %v16235_v61, 0.0  ;;  %16238 = vst [vmem:[#allocation257_spill] sm:$0xff] %v11328_v25  ;;  %vm3153_vm4 = vcmp.eq.s32.totalorder %v16240_v22, %v10829_v51  ;;  %vm3154_vm9 = vcmp.eq.s32.totalorder %v16240_v22, %v10898_v6  ;;  %v16244_v61 = vld [vmem:[#allocation33_spill] sm:$0xff]  ;;  %v16250_v25 = vld [vmem:[#allocation80_spill] sm:$0xff] }
 0xa22   : > { %vm3159_vm6 = vcmp.eq.s32.totalorder %v16241_v29, %v10829_v51  ;;  %vm3160_vm10 = vcmp.eq.s32.totalorder %v16241_v29, %v10898_v6  ;;  %vm3165_vm14 = vcmp.eq.s32.totalorder %v16243_v13, %v10829_v51  ;;  %vm3163_vm12 = vcmp.eq.s32.totalorder %v16244_v61, %v10829_v51 }
 0xa23   : > { %vm3164_vm8 = vcmp.eq.s32.totalorder %v16244_v61, %v10898_v6  ;;  %vm3167_vm7 = vcmp.eq.s32.totalorder %v16245_v30, %v10829_v51  ;;  %vm3168_vm5 = vcmp.eq.s32.totalorder %v16245_v30, %v10898_v6  ;;  %v3377_v17 = vsel %vm3153_vm4, %v16247_v0, 0.0 }
 0xa24   : > { %vm3173_vm1 = vcmp.eq.s32.totalorder %v16249_v37, %v10829_v51  ;;  %vm3174_vm2 = vcmp.eq.s32.totalorder %v16249_v37, %v10898_v6  ;;  %v3378_v28 = vsel %vm3154_vm9, %v16247_v0, 0.0  ;;  %vm3176_vm11 = vcmp.eq.s32.totalorder %v16251_v4, %v10898_v6  ;;  %v16254_v0 = vld [vmem:[#allocation318_spill] sm:$0xff] }
 0xa25   : > { %vm3179_vm13 = vcmp.eq.s32.totalorder %v16252_v56, %v10829_v51  ;;  %vm3180_vm0 = vcmp.eq.s32.totalorder %v16252_v56, %v10898_v6  ;;  %vm3185_vm15 = vcmp.eq.s32.totalorder %v16253_v40, %v10829_v51  ;;  %vm3186_vm9 = vcmp.eq.s32.totalorder %v16253_v40, %v10898_v6 }
 0xa26   : > { %vm3178_vm4 = vcmp.eq.s32.totalorder %v16250_v25, %v10898_v6  ;;  %v11390_v22 = vadd.f32 %v3377_v17, %v11109_v43  ;;  %v3391_v7 = vsel %vm3167_vm7, %v16256_v59, 0.0  ;;  %v3392_v44 = vsel %vm3168_vm5, %v16256_v59, 0.0  ;;  %v16259_v59 = vld [vmem:[#allocation335_spill] sm:$0xff] }
 0xa27   : > { %v3383_v26 = vsel %vm3159_vm6, %v16257_v55, 0.0  ;;  %vm3192_vm3 = vcmp.eq.s32.totalorder %v16254_v0, %v10898_v6  ;;  %v11409_v17 = vadd.f32 %v3378_v28, %v11115_v16  ;;  %v3384_v30 = vsel %vm3160_vm10, %v16257_v55, 0.0  ;;  %v16261_v16 = vld [vmem:[#allocation337_spill] sm:$0xff] }
 0xa28   : > { %16255 = vst [vmem:[#allocation260_spill] sm:$0xff] %v11390_v22  ;;  %v3397_v43 = vsel %vm3173_vm1, %v16259_v59, 0.0  ;;  %v3398_v33 = vsel %vm3174_vm2, %v16259_v59, 0.0  ;;  %v3387_v28 = vsel %vm3163_vm12, %v16260_v38, 0.0  ;;  %v3388_v55 = vsel %vm3164_vm8, %v16260_v38, 0.0  ;;  %v11440_v37 = vpop.permute.xlu1 %5287  ;;  %v11442_v59 = vpop.permute.xlu2 %5305 }
 0xa29   : > { %16258 = vst [vmem:[#allocation261_spill] sm:$0xff] %v11409_v17  ;;  %v3389_v29 = vsel %vm3165_vm14, %v16261_v16, 0.0  ;;  %vm16262_vm6 = vcmp.eq.s32.totalorder %v16243_v13, %v10898_v6  ;;  %v16265_v17 = vld [vmem:[#allocation85_spill] sm:$0xff]  ;;  %v11449_v61 = vadd.f32 %v3391_v7, %v11209_v31  ;;  %v11452_v38 = vadd.f32 %v3392_v44, %v11215_v50  ;;  %v16266_v13 = vld [vmem:[#allocation338_spill] sm:$0xff]  ;;  %v16269_v31 = vld [vmem:[#allocation316_spill] sm:$0xff] }
 0xa2a   : > { %v3390_v24 = vsel %vm16262_vm6, %v16261_v16, 0.0  ;;  %16263 = vst [vmem:[#allocation262_spill] sm:$0xff] %v11440_v37  ;;  %vm3181_vm10 = vcmp.eq.s32.totalorder %v16265_v17, %v10829_v51  ;;  %vm3182_vm12 = vcmp.eq.s32.totalorder %v16265_v17, %v10898_v6  ;;  %v11455_v22 = vadd.f32 %v3383_v26, %v11121_v49  ;;  %v16268_v37 = vld [vmem:[#allocation78_spill] sm:$0xff]  ;;  %v16270_v26 = vld [vmem:[#allocation87_spill] sm:$0xff]  ;;  %v16293_v17 = vld [vmem:[#allocation96_spill] sm:$0xff] }
 0xa2b   : > { %16264 = vst [vmem:[#allocation8_spill] sm:$0xff] %v11442_v59  ;;  %v3403_v16 = vsel %vm3179_vm13, %v16266_v13, 0.0  ;;  %v11461_v59 = vpop.permute.xlu0 %5335  ;;  %vm3183_vm14 = vcmp.eq.s32.totalorder %v16268_v37, %v10829_v51  ;;  %vm3184_vm8 = vcmp.eq.s32.totalorder %v16268_v37, %v10898_v6  ;;  %vm3187_vm7 = vcmp.eq.s32.totalorder %v16269_v31, %v10829_v51 }
 0xa2c   : > { %16267 = vst [vmem:[#allocation263_spill] sm:$0xff] %v11461_v59  ;;  %v11470_v44 = vadd.f32 %v3384_v30, %v11127_v14  ;;  %v11473_v49 = vadd.f32 %v3397_v43, %v11245_v27  ;;  %v11476_v7 = vadd.f32 %v3398_v33, %v11251_v62  ;;  %v3404_v50 = vsel %vm3180_vm0, %v16266_v13, 0.0  ;;  %v16271_v27 = vld [vmem:[#allocation319_spill] sm:$0xff]  ;;  %v16272_v43 = vld [vmem:[#allocation88_spill] sm:$0xff]  ;;  %v16281_v13 = vld [vmem:[#allocation246_spill] sm:$0xff] }
 0xa2d   : > { %vm3188_vm1 = vcmp.eq.s32.totalorder %v16269_v31, %v10898_v6  ;;  %v11491_v14 = vadd.f32 %v3387_v28, %v11161_v20  ;;  %v11494_v62 = vadd.f32 %v3388_v55, %v11167_v58  ;;  %v11497_v56 = vadd.f32 %v3389_v29, %v11135_v48  ;;  %v16273_v20 = vld [vmem:[#allocation339_spill] sm:$0xff] }
 0xa2e   : > { %v11500_v30 = vadd.f32 %v3390_v24, %v11141_v15  ;;  %vm3195_vm0 = vcmp.eq.s32.totalorder %v16272_v43, %v10829_v51  ;;  %v11507_v33 = vadd.f32 %v3403_v16, %v11283_v57  ;;  %vm16274_vm2 = vcmp.eq.s32.totalorder %v16246_v35, %v10829_v51  ;;  %v16276_v15 = vld [vmem:[#allocation283_spill] sm:$0xff]  ;;  %v16280_v24 = vld [vmem:[#allocation252_spill] sm:$0xff] }
 0xa2f   : > { %v3393_v58 = vsel %vm16274_vm2, %v16273_v20, 0.0  ;;  %vm16275_vm13 = vcmp.eq.s32.totalorder %v16246_v35, %v10898_v6  ;;  %vm2745_vm5 = vcmp.eq.s32.totalorder %v16276_v15, %v10829_v51  ;;  %v11520_v28 = vadd.f32 %v3404_v50, %v11289_v10  ;;  %v16277_v55 = vld [vmem:[#allocation91_spill] sm:$0xff]  ;;  %v16283_v50 = vld [vmem:[#allocation92_spill] sm:$0xff] }
 0xa30   : > { %v3394_v48 = vsel %vm16275_vm13, %v16273_v20, 0.0  ;;  %vm16278_vm6 = vcmp.eq.s32.totalorder %v16248_v53, %v10829_v51  ;;  %vm16279_vm2 = vcmp.eq.s32.totalorder %v16248_v53, %v10898_v6  ;;  %v3409_v35 = vsel %vm3185_vm15, %v16280_v24, 0.0 }
 0xa31   : > { %v3395_v57 = vsel %vm16278_vm6, %v16277_v55, 0.0  ;;  %v3396_v29 = vsel %vm16279_vm2, %v16277_v55, 0.0  ;;  %v3410_v10 = vsel %vm3186_vm9, %v16280_v24, 0.0  ;;  %vm16282_vm13 = vcmp.eq.s32.totalorder %v16251_v4, %v10829_v51  ;;  %v16285_v24 = vld [vmem:[#allocation340_spill] sm:$0xff] }
 0xa32   : > { %v3399_v16 = vsel %vm16282_vm13, %v16281_v13, 0.0  ;;  %v3400_v53 = vsel %vm3176_vm11, %v16281_v13, 0.0  ;;  %vm16284_vm15 = vcmp.eq.s32.totalorder %v16250_v25, %v10829_v51  ;;  %v11553_v40 = vadd.f32 %v3393_v58, %v11185_v3  ;;  %v6843_v25 = vld [vmem:[%s7053_s27] sm:$0xff]  ;;  %v11581_v58 = vpop.permute.xlu1 %5293 }
 0xa33   : > { %v3401_v20 = vsel %vm16284_vm15, %v16283_v50, 0.0  ;;  %v11556_v55 = vadd.f32 %v3394_v48, %v11191_v1  ;;  %v3402_v4 = vsel %vm3178_vm4, %v16283_v50, 0.0  ;;  %vm16286_vm11 = vcmp.eq.s32.totalorder %v16254_v0, %v10829_v51  ;;  %16287 = vst [vmem:[#allocation264_spill] sm:$0xff] %v11581_v58  ;;  %v11583_v48 = vpop.permute.xlu2 %5314  ;;  %v11597_v0 = vpop.permute.xlu0 %5344  ;;  %v16290_v50 = vld [vmem:[#allocation341_spill] sm:$0xff] }
 0xa34   : > { %v3415_v13 = vsel %vm16286_vm11, %v16285_v24, 0.0  ;;  %v15057_v59 = vmov 7   ;;  %v11568_v2 = vadd.f32 %v3395_v57, %v11147_v63  ;;  %v11571_v23 = vadd.f32 %v3396_v29, %v11153_v45  ;;  %16288 = vst [vmem:[#allocation11_spill] sm:$0xff] %v11583_v48  ;;  %v16323_v48 = vld [vmem:[#allocation121_spill] sm:$0xff] }
 0xa35   : > { %6776 = vset.pattern.permute.xlu0 %v15057_v59  ;;  %v11574_v3 = vadd.f32 %v3409_v35, %v11308_v41  ;;  %v3416_v1 = vsel %vm3192_vm3, %v16285_v24, 0.0  ;;  %v11586_v63 = vadd.f32 %v3410_v10, %v11314_v34  ;;  %v11589_v45 = vadd.f32 %v3399_v16, %v11221_v12  ;;  %16289 = vst [vmem:[#allocation266_spill] sm:$0xff] %v11597_v0  ;;  %v16291_v34 = vld [vmem:[#allocation93_spill] sm:$0xff]  ;;  %v16292_v10 = vld [vmem:[#allocation95_spill] sm:$0xff]  ;;  %v16322_v0 = vld [vmem:[#allocation10_spill] sm:$0xff] }
 0xa36   : > { %5726 = vperm.xlu0 %6776, %v6843_v25   ;;  %v11592_v41 = vadd.f32 %v3400_v53, %v11227_v19  ;;  %v11595_v57 = vadd.f32 %v3401_v20, %v11173_v18  ;;  %v11600_v29 = vadd.f32 %v3402_v4, %v11179_v11  ;;  %v11603_v35 = vadd.f32 %v3415_v13, %v11320_v52  ;;  %v16296_v20 = vld [vmem:[#allocation98_spill] sm:$0xff]  ;;  %v16298_v13 = vld [vmem:[#allocation99_spill] sm:$0xff] }
 0xa37   : > { %v3405_v12 = vsel %vm3181_vm10, %v16290_v50, 0.0  ;;  %v3406_v19 = vsel %vm3182_vm12, %v16290_v50, 0.0  ;;  %v11614_v18 = vadd.f32 %v3416_v1, %v11326_v46  ;;  %v3407_v11 = vsel %vm3183_vm14, %v16291_v34, 0.0  ;;  %v16300_v25 = vld [vmem:[#allocation62_spill] sm:$0xff]  ;;  %5534 = vperm.xlu2 %6774, %v16322_v0  }
 0xa38   : > { %v3408_v52 = vsel %vm3184_vm8, %v16291_v34, 0.0  ;;  %v3411_v16 = vsel %vm3187_vm7, %v16292_v10, 0.0  ;;  %v3412_v46 = vsel %vm3188_vm1, %v16292_v10, 0.0  ;;  %vm16294_vm3 = vcmp.eq.s32.totalorder %v16270_v26, %v10829_v51  ;;  %v16309_v10 = vld [vmem:[#allocation112_spill] sm:$0xff] }
 0xa39   : > { %v3413_v53 = vsel %vm16294_vm3, %v16293_v17, 0.0  ;;  %vm16295_vm4 = vcmp.eq.s32.totalorder %v16270_v26, %v10898_v6  ;;  %vm16297_vm9 = vcmp.eq.s32.totalorder %v16271_v27, %v10829_v51  ;;  %v11645_v24 = vadd.f32 %v3405_v12, %v11257_v32  ;;  %v16329_v27 = vld [vmem:[#allocation362_spill] sm:$0xff] }
 0xa3a   : > { %v3414_v37 = vsel %vm16295_vm4, %v16293_v17, 0.0  ;;  %v3417_v4 = vsel %vm16297_vm9, %v16296_v20, 0.0  ;;  %v11648_v31 = vadd.f32 %v3406_v19, %v11263_v47  ;;  %v3419_v1 = vsel %vm3195_vm0, %v16298_v13, 0.0  ;;  %v16312_v17 = vld [vmem:[#allocation116_spill] sm:$0xff] }
 0xa3b   : > { %vm16299_vm10 = vcmp.eq.s32.totalorder %v16272_v43, %v10898_v6  ;;  %v2969_v32 = vsel %vm2745_vm5, %v16300_v25, 0.0  ;;  %v11663_v50 = vadd.f32 %v3407_v11, %v11197_v36  ;;  %v11666_v47 = vadd.f32 %v3408_v52, %v11203_v8  ;;  %v11707_v52 = vpop.permute.xlu0 %5353  ;;  %v6845_v25 = vld [vmem:[%s7053_s27 + $0x40] sm:$0xff] }
 0xa3c   : > { %v3420_v26 = vsel %vm16299_vm10, %v16298_v13, 0.0  ;;  %v11669_v12 = vadd.f32 %v3411_v16, %v11295_v54  ;;  %v11674_v43 = vadd.f32 %v3412_v46, %v11301_v39  ;;  %v11677_v19 = vadd.f32 %v3413_v53, %v11233_v42  ;;  %v16302_v54 = vld [vmem:[#allocation255_spill] sm:$0xff]  ;;  %v11695_v42 = vpop.permute.xlu1 %5302  ;;  %16308 = vst [vmem:[#allocation276_spill] sm:$0xff] %v11707_v52  ;;  %v16310_v16 = vld [vmem:[#allocation114_spill] sm:$0xff]  ;;  %v16320_v52 = vld [vmem:[#allocation357_spill] sm:$0xff] }
 0xa3d   : > { %v11680_v34 = vadd.f32 %v3414_v37, %v11239_v21  ;;  %v11682_v36 = vadd.f32 %v3417_v4, %v2969_v32  ;;  %v11685_v8 = vadd.f32 %v3419_v1, %v11269_v9  ;;  %v11688_v11 = vadd.f32 %v3420_v26, %v16302_v54  ;;  %16304 = vst [vmem:[#allocation272_spill] sm:$0xff] %v11695_v42  ;;  %v11697_v21 = vpop.permute.xlu2 %5323  ;;  %v16306_v39 = vld [vmem:[#allocation111_spill] sm:$0xff]  ;;  %v16314_v37 = vld [vmem:[#allocation113_spill] sm:$0xff]  ;;  %v16317_v1 = vld [vmem:[#allocation354_spill] sm:$0xff] }
 0xa3e   : > { %vm3601_vm12 = vcmp.eq.s32.totalorder %v16303_v60, %v10829_v51  ;;  %vm3602_vm14 = vcmp.eq.s32.totalorder %v16303_v60, %v10898_v6  ;;  %5741 = vperm.xlu0 %6776, %v6844_v5   ;;  %16305 = vst [vmem:[#allocation273_spill] sm:$0xff] %v11697_v21  ;;  %vm3611_vm8 = vcmp.eq.s32.totalorder %v16306_v39, %v10829_v51  ;;  %v16307_v9 = vld [vmem:[#allocation31_spill] sm:$0xff]  ;;  %v16318_v32 = vld [vmem:[#allocation120_spill] sm:$0xff] }
 0xa3f   : > { %16301 = vst [vmem:[#allocation268_spill] sm:$0xff] %v11682_v36  ;;  %vm3612_vm7 = vcmp.eq.s32.totalorder %v16306_v39, %v10898_v6  ;;  %vm3607_vm5 = vcmp.eq.s32.totalorder %v16307_v9, %v10829_v51  ;;  %vm3608_vm1 = vcmp.eq.s32.totalorder %v16307_v9, %v10898_v6  ;;  %vm3617_vm0 = vcmp.eq.s32.totalorder %v16309_v10, %v10829_v51  ;;  %v16311_v46 = vld [vmem:[#allocation27_spill] sm:$0xff]  ;;  %v16319_v5 = vld [vmem:[#allocation356_spill] sm:$0xff] }
 0xa40   : > { %vm3618_vm6 = vcmp.eq.s32.totalorder %v16309_v10, %v10898_v6  ;;  %vm3613_vm2 = vcmp.eq.s32.totalorder %v16310_v16, %v10829_v51  ;;  %vm3624_vm4 = vcmp.eq.s32.totalorder %v16312_v17, %v10898_v6  ;;  %v16313_v53 = vld [vmem:[#allocation115_spill] sm:$0xff]  ;;  %v3825_v26 = vsel %vm3601_vm12, %v16317_v1, 0.0  ;;  %v16324_v39 = vld [vmem:[#allocation260_spill] sm:$0xff] }
 0xa41   : > { %vm3619_vm9 = vcmp.eq.s32.totalorder %v16313_v53, %v10829_v51  ;;  %v16315_v4 = vld [vmem:[#allocation43_spill] sm:$0xff]  ;;  %vm3622_vm10 = vcmp.eq.s32.totalorder %v16314_v37, %v10898_v6  ;;  %vm3635_vm15 = vcmp.eq.s32.totalorder %v16318_v32, %v10829_v51  ;;  %vm3636_vm11 = vcmp.eq.s32.totalorder %v16318_v32, %v10898_v6 }
 0xa42   : > { %v16316_v13 = vld [vmem:[#allocation119_spill] sm:$0xff]  ;;  %v3826_v54 = vsel %vm3602_vm14, %v16317_v1, 0.0  ;;  %v3835_v59 = vsel %vm3611_vm8, %v16319_v5, 0.0  ;;  %v3836_v36 = vsel %vm3612_vm7, %v16319_v5, 0.0  ;;  %v3831_v21 = vsel %vm3607_vm5, %v16320_v52, 0.0  ;;  %v16321_v1 = vld [vmem:[#allocation209_spill] sm:$0xff] }
 0xa43   : > { %vm3625_vm3 = vcmp.eq.s32.totalorder %v16316_v13, %v10829_v51  ;;  %vm3626_vm13 = vcmp.eq.s32.totalorder %v16316_v13, %v10898_v6  ;;  %v3832_v60 = vsel %vm3608_vm1, %v16320_v52, 0.0  ;;  %5544 = vperm.xlu1 %6773, %v16321_v1   ;;  %vm3631_vm12 = vcmp.eq.s32.totalorder %v16323_v48, %v10829_v51  ;;  %v16325_v5 = vld [vmem:[#allocation359_spill] sm:$0xff]  ;;  %v16326_v52 = vld [vmem:[#allocation360_spill] sm:$0xff] }
 0xa44   : > { %v11774_v20 = vadd.f32 %v3825_v26, %v16324_v39  ;;  %v3841_v42 = vsel %vm3617_vm0, %v16325_v5, 0.0  ;;  %v3842_v9 = vsel %vm3618_vm6, %v16325_v5, 0.0  ;;  %v3837_v0 = vsel %vm3613_vm2, %v16326_v52, 0.0  ;;  %v16327_v26 = vld [vmem:[#allocation261_spill] sm:$0xff]  ;;  %v11806_v58 = vpop.permute.xlu1 %5311 }
 0xa45   : > { %vm3632_vm14 = vcmp.eq.s32.totalorder %v16323_v48, %v10898_v6  ;;  %v11791_v1 = vadd.f32 %v3826_v54, %v16327_v26  ;;  %vm16328_vm8 = vcmp.eq.s32.totalorder %v16310_v16, %v10898_v6  ;;  %vm16330_vm7 = vcmp.eq.s32.totalorder %v16312_v17, %v10829_v51  ;;  %16331 = vst [vmem:[#allocation275_spill] sm:$0xff] %v11806_v58  ;;  %v11808_v54 = vpop.permute.xlu2 %5332  ;;  %v16333_v26 = vld [vmem:[#allocation37_spill] sm:$0xff]  ;;  %v16334_v16 = vld [vmem:[#allocation343_spill] sm:$0xff] }
 0xa46   : > { %v3838_v39 = vsel %vm16328_vm8, %v16326_v52, 0.0  ;;  %v3847_v10 = vsel %vm16330_vm7, %v16329_v27, 0.0  ;;  %v3848_v5 = vsel %vm3624_vm4, %v16329_v27, 0.0  ;;  %5750 = vperm.xlu0 %6776, %v6845_v25   ;;  %16332 = vst [vmem:[#allocation279_spill] sm:$0xff] %v11808_v54  ;;  %vm3627_vm5 = vcmp.eq.s32.totalorder %v16333_v26, %v10829_v51  ;;  %v11830_v54 = vpop.permute.xlu0 %5362  ;;  %v16336_v58 = vld [vmem:[#allocation117_spill] sm:$0xff] }
 0xa47   : > { %vm3628_vm1 = vcmp.eq.s32.totalorder %v16333_v26, %v10898_v6  ;;  %vm3637_vm0 = vcmp.eq.s32.totalorder %v16334_v16, %v10829_v51  ;;  %vm3638_vm6 = vcmp.eq.s32.totalorder %v16334_v16, %v10898_v6  ;;  %v11819_v27 = vadd.f32 %v3835_v59, %v11491_v14  ;;  %16335 = vst [vmem:[#allocation282_spill] sm:$0xff] %v11830_v54  ;;  %v16337_v59 = vld [vmem:[#allocation346_spill] sm:$0xff] }
 0xa48   : > { %v11822_v25 = vadd.f32 %v3836_v36, %v11494_v62  ;;  %v11825_v17 = vadd.f32 %v3831_v21, %v11455_v22  ;;  %v11828_v52 = vadd.f32 %v3832_v60, %v11470_v44  ;;  %v11839_v14 = vadd.f32 %v3841_v42, %v11553_v40  ;;  %v16338_v62 = vld [vmem:[#allocation363_spill] sm:$0xff]  ;;  %v16339_v21 = vld [vmem:[#allocation118_spill] sm:$0xff] }
 0xa49   : > { %v11842_v22 = vadd.f32 %v3842_v9, %v11556_v55  ;;  %v11845_v44 = vadd.f32 %v3837_v0, %v11497_v56  ;;  %v3843_v36 = vsel %vm3619_vm9, %v16338_v62, 0.0  ;;  %v11858_v40 = vadd.f32 %v3838_v39, %v11500_v30  ;;  %v16342_v60 = vld [vmem:[#allocation7_spill] sm:$0xff]  ;;  %v16348_v0 = vld [vmem:[#allocation14_spill] sm:$0xff] }
 0xa4a   : > { %v11861_v56 = vadd.f32 %v3847_v10, %v11589_v45  ;;  %v11864_v55 = vadd.f32 %v3848_v5, %v11592_v41  ;;  %vm16341_vm9 = vcmp.eq.s32.totalorder %v16313_v53, %v10898_v6  ;;  %vm16343_vm8 = vcmp.eq.s32.totalorder %v16311_v46, %v10829_v51  ;;  %v16345_v45 = vld [vmem:[#allocation364_spill] sm:$0xff]  ;;  %v16349_v10 = vld [vmem:[#allocation365_spill] sm:$0xff]  ;;  %v16354_v54 = vld [vmem:[#allocation206_spill] sm:$0xff] }
 0xa4b   : > { %v3844_v42 = vsel %vm16341_vm9, %v16338_v62, 0.0  ;;  %v3839_v9 = vsel %vm16343_vm8, %v16342_v60, 0.0  ;;  %vm16344_vm7 = vcmp.eq.s32.totalorder %v16311_v46, %v10898_v6  ;;  %vm16346_vm4 = vcmp.eq.s32.totalorder %v16315_v4, %v10829_v51  ;;  %v16350_v62 = vld [vmem:[#allocation125_spill] sm:$0xff]  ;;  %5549 = vperm.xlu2 %6774, %v16354_v54  }
 0xa4c   : > { %16340 = vst [vmem:[#allocation278_spill] sm:$0xff] %v11864_v55  ;;  %v3840_v30 = vsel %vm16344_vm7, %v16342_v60, 0.0  ;;  %v3853_v41 = vsel %vm16346_vm4, %v16345_v45, 0.0  ;;  %vm16347_vm2 = vcmp.eq.s32.totalorder %v16315_v4, %v10898_v6  ;;  %vm2692_vm9 = vcmp.eq.s32.totalorder %v16348_v0, %v10898_v6 }
 0xa4d   : > { %v3854_v53 = vsel %vm16347_vm2, %v16345_v45, 0.0  ;;  %v11889_v39 = vadd.f32 %v3843_v36, %v11568_v2  ;;  %v3849_v46 = vsel %vm3625_vm3, %v16349_v10, 0.0  ;;  %v3850_v5 = vsel %vm3626_vm13, %v16349_v10, 0.0  ;;  %v16352_v36 = vld [vmem:[#allocation250_spill] sm:$0xff]  ;;  %v16353_v10 = vld [vmem:[#allocation207_spill] sm:$0xff] }
 0xa4e   : > { %vm16351_vm2 = vcmp.eq.s32.totalorder %v16314_v37, %v10829_v51  ;;  %v11904_v60 = vadd.f32 %v3844_v42, %v11571_v23  ;;  %v3846_v2 = vsel %vm3622_vm10, %v16350_v62, 0.0  ;;  %v3859_v13 = vsel %vm3635_vm15, %v16352_v36, 0.0  ;;  %5559 = vperm.xlu1 %6773, %v16353_v10  }
 0xa4f   : > { %v3845_v4 = vsel %vm16351_vm2, %v16350_v62, 0.0  ;;  %v3860_v45 = vsel %vm3636_vm11, %v16352_v36, 0.0  ;;  %v11921_v23 = vadd.f32 %v3839_v9, %v11449_v61  ;;  %v11924_v37 = vadd.f32 %v3840_v30, %v11452_v38  ;;  %v16355_v61 = vld [vmem:[#allocation251_spill] sm:$0xff]  ;;  %v6846_v9 = vld [vmem:[%s7053_s27 + $0x58] sm:$0xff]  ;;  %v16364_v36 = vld [vmem:[#allocation126_spill] sm:$0xff] }
 0xa50   : > { %v11927_v42 = vadd.f32 %v3853_v41, %v11645_v24  ;;  %v11930_v62 = vadd.f32 %v3854_v53, %v11648_v31  ;;  %v11933_v55 = vadd.f32 %v3849_v46, %v11595_v57  ;;  %v11936_v32 = vadd.f32 %v3850_v5, %v11600_v29  ;;  %5759 = vperm.xlu0 %6776, %v6846_v9   ;;  %v11946_v24 = vpop.permute.xlu1 %5320  ;;  %v11948_v31 = vpop.permute.xlu2 %5341  ;;  %v16359_v53 = vld [vmem:[#allocation123_spill] sm:$0xff]  ;;  %v16370_v9 = vld [vmem:[#allocation294_spill] sm:$0xff] }
 0xa51   : > { %v11939_v54 = vadd.f32 %v3845_v4, %v11473_v49  ;;  %v3855_v38 = vsel %vm3631_vm12, %v16355_v61, 0.0  ;;  %v11951_v57 = vadd.f32 %v3846_v2, %v11476_v7  ;;  %v11954_v29 = vadd.f32 %v3859_v13, %v11669_v12  ;;  %v11963_v41 = vpop.permute.xlu0 %5371  ;;  %v16360_v12 = vld [vmem:[#allocation256_spill] sm:$0xff]  ;;  %v16361_v4 = vld [vmem:[#allocation89_spill] sm:$0xff] }
 0xa52   : > { %v11957_v49 = vadd.f32 %v3860_v45, %v11674_v43  ;;  %v3856_v30 = vsel %vm3632_vm14, %v16355_v61, 0.0  ;;  %16358 = vst [vmem:[#allocation284_spill] sm:$0xff] %v11963_v41  ;;  %v3851_v46 = vsel %vm3627_vm5, %v16359_v53, 0.0  ;;  %v3852_v7 = vsel %vm3628_vm1, %v16359_v53, 0.0  ;;  %v16367_v45 = vld [vmem:[#allocation90_spill] sm:$0xff] }
 0xa53   : > { %16356 = vst [vmem:[#allocation280_spill] sm:$0xff] %v11954_v29  ;;  %v3861_v43 = vsel %vm3637_vm0, %v16360_v12, 0.0  ;;  %v3862_v48 = vsel %vm3638_vm6, %v16360_v12, 0.0  ;;  %v11982_v5 = vadd.f32 %v3855_v38, %v11663_v50  ;;  %vm16362_vm13 = vcmp.eq.s32.totalorder %v16336_v58, %v10829_v51  ;;  %v16373_v53 = vld [vmem:[#allocation6_spill] sm:$0xff]  ;;  %v16379_v12 = vld [vmem:[#allocation151_spill] sm:$0xff]  ;;  %v16396_v29 = vld [vmem:[#allocation369_spill] sm:$0xff] }
 0xa54   : > { %16357 = vst [vmem:[#allocation45_spill] sm:$0xff] %v11957_v49  ;;  %v3857_v2 = vsel %vm16362_vm13, %v16361_v4, 0.0  ;;  %vm16363_vm15 = vcmp.eq.s32.totalorder %v16336_v58, %v10898_v6  ;;  %vm16365_vm11 = vcmp.eq.s32.totalorder %v16337_v59, %v10829_v51  ;;  %v11997_v16 = vadd.f32 %v3856_v30, %v11666_v47  ;;  %5564 = vperm.xlu2 %6774, %v16373_v53   ;;  %v16395_v49 = vld [vmem:[#allocation12_spill] sm:$0xff] }
 0xa55   : > { %v3858_v26 = vsel %vm16363_vm15, %v16361_v4, 0.0  ;;  %v3867_v13 = vsel %vm16365_vm11, %v16364_v36, 0.0  ;;  %vm16366_vm3 = vcmp.eq.s32.totalorder %v16337_v59, %v10898_v6  ;;  %vm16368_vm10 = vcmp.eq.s32.totalorder %v16339_v21, %v10829_v51  ;;  %v16381_v4 = vld [vmem:[#allocation144_spill] sm:$0xff] }
 0xa56   : > { %v3868_v50 = vsel %vm16366_vm3, %v16364_v36, 0.0  ;;  %v3863_v10 = vsel %vm16368_vm10, %v16367_v45, 0.0  ;;  %vm16369_vm12 = vcmp.eq.s32.totalorder %v16339_v21, %v10898_v6  ;;  %v12012_v61 = vadd.f32 %v3851_v46, %v11507_v33  ;;  %v16384_v36 = vld [vmem:[#allocation133_spill] sm:$0xff] }
 0xa57   : > { %v3864_v58 = vsel %vm16369_vm12, %v16367_v45, 0.0  ;;  %v12015_v47 = vadd.f32 %v3852_v7, %v11520_v28  ;;  %v12018_v38 = vadd.f32 %v3861_v43, %v11677_v19  ;;  %v12021_v59 = vadd.f32 %v3862_v48, %v11680_v34  ;;  %v16372_v19 = vld [vmem:[#allocation212_spill] sm:$0xff]  ;;  %v16378_v7 = vld [vmem:[#allocation141_spill] sm:$0xff] }
 0xa58   : > { %v12027_v30 = vsel %vm2692_vm9, %v16370_v9, 0.0  ;;  %v12030_v21 = vadd.f32 %v3857_v2, %v11574_v3  ;;  %v12033_v33 = vadd.f32 %v3858_v26, %v11586_v63  ;;  %v12036_v28 = vadd.f32 %v3867_v13, %v11685_v8  ;;  %5574 = vperm.xlu1 %6773, %v16372_v19   ;;  %v16374_v3 = vld [vmem:[#allocation137_spill] sm:$0xff]  ;;  %v16375_v63 = vld [vmem:[#allocation135_spill] sm:$0xff]  ;;  %v16376_v8 = vld [vmem:[#allocation138_spill] sm:$0xff] }
 0xa59   : > { %16371 = vst [vmem:[#allocation53_spill] sm:$0xff] %v12027_v30  ;;  %v12041_v34 = vadd.f32 %v3868_v50, %v11688_v11  ;;  %v12044_v0 = vadd.f32 %v3863_v10, %v11603_v35  ;;  %v12047_v46 = vadd.f32 %v3864_v58, %v11614_v18  ;;  %vm4049_vm14 = vcmp.eq.s32.totalorder %v16374_v3, %v10829_v51  ;;  %v6847_v35 = vld [vmem:[%s7053_s27 + $0x80] sm:$0xff]  ;;  %v12060_v11 = vpop.permute.xlu1 %5329  ;;  %v12062_v18 = vpop.permute.xlu2 %5350  ;;  %v16380_v48 = vld [vmem:[#allocation24_spill] sm:$0xff]  ;;  %v16385_v13 = vld [vmem:[#allocation46_spill] sm:$0xff] }
 0xa5a   : > { %vm4050_vm5 = vcmp.eq.s32.totalorder %v16374_v3, %v10898_v6  ;;  %vm4055_vm1 = vcmp.eq.s32.totalorder %v16375_v63, %v10829_v51  ;;  %vm4056_vm0 = vcmp.eq.s32.totalorder %v16375_v63, %v10898_v6  ;;  %vm4061_vm6 = vcmp.eq.s32.totalorder %v16376_v8, %v10829_v51  ;;  %5774 = vperm.xlu0 %6776, %v6847_v35   ;;  %v5450_v43 = vpop.permute.xlu0 %5449  ;;  %v16386_v50 = vld [vmem:[#allocation142_spill] sm:$0xff]  ;;  %v16387_v45 = vld [vmem:[#allocation381_spill] sm:$0xff]  ;;  %v16388_v58 = vld [vmem:[#allocation147_spill] sm:$0xff] }
 0xa5b   : > { %16377 = vst [vmem:[#allocation286_spill] sm:$0xff] %v12062_v18  ;;  %vm4062_vm4 = vcmp.eq.s32.totalorder %v16376_v8, %v10898_v6  ;;  %vm4067_vm8 = vcmp.eq.s32.totalorder %v16378_v7, %v10829_v51  ;;  %vm5377_vm7 = vcmp.eq.s32.totalorder %v16379_v12, %v10829_v51  ;;  %vm5378_vm9 = vcmp.eq.s32.totalorder %v16379_v12, %v10898_v6  ;;  %v16389_v19 = vld [vmem:[#allocation385_spill] sm:$0xff]  ;;  %v16393_v30 = vld [vmem:[#allocation391_spill] sm:$0xff]  ;;  %v16417_v18 = vld [vmem:[#allocation62_spill] sm:$0xff] }
 0xa5c   : > { %vm4068_vm15 = vcmp.eq.s32.totalorder %v16378_v7, %v10898_v6  ;;  %vm4073_vm11 = vcmp.eq.s32.totalorder %v16381_v4, %v10829_v51  ;;  %v12080_v2 = vsel %vm5377_vm7, %v5450_v43, 0.0  ;;  %v12082_v26 = vsel %vm5378_vm9, %v5450_v43, 0.0  ;;  %v16390_v12 = vld [vmem:[#allocation145_spill] sm:$0xff]  ;;  %5579 = vperm.xlu2 %6774, %v16395_v49   ;;  %v16398_v49 = vld [vmem:[#allocation392_spill] sm:$0xff]  ;;  %v6848_v7 = vld [vmem:[%s7053_s27 + $0x88] sm:$0xff] }
 0xa5d   : > { %16382 = vst [vmem:[#allocation287_spill] sm:$0xff] %v12080_v2  ;;  %vm4063_vm12 = vcmp.eq.s32.totalorder %v16385_v13, %v10829_v51  ;;  %vm4064_vm13 = vcmp.eq.s32.totalorder %v16385_v13, %v10898_v6  ;;  %vm4069_vm2 = vcmp.eq.s32.totalorder %v16386_v50, %v10829_v51  ;;  %v4273_v10 = vsel %vm4049_vm14, %v16387_v45, 0.0  ;;  %v16391_v43 = vld [vmem:[#allocation389_spill] sm:$0xff] }
 0xa5e   : > { %16383 = vst [vmem:[#allocation281_spill] sm:$0xff] %v12082_v26  ;;  %vm4066_vm7 = vcmp.eq.s32.totalorder %v16384_v36, %v10898_v6  ;;  %vm4079_vm9 = vcmp.eq.s32.totalorder %v16388_v58, %v10829_v51  ;;  %vm4070_vm10 = vcmp.eq.s32.totalorder %v16386_v50, %v10898_v6  ;;  %v4274_v9 = vsel %vm4050_vm5, %v16387_v45, 0.0  ;;  %v16392_v26 = vld [vmem:[#allocation390_spill] sm:$0xff] }
 0xa5f   : > { %v4279_v53 = vsel %vm4055_vm1, %v16389_v19, 0.0  ;;  %v4280_v35 = vsel %vm4056_vm0, %v16389_v19, 0.0  ;;  %vm2746_vm14 = vcmp.eq.s32.totalorder %v16276_v15, %v10898_v6  ;;  %vm4075_vm3 = vcmp.eq.s32.totalorder %v16390_v12, %v10829_v51 }
 0xa60   : > { %v4285_v3 = vsel %vm4061_vm6, %v16391_v43, 0.0  ;;  %v4286_v45 = vsel %vm4062_vm4, %v16391_v43, 0.0  ;;  %v4287_v2 = vsel %vm4063_vm12, %v16392_v26, 0.0  ;;  %vm4076_vm5 = vcmp.eq.s32.totalorder %v16390_v12, %v10898_v6  ;;  %v16394_v43 = vld [vmem:[#allocation210_spill] sm:$0xff] }
 0xa61   : > { %v12134_v63 = vadd.f32 %v4273_v10, %v11774_v20  ;;  %v4288_v19 = vsel %vm4064_vm13, %v16392_v26, 0.0  ;;  %v4291_v8 = vsel %vm4067_vm8, %v16393_v30, 0.0  ;;  %5589 = vperm.xlu1 %6773, %v16394_v43   ;;  %vm4081_vm1 = vcmp.eq.s32.totalorder %v16396_v29, %v10829_v51  ;;  %v16397_v43 = vld [vmem:[#allocation136_spill] sm:$0xff] }
 0xa62   : > { %v12149_v20 = vadd.f32 %v4274_v9, %v11791_v1  ;;  %v12152_v10 = vadd.f32 %v4279_v53, %v11825_v17  ;;  %v12155_v26 = vadd.f32 %v4280_v35, %v11828_v52  ;;  %v4292_v13 = vsel %vm4068_vm15, %v16393_v30, 0.0  ;;  %5777 = vperm.xlu0 %6776, %v6848_v7   ;;  %v12179_v9 = vpop.permute.xlu1 %5338  ;;  %v12181_v53 = vpop.permute.xlu2 %5359  ;;  %v16406_v7 = vld [vmem:[#allocation368_spill] sm:$0xff] }
 0xa63   : > { %vm4071_vm0 = vcmp.eq.s32.totalorder %v16397_v43, %v10829_v51  ;;  %vm4082_vm6 = vcmp.eq.s32.totalorder %v16396_v29, %v10898_v6  ;;  %v12166_v1 = vadd.f32 %v4285_v3, %v11845_v44  ;;  %v12169_v17 = vadd.f32 %v4286_v45, %v11858_v40  ;;  %16399 = vst [vmem:[#allocation289_spill] sm:$0xff] %v12181_v53  ;;  %v16400_v44 = vld [vmem:[#allocation366_spill] sm:$0xff]  ;;  %v5465_v35 = vpop.permute.xlu0 %5464  ;;  %v16402_v3 = vld [vmem:[#allocation139_spill] sm:$0xff]  ;;  %v16403_v45 = vld [vmem:[#allocation372_spill] sm:$0xff] }
 0xa64   : > { %v12172_v52 = vadd.f32 %v4287_v2, %v11921_v23  ;;  %v4293_v30 = vsel %vm4069_vm2, %v16398_v49, 0.0  ;;  %v12188_v40 = vadd.f32 %v4288_v19, %v11924_v37  ;;  %v12191_v23 = vadd.f32 %v4291_v8, %v11889_v39  ;;  %v16401_v2 = vld [vmem:[#allocation264_spill] sm:$0xff] }
 0xa65   : > { %vm5383_vm2 = vcmp.eq.s32.totalorder %v16401_v2, %v10829_v51  ;;  %vm5384_vm13 = vcmp.eq.s32.totalorder %v16401_v2, %v10898_v6  ;;  %vm4086_vm12 = vcmp.eq.s32.totalorder %v16400_v44, %v10898_v6  ;;  %v12206_v39 = vadd.f32 %v4292_v13, %v11904_v60  ;;  %v16407_v13 = vld [vmem:[#allocation393_spill] sm:$0xff]  ;;  %v16410_v2 = vld [vmem:[#allocation394_spill] sm:$0xff] }
 0xa66   : > { %v4294_v37 = vsel %vm4070_vm10, %v16398_v49, 0.0  ;;  %v12212_v19 = vsel %vm5383_vm2, %v5465_v35, 0.0  ;;  %v12214_v8 = vsel %vm5384_vm13, %v5465_v35, 0.0  ;;  %vm4078_vm15 = vcmp.eq.s32.totalorder %v16402_v3, %v10898_v6 }
 0xa67   : > { %16404 = vst [vmem:[#allocation290_spill] sm:$0xff] %v12212_v19  ;;  %vm4091_vm8 = vcmp.eq.s32.totalorder %v16406_v7, %v10829_v51  ;;  %vm4092_vm4 = vcmp.eq.s32.totalorder %v16406_v7, %v10898_v6  ;;  %v12223_v60 = vadd.f32 %v4293_v30, %v11939_v54  ;;  %vm16408_vm10 = vcmp.eq.s32.totalorder %v16380_v48, %v10829_v51  ;;  %v16412_v30 = vld [vmem:[#allocation395_spill] sm:$0xff] }
 0xa68   : > { %16405 = vst [vmem:[#allocation51_spill] sm:$0xff] %v12214_v8  ;;  %v4283_v50 = vsel %vm16408_vm10, %v16407_v13, 0.0  ;;  %vm16409_vm2 = vcmp.eq.s32.totalorder %v16380_v48, %v10898_v6  ;;  %v4297_v35 = vsel %vm4073_vm11, %v16410_v2, 0.0  ;;  %vm16411_vm13 = vcmp.eq.s32.totalorder %v16381_v4, %v10898_v6 }
 0xa69   : > { %v4284_v49 = vsel %vm16409_vm2, %v16407_v13, 0.0  ;;  %v4298_v54 = vsel %vm16411_vm13, %v16410_v2, 0.0  ;;  %v4299_v8 = vsel %vm4075_vm3, %v16412_v30, 0.0  ;;  %v4300_v48 = vsel %vm4076_vm5, %v16412_v30, 0.0  ;;  %v16413_v13 = vld [vmem:[#allocation397_spill] sm:$0xff]  ;;  %v16415_v2 = vld [vmem:[#allocation398_spill] sm:$0xff] }
 0xa6a   : > { %vm16414_vm10 = vcmp.eq.s32.totalorder %v16384_v36, %v10829_v51  ;;  %v12254_v53 = vadd.f32 %v4294_v37, %v11951_v57  ;;  %v4290_v4 = vsel %vm4066_vm7, %v16413_v13, 0.0  ;;  %v4303_v12 = vsel %vm4079_vm9, %v16415_v2, 0.0  ;;  %v16419_v37 = vld [vmem:[#allocation319_spill] sm:$0xff] }
 0xa6b   : > { %v4289_v19 = vsel %vm16414_vm10, %v16413_v13, 0.0  ;;  %vm16416_vm11 = vcmp.eq.s32.totalorder %v16388_v58, %v10898_v6  ;;  %v12272_v57 = vsel %vm2746_vm14, %v16417_v18, 0.0  ;;  %vm3194_vm3 = vcmp.eq.s32.totalorder %v16419_v37, %v10898_v6  ;;  %v16441_v37 = vld [vmem:[#allocation237_spill] sm:$0xff] }
 0xa6c   : > { %v4304_v30 = vsel %vm16416_vm11, %v16415_v2, 0.0  ;;  %16418 = vst [vmem:[#allocation55_spill] sm:$0xff] %v12272_v57  ;;  %v12277_v36 = vadd.f32 %v4283_v50, %v11819_v27  ;;  %v12280_v13 = vadd.f32 %v4284_v49, %v11822_v25  ;;  %v12283_v41 = vadd.f32 %v4297_v35, %v11933_v55  ;;  %v16421_v2 = vld [vmem:[#allocation15_spill] sm:$0xff]  ;;  %v6849_v25 = vld [vmem:[%s7053_s27 + $0x8] sm:$0xff]  ;;  %v5480_v35 = vpop.permute.xlu0 %5479 }
 0xa6d   : > { %v16420_v58 = vmov 7   ;;  %5594 = vperm.xlu2 %6774, %v16421_v2   ;;  %v12288_v15 = vadd.f32 %v4298_v54, %v11936_v32  ;;  %v12291_v18 = vadd.f32 %v4299_v8, %v12012_v61  ;;  %v12294_v57 = vadd.f32 %v4300_v48, %v12015_v47  ;;  %v16422_v49 = vld [vmem:[#allocation399_spill] sm:$0xff]  ;;  %v16425_v8 = vld [vmem:[#allocation272_spill] sm:$0xff]  ;;  %v16427_v48 = vld [vmem:[#allocation402_spill] sm:$0xff] }
 0xa6e   : > { %6777 = vset.pattern.permute.xlu1 %v16420_v58  ;;  %v12297_v27 = vadd.f32 %v4289_v19, %v11839_v14  ;;  %v12301_v55 = vadd.f32 %v4290_v4, %v11842_v22  ;;  %v12304_v50 = vadd.f32 %v4303_v12, %v11982_v5  ;;  %v12307_v32 = vadd.f32 %v4304_v30, %v11997_v16  ;;  %v6850_v47 = vld [vmem:[%s7053_s27 + $0x90] sm:$0xff]  ;;  %v12314_v14 = vpop.permute.xlu1 %5347  ;;  %v12316_v19 = vpop.permute.xlu2 %5368  ;;  %v16424_v5 = vld [vmem:[#allocation401_spill] sm:$0xff] }
 0xa6f   : > { %5729 = vperm.xlu1 %6777, %v6849_v25   ;;  %v4305_v61 = vsel %vm4081_vm1, %v16422_v49, 0.0  ;;  %5780 = vperm.xlu0 %6776, %v6850_v47   ;;  %16423 = vst [vmem:[#allocation291_spill] sm:$0xff] %v12316_v19  ;;  %v4306_v22 = vsel %vm4082_vm6, %v16422_v49, 0.0  ;;  %v4295_v16 = vsel %vm4071_vm0, %v16424_v5, 0.0  ;;  %vm5389_vm7 = vcmp.eq.s32.totalorder %v16425_v8, %v10829_v51  ;;  %v16431_v2 = vld [vmem:[#allocation403_spill] sm:$0xff]  ;;  %v16434_v49 = vld [vmem:[#allocation154_spill] sm:$0xff] }
 0xa70   : > { %vm5390_vm9 = vcmp.eq.s32.totalorder %v16425_v8, %v10898_v6  ;;  %vm16426_vm14 = vcmp.eq.s32.totalorder %v16397_v43, %v10898_v6  ;;  %vm16428_vm5 = vcmp.eq.s32.totalorder %v16400_v44, %v10829_v51  ;;  %v12338_v4 = vsel %vm5389_vm7, %v5480_v35, 0.0  ;;  %v16436_v8 = vld [vmem:[#allocation404_spill] sm:$0xff]  ;;  %v16464_v19 = vld [vmem:[#allocation173_spill] sm:$0xff] }
 0xa71   : > { %v4296_v54 = vsel %vm16426_vm14, %v16424_v5, 0.0  ;;  %v4309_v29 = vsel %vm16428_vm5, %v16427_v48, 0.0  ;;  %16429 = vst [vmem:[#allocation292_spill] sm:$0xff] %v12338_v4  ;;  %v12340_v12 = vsel %vm5390_vm9, %v5480_v35, 0.0  ;;  %v4310_v30 = vsel %vm4086_vm12, %v16427_v48, 0.0  ;;  %v16461_v4 = vld [vmem:[#allocation181_spill] sm:$0xff] }
 0xa72   : > { %16430 = vst [vmem:[#allocation285_spill] sm:$0xff] %v12340_v12  ;;  %vm16432_vm1 = vcmp.eq.s32.totalorder %v16403_v45, %v10829_v51  ;;  %vm16433_vm0 = vcmp.eq.s32.totalorder %v16403_v45, %v10898_v6  ;;  %vm16435_vm6 = vcmp.eq.s32.totalorder %v16402_v3, %v10829_v51  ;;  %v12359_v5 = vadd.f32 %v4305_v61, %v12030_v21  ;;  %v16437_v3 = vld [vmem:[#allocation278_spill] sm:$0xff] }
 0xa73   : > { %v4311_v43 = vsel %vm16432_vm1, %v16431_v2, 0.0  ;;  %v4312_v25 = vsel %vm16433_vm0, %v16431_v2, 0.0  ;;  %v4301_v47 = vsel %vm16435_vm6, %v16434_v49, 0.0  ;;  %v4302_v44 = vsel %vm4078_vm15, %v16434_v49, 0.0 }
 0xa74   : > { %v4315_v45 = vsel %vm4091_vm8, %v16436_v8, 0.0  ;;  %v4316_v35 = vsel %vm4092_vm4, %v16436_v8, 0.0  ;;  %v12374_v21 = vadd.f32 %v4306_v22, %v12033_v33  ;;  %v12377_v61 = vadd.f32 %v4295_v16, %v11861_v56  ;;  %v16438_v56 = vld [vmem:[#allocation98_spill] sm:$0xff]  ;;  %v6851_v22 = vld [vmem:[%s7053_s27 + $0x18] sm:$0xff]  ;;  %v16442_v16 = vld [vmem:[#allocation275_spill] sm:$0xff] }
 0xa75   : > { %v12380_v48 = vadd.f32 %v4296_v54, %v16437_v3  ;;  %v12383_v2 = vadd.f32 %v4309_v29, %v12018_v38  ;;  %v12386_v49 = vadd.f32 %v4310_v30, %v12021_v59  ;;  %v12389_v12 = vadd.f32 %v4311_v43, %v12044_v0  ;;  %6778 = vset.pattern.permute.xlu2 %v16420_v58  ;;  %v16440_v58 = vld [vmem:[#allocation165_spill] sm:$0xff]  ;;  %v5495_v30 = vpop.permute.xlu0 %5494  ;;  %v16449_v8 = vld [vmem:[#allocation424_spill] sm:$0xff]  ;;  %v16450_v3 = vld [vmem:[#allocation167_spill] sm:$0xff] }
 0xa76   : > { %v12392_v7 = vadd.f32 %v4312_v25, %v12047_v46  ;;  %v12395_v33 = vadd.f32 %v4301_v47, %v11927_v42  ;;  %v12402_v38 = vsel %vm3194_vm3, %v16438_v56, 0.0  ;;  %v12405_v59 = vadd.f32 %v4302_v44, %v11930_v62  ;;  %v6852_v42 = vld [vmem:[%s7053_s27 + $0x10] sm:$0xff]  ;;  %v6853_v62 = vld [vmem:[%s7053_s27 + $0x98] sm:$0xff]  ;;  %v16445_v43 = vld [vmem:[#allocation169_spill] sm:$0xff] }
 0xa77   : > { %16439 = vst [vmem:[#allocation288_spill] sm:$0xff] %v12402_v38  ;;  %v12408_v0 = vadd.f32 %v4315_v45, %v12036_v28  ;;  %v12411_v46 = vadd.f32 %v4316_v35, %v12041_v34  ;;  %5735 = vperm.xlu1 %6777, %v6851_v22   ;;  %5732 = vperm.xlu2 %6778, %v6852_v42   ;;  %v12424_v28 = vpop.permute.xlu1 %5356  ;;  %v5445_v34 = vpop.permute.xlu2 %5444  ;;  %v16448_v44 = vld [vmem:[#allocation168_spill] sm:$0xff]  ;;  %v16451_v56 = vld [vmem:[#allocation171_spill] sm:$0xff]  ;;  %v16452_v22 = vld [vmem:[#allocation170_spill] sm:$0xff] }
 0xa78   : > { %vm4497_vm4 = vcmp.eq.s32.totalorder %v16440_v58, %v10829_v51  ;;  %vm4498_vm8 = vcmp.eq.s32.totalorder %v16440_v58, %v10898_v6  ;;  %vm5375_vm15 = vcmp.eq.s32.totalorder %v16441_v37, %v10829_v51  ;;  %vm5376_vm12 = vcmp.eq.s32.totalorder %v16441_v37, %v10898_v6  ;;  %5783 = vperm.xlu0 %6776, %v6853_v62   ;;  %v16453_v42 = vld [vmem:[#allocation406_spill] sm:$0xff]  ;;  %v16457_v58 = vld [vmem:[#allocation375_spill] sm:$0xff] }
 0xa79   : > { %vm5395_vm2 = vcmp.eq.s32.totalorder %v16442_v16, %v10829_v51  ;;  %vm5396_vm13 = vcmp.eq.s32.totalorder %v16442_v16, %v10898_v6  ;;  %v12430_v54 = vsel %vm5375_vm15, %v5445_v34, 0.0  ;;  %v12432_v29 = vsel %vm5376_vm12, %v5445_v34, 0.0  ;;  %v16454_v34 = vld [vmem:[#allocation178_spill] sm:$0xff] }
 0xa7a   : > { %16443 = vst [vmem:[#allocation293_spill] sm:$0xff] %v12430_v54  ;;  %vm4507_vm10 = vcmp.eq.s32.totalorder %v16445_v43, %v10829_v51  ;;  %vm4508_vm11 = vcmp.eq.s32.totalorder %v16445_v43, %v10898_v6  ;;  %v12438_v25 = vsel %vm5395_vm2, %v5495_v30, 0.0  ;;  %v12440_v47 = vsel %vm5396_vm13, %v5495_v30, 0.0  ;;  %v16455_v43 = vld [vmem:[#allocation428_spill] sm:$0xff] }
 0xa7b   : > { %16444 = vst [vmem:[#allocation295_spill] sm:$0xff] %v12432_v29  ;;  %vm4503_vm3 = vcmp.eq.s32.totalorder %v16448_v44, %v10829_v51  ;;  %vm4504_vm7 = vcmp.eq.s32.totalorder %v16448_v44, %v10898_v6  ;;  %v4731_v45 = vsel %vm4507_vm10, %v16449_v8, 0.0  ;;  %v4732_v35 = vsel %vm4508_vm11, %v16449_v8, 0.0  ;;  %v6856_v44 = vld [vmem:[%s7053_s27 + $0xa0] sm:$0xff] }
 0xa7c   : > { %16446 = vst [vmem:[#allocation298_spill] sm:$0xff] %v12438_v25  ;;  %vm4511_vm9 = vcmp.eq.s32.totalorder %v16450_v3, %v10829_v51  ;;  %vm4512_vm14 = vcmp.eq.s32.totalorder %v16450_v3, %v10898_v6  ;;  %vm4509_vm5 = vcmp.eq.s32.totalorder %v16451_v56, %v10829_v51  ;;  %vm4510_vm1 = vcmp.eq.s32.totalorder %v16451_v56, %v10898_v6  ;;  %v16458_v25 = vld [vmem:[#allocation253_spill] sm:$0xff] }
 0xa7d   : > { %16447 = vst [vmem:[#allocation301_spill] sm:$0xff] %v12440_v47  ;;  %vm4517_vm0 = vcmp.eq.s32.totalorder %v16452_v22, %v10829_v51  ;;  %vm4518_vm6 = vcmp.eq.s32.totalorder %v16452_v22, %v10898_v6  ;;  %vm4523_vm15 = vcmp.eq.s32.totalorder %v16453_v42, %v10829_v51  ;;  %vm4524_vm12 = vcmp.eq.s32.totalorder %v16453_v42, %v10898_v6  ;;  %v6855_v47 = vld [vmem:[%s7053_s27 + $0x20] sm:$0xff] }
 0xa7e   : > { %v12465_v37 = vadd.f32 %v4731_v45, %v12277_v36  ;;  %v12468_v62 = vadd.f32 %v4732_v35, %v12280_v13  ;;  %v4721_v16 = vsel %vm4497_vm4, %v16454_v34, 0.0  ;;  %v4722_v30 = vsel %vm4498_vm8, %v16454_v34, 0.0  ;;  %v16456_v36 = vld [vmem:[#allocation179_spill] sm:$0xff] }
 0xa7f   : > { %v4735_v8 = vsel %vm4511_vm9, %v16455_v43, 0.0  ;;  %v4736_v3 = vsel %vm4512_vm14, %v16455_v43, 0.0  ;;  %v4727_v13 = vsel %vm4503_vm3, %v16456_v36, 0.0  ;;  %v4728_v45 = vsel %vm4504_vm7, %v16456_v36, 0.0  ;;  %v6854_v35 = vld [vmem:[%s7053_s27 + $0x30] sm:$0xff]  ;;  %5738 = vperm.xlu2 %6778, %v6855_v47   ;;  %v12503_v36 = vpop.permute.xlu1 %5365  ;;  %v5460_v47 = vpop.permute.xlu2 %5459 }
 0xa80   : > { %5744 = vperm.xlu1 %6777, %v6854_v35   ;;  %v4741_v34 = vsel %vm4517_vm0, %v16457_v58, 0.0  ;;  %v4742_v43 = vsel %vm4518_vm6, %v16457_v58, 0.0  ;;  %vm5381_vm4 = vcmp.eq.s32.totalorder %v16458_v25, %v10829_v51  ;;  %vm5382_vm8 = vcmp.eq.s32.totalorder %v16458_v25, %v10898_v6  ;;  %5786 = vperm.xlu0 %6776, %v6856_v44   ;;  %v5510_v58 = vpop.permute.xlu0 %5509 }
 0xa81   : > { %vm5401_vm2 = vcmp.eq.s32.totalorder %v11946_v24, %v10829_v51  ;;  %vm5402_vm13 = vcmp.eq.s32.totalorder %v11946_v24, %v10898_v6  ;;  %v12509_v35 = vsel %vm5381_vm4, %v5460_v47, 0.0  ;;  %v12511_v22 = vsel %vm5382_vm8, %v5460_v47, 0.0 }
 0xa82   : > { %16459 = vst [vmem:[#allocation304_spill] sm:$0xff] %v12509_v35  ;;  %v4733_v25 = vsel %vm4509_vm5, %v16461_v4, 0.0  ;;  %v4734_v44 = vsel %vm4510_vm1, %v16461_v4, 0.0  ;;  %v12521_v29 = vsel %vm5401_vm2, %v5510_v58, 0.0  ;;  %v12523_v54 = vsel %vm5402_vm13, %v5510_v58, 0.0 }
 0xa83   : > { %16460 = vst [vmem:[#allocation306_spill] sm:$0xff] %v12511_v22  ;;  %v4785_v24 = vadd.f32 %v4721_v16, %v12134_v63  ;;  %v4786_v47 = vadd.f32 %v4722_v30, %v12149_v20  ;;  %v4799_v22 = vadd.f32 %v4735_v8, %v12172_v52  ;;  %v4800_v35 = vadd.f32 %v4736_v3, %v12188_v40  ;;  %v16465_v40 = vld [vmem:[#allocation396_spill] sm:$0xff]  ;;  %v16469_v16 = vld [vmem:[#allocation54_spill] sm:$0xff]  ;;  %v16470_v3 = vld [vmem:[#allocation221_spill] sm:$0xff] }
 0xa84   : > { %16462 = vst [vmem:[#allocation307_spill] sm:$0xff] %v12521_v29  ;;  %vm4515_vm10 = vcmp.eq.s32.totalorder %v16464_v19, %v10829_v51  ;;  %v12532_v38 = vadd.f32 %v4727_v13, %v12152_v10  ;;  %v12535_v4 = vadd.f32 %v4728_v45, %v12155_v26  ;;  %v4805_v56 = vadd.f32 %v4741_v34, %v12223_v60  ;;  %v6857_v30 = vld [vmem:[%s7053_s27 + $0x48] sm:$0xff]  ;;  %v6858_v8 = vld [vmem:[%s7053_s27 + $0x38] sm:$0xff]  ;;  %v16471_v13 = vld [vmem:[#allocation257_spill] sm:$0xff] }
 0xa85   : > { %16463 = vst [vmem:[#allocation309_spill] sm:$0xff] %v12523_v54  ;;  %v4806_v63 = vadd.f32 %v4742_v43, %v12254_v53  ;;  %v12540_v20 = vadd.f32 %v4733_v25, %v12166_v1  ;;  %v12543_v52 = vadd.f32 %v4734_v44, %v12169_v17  ;;  %v4747_v10 = vsel %vm4523_vm15, %v16465_v40, 0.0  ;;  %v16466_v53 = vld [vmem:[#allocation193_spill] sm:$0xff]  ;;  %v16467_v1 = vld [vmem:[#allocation199_spill] sm:$0xff]  ;;  %v6859_v45 = vld [vmem:[%s7053_s27 + $0xa8] sm:$0xff] }
 0xa86   : > { %v4748_v26 = vsel %vm4524_vm12, %v16465_v40, 0.0  ;;  %vm4516_vm11 = vcmp.eq.s32.totalorder %v16464_v19, %v10898_v6  ;;  %vm4945_vm3 = vcmp.eq.s32.totalorder %v16466_v53, %v10829_v51  ;;  %vm4946_vm7 = vcmp.eq.s32.totalorder %v16466_v53, %v10898_v6  ;;  %v16468_v17 = vld [vmem:[#allocation217_spill] sm:$0xff]  ;;  %v16478_v29 = vld [vmem:[#allocation195_spill] sm:$0xff] }
 0xa87   : > { %vm4959_vm9 = vcmp.eq.s32.totalorder %v16467_v1, %v10829_v51  ;;  %vm4960_vm14 = vcmp.eq.s32.totalorder %v16467_v1, %v10898_v6  ;;  %vm4965_vm5 = vcmp.eq.s32.totalorder %v16469_v16, %v10829_v51  ;;  %vm4966_vm1 = vcmp.eq.s32.totalorder %v16469_v16, %v10898_v6  ;;  %5747 = vperm.xlu2 %6778, %v6858_v8   ;;  %v5440_v34 = vpop.permute.xlu1 %5439  ;;  %v5475_v43 = vpop.permute.xlu2 %5474  ;;  %v16474_v8 = vld [vmem:[#allocation438_spill] sm:$0xff]  ;;  %v6862_v19 = vld [vmem:[%s7053_s27 + $0xb0] sm:$0xff] }
 0xa88   : > { %v5183_v60 = vsel %vm4959_vm9, %v16468_v17, 0.0  ;;  %v5184_v42 = vsel %vm4960_vm14, %v16468_v17, 0.0  ;;  %5753 = vperm.xlu1 %6777, %v6857_v30   ;;  %vm5387_vm0 = vcmp.eq.s32.totalorder %v16470_v3, %v10829_v51  ;;  %vm5388_vm6 = vcmp.eq.s32.totalorder %v16470_v3, %v10898_v6  ;;  %5789 = vperm.xlu0 %6776, %v6859_v45   ;;  %v5525_v1 = vpop.permute.xlu0 %5524 }
 0xa89   : > { %vm5373_vm15 = vcmp.eq.s32.totalorder %v16471_v13, %v10829_v51  ;;  %vm5374_vm12 = vcmp.eq.s32.totalorder %v16471_v13, %v10898_v6  ;;  %v12584_v44 = vsel %vm5387_vm0, %v5475_v43, 0.0  ;;  %v12586_v40 = vsel %vm5388_vm6, %v5475_v43, 0.0 }
 0xa8a   : > { %v12580_v58 = vsel %vm5373_vm15, %v5440_v34, 0.0  ;;  %v12582_v25 = vsel %vm5374_vm12, %v5440_v34, 0.0  ;;  %16472 = vst [vmem:[#allocation310_spill] sm:$0xff] %v12584_v44  ;;  %v5247_v17 = vadd.f32 %v5183_v60, %v4799_v22  ;;  %v5248_v30 = vadd.f32 %v5184_v42, %v4800_v35  ;;  %v16475_v35 = vld [vmem:[#allocation407_spill] sm:$0xff] }
 0xa8b   : > { %16473 = vst [vmem:[#allocation311_spill] sm:$0xff] %v12586_v40  ;;  %vm5407_vm4 = vcmp.eq.s32.totalorder %v12060_v11, %v10829_v51  ;;  %vm5408_vm8 = vcmp.eq.s32.totalorder %v12060_v11, %v10898_v6  ;;  %v5169_v3 = vsel %vm4945_vm3, %v16474_v8, 0.0  ;;  %v5170_v13 = vsel %vm4946_vm7, %v16474_v8, 0.0  ;;  %v16476_v22 = vld [vmem:[#allocation219_spill] sm:$0xff]  ;;  %v16477_v8 = vld [vmem:[#allocation184_spill] sm:$0xff] }
 0xa8c   : > { %v5631_v45 = vsel %vm5407_vm4, %v5525_v1, 0.0  ;;  %v5632_v34 = vsel %vm5408_vm8, %v5525_v1, 0.0  ;;  %vm4529_vm2 = vcmp.eq.s32.totalorder %v16475_v35, %v10829_v51  ;;  %v5189_v11 = vsel %vm4965_vm5, %v16476_v22, 0.0 }
 0xa8d   : > { %v5190_v60 = vsel %vm4966_vm1, %v16476_v22, 0.0  ;;  %v12610_v42 = vadd.f32 %v5631_v45, %v5247_v17  ;;  %v12612_v53 = vadd.f32 %v5632_v34, %v5248_v30  ;;  %v4811_v43 = vadd.f32 %v4747_v10, %v12291_v18  ;;  %v16479_v18 = vld [vmem:[#allocation198_spill] sm:$0xff]  ;;  %v6860_v30 = vld [vmem:[%s7053_s27 + $0x60] sm:$0xff] }
 0xa8e   : > { %v4812_v1 = vadd.f32 %v4748_v26, %v12294_v57  ;;  %v4739_v54 = vsel %vm4515_vm10, %v16477_v8, 0.0  ;;  %vm4951_vm13 = vcmp.eq.s32.totalorder %v16478_v29, %v10829_v51  ;;  %vm4530_vm3 = vcmp.eq.s32.totalorder %v16475_v35, %v10898_v6  ;;  %v16481_v45 = vld [vmem:[#allocation262_spill] sm:$0xff]  ;;  %v6864_v35 = vld [vmem:[%s7053_s27 + $0xb8] sm:$0xff] }
 0xa8f   : > { %v5233_v16 = vadd.f32 %v5169_v3, %v4785_v24  ;;  %vm4952_vm7 = vcmp.eq.s32.totalorder %v16478_v29, %v10898_v6  ;;  %vm4971_vm9 = vcmp.eq.s32.totalorder %v16479_v18, %v10829_v51  ;;  %vm4972_vm14 = vcmp.eq.s32.totalorder %v16479_v18, %v10898_v6  ;;  %v6861_v24 = vld [vmem:[%s7053_s27 + $0x50] sm:$0xff]  ;;  %v16480_v3 = vld [vmem:[#allocation238_spill] sm:$0xff] }
 0xa90   : > { %v4740_v57 = vsel %vm4516_vm11, %v16477_v8, 0.0  ;;  %v5234_v10 = vadd.f32 %v5170_v13, %v4786_v47  ;;  %v5253_v26 = vadd.f32 %v5189_v11, %v4805_v56  ;;  %v5254_v17 = vadd.f32 %v5190_v60, %v4806_v63  ;;  %5762 = vperm.xlu1 %6777, %v6860_v30   ;;  %5756 = vperm.xlu2 %6778, %v6861_v24   ;;  %v5455_v47 = vpop.permute.xlu1 %5454  ;;  %v5490_v56 = vpop.permute.xlu2 %5489  ;;  %v16484_v30 = vld [vmem:[#allocation441_spill] sm:$0xff] }
 0xa91   : > { %vm5393_vm10 = vcmp.eq.s32.totalorder %v16480_v3, %v10829_v51  ;;  %vm5394_vm5 = vcmp.eq.s32.totalorder %v16480_v3, %v10898_v6  ;;  %vm5379_vm1 = vcmp.eq.s32.totalorder %v16481_v45, %v10829_v51  ;;  %vm5380_vm0 = vcmp.eq.s32.totalorder %v16481_v45, %v10898_v6  ;;  %5792 = vperm.xlu0 %6776, %v6862_v19   ;;  %v5540_v11 = vpop.permute.xlu0 %5539 }
 0xa92   : > { %v12645_v63 = vsel %vm5379_vm1, %v5455_v47, 0.0  ;;  %v12647_v13 = vsel %vm5380_vm0, %v5455_v47, 0.0  ;;  %v5617_v34 = vsel %vm5393_vm10, %v5490_v56, 0.0  ;;  %v5618_v22 = vsel %vm5394_vm5, %v5490_v56, 0.0  ;;  %v16485_v47 = vld [vmem:[#allocation408_spill] sm:$0xff] }
 0xa93   : > { %vm5413_vm11 = vcmp.eq.s32.totalorder %v12179_v9, %v10829_v51  ;;  %vm5414_vm6 = vcmp.eq.s32.totalorder %v12179_v9, %v10898_v6  ;;  %v12653_v60 = vadd.f32 %v5617_v34, %v5233_v16  ;;  %v12655_v8 = vadd.f32 %v5618_v22, %v5234_v10  ;;  %v16486_v9 = vld [vmem:[#allocation216_spill] sm:$0xff] }
 0xa94   : > { %v5175_v24 = vsel %vm4951_vm13, %v16484_v30, 0.0  ;;  %v5176_v3 = vsel %vm4952_vm7, %v16484_v30, 0.0  ;;  %v5637_v45 = vsel %vm5413_vm11, %v5540_v11, 0.0  ;;  %v5638_v19 = vsel %vm5414_vm6, %v5540_v11, 0.0  ;;  %v16489_v11 = vld [vmem:[#allocation400_spill] sm:$0xff] }
 0xa95   : > { %16482 = vst [vmem:[#allocation57_spill] sm:$0xff] %v12653_v60  ;;  %vm4535_vm15 = vcmp.eq.s32.totalorder %v16485_v47, %v10829_v51  ;;  %v5195_v16 = vsel %vm4971_vm9, %v16486_v9, 0.0  ;;  %v5196_v10 = vsel %vm4972_vm14, %v16486_v9, 0.0  ;;  %v12675_v56 = vadd.f32 %v5637_v45, %v5253_v26  ;;  %v16494_v45 = vld [vmem:[#allocation258_spill] sm:$0xff] }
 0xa96   : > { %16483 = vst [vmem:[#allocation312_spill] sm:$0xff] %v12655_v8  ;;  %v12677_v29 = vadd.f32 %v5638_v19, %v5254_v17  ;;  %v12680_v34 = vadd.f32 %v4739_v54, %v12191_v23  ;;  %v12683_v22 = vadd.f32 %v4740_v57, %v12206_v39  ;;  %v4753_v30 = vsel %vm4529_vm2, %v16489_v11, 0.0  ;;  %v16490_v8 = vld [vmem:[#allocation197_spill] sm:$0xff]  ;;  %v16491_v23 = vld [vmem:[#allocation202_spill] sm:$0xff] }
 0xa97   : > { %16487 = vst [vmem:[#allocation313_spill] sm:$0xff] %v12675_v56  ;;  %vm4957_vm12 = vcmp.eq.s32.totalorder %v16490_v8, %v10829_v51  ;;  %vm4536_vm4 = vcmp.eq.s32.totalorder %v16485_v47, %v10898_v6  ;;  %v5239_v18 = vadd.f32 %v5175_v24, %v12532_v38  ;;  %vm4958_vm8 = vcmp.eq.s32.totalorder %v16490_v8, %v10898_v6  ;;  %v6863_v17 = vld [vmem:[%s7053_s27 + $0x68] sm:$0xff]  ;;  %v6865_v47 = vld [vmem:[%s7053_s27 + $0xc0] sm:$0xff] }
 0xa98   : > { %16488 = vst [vmem:[#allocation64_spill] sm:$0xff] %v12677_v29  ;;  %vm4977_vm13 = vcmp.eq.s32.totalorder %v16491_v23, %v10829_v51  ;;  %vm4978_vm7 = vcmp.eq.s32.totalorder %v16491_v23, %v10898_v6  ;;  %v4754_v39 = vsel %vm4530_vm3, %v16489_v11, 0.0  ;;  %v5240_v54 = vadd.f32 %v5176_v3, %v12535_v4  ;;  %5765 = vperm.xlu2 %6778, %v6863_v17   ;;  %v16492_v38 = vld [vmem:[#allocation226_spill] sm:$0xff]  ;;  %v5470_v4 = vpop.permute.xlu1 %5469  ;;  %v16499_v17 = vld [vmem:[#allocation444_spill] sm:$0xff]  ;;  %v16646_v56 = vld [vmem:[#allocation233_spill] sm:$0xff] }
 0xa99   : > { %v5259_v57 = vadd.f32 %v5195_v16, %v4811_v43  ;;  %v5260_v26 = vadd.f32 %v5196_v10, %v4812_v1  ;;  %5967 = vperm.xlu1 %6777, %v16492_v38   ;;  %v16493_v24 = vld [vmem:[#allocation254_spill] sm:$0xff]  ;;  %vm5385_vm14 = vcmp.eq.s32.totalorder %v16494_v45, %v10829_v51  ;;  %vm5386_vm3 = vcmp.eq.s32.totalorder %v16494_v45, %v10898_v6  ;;  %v5505_v43 = vpop.permute.xlu2 %5504  ;;  %v5555_v16 = vpop.permute.xlu0 %5554 }
 0xa9a   : > { %vm5399_vm2 = vcmp.eq.s32.totalorder %v16493_v24, %v10829_v51  ;;  %vm5400_vm9 = vcmp.eq.s32.totalorder %v16493_v24, %v10898_v6  ;;  %5795 = vperm.xlu0 %6776, %v6864_v35   ;;  %v12716_v1 = vsel %vm5385_vm14, %v5470_v4, 0.0  ;;  %v12718_v3 = vsel %vm5386_vm3, %v5470_v4, 0.0  ;;  %v16500_v4 = vld [vmem:[#allocation175_spill] sm:$0xff] }
 0xa9b   : > { %16495 = vst [vmem:[#allocation58_spill] sm:$0xff] %v12716_v1  ;;  %v5623_v19 = vsel %vm5399_vm2, %v5505_v43, 0.0  ;;  %v5624_v9 = vsel %vm5400_vm9, %v5505_v43, 0.0  ;;  %vm5419_vm10 = vcmp.eq.s32.totalorder %v12314_v14, %v10829_v51  ;;  %vm5420_vm5 = vcmp.eq.s32.totalorder %v12314_v14, %v10898_v6  ;;  %v16501_v14 = vld [vmem:[#allocation234_spill] sm:$0xff] }
 0xa9c   : > { %16496 = vst [vmem:[#allocation314_spill] sm:$0xff] %v12718_v3  ;;  %v12724_v10 = vadd.f32 %v5623_v19, %v5239_v18  ;;  %v12726_v11 = vadd.f32 %v5624_v9, %v5240_v54  ;;  %v5181_v38 = vsel %vm4957_vm12, %v16499_v17, 0.0  ;;  %v5182_v24 = vsel %vm4958_vm8, %v16499_v17, 0.0  ;;  %v16658_v1 = vld [vmem:[#allocation330_spill] sm:$0xff] }
 0xa9d   : > { %v5643_v45 = vsel %vm5419_vm10, %v5555_v16, 0.0  ;;  %v5644_v35 = vsel %vm5420_vm5, %v5555_v16, 0.0  ;;  %vm4521_vm1 = vcmp.eq.s32.totalorder %v16500_v4, %v10829_v51  ;;  %v5201_v18 = vsel %vm4977_vm13, %v16501_v14, 0.0  ;;  %v16504_v16 = vld [vmem:[#allocation155_spill] sm:$0xff] }
 0xa9e   : > { %16497 = vst [vmem:[#allocation60_spill] sm:$0xff] %v12724_v10  ;;  %v5202_v54 = vsel %vm4978_vm7, %v16501_v14, 0.0  ;;  %v12746_v43 = vadd.f32 %v5643_v45, %v5259_v57  ;;  %v12748_v19 = vadd.f32 %v5644_v35, %v5260_v26  ;;  %v4817_v8 = vadd.f32 %v4753_v30, %v12359_v5  ;;  %v16506_v5 = vld [vmem:[#allocation205_spill] sm:$0xff]  ;;  %v16507_v26 = vld [vmem:[#allocation215_spill] sm:$0xff]  ;;  %v16510_v45 = vld [vmem:[#allocation8_spill] sm:$0xff] }
 0xa9f   : > { %16498 = vst [vmem:[#allocation67_spill] sm:$0xff] %v12726_v11  ;;  %v4818_v9 = vadd.f32 %v4754_v39, %v12374_v21  ;;  %v4759_v17 = vsel %vm4535_vm15, %v16504_v16, 0.0  ;;  %v16505_v11 = vld [vmem:[#allocation201_spill] sm:$0xff]  ;;  %vm4522_vm11 = vcmp.eq.s32.totalorder %v16500_v4, %v10898_v6  ;;  %v5245_v23 = vadd.f32 %v5181_v38, %v12540_v20  ;;  %v16508_v20 = vld [vmem:[#allocation47_spill] sm:$0xff]  ;;  %v6866_v4 = vld [vmem:[%s7053_s27 + $0xc8] sm:$0xff] }
 0xaa0   : > { %16502 = vst [vmem:[#allocation70_spill] sm:$0xff] %v12746_v43  ;;  %vm4963_vm0 = vcmp.eq.s32.totalorder %v16505_v11, %v10829_v51  ;;  %vm4964_vm6 = vcmp.eq.s32.totalorder %v16505_v11, %v10898_v6  ;;  %vm4983_vm12 = vcmp.eq.s32.totalorder %v16506_v5, %v10829_v51  ;;  %vm4984_vm8 = vcmp.eq.s32.totalorder %v16506_v5, %v10898_v6  ;;  %v16509_v38 = vld [vmem:[#allocation259_spill] sm:$0xff]  ;;  %v16628_v43 = vld [vmem:[#allocation61_spill] sm:$0xff] }
 0xaa1   : > { %16503 = vst [vmem:[#allocation76_spill] sm:$0xff] %v12748_v19  ;;  %v4760_v21 = vsel %vm4536_vm4, %v16504_v16, 0.0  ;;  %v5246_v30 = vadd.f32 %v5182_v24, %v12543_v52  ;;  %v5265_v39 = vadd.f32 %v5201_v18, %v4817_v8  ;;  %v5266_v57 = vadd.f32 %v5202_v54, %v4818_v9  ;;  %5887 = vperm.xlu2 %6778, %v16507_v26   ;;  %v5485_v52 = vpop.permute.xlu1 %5484  ;;  %v5520_v24 = vpop.permute.xlu2 %5519  ;;  %v16513_v26 = vld [vmem:[#allocation447_spill] sm:$0xff]  ;;  %v16618_v19 = vld [vmem:[#allocation200_spill] sm:$0xff] }
 0xaa2   : > { %5972 = vperm.xlu1 %6777, %v16508_v20   ;;  %vm5405_vm15 = vcmp.eq.s32.totalorder %v16509_v38, %v10829_v51  ;;  %vm5406_vm13 = vcmp.eq.s32.totalorder %v16509_v38, %v10898_v6  ;;  %vm5391_vm7 = vcmp.eq.s32.totalorder %v16510_v45, %v10829_v51  ;;  %vm5392_vm4 = vcmp.eq.s32.totalorder %v16510_v45, %v10898_v6  ;;  %v5570_v8 = vpop.permute.xlu0 %5569 }
 0xaa3   : > { %5798 = vperm.xlu0 %6776, %v6865_v47   ;;  %v12783_v35 = vsel %vm5391_vm7, %v5485_v52, 0.0  ;;  %v12785_v14 = vsel %vm5392_vm4, %v5485_v52, 0.0  ;;  %v5629_v18 = vsel %vm5405_vm15, %v5520_v24, 0.0  ;;  %v5630_v54 = vsel %vm5406_vm13, %v5520_v24, 0.0  ;;  %v16514_v52 = vld [vmem:[#allocation172_spill] sm:$0xff] }
 0xaa4   : > { %16511 = vst [vmem:[#allocation79_spill] sm:$0xff] %v12783_v35  ;;  %vm5425_vm2 = vcmp.eq.s32.totalorder %v12424_v28, %v10829_v51  ;;  %vm5426_vm9 = vcmp.eq.s32.totalorder %v12424_v28, %v10898_v6  ;;  %v12791_v9 = vadd.f32 %v5629_v18, %v5245_v23  ;;  %v12793_v16 = vadd.f32 %v5630_v54, %v5246_v30  ;;  %v16515_v28 = vld [vmem:[#allocation249_spill] sm:$0xff]  ;;  %v16518_v18 = vld [vmem:[#allocation176_spill] sm:$0xff]  ;;  %v16519_v54 = vld [vmem:[#allocation174_spill] sm:$0xff] }
 0xaa5   : > { %16512 = vst [vmem:[#allocation82_spill] sm:$0xff] %v12785_v14  ;;  %v5187_v20 = vsel %vm4963_vm0, %v16513_v26, 0.0  ;;  %v5188_v38 = vsel %vm4964_vm6, %v16513_v26, 0.0  ;;  %v5649_v45 = vsel %vm5425_vm2, %v5570_v8, 0.0  ;;  %v5650_v47 = vsel %vm5426_vm9, %v5570_v8, 0.0  ;;  %v16520_v8 = vld [vmem:[#allocation187_spill] sm:$0xff] }
 0xaa6   : > { %vm4513_vm14 = vcmp.eq.s32.totalorder %v16514_v52, %v10829_v51  ;;  %vm4514_vm3 = vcmp.eq.s32.totalorder %v16514_v52, %v10898_v6  ;;  %v5207_v23 = vsel %vm4983_vm12, %v16515_v28, 0.0  ;;  %v5208_v30 = vsel %vm4984_vm8, %v16515_v28, 0.0  ;;  %v16526_v28 = vld [vmem:[#allocation11_spill] sm:$0xff]  ;;  %v13396_v14 = vld [vmem:[%s14498_s1 + $0x98] sm:$0xff]  ;;  %v16631_v35 = vld [vmem:[#allocation73_spill] sm:$0xff] }
 0xaa7   : > { %v12815_v11 = vadd.f32 %v5649_v45, %v5265_v39  ;;  %v12817_v24 = vadd.f32 %v5650_v47, %v5266_v57  ;;  %vm4527_vm10 = vcmp.eq.s32.totalorder %v16518_v18, %v10829_v51  ;;  %vm4519_vm5 = vcmp.eq.s32.totalorder %v16519_v54, %v10829_v51  ;;  %v16521_v39 = vld [vmem:[#allocation38_spill] sm:$0xff]  ;;  %v16522_v45 = vld [vmem:[#allocation204_spill] sm:$0xff] }
 0xaa8   : > { %v4745_v26 = vsel %vm4521_vm1, %v16520_v8, 0.0  ;;  %v4823_v10 = vadd.f32 %v4759_v17, %v12389_v12  ;;  %v4824_v5 = vadd.f32 %v4760_v21, %v12392_v7  ;;  %vm4955_vm0 = vcmp.eq.s32.totalorder %v16521_v39, %v10829_v51  ;;  %v16523_v47 = vld [vmem:[#allocation48_spill] sm:$0xff] }
 0xaa9   : > { %16516 = vst [vmem:[#allocation33_spill] sm:$0xff] %v12815_v11  ;;  %vm4528_vm6 = vcmp.eq.s32.totalorder %v16518_v18, %v10898_v6  ;;  %v5251_v57 = vadd.f32 %v5187_v20, %v12680_v34  ;;  %vm4956_vm12 = vcmp.eq.s32.totalorder %v16521_v39, %v10898_v6  ;;  %vm4969_vm8 = vcmp.eq.s32.totalorder %v16522_v45, %v10829_v51  ;;  %v16524_v34 = vld [vmem:[#allocation35_spill] sm:$0xff]  ;;  %v16535_v39 = vld [vmem:[#allocation177_spill] sm:$0xff]  ;;  %v16542_v11 = vld [vmem:[#allocation266_spill] sm:$0xff] }
 0xaaa   : > { %16517 = vst [vmem:[#allocation86_spill] sm:$0xff] %v12817_v24  ;;  %vm4970_vm1 = vcmp.eq.s32.totalorder %v16522_v45, %v10898_v6  ;;  %v4746_v12 = vsel %vm4522_vm11, %v16520_v8, 0.0  ;;  %v5252_v7 = vadd.f32 %v5188_v38, %v12683_v22  ;;  %v5271_v17 = vadd.f32 %v5207_v23, %v4823_v10  ;;  %5892 = vperm.xlu2 %6778, %v16523_v47   ;;  %v16525_v20 = vld [vmem:[#allocation263_spill] sm:$0xff]  ;;  %v5500_v22 = vpop.permute.xlu1 %5499  ;;  %v5535_v10 = vpop.permute.xlu2 %5534 }
 0xaab   : > { %v5272_v21 = vadd.f32 %v5208_v30, %v4824_v5  ;;  %5977 = vperm.xlu1 %6777, %v16524_v34   ;;  %vm5411_vm15 = vcmp.eq.s32.totalorder %v16525_v20, %v10829_v51  ;;  %vm5412_vm13 = vcmp.eq.s32.totalorder %v16525_v20, %v10898_v6  ;;  %vm5397_vm7 = vcmp.eq.s32.totalorder %v16526_v28, %v10829_v51  ;;  %v5585_v5 = vpop.permute.xlu0 %5584  ;;  %v16531_v20 = vld [vmem:[#allocation448_spill] sm:$0xff]  ;;  %v6867_v18 = vld [vmem:[%s7053_s27 + $0xd0] sm:$0xff] }
 0xaac   : > { %vm5398_vm11 = vcmp.eq.s32.totalorder %v16526_v28, %v10898_v6  ;;  %5801 = vperm.xlu0 %6776, %v6866_v4   ;;  %v12856_v38 = vsel %vm5397_vm7, %v5500_v22, 0.0  ;;  %v5635_v30 = vsel %vm5411_vm15, %v5535_v10, 0.0  ;;  %v5636_v8 = vsel %vm5412_vm13, %v5535_v10, 0.0 }
 0xaad   : > { %16527 = vst [vmem:[#allocation49_spill] sm:$0xff] %v12856_v38  ;;  %v12858_v23 = vsel %vm5398_vm11, %v5500_v22, 0.0  ;;  %vm5431_vm4 = vcmp.eq.s32.totalorder %v12503_v36, %v10829_v51  ;;  %vm5432_vm2 = vcmp.eq.s32.totalorder %v12503_v36, %v10898_v6  ;;  %v12864_v47 = vadd.f32 %v5635_v30, %v5251_v57  ;;  %v16532_v36 = vld [vmem:[#allocation449_spill] sm:$0xff] }
 0xaae   : > { %16528 = vst [vmem:[#allocation331_spill] sm:$0xff] %v12858_v23  ;;  %v12866_v34 = vadd.f32 %v5636_v8, %v5252_v7  ;;  %v5179_v28 = vsel %vm4955_vm0, %v16531_v20, 0.0  ;;  %v5180_v4 = vsel %vm4956_vm12, %v16531_v20, 0.0  ;;  %v5655_v22 = vsel %vm5431_vm4, %v5585_v5, 0.0 }
 0xaaf   : > { %16529 = vst [vmem:[#allocation84_spill] sm:$0xff] %v12864_v47  ;;  %v5656_v10 = vsel %vm5432_vm2, %v5585_v5, 0.0  ;;  %vm4520_vm9 = vcmp.eq.s32.totalorder %v16519_v54, %v10898_v6  ;;  %v5193_v57 = vsel %vm4969_vm8, %v16532_v36, 0.0  ;;  %v5194_v7 = vsel %vm4970_vm1, %v16532_v36, 0.0  ;;  %v16536_v5 = vld [vmem:[#allocation427_spill] sm:$0xff] }
 0xab0   : > { %16530 = vst [vmem:[#allocation39_spill] sm:$0xff] %v12866_v34  ;;  %v12886_v30 = vadd.f32 %v5655_v22, %v5271_v17  ;;  %v12888_v8 = vadd.f32 %v5656_v10, %v5272_v21  ;;  %vm4533_vm0 = vcmp.eq.s32.totalorder %v16535_v39, %v10829_v51  ;;  %v4737_v20 = vsel %vm4513_vm14, %v16536_v5, 0.0  ;;  %v16537_v21 = vld [vmem:[#allocation429_spill] sm:$0xff]  ;;  %v16661_v34 = vld [vmem:[#allocation242_spill] sm:$0xff] }
 0xab1   : > { %v4738_v24 = vsel %vm4514_vm3, %v16536_v5, 0.0  ;;  %v4809_v45 = vadd.f32 %v4745_v26, %v12283_v41  ;;  %v4810_v17 = vadd.f32 %v4746_v12, %v12288_v15  ;;  %vm4534_vm12 = vcmp.eq.s32.totalorder %v16535_v39, %v10898_v6  ;;  %v16538_v10 = vld [vmem:[#allocation5_spill] sm:$0xff]  ;;  %v16539_v41 = vld [vmem:[#allocation191_spill] sm:$0xff]  ;;  %v6868_v39 = vld [vmem:[%s7053_s27 + $0xd8] sm:$0xff] }
 0xab2   : > { %16533 = vst [vmem:[#allocation80_spill] sm:$0xff] %v12886_v30  ;;  %v4743_v22 = vsel %vm4519_vm5, %v16537_v21, 0.0  ;;  %v4751_v36 = vsel %vm4527_vm10, %v16538_v10, 0.0  ;;  %v5243_v52 = vadd.f32 %v5179_v28, %v12465_v37  ;;  %vm4961_vm14 = vcmp.eq.s32.totalorder %v16539_v41, %v10829_v51  ;;  %v16541_v30 = vld [vmem:[#allocation230_spill] sm:$0xff]  ;;  %v16543_v37 = vld [vmem:[#allocation273_spill] sm:$0xff]  ;;  %v5550_v28 = vpop.permute.xlu2 %5549 }
 0xab3   : > { %16534 = vst [vmem:[#allocation83_spill] sm:$0xff] %v12888_v8  ;;  %v4752_v15 = vsel %vm4528_vm6, %v16538_v10, 0.0  ;;  %v5244_v26 = vadd.f32 %v5180_v4, %v12468_v62  ;;  %v5257_v12 = vadd.f32 %v5193_v57, %v4809_v45  ;;  %v5258_v5 = vadd.f32 %v5194_v7, %v4810_v17  ;;  %v16540_v8 = vld [vmem:[#allocation218_spill] sm:$0xff]  ;;  %5982 = vperm.xlu1 %6777, %v16541_v30   ;;  %v5515_v62 = vpop.permute.xlu1 %5514  ;;  %v12939_v10 = vpop.permute.xlu0 %5726 }
 0xab4   : > { %5897 = vperm.xlu2 %6778, %v16540_v8   ;;  %vm5417_vm3 = vcmp.eq.s32.totalorder %v16542_v11, %v10829_v51  ;;  %vm5418_vm10 = vcmp.eq.s32.totalorder %v16542_v11, %v10898_v6  ;;  %vm5403_vm5 = vcmp.eq.s32.totalorder %v16543_v37, %v10829_v51  ;;  %vm5404_vm6 = vcmp.eq.s32.totalorder %v16543_v37, %v10898_v6  ;;  %v16548_v37 = vld [vmem:[#allocation450_spill] sm:$0xff] }
 0xab5   : > { %5804 = vperm.xlu0 %6776, %v6867_v18   ;;  %v5627_v4 = vsel %vm5403_vm5, %v5515_v62, 0.0  ;;  %v5628_v57 = vsel %vm5404_vm6, %v5515_v62, 0.0  ;;  %v5641_v7 = vsel %vm5417_vm3, %v5550_v28, 0.0  ;;  %v5642_v30 = vsel %vm5418_vm10, %v5550_v28, 0.0  ;;  %v16549_v62 = vld [vmem:[#allocation433_spill] sm:$0xff] }
 0xab6   : > { %v12931_v8 = vadd.f32 %v5627_v4, %v5243_v52  ;;  %v12933_v45 = vadd.f32 %v5628_v57, %v5244_v26  ;;  %v12935_v17 = vadd.f32 %v5641_v7, %v5257_v12  ;;  %v12937_v11 = vadd.f32 %v5642_v30, %v5258_v5  ;;  %v16550_v52 = vld [vmem:[#allocation410_spill] sm:$0xff]  ;;  %v16551_v5 = vld [vmem:[#allocation451_spill] sm:$0xff] }
 0xab7   : > { %vm4962_vm8 = vcmp.eq.s32.totalorder %v16539_v41, %v10898_v6  ;;  %v5185_v18 = vsel %vm4961_vm14, %v16548_v37, 0.0  ;;  %vm4975_vm1 = vcmp.eq.s32.totalorder %v16549_v62, %v10829_v51  ;;  %vm4976_vm15 = vcmp.eq.s32.totalorder %v16549_v62, %v10898_v6  ;;  %v16552_v4 = vld [vmem:[#allocation411_spill] sm:$0xff]  ;;  %v16554_v62 = vld [vmem:[#allocation21_spill] sm:$0xff] }
 0xab8   : > { %16544 = vst [vmem:[#allocation81_spill] sm:$0xff] %v12931_v8  ;;  %vm4525_vm13 = vcmp.eq.s32.totalorder %v16550_v52, %v10829_v51  ;;  %vm4526_vm7 = vcmp.eq.s32.totalorder %v16550_v52, %v10898_v6  ;;  %v4801_v26 = vadd.f32 %v4737_v20, %v12297_v27  ;;  %v5186_v12 = vsel %vm4962_vm8, %v16548_v37, 0.0  ;;  %v16553_v37 = vld [vmem:[#allocation190_spill] sm:$0xff] }
 0xab9   : > { %16545 = vst [vmem:[#allocation315_spill] sm:$0xff] %v12933_v45  ;;  %v5199_v28 = vsel %vm4975_vm1, %v16551_v5, 0.0  ;;  %v5200_v41 = vsel %vm4976_vm15, %v16551_v5, 0.0  ;;  %vm4539_vm11 = vcmp.eq.s32.totalorder %v16552_v4, %v10829_v51  ;;  %v4802_v57 = vadd.f32 %v4738_v24, %v12301_v55  ;;  %v16569_v45 = vld [vmem:[#allocation194_spill] sm:$0xff] }
 0xaba   : > { %16546 = vst [vmem:[#allocation318_spill] sm:$0xff] %v12935_v17  ;;  %v4744_v7 = vsel %vm4520_vm9, %v16537_v21, 0.0  ;;  %v4815_v30 = vadd.f32 %v4751_v36, %v12304_v50  ;;  %v4816_v27 = vadd.f32 %v4752_v15, %v12307_v32  ;;  %vm4540_vm4 = vcmp.eq.s32.totalorder %v16552_v4, %v10898_v6  ;;  %v16555_v36 = vld [vmem:[#allocation19_spill] sm:$0xff]  ;;  %v6869_v4 = vld [vmem:[%s7053_s27 + $0xe0] sm:$0xff] }
 0xabb   : > { %16547 = vst [vmem:[#allocation332_spill] sm:$0xff] %v12937_v11  ;;  %v4807_v20 = vadd.f32 %v4743_v22, %v12377_v61  ;;  %v4757_v55 = vsel %vm4533_vm0, %v16553_v37, 0.0  ;;  %v5249_v24 = vadd.f32 %v5185_v18, %v4801_v26  ;;  %vm4967_vm2 = vcmp.eq.s32.totalorder %v16554_v62, %v10829_v51  ;;  %v16556_v61 = vld [vmem:[#allocation227_spill] sm:$0xff]  ;;  %v16557_v22 = vld [vmem:[#allocation276_spill] sm:$0xff]  ;;  %v5530_v18 = vpop.permute.xlu1 %5529  ;;  %v5565_v26 = vpop.permute.xlu2 %5564 }
 0xabc   : > { %v4758_v50 = vsel %vm4534_vm12, %v16553_v37, 0.0  ;;  %v5250_v32 = vadd.f32 %v5186_v12, %v4802_v57  ;;  %v5263_v54 = vadd.f32 %v5199_v28, %v4815_v30  ;;  %v5264_v21 = vadd.f32 %v5200_v41, %v4816_v27  ;;  %5902 = vperm.xlu2 %6778, %v16555_v36   ;;  %5987 = vperm.xlu1 %6777, %v16556_v61   ;;  %v16558_v15 = vld [vmem:[#allocation279_spill] sm:$0xff]  ;;  %v13000_v36 = vpop.permute.xlu0 %5741  ;;  %v16562_v61 = vld [vmem:[#allocation452_spill] sm:$0xff] }
 0xabd   : > { %vm5423_vm9 = vcmp.eq.s32.totalorder %v16557_v22, %v10829_v51  ;;  %vm5424_vm0 = vcmp.eq.s32.totalorder %v16557_v22, %v10898_v6  ;;  %vm5409_vm14 = vcmp.eq.s32.totalorder %v16558_v15, %v10829_v51  ;;  %vm5410_vm3 = vcmp.eq.s32.totalorder %v16558_v15, %v10898_v6  ;;  %5807 = vperm.xlu0 %6776, %v6868_v39   ;;  %v16563_v15 = vld [vmem:[#allocation436_spill] sm:$0xff]  ;;  %v16565_v39 = vld [vmem:[#allocation453_spill] sm:$0xff]  ;;  %v13412_v11 = vld [vmem:[%s14498_s1 + $0x10] sm:$0xff] }
 0xabe   : > { %v5633_v12 = vsel %vm5409_vm14, %v5530_v18, 0.0  ;;  %v5634_v5 = vsel %vm5410_vm3, %v5530_v18, 0.0  ;;  %v5647_v28 = vsel %vm5423_vm9, %v5565_v26, 0.0  ;;  %v5648_v41 = vsel %vm5424_vm0, %v5565_v26, 0.0  ;;  %16561 = vst [vmem:[#allocation336_spill] sm:$0xff] %v13000_v36  ;;  %v16633_v17 = vld [vmem:[#allocation71_spill] sm:$0xff] }
 0xabf   : > { %v12992_v57 = vadd.f32 %v5633_v12, %v5249_v24  ;;  %v12994_v30 = vadd.f32 %v5634_v5, %v5250_v32  ;;  %v12996_v27 = vadd.f32 %v5647_v28, %v5263_v54  ;;  %v12998_v37 = vadd.f32 %v5648_v41, %v5264_v21  ;;  %v6220_v24 = vld [vmem:[%s14498_s1 + $0x78] sm:$0xff]  ;;  %v16564_v54 = vld [vmem:[#allocation342_spill] sm:$0xff] }
 0xac0   : > { %vm4968_vm12 = vcmp.eq.s32.totalorder %v16554_v62, %v10898_v6  ;;  %v5191_v22 = vsel %vm4967_vm2, %v16562_v61, 0.0  ;;  %vm4981_vm10 = vcmp.eq.s32.totalorder %v16563_v15, %v10829_v51  ;;  %vm4982_vm5 = vcmp.eq.s32.totalorder %v16563_v15, %v10898_v6  ;;  %v6236_v32 = vld [vmem:[%s14498_s1 + $0xf8] sm:$0xff]  ;;  %6237 = vmatpush.msra.mxu0 %v6220_v24  ;;  %v16567_v5 = vld [vmem:[#allocation430_spill] sm:$0xff]  ;;  %6643 = vmatpush.msra.mxu2 %v6220_v24 }
 0xac1   : > { %16559 = vst [vmem:[#allocation334_spill] sm:$0xff] %v12996_v27  ;;  %vm3641_vm6 = vcmp.eq.s32.totalorder %v16564_v54, %v10829_v51  ;;  %v4808_v62 = vadd.f32 %v4744_v7, %v12380_v48  ;;  %v5192_v21 = vsel %vm4968_vm12, %v16562_v61, 0.0  ;;  %v5205_v18 = vsel %vm4981_vm10, %v16565_v39, 0.0  ;;  %6350 = vmatpush.msra.mxu1 %v6236_v32  ;;  %v16566_v12 = vld [vmem:[#allocation148_spill] sm:$0xff]  ;;  %6659 = vmatpush.msra.mxu3 %v6236_v32  ;;  %v16568_v61 = vld [vmem:[#allocation185_spill] sm:$0xff]  ;;  %v16571_v24 = vld [vmem:[#allocation222_spill] sm:$0xff] }
 0xac2   : > { %16560 = vst [vmem:[#allocation335_spill] sm:$0xff] %v12998_v37  ;;  %v5206_v26 = vsel %vm4982_vm5, %v16565_v39, 0.0  ;;  %vm4083_vm8 = vcmp.eq.s32.totalorder %v16566_v12, %v10829_v51  ;;  %v4749_v28 = vsel %vm4525_vm13, %v16567_v5, 0.0  ;;  %v4750_v48 = vsel %vm4526_vm7, %v16567_v5, 0.0 }
 0xac3   : > { %v4821_v7 = vadd.f32 %v4757_v55, %v12383_v2  ;;  %v4822_v41 = vadd.f32 %v4758_v50, %v12386_v49  ;;  %vm4084_vm1 = vcmp.eq.s32.totalorder %v16566_v12, %v10898_v6  ;;  %v4763_v15 = vsel %vm4539_vm11, %v16568_v61, 0.0  ;;  %v16570_v50 = vld [vmem:[#allocation29_spill] sm:$0xff]  ;;  %v5580_v32 = vpop.permute.xlu2 %5579  ;;  %v16590_v12 = vld [vmem:[#allocation286_spill] sm:$0xff] }
 0xac4   : > { %v5255_v39 = vadd.f32 %v5191_v22, %v4807_v20  ;;  %vm4973_vm15 = vcmp.eq.s32.totalorder %v16569_v45, %v10829_v51  ;;  %vm4974_vm13 = vcmp.eq.s32.totalorder %v16569_v45, %v10898_v6  ;;  %v4764_v2 = vsel %vm4540_vm4, %v16568_v61, 0.0  ;;  %5907 = vperm.xlu2 %6778, %v16570_v50   ;;  %5992 = vperm.xlu1 %6777, %v16571_v24   ;;  %v16572_v20 = vld [vmem:[#allocation282_spill] sm:$0xff]  ;;  %v5545_v22 = vpop.permute.xlu1 %5544  ;;  %v13077_v24 = vpop.permute.xlu0 %5750 }
 0xac5   : > { %v5256_v49 = vadd.f32 %v5192_v21, %v4808_v62  ;;  %v5269_v52 = vadd.f32 %v5205_v18, %v4821_v7  ;;  %v5270_v55 = vadd.f32 %v5206_v26, %v4822_v41  ;;  %vm5429_vm7 = vcmp.eq.s32.totalorder %v16572_v20, %v10829_v51  ;;  %5810 = vperm.xlu0 %6776, %v6869_v4   ;;  %v6219_v62 = vld [vmem:[%s14498_s1 + $0x70] sm:$0xff]  ;;  %v16580_v45 = vld [vmem:[#allocation270_spill] sm:$0xff] }
 0xac6   : > { %vm5430_vm11 = vcmp.eq.s32.totalorder %v16572_v20, %v10898_v6  ;;  %vm5415_vm2 = vcmp.eq.s32.totalorder %v11948_v31, %v10829_v51  ;;  %vm5416_vm9 = vcmp.eq.s32.totalorder %v11948_v31, %v10898_v6  ;;  %v6235_v21 = vld [vmem:[%s14498_s1 + $0xf0] sm:$0xff]  ;;  %v5653_v5 = vsel %vm5429_vm7, %v5580_v32, 0.0  ;;  %6238 = vmatpush.msra.mxu0 %v6219_v62  ;;  %16577 = vst [vmem:[#allocation316_spill] sm:$0xff] %v13077_v24  ;;  %v16578_v20 = vld [vmem:[#allocation150_spill] sm:$0xff] }
 0xac7   : > { %v5639_v18 = vsel %vm5415_vm2, %v5545_v22, 0.0  ;;  %v5640_v26 = vsel %vm5416_vm9, %v5545_v22, 0.0  ;;  %v5654_v7 = vsel %vm5430_vm11, %v5580_v32, 0.0  ;;  %6351 = vmatpush.msra.mxu1 %v6235_v21  ;;  %vm3642_vm4 = vcmp.eq.s32.totalorder %v16564_v54, %v10898_v6  ;;  %6644 = vmatpush.msra.mxu2 %v6219_v62  ;;  %v6217_v22 = vld [vmem:[%s14498_s1 + $0x60] sm:$0xff]  ;;  %v13197_v54 = vld [vmem:[%s14498_s1 + $0xc8] sm:$0xff] }
 0xac8   : > { %v13069_v31 = vadd.f32 %v5639_v18, %v5255_v39  ;;  %v13071_v41 = vadd.f32 %v5640_v26, %v5256_v49  ;;  %v13073_v61 = vadd.f32 %v5653_v5, %v5269_v52  ;;  %v13075_v50 = vadd.f32 %v5654_v7, %v5270_v55  ;;  %v16579_v49 = vld [vmem:[#allocation439_spill] sm:$0xff]  ;;  %v6218_v52 = vld [vmem:[%s14498_s1 + $0x68] sm:$0xff]  ;;  %6660 = vmatpush.msra.mxu3 %v6235_v21  ;;  %v6233_v21 = vld [vmem:[%s14498_s1 + $0xe0] sm:$0xff] }
 0xac9   : > { %v5197_v4 = vsel %vm4973_vm15, %v16578_v20, 0.0  ;;  %v5198_v39 = vsel %vm4974_vm13, %v16578_v20, 0.0  ;;  %vm4987_vm0 = vcmp.eq.s32.totalorder %v16579_v49, %v10829_v51  ;;  %vm4988_vm14 = vcmp.eq.s32.totalorder %v16579_v49, %v10898_v6  ;;  %v6234_v55 = vld [vmem:[%s14498_s1 + $0xe8] sm:$0xff]  ;;  %6239 = vmatpush.msra.mxu0 %v6218_v52  ;;  %v16582_v7 = vld [vmem:[#allocation265_spill] sm:$0xff]  ;;  %v16583_v20 = vld [vmem:[#allocation127_spill] sm:$0xff]  ;;  %6645 = vmatpush.msra.mxu2 %v6218_v52 }
 0xaca   : > { %16573 = vst [vmem:[#allocation337_spill] sm:$0xff] %v13069_v31  ;;  %vm2689_vm3 = vcmp.eq.s32.totalorder %v16580_v45, %v10829_v51  ;;  %vm2690_vm12 = vcmp.eq.s32.totalorder %v16580_v45, %v10898_v6  ;;  %v4813_v32 = vadd.f32 %v4749_v28, %v12395_v33  ;;  %v4814_v62 = vadd.f32 %v4750_v48, %v12405_v59  ;;  %v16581_v18 = vld [vmem:[#allocation454_spill] sm:$0xff]  ;;  %v16584_v59 = vld [vmem:[#allocation413_spill] sm:$0xff]  ;;  %v6216_v49 = vld [vmem:[%s14498_s1 + $0x58] sm:$0xff] }
 0xacb   : > { %16574 = vst [vmem:[#allocation85_spill] sm:$0xff] %v13071_v41  ;;  %v5211_v26 = vsel %vm4987_vm0, %v16581_v18, 0.0  ;;  %v5212_v5 = vsel %vm4988_vm14, %v16581_v18, 0.0  ;;  %6352 = vmatpush.msra.mxu1 %v6234_v55  ;;  %vm2697_vm10 = vcmp.eq.s32.totalorder %v16582_v7, %v10829_v51  ;;  %v13117_v33 = vsel %vm3641_vm6, %v16583_v20, 0.0  ;;  %6661 = vmatpush.msra.mxu3 %v6234_v55  ;;  %v16585_v18 = vld [vmem:[#allocation152_spill] sm:$0xff]  ;;  %v13427_v41 = vld [vmem:[%s14498_s1 + $0x90] sm:$0xff] }
 0xacc   : > { %16575 = vst [vmem:[#allocation338_spill] sm:$0xff] %v13073_v61  ;;  %vm4531_vm5 = vcmp.eq.s32.totalorder %v16584_v59, %v10829_v51  ;;  %v4827_v28 = vadd.f32 %v4763_v15, %v12408_v0  ;;  %v4828_v48 = vadd.f32 %v4764_v2, %v12411_v46  ;;  %vm2698_vm15 = vcmp.eq.s32.totalorder %v16582_v7, %v10898_v6  ;;  %v6232_v15 = vld [vmem:[%s14498_s1 + $0xd8] sm:$0xff]  ;;  %v13177_v60 = vpop.permute.xlu0 %5759  ;;  %v16636_v31 = vld [vmem:[#allocation69_spill] sm:$0xff] }
 0xacd   : > { %16576 = vst [vmem:[#allocation78_spill] sm:$0xff] %v13075_v50  ;;  %v4307_v8 = vsel %vm4083_vm8, %v16585_v18, 0.0  ;;  %vm4532_vm6 = vcmp.eq.s32.totalorder %v16584_v59, %v10898_v6  ;;  %v5261_v0 = vadd.f32 %v5197_v4, %v4813_v32  ;;  %v5262_v46 = vadd.f32 %v5198_v39, %v4814_v62  ;;  %6240 = vmatpush.msra.mxu0 %v6217_v22  ;;  %v16586_v50 = vld [vmem:[#allocation284_spill] sm:$0xff]  ;;  %v16588_v4 = vld [vmem:[#allocation231_spill] sm:$0xff] }
 0xace   : > { %6353 = vmatpush.msra.mxu1 %v6233_v21  ;;  %v4308_v2 = vsel %vm4084_vm1, %v16585_v18, 0.0  ;;  %v5275_v52 = vadd.f32 %v5211_v26, %v4827_v28  ;;  %v5276_v55 = vadd.f32 %v5212_v5, %v4828_v48  ;;  %vm5435_vm8 = vcmp.eq.s32.totalorder %v16586_v50, %v10829_v51  ;;  %v16587_v61 = vld [vmem:[#allocation28_spill] sm:$0xff]  ;;  %5997 = vperm.xlu1 %6777, %v16588_v4   ;;  %v6215_v39 = vld [vmem:[%s14498_s1 + $0x50] sm:$0xff]  ;;  %v5560_v26 = vpop.permute.xlu1 %5559  ;;  %v5595_v5 = vpop.permute.xlu2 %5594 }
 0xacf   : > { %5912 = vperm.xlu2 %6778, %v16587_v61   ;;  %v16589_v32 = vld [vmem:[#allocation379_spill] sm:$0xff]  ;;  %vm5436_vm1 = vcmp.eq.s32.totalorder %v16586_v50, %v10898_v6  ;;  %vm5421_vm13 = vcmp.eq.s32.totalorder %v16590_v12, %v10829_v51  ;;  %vm5422_vm7 = vcmp.eq.s32.totalorder %v16590_v12, %v10898_v6  ;;  %v6870_v61 = vld [vmem:[%s7053_s27 + $0xe8] sm:$0xff]  ;;  %6241 = vmatpush.msra.mxu0 %v6216_v49  ;;  %v5659_v4 = vsel %vm5435_vm8, %v5595_v5, 0.0  ;;  %v16600_v59 = vld [vmem:[#allocation288_spill] sm:$0xff] }
 0xad0   : > { %v4755_v62 = vsel %vm4531_vm5, %v16589_v32, 0.0  ;;  %5813 = vperm.xlu0 %6776, %v6870_v61   ;;  %v13162_v28 = vld [vmem:[%s14498_s1 + $0xd0] sm:$0xff]  ;;  %v5645_v48 = vsel %vm5421_vm13, %v5560_v26, 0.0  ;;  %v5646_v18 = vsel %vm5422_vm7, %v5560_v26, 0.0  ;;  %v5660_v23 = vsel %vm5436_vm1, %v5595_v5, 0.0  ;;  %6354 = vmatpush.msra.mxu1 %v6232_v15  ;;  %v16591_v12 = vld [vmem:[#allocation18_spill] sm:$0xff] }
 0xad1   : > { %6646 = vmatpush.msra.mxu2 %v6217_v22  ;;  %vm2695_vm11 = vcmp.eq.s32.totalorder %v16591_v12, %v10829_v51  ;;  %v13169_v61 = vadd.f32 %v5645_v48, %v5261_v0  ;;  %v13171_v38 = vadd.f32 %v5646_v18, %v5262_v46  ;;  %v13173_v37 = vadd.f32 %v5659_v4, %v5275_v52  ;;  %v16597_v22 = vld [vmem:[#allocation280_spill] sm:$0xff]  ;;  %v16602_v5 = vld [vmem:[#allocation387_spill] sm:$0xff] }
 0xad2   : > { %v13175_v27 = vadd.f32 %v5660_v23, %v5276_v55  ;;  %16596 = vst [vmem:[#allocation91_spill] sm:$0xff] %v13177_v60  ;;  %6242 = vmatpush.msra.mxu0 %v6215_v39  ;;  %v3866_v50 = vsel %vm3642_vm4, %v16583_v20, 0.0  ;;  %v4371_v26 = vadd.f32 %v4307_v8, %v16597_v22  ;;  %v4756_v0 = vsel %vm4532_vm6, %v16589_v32, 0.0  ;;  %v16598_v46 = vld [vmem:[#allocation196_spill] sm:$0xff]  ;;  %6355 = vmatpush.msra.mxu1 %v13162_v28  ;;  %v6214_v23 = vld [vmem:[%s14498_s1 + $0x48] sm:$0xff]  ;;  %v13202_v8 = vld [vmem:[%s14498_s1 + $0x40] sm:$0xff] }
 0xad3   : > { %16592 = vst [vmem:[#allocation87_spill] sm:$0xff] %v13169_v61  ;;  %vm4979_vm2 = vcmp.eq.s32.totalorder %v16598_v46, %v10829_v51  ;;  %6662 = vmatpush.msra.mxu3 %v6233_v21  ;;  %v16599_v20 = vld [vmem:[#allocation55_spill] sm:$0xff]  ;;  %v16601_v55 = vld [vmem:[#allocation45_spill] sm:$0xff]  ;;  %vm4980_vm9 = vcmp.eq.s32.totalorder %v16598_v46, %v10898_v6  ;;  %6647 = vmatpush.msra.mxu2 %v6216_v49  ;;  %v16603_v18 = vld [vmem:[#allocation296_spill] sm:$0xff] }
 0xad4   : > { %16593 = vst [vmem:[#allocation88_spill] sm:$0xff] %v13171_v38  ;;  %v3482_v52 = vadd.f32 %v16600_v59, %v16599_v20  ;;  %v4372_v32 = vadd.f32 %v4308_v2, %v16601_v55  ;;  %v5203_v48 = vsel %vm4979_vm2, %v16602_v5, 0.0  ;;  %6243 = vmatpush.msra.mxu0 %v6214_v23  ;;  %vm2696_vm4 = vcmp.eq.s32.totalorder %v16591_v12, %v10898_v6  ;;  %v13229_v49 = vld [vmem:[%s14498_s1 + $0xc0] sm:$0xff]  ;;  %v16604_v46 = vld [vmem:[#allocation267_spill] sm:$0xff] }
 0xad5   : > { %16594 = vst [vmem:[#allocation339_spill] sm:$0xff] %v13173_v37  ;;  %v13216_v21 = vsel %vm2689_vm3, %v16603_v18, 0.0  ;;  %v13222_v2 = vsel %vm2690_vm12, %v16603_v18, 0.0  ;;  %v4819_v4 = vadd.f32 %v4755_v62, %v4371_v26  ;;  %v5204_v22 = vsel %vm4980_vm9, %v16602_v5, 0.0  ;;  %6356 = vmatpush.msra.mxu1 %v13197_v54  ;;  %6663 = vmatpush.msra.mxu3 %v6232_v15  ;;  %v16605_v20 = vld [vmem:[#allocation297_spill] sm:$0xff]  ;;  %v16606_v62 = vld [vmem:[#allocation268_spill] sm:$0xff] }
 0xad6   : > { %16595 = vst [vmem:[#allocation283_spill] sm:$0xff] %v13175_v27  ;;  %vm2703_vm0 = vcmp.eq.s32.totalorder %v16604_v46, %v10829_v51  ;;  %v13237_v45 = vsel %vm2697_vm10, %v16605_v20, 0.0  ;;  %v3929_v26 = vadd.f32 %v13117_v33, %v16606_v62  ;;  %v3930_v59 = vadd.f32 %v3866_v50, %v3482_v52  ;;  %6244 = vmatpush.msra.mxu0 %v13202_v8  ;;  %v13245_v15 = vld [vmem:[%s14498_s1 + $0x38] sm:$0xff]  ;;  %v16607_v5 = vld [vmem:[#allocation271_spill] sm:$0xff]  ;;  %v16612_v62 = vld [vmem:[#allocation289_spill] sm:$0xff]  ;;  %v13281_v27 = vpop.permute.xlu2 %5732 }
 0xad7   : > { %v4820_v55 = vadd.f32 %v4756_v0, %v4372_v32  ;;  %6648 = vmatpush.msra.mxu2 %v6215_v39  ;;  %vm2701_vm14 = vcmp.eq.s32.totalorder %v16607_v5, %v10829_v51  ;;  %v13253_v18 = vsel %vm2698_vm15, %v16605_v20, 0.0  ;;  %v16608_v33 = vld [vmem:[#allocation367_spill] sm:$0xff]  ;;  %v5267_v50 = vadd.f32 %v5203_v48, %v4819_v4  ;;  %v16609_v0 = vld [vmem:[#allocation213_spill] sm:$0xff]  ;;  %v16610_v52 = vld [vmem:[#allocation228_spill] sm:$0xff]  ;;  %v5575_v48 = vpop.permute.xlu1 %5574  ;;  %6357 = vmatpush.msra.mxu1 %v13229_v49 }
 0xad8   : > { %vm4089_vm3 = vcmp.eq.s32.totalorder %v16608_v33, %v10829_v51  ;;  %vm4090_vm12 = vcmp.eq.s32.totalorder %v16608_v33, %v10898_v6  ;;  %5917 = vperm.xlu2 %6778, %v16609_v0   ;;  %6002 = vperm.xlu1 %6777, %v16610_v52   ;;  %v13264_v39 = vld [vmem:[%s14498_s1 + $0xb8] sm:$0xff]  ;;  %v16611_v32 = vld [vmem:[#allocation25_spill] sm:$0xff]  ;;  %vm5427_vm10 = vcmp.eq.s32.totalorder %v16612_v62, %v10829_v51  ;;  %v6871_v33 = vld [vmem:[%s7053_s27 + $0xf0] sm:$0xff] }
 0xad9   : > { %v4313_v7 = vsel %vm4089_vm3, %v16611_v32, 0.0  ;;  %v5268_v20 = vadd.f32 %v5204_v22, %v4820_v55  ;;  %vm5428_vm5 = vcmp.eq.s32.totalorder %v16612_v62, %v10898_v6  ;;  %5816 = vperm.xlu0 %6776, %v6871_v33   ;;  %v13276_v4 = vld [vmem:[%s14498_s1 + $0x30] sm:$0xff]  ;;  %v4314_v0 = vsel %vm4090_vm12, %v16611_v32, 0.0  ;;  %v16613_v22 = vld [vmem:[#allocation416_spill] sm:$0xff]  ;;  %6245 = vmatpush.msra.mxu0 %v13245_v15 }
 0xada   : > { %vm4537_vm15 = vcmp.eq.s32.totalorder %v16613_v22, %v10829_v51  ;;  %v5651_v55 = vsel %vm5427_vm10, %v5575_v48, 0.0  ;;  %v5652_v52 = vsel %vm5428_vm5, %v5575_v48, 0.0  ;;  %v13287_v62 = vld [vmem:[%s14498_s1 + $0xb0] sm:$0xff]  ;;  %6664 = vmatpush.msra.mxu3 %v13162_v28  ;;  %vm4538_vm6 = vcmp.eq.s32.totalorder %v16613_v22, %v10898_v6  ;;  %6358 = vmatpush.msra.mxu1 %v13264_v39  ;;  %v16620_v22 = vld [vmem:[#allocation220_spill] sm:$0xff] }
 0xadb   : > { %v16614_v32 = vld [vmem:[#allocation383_spill] sm:$0xff]  ;;  %v13293_v37 = vadd.f32 %v5651_v55, %v5267_v50  ;;  %v13295_v60 = vadd.f32 %v5652_v52, %v5268_v20  ;;  %v4377_v61 = vadd.f32 %v4313_v7, %v3929_v26  ;;  %vm4985_vm8 = vcmp.eq.s32.totalorder %v16618_v19, %v10829_v51  ;;  %6246 = vmatpush.msra.mxu0 %v13276_v4  ;;  %v13311_v50 = vld [vmem:[%s14498_s1 + $0x28] sm:$0xff]  ;;  %v13323_v52 = vpop.permute.xlu0 %5774 }
 0xadc   : > { %v4761_v33 = vsel %vm4537_vm15, %v16614_v32, 0.0  ;;  %v16617_v48 = vld [vmem:[#allocation299_spill] sm:$0xff]  ;;  %v4762_v28 = vsel %vm4538_vm6, %v16614_v32, 0.0  ;;  %v13316_v20 = vld [vmem:[%s14498_s1 + $0xa8] sm:$0xff]  ;;  %6649 = vmatpush.msra.mxu2 %v6214_v23  ;;  %v4378_v7 = vadd.f32 %v4314_v0, %v3930_v59  ;;  %vm4986_vm13 = vcmp.eq.s32.totalorder %v16618_v19, %v10898_v6  ;;  %6359 = vmatpush.msra.mxu1 %v13287_v62  ;;  %v16621_v23 = vld [vmem:[#allocation65_spill] sm:$0xff] }
 0xadd   : > { %16615 = vst [vmem:[#allocation252_spill] sm:$0xff] %v13293_v37  ;;  %v13302_v38 = vsel %vm2695_vm11, %v16617_v48, 0.0  ;;  %v16619_v26 = vld [vmem:[#allocation59_spill] sm:$0xff]  ;;  %v5209_v55 = vsel %vm4985_vm8, %v16620_v22, 0.0  ;;  %6665 = vmatpush.msra.mxu3 %v13197_v54  ;;  %vm2702_vm7 = vcmp.eq.s32.totalorder %v16607_v5, %v10898_v6  ;;  %vm3135_vm2 = vcmp.eq.s32.totalorder %v16621_v23, %v10829_v51  ;;  %6247 = vmatpush.msra.mxu0 %v13311_v50  ;;  %v13338_v0 = vld [vmem:[%s14498_s1 + $0x20] sm:$0xff] }
 0xade   : > { %16616 = vst [vmem:[#allocation246_spill] sm:$0xff] %v13295_v60  ;;  %vm3137_vm1 = vcmp.eq.s32.totalorder %v16619_v26, %v10829_v51  ;;  %vm3138_vm11 = vcmp.eq.s32.totalorder %v16619_v26, %v10898_v6  ;;  %v4825_v59 = vadd.f32 %v4761_v33, %v4377_v61  ;;  %v5210_v19 = vsel %vm4986_vm13, %v16620_v22, 0.0  ;;  %6650 = vmatpush.msra.mxu2 %v13202_v8  ;;  %v16622_v61 = vld [vmem:[#allocation63_spill] sm:$0xff]  ;;  %v13355_v33 = vld [vmem:[%s14498_s1 + $0xa0] sm:$0xff]  ;;  %v16623_v8 = vld [vmem:[#allocation300_spill] sm:$0xff] }
 0xadf   : > { %v13345_v54 = vsel %vm2696_vm4, %v16617_v48, 0.0  ;;  %vm3136_vm9 = vcmp.eq.s32.totalorder %v16621_v23, %v10898_v6  ;;  %vm3133_vm3 = vcmp.eq.s32.totalorder %v16622_v61, %v10829_v51  ;;  %v4826_v32 = vadd.f32 %v4762_v28, %v4378_v7  ;;  %6360 = vmatpush.msra.mxu1 %v13316_v20  ;;  %6666 = vmatpush.msra.mxu3 %v13229_v49  ;;  %v16624_v48 = vld [vmem:[#allocation68_spill] sm:$0xff]  ;;  %v16626_v22 = vld [vmem:[#allocation223_spill] sm:$0xff]  ;;  %v16627_v60 = vld [vmem:[#allocation302_spill] sm:$0xff] }
 0xae0   : > { %v13362_v12 = vsel %vm2703_vm0, %v16623_v8, 0.0  ;;  %vm3134_vm4 = vcmp.eq.s32.totalorder %v16622_v61, %v10898_v6  ;;  %vm3139_vm12 = vcmp.eq.s32.totalorder %v16624_v48, %v10829_v51  ;;  %v5273_v28 = vadd.f32 %v5209_v55, %v4825_v59  ;;  %v16625_v7 = vld [vmem:[#allocation52_spill] sm:$0xff]  ;;  %6007 = vperm.xlu1 %6777, %v16626_v22   ;;  %v16629_v59 = vld [vmem:[#allocation291_spill] sm:$0xff]  ;;  %v5590_v22 = vpop.permute.xlu1 %5589  ;;  %6248 = vmatpush.msra.mxu0 %v13338_v0 }
 0xae1   : > { %5922 = vperm.xlu2 %6778, %v16625_v7   ;;  %v13373_v49 = vld [vmem:[%s14498_s1 + $0x18] sm:$0xff]  ;;  %v13379_v37 = vsel %vm2701_vm14, %v16627_v60, 0.0  ;;  %vm3141_vm0 = vcmp.eq.s32.totalorder %v16628_v43, %v10829_v51  ;;  %vm3140_vm5 = vcmp.eq.s32.totalorder %v16624_v48, %v10898_v6  ;;  %v5274_v55 = vadd.f32 %v5210_v19, %v4826_v32  ;;  %v16630_v7 = vld [vmem:[#allocation41_spill] sm:$0xff]  ;;  %v16632_v19 = vld [vmem:[#allocation66_spill] sm:$0xff]  ;;  %6361 = vmatpush.msra.mxu1 %v13355_v33 }
 0xae2   : > { %vm5433_vm15 = vcmp.eq.s32.totalorder %v16629_v59, %v10829_v51  ;;  %vm5434_vm6 = vcmp.eq.s32.totalorder %v16629_v59, %v10898_v6  ;;  %5957 = vperm.xlu0 %6776, %v16630_v7   ;;  %vm3143_vm13 = vcmp.eq.s32.totalorder %v16632_v19, %v10829_v51  ;;  %vm3144_vm10 = vcmp.eq.s32.totalorder %v16632_v19, %v10898_v6  ;;  %v13406_v7 = vpop.permute.xlu2 %5738  ;;  %v16641_v19 = vld [vmem:[#allocation322_spill] sm:$0xff]  ;;  %v16644_v5 = vld [vmem:[#allocation323_spill] sm:$0xff] }
 0xae3   : > { %v5657_v32 = vsel %vm5433_vm15, %v5590_v22, 0.0  ;;  %v5658_v59 = vsel %vm5434_vm6, %v5590_v22, 0.0  ;;  %6651 = vmatpush.msra.mxu2 %v13245_v15  ;;  %vm3145_vm8 = vcmp.eq.s32.totalorder %v16633_v17, %v10829_v51  ;;  %vm3146_vm14 = vcmp.eq.s32.totalorder %v16633_v17, %v10898_v6  ;;  %6249 = vmatpush.msra.mxu0 %v13373_v49  ;;  %v16637_v15 = vld [vmem:[#allocation317_spill] sm:$0xff]  ;;  %v13500_v29 = vpop.permute.xlu0 %5777 }
 0xae4   : > { %v13419_v24 = vadd.f32 %v5657_v32, %v5273_v28  ;;  %v13421_v22 = vadd.f32 %v5658_v59, %v5274_v55  ;;  %vm3149_vm15 = vcmp.eq.s32.totalorder %v16636_v31, %v10829_v51  ;;  %v3361_v40 = vsel %vm3137_vm1, %v16637_v15, 0.0  ;;  %v16638_v55 = vld [vmem:[#allocation320_spill] sm:$0xff]  ;;  %6362 = vmatpush.msra.mxu1 %v13396_v14  ;;  %v13447_v59 = vld [vmem:[%s14498_s1 + $0x8] sm:$0xff]  ;;  %6667 = vmatpush.msra.mxu3 %v13264_v39 }
 0xae5   : > { %v3362_v28 = vsel %vm3138_vm11, %v16637_v15, 0.0  ;;  %v3367_v32 = vsel %vm3143_vm13, %v16638_v55, 0.0  ;;  %vm2704_vm1 = vcmp.eq.s32.totalorder %v16604_v46, %v10898_v6  ;;  %vm3150_vm11 = vcmp.eq.s32.totalorder %v16636_v31, %v10898_v6  ;;  %v16639_v15 = vld [vmem:[#allocation321_spill] sm:$0xff]  ;;  %6250 = vmatpush.msra.mxu0 %v13412_v11  ;;  %6652 = vmatpush.msra.mxu2 %v13276_v4  ;;  %v13484_v4 = vld [vmem:[%s14498_s1 + $0x88] sm:$0xff] }
 0xae6   : > { %16634 = vst [vmem:[#allocation92_spill] sm:$0xff] %v13419_v24  ;;  %v3368_v26 = vsel %vm3144_vm10, %v16638_v55, 0.0  ;;  %v3358_v39 = vsel %vm3134_vm4, %v16639_v15, 0.0  ;;  %v16640_v24 = vld [vmem:[#allocation74_spill] sm:$0xff]  ;;  %v3359_v55 = vsel %vm3135_vm2, %v16641_v19, 0.0  ;;  %v3360_v61 = vsel %vm3136_vm9, %v16641_v19, 0.0  ;;  %6363 = vmatpush.msra.mxu1 %v13427_v41  ;;  %6668 = vmatpush.msra.mxu3 %v13287_v62 }
 0xae7   : > { %16635 = vst [vmem:[#allocation340_spill] sm:$0xff] %v13421_v22  ;;  %v3357_v22 = vsel %vm3133_vm3, %v16639_v15, 0.0  ;;  %vm3151_vm6 = vcmp.eq.s32.totalorder %v16640_v24, %v10829_v51  ;;  %vm3152_vm10 = vcmp.eq.s32.totalorder %v16640_v24, %v10898_v6  ;;  %v2926_v15 = vsel %vm2702_vm7, %v16627_v60, 0.0  ;;  %6251 = vmatpush.msra.mxu0 %v13447_v59  ;;  %v13506_v62 = vld [vmem:[%s14498_s1] sm:$0xff]  ;;  %6653 = vmatpush.msra.mxu2 %v13311_v50  ;;  %v16642_v60 = vld [vmem:[#allocation243_spill] sm:$0xff]  ;;  %v16664_v46 = vld [vmem:[#allocation94_spill] sm:$0xff] }
 0xae8   : > { %v13492_v44 = vadd.f32 %v3361_v40, %v13216_v21  ;;  %v13495_v23 = vadd.f32 %v3362_v28, %v13222_v2  ;;  %v13498_v19 = vadd.f32 %v3367_v32, %v13302_v38  ;;  %v13510_v40 = vadd.f32 %v3368_v26, %v13345_v54  ;;  %v16643_v38 = vld [vmem:[#allocation244_spill] sm:$0xff]  ;;  %v16645_v32 = vld [vmem:[#allocation34_spill] sm:$0xff]  ;;  %6012 = vperm.xlu1 %6777, %v16646_v56   ;;  %v13527_v50 = vld [vmem:[%s14498_s1 + $0x80] sm:$0xff] }
 0xae9   : > { %v13513_v21 = vadd.f32 %v3357_v22, %v16642_v60  ;;  %v13516_v2 = vadd.f32 %v3358_v39, %v16643_v38  ;;  %v3373_v28 = vsel %vm3149_vm15, %v16644_v5, 0.0  ;;  %5927 = vperm.xlu2 %6778, %v16645_v32   ;;  %v16647_v54 = vld [vmem:[#allocation239_spill] sm:$0xff]  ;;  %v16648_v26 = vld [vmem:[#allocation240_spill] sm:$0xff]  ;;  %v3374_v60 = vsel %vm3150_vm11, %v16644_v5, 0.0  ;;  %6364 = vmatpush.msra.mxu1 %v13484_v4 }
 0xaea   : > { %v13530_v22 = vadd.f32 %v3359_v55, %v16647_v54  ;;  %v13533_v39 = vadd.f32 %v3360_v61, %v16648_v26  ;;  %v16649_v38 = vld [vmem:[#allocation324_spill] sm:$0xff]  ;;  %v16650_v61 = vld [vmem:[#allocation325_spill] sm:$0xff]  ;;  %vm16651_vm7 = vcmp.eq.s32.totalorder %v16628_v43, %v10898_v6  ;;  %v16652_v54 = vld [vmem:[#allocation327_spill] sm:$0xff]  ;;  %v13563_v3 = vpop.permute.xlu2 %5747  ;;  %6252 = vmatpush.msra.mxu0 %v13506_v62  ;;  %6669 = vmatpush.msra.mxu3 %v13316_v20  ;;  %v3375_v17 = vsel %vm3151_vm6, %v16658_v1, 0.0 }
 0xaeb   : > { %v3363_v56 = vsel %vm3139_vm12, %v16649_v38, 0.0  ;;  %v6872_v32 = vld [vmem:[%s7053_s27 + $0x78] sm:$0xff]  ;;  %v3364_v55 = vsel %vm3140_vm5, %v16649_v38, 0.0  ;;  %v3365_v31 = vsel %vm3141_vm0, %v16650_v61, 0.0  ;;  %v3366_v5 = vsel %vm16651_vm7, %v16650_v61, 0.0  ;;  %16653 = vst [vmem:[#allocation341_spill] sm:$0xff] %v13563_v3  ;;  %6365 = vmatpush.msra.mxu1 %v13527_v50  ;;  %6654 = vmatpush.msra.mxu2 %v13338_v0 }
 0xaec   : > { %5771 = vperm.xlu0 %6776, %v6872_v32   ;;  %v3369_v26 = vsel %vm3145_vm8, %v16652_v54, 0.0  ;;  %v13561_v32 = vpop.permute.xlu1 %5729  ;;  %v13568_v48 = vadd.f32 %v3373_v28, %v13379_v37  ;;  %v3370_v43 = vsel %vm3146_vm14, %v16652_v54, 0.0  ;;  %v16654_v38 = vld [vmem:[#allocation328_spill] sm:$0xff]  ;;  %vm16655_vm2 = vcmp.eq.s32.totalorder %v16631_v35, %v10829_v51  ;;  %6670 = vmatpush.msra.mxu3 %v13355_v33  ;;  %v16663_v0 = vld [vmem:[#allocation247_spill] sm:$0xff] }
 0xaed   : > { %v3371_v61 = vsel %vm16655_vm2, %v16654_v38, 0.0  ;;  %vm16656_vm9 = vcmp.eq.s32.totalorder %v16631_v35, %v10898_v6  ;;  %v13583_v20 = vadd.f32 %v3374_v60, %v2926_v15  ;;  %v16657_v37 = vld [vmem:[#allocation248_spill] sm:$0xff]  ;;  %v3376_v54 = vsel %vm3152_vm10, %v16658_v1, 0.0  ;;  %v16659_v35 = vld [vmem:[#allocation53_spill] sm:$0xff]  ;;  %6655 = vmatpush.msra.mxu2 %v13373_v49 }
 0xaee   : > { %v3372_v3 = vsel %vm16656_vm9, %v16654_v38, 0.0  ;;  %v3427_v28 = vadd.f32 %v3363_v56, %v16657_v37  ;;  %v3428_v38 = vadd.f32 %v3364_v55, %v16659_v35  ;;  %v16660_v15 = vld [vmem:[#allocation241_spill] sm:$0xff]  ;;  %v3430_v56 = vadd.f32 %v3366_v5, %v16661_v34  ;;  %6671 = vmatpush.msra.mxu3 %v13396_v14  ;;  %v16667_v14 = vld [vmem:[#allocation23_spill] sm:$0xff]  ;;  %v16673_v5 = vld [vmem:[#allocation122_spill] sm:$0xff] }
 0xaef   : > { %v3429_v60 = vadd.f32 %v3365_v31, %v16660_v15  ;;  %v3433_v37 = vadd.f32 %v3369_v26, %v13237_v45  ;;  %v2928_v47 = vsel %vm2704_vm1, %v16623_v8, 0.0  ;;  %v3434_v24 = vadd.f32 %v3370_v43, %v13253_v18  ;;  %v16662_v1 = vld [vmem:[#allocation245_spill] sm:$0xff]  ;;  %6656 = vmatpush.msra.mxu2 %v13412_v11  ;;  %v16671_v55 = vld [vmem:[#allocation103_spill] sm:$0xff] }
 0xaf0   : > { %v13606_v36 = vadd.f32 %v3371_v61, %v16662_v1  ;;  %v13609_v33 = vadd.f32 %v3372_v3, %v16663_v0  ;;  %v13614_v34 = vadd.f32 %v3375_v17, %v13362_v12  ;;  %v13616_v45 = vadd.f32 %v3376_v54, %v2928_v47  ;;  %v16665_v18 = vld [vmem:[#allocation97_spill] sm:$0xff]  ;;  %v16666_v3 = vld [vmem:[#allocation100_spill] sm:$0xff]  ;;  %v16669_v47 = vld [vmem:[#allocation102_spill] sm:$0xff]  ;;  %v13636_v12 = vpop.permute.xlu0 %5780  ;;  %6672 = vmatpush.msra.mxu3 %v13427_v41 }
 0xaf1   : > { %vm3581_vm3 = vcmp.eq.s32.totalorder %v16664_v46, %v10829_v51  ;;  %vm3582_vm4 = vcmp.eq.s32.totalorder %v16664_v46, %v10898_v6  ;;  %vm3587_vm12 = vcmp.eq.s32.totalorder %v16665_v18, %v10829_v51  ;;  %vm3588_vm0 = vcmp.eq.s32.totalorder %v16665_v18, %v10898_v6  ;;  %5932 = vperm.xlu2 %6778, %v16667_v14   ;;  %v16668_v8 = vld [vmem:[#allocation153_spill] sm:$0xff]  ;;  %v16675_v61 = vld [vmem:[#allocation344_spill] sm:$0xff]  ;;  %v16677_v0 = vld [vmem:[#allocation347_spill] sm:$0xff] }
 0xaf2   : > { %vm3583_vm5 = vcmp.eq.s32.totalorder %v16666_v3, %v10829_v51  ;;  %6017 = vperm.xlu1 %6777, %v16668_v8   ;;  %vm3584_vm14 = vcmp.eq.s32.totalorder %v16666_v3, %v10898_v6  ;;  %vm3585_vm8 = vcmp.eq.s32.totalorder %v16669_v47, %v10829_v51  ;;  %vm3586_vm13 = vcmp.eq.s32.totalorder %v16669_v47, %v10898_v6  ;;  %v16670_v49 = vld [vmem:[#allocation101_spill] sm:$0xff]  ;;  %v13654_v41 = vpop.permute.xlu2 %5756  ;;  %v16678_v18 = vld [vmem:[#allocation22_spill] sm:$0xff]  ;;  %v16679_v8 = vld [vmem:[#allocation348_spill] sm:$0xff] }
 0xaf3   : > { %vm3591_vm15 = vcmp.eq.s32.totalorder %v16670_v49, %v10829_v51  ;;  %vm3593_vm1 = vcmp.eq.s32.totalorder %v16671_v55, %v10829_v51  ;;  %vm3594_vm11 = vcmp.eq.s32.totalorder %v16671_v55, %v10898_v6  ;;  %v16672_v31 = vld [vmem:[#allocation105_spill] sm:$0xff]  ;;  %v3805_v26 = vsel %vm3581_vm3, %v16673_v5, 0.0  ;;  %16674 = vst [vmem:[#allocation93_spill] sm:$0xff] %v13654_v41  ;;  %6657 = vmatpush.msra.mxu2 %v13447_v59 }
 0xaf4   : > { %vm3589_vm6 = vcmp.eq.s32.totalorder %v16672_v31, %v10829_v51  ;;  %v13652_v11 = vpop.permute.xlu1 %5735  ;;  %vm3590_vm10 = vcmp.eq.s32.totalorder %v16672_v31, %v10898_v6  ;;  %v3806_v43 = vsel %vm3582_vm4, %v16673_v5, 0.0  ;;  %v3811_v17 = vsel %vm3587_vm12, %v16675_v61, 0.0  ;;  %v16676_v35 = vld [vmem:[#allocation345_spill] sm:$0xff]  ;;  %6673 = vmatpush.msra.mxu3 %v13484_v4 }
 0xaf5   : > { %v3812_v54 = vsel %vm3588_vm0, %v16675_v61, 0.0  ;;  %v3807_v15 = vsel %vm3583_vm5, %v16676_v35, 0.0  ;;  %v3808_v1 = vsel %vm3584_vm14, %v16676_v35, 0.0  ;;  %v3817_v46 = vsel %vm3593_vm1, %v16677_v0, 0.0  ;;  %6658 = vmatpush.msra.mxu2 %v13506_v62  ;;  %v16682_v31 = vld [vmem:[#allocation225_spill] sm:$0xff] }
 0xaf6   : > { %v3818_v14 = vsel %vm3594_vm11, %v16677_v0, 0.0  ;;  %vm3595_vm7 = vcmp.eq.s32.totalorder %v16678_v18, %v10829_v51  ;;  %vm3596_vm2 = vcmp.eq.s32.totalorder %v16678_v18, %v10898_v6  ;;  %v3869_v59 = vadd.f32 %v3805_v26, %v13513_v21  ;;  %6674 = vmatpush.msra.mxu3 %v13527_v50  ;;  %v16681_v50 = vld [vmem:[#allocation56_spill] sm:$0xff]  ;;  %v16686_v35 = vld [vmem:[#allocation405_spill] sm:$0xff] }
 0xaf7   : > { %v3813_v3 = vsel %vm3589_vm6, %v16679_v8, 0.0  ;;  %v3870_v55 = vadd.f32 %v3806_v43, %v13516_v2  ;;  %v13693_v5 = vadd.f32 %v3811_v17, %v3427_v28  ;;  %v13695_v4 = vadd.f32 %v3812_v54, %v3428_v38  ;;  %v16680_v38 = vld [vmem:[#allocation124_spill] sm:$0xff]  ;;  %v16685_v54 = vld [vmem:[#allocation351_spill] sm:$0xff]  ;;  %v16691_v18 = vld [vmem:[#allocation129_spill] sm:$0xff] }
 0xaf8   : > { %v3814_v61 = vsel %vm3590_vm10, %v16679_v8, 0.0  ;;  %vm3592_vm9 = vcmp.eq.s32.totalorder %v16670_v49, %v10898_v6  ;;  %v3871_v21 = vadd.f32 %v3807_v15, %v13530_v22  ;;  %v3872_v62 = vadd.f32 %v3808_v1, %v13533_v39  ;;  %v16683_v22 = vld [vmem:[#allocation349_spill] sm:$0xff]  ;;  %v16688_v0 = vld [vmem:[#allocation352_spill] sm:$0xff] }
 0xaf9   : > { %v13706_v26 = vadd.f32 %v3817_v46, %v3433_v37  ;;  %v13708_v2 = vadd.f32 %v3818_v14, %v3434_v24  ;;  %v13710_v28 = vadd.f32 %v3813_v3, %v3429_v60  ;;  %vm4029_vm3 = vcmp.eq.s32.totalorder %v16680_v38, %v10829_v51  ;;  %5937 = vperm.xlu2 %6778, %v16681_v50   ;;  %v16684_v37 = vld [vmem:[#allocation376_spill] sm:$0xff]  ;;  %v16689_v14 = vld [vmem:[#allocation409_spill] sm:$0xff] }
 0xafa   : > { %vm4030_vm4 = vcmp.eq.s32.totalorder %v16680_v38, %v10898_v6  ;;  %6022 = vperm.xlu1 %6777, %v16682_v31   ;;  %v13718_v43 = vadd.f32 %v3814_v61, %v3430_v56  ;;  %v3809_v39 = vsel %vm3585_vm8, %v16683_v22, 0.0  ;;  %v4253_v60 = vsel %vm4029_vm3, %v16684_v37, 0.0  ;;  %v13740_v1 = vpop.permute.xlu2 %5765  ;;  %v13752_v61 = vpop.permute.xlu0 %5783  ;;  %v16690_v31 = vld [vmem:[#allocation180_spill] sm:$0xff] }
 0xafb   : > { %v4254_v24 = vsel %vm4030_vm4, %v16684_v37, 0.0  ;;  %v3810_v17 = vsel %vm3586_vm13, %v16683_v22, 0.0  ;;  %v3819_v56 = vsel %vm3595_vm7, %v16685_v54, 0.0  ;;  %vm4477_vm12 = vcmp.eq.s32.totalorder %v16686_v35, %v10829_v51  ;;  %16687 = vst [vmem:[#allocation95_spill] sm:$0xff] %v13740_v1  ;;  %v16692_v22 = vld [vmem:[#allocation434_spill] sm:$0xff] }
 0xafc   : > { %vm4478_vm0 = vcmp.eq.s32.totalorder %v16686_v35, %v10898_v6  ;;  %v13738_v15 = vpop.permute.xlu1 %5744  ;;  %v3820_v47 = vsel %vm3596_vm2, %v16685_v54, 0.0  ;;  %v3815_v46 = vsel %vm3591_vm15, %v16688_v0, 0.0  ;;  %v4701_v8 = vsel %vm4477_vm12, %v16689_v14, 0.0  ;;  %v16693_v35 = vld [vmem:[#allocation370_spill] sm:$0xff] }
 0xafd   : > { %v4702_v3 = vsel %vm4478_vm0, %v16689_v14, 0.0  ;;  %v4317_v38 = vadd.f32 %v4253_v60, %v3869_v59  ;;  %v4318_v50 = vadd.f32 %v4254_v24, %v3870_v55  ;;  %vm4925_vm5 = vcmp.eq.s32.totalorder %v16690_v31, %v10829_v51  ;;  %v16694_v24 = vld [vmem:[#allocation104_spill] sm:$0xff] }
 0xafe   : > { %vm4926_vm14 = vcmp.eq.s32.totalorder %v16690_v31, %v10898_v6  ;;  %vm4031_vm8 = vcmp.eq.s32.totalorder %v16691_v18, %v10829_v51  ;;  %vm4032_vm13 = vcmp.eq.s32.totalorder %v16691_v18, %v10898_v6  ;;  %v5149_v37 = vsel %vm4925_vm5, %v16692_v22, 0.0 }
 0xaff   : > { %v5150_v54 = vsel %vm4926_vm14, %v16692_v22, 0.0  ;;  %v4255_v14 = vsel %vm4031_vm8, %v16693_v35, 0.0  ;;  %v4256_v59 = vsel %vm4032_vm13, %v16693_v35, 0.0  ;;  %v4765_v55 = vadd.f32 %v4701_v8, %v4317_v38 }
 0xb00   : > { %v4766_v60 = vadd.f32 %v4702_v3, %v4318_v50  ;;  %vm3597_vm15 = vcmp.eq.s32.totalorder %v16694_v24, %v10829_v51  ;;  %v3873_v31 = vadd.f32 %v3809_v39, %v13492_v44  ;;  %v3874_v1 = vadd.f32 %v3810_v17, %v13495_v23  ;;  %v16695_v44 = vld [vmem:[#allocation40_spill] sm:$0xff]  ;;  %v16696_v23 = vld [vmem:[#allocation235_spill] sm:$0xff] }
 0xb01   : > { %v13771_v41 = vadd.f32 %v3819_v56, %v13606_v36  ;;  %v13774_v18 = vadd.f32 %v3820_v47, %v13609_v33  ;;  %v13780_v22 = vsel %vm3592_vm9, %v16688_v0, 0.0  ;;  %v13783_v8 = vadd.f32 %v3815_v46, %v13498_v19  ;;  %5942 = vperm.xlu2 %6778, %v16695_v44   ;;  %v16697_v33 = vld [vmem:[#allocation30_spill] sm:$0xff]  ;;  %v16699_v50 = vld [vmem:[#allocation431_spill] sm:$0xff] }
 0xb02   : > { %v5213_v3 = vadd.f32 %v5149_v37, %v4765_v55  ;;  %v5214_v38 = vadd.f32 %v5150_v54, %v4766_v60  ;;  %6027 = vperm.xlu1 %6777, %v16696_v23   ;;  %v4319_v36 = vadd.f32 %v4255_v14, %v3871_v21  ;;  %v4320_v39 = vadd.f32 %v4256_v59, %v3872_v62  ;;  %v5888_v21 = vpop.permute.xlu2 %5887  ;;  %v16698_v62 = vld [vmem:[#allocation419_spill] sm:$0xff]  ;;  %v16700_v37 = vld [vmem:[#allocation128_spill] sm:$0xff]  ;;  %v13813_v59 = vpop.permute.xlu0 %5786 }
 0xb03   : > { %vm4479_vm1 = vcmp.eq.s32.totalorder %v16697_v33, %v10829_v51  ;;  %vm4480_vm11 = vcmp.eq.s32.totalorder %v16697_v33, %v10898_v6  ;;  %vm5821_vm6 = vcmp.eq.s32.totalorder %v12939_v10, %v10829_v51  ;;  %vm5822_vm10 = vcmp.eq.s32.totalorder %v12939_v10, %v10898_v6  ;;  %v16701_v10 = vld [vmem:[#allocation131_spill] sm:$0xff]  ;;  %v16704_v23 = vld [vmem:[#allocation16_spill] sm:$0xff]  ;;  %v16705_v33 = vld [vmem:[#allocation157_spill] sm:$0xff] }
 0xb04   : > { %v5661_v49 = vadd.f32 %v12580_v58, %v5213_v3  ;;  %v5662_v17 = vadd.f32 %v12582_v25, %v5214_v38  ;;  %v13797_v19 = vpop.permute.xlu1 %5753  ;;  %v4703_v56 = vsel %vm4479_vm1, %v16698_v62, 0.0  ;;  %v4704_v47 = vsel %vm4480_vm11, %v16698_v62, 0.0  ;;  %v16702_v54 = vld [vmem:[#allocation203_spill] sm:$0xff]  ;;  %v16708_v62 = vld [vmem:[#allocation232_spill] sm:$0xff] }
 0xb05   : > { %v6045_v0 = vsel %vm5821_vm6, %v5888_v21, 0.0  ;;  %v6046_v46 = vsel %vm5822_vm10, %v5888_v21, 0.0  ;;  %vm4927_vm7 = vcmp.eq.s32.totalorder %v16699_v50, %v10829_v51  ;;  %vm4928_vm2 = vcmp.eq.s32.totalorder %v16699_v50, %v10898_v6  ;;  %v16703_v55 = vld [vmem:[#allocation371_spill] sm:$0xff]  ;;  %v16707_v21 = vld [vmem:[#allocation42_spill] sm:$0xff] }
 0xb06   : > { %v6109_v58 = vadd.f32 %v6045_v0, %v5661_v49  ;;  %v6110_v25 = vadd.f32 %v6046_v46, %v5662_v17  ;;  %vm4037_vm9 = vcmp.eq.s32.totalorder %v16700_v37, %v10829_v51  ;;  %vm4033_vm3 = vcmp.eq.s32.totalorder %v16701_v10, %v10829_v51  ;;  %v16706_v49 = vld [vmem:[#allocation355_spill] sm:$0xff]  ;;  %v16709_v0 = vld [vmem:[#allocation414_spill] sm:$0xff] }
 0xb07   : > { %vm4034_vm4 = vcmp.eq.s32.totalorder %v16701_v10, %v10898_v6  ;;  %v5151_v35 = vsel %vm4927_vm7, %v16702_v54, 0.0  ;;  %v5152_v14 = vsel %vm4928_vm2, %v16702_v54, 0.0  ;;  %v4257_v60 = vsel %vm4033_vm3, %v16703_v55, 0.0  ;;  %v16711_v10 = vld [vmem:[#allocation295_spill] sm:$0xff] }
 0xb08   : > { %v4258_v3 = vsel %vm4034_vm4, %v16703_v55, 0.0  ;;  %v4767_v38 = vadd.f32 %v4703_v56, %v4319_v36  ;;  %v4768_v44 = vadd.f32 %v4704_v47, %v4320_v39  ;;  %6253 = vmatmul.f32.vlgmr.msra.gmra.mxu0 %v6109_v58  ;;  %6366 = vmatmul.f32.vlgmr.msra.gmra.mxu1 %v6110_v25  ;;  %vm4038_vm12 = vcmp.eq.s32.totalorder %v16700_v37, %v10898_v6  ;;  %v16710_v58 = vld [vmem:[#allocation293_spill] sm:$0xff] }
 0xb09   : > { %vm4035_vm0 = vcmp.eq.s32.totalorder %v16704_v23, %v10829_v51  ;;  %vm4036_vm5 = vcmp.eq.s32.totalorder %v16704_v23, %v10898_v6  ;;  %vm4481_vm14 = vcmp.eq.s32.totalorder %v16705_v33, %v10829_v51  ;;  %v3821_v36 = vsel %vm3597_vm15, %v16706_v49, 0.0  ;;  %5947 = vperm.xlu2 %6778, %v16707_v21  }
 0xb0a   : > { %vm4482_vm8 = vcmp.eq.s32.totalorder %v16705_v33, %v10898_v6  ;;  %v5215_v39 = vadd.f32 %v5151_v35, %v4767_v38  ;;  %v5216_v17 = vadd.f32 %v5152_v14, %v4768_v44  ;;  %6032 = vperm.xlu1 %6777, %v16708_v62   ;;  %v4321_v56 = vadd.f32 %v4257_v60, %v3873_v31  ;;  %v5893_v14 = vpop.permute.xlu2 %5892  ;;  %v16712_v31 = vld [vmem:[#allocation13_spill] sm:$0xff]  ;;  %v16713_v60 = vld [vmem:[#allocation442_spill] sm:$0xff] }
 0xb0b   : > { %v4322_v47 = vadd.f32 %v4258_v3, %v3874_v1  ;;  %v4705_v46 = vsel %vm4481_vm14, %v16709_v0, 0.0  ;;  %v4706_v50 = vsel %vm4482_vm8, %v16709_v0, 0.0  ;;  %vm5823_vm13 = vcmp.eq.s32.totalorder %v13561_v32, %v10829_v51  ;;  %v16715_v0 = vld [vmem:[#allocation269_spill] sm:$0xff] }
 0xb0c   : > { %v5663_v25 = vadd.f32 %v16710_v58, %v5215_v39  ;;  %v5664_v54 = vadd.f32 %v16711_v10, %v5216_v17  ;;  %vm5824_vm15 = vcmp.eq.s32.totalorder %v13561_v32, %v10898_v6  ;;  %v13841_v35 = vpop.permute.xlu1 %5762  ;;  %vm4929_vm1 = vcmp.eq.s32.totalorder %v16712_v31, %v10829_v51  ;;  %v16714_v39 = vld [vmem:[#allocation380_spill] sm:$0xff]  ;;  %v16716_v10 = vld [vmem:[#allocation373_spill] sm:$0xff] }
 0xb0d   : > { %vm4930_vm11 = vcmp.eq.s32.totalorder %v16712_v31, %v10898_v6  ;;  %v6047_v1 = vsel %vm5823_vm13, %v5893_v14, 0.0  ;;  %v6048_v55 = vsel %vm5824_vm15, %v5893_v14, 0.0  ;;  %v5153_v3 = vsel %vm4929_vm1, %v16713_v60, 0.0  ;;  %v16720_v31 = vld [vmem:[#allocation224_spill] sm:$0xff] }
 0xb0e   : > { %v5154_v38 = vsel %vm4930_vm11, %v16713_v60, 0.0  ;;  %v6111_v44 = vadd.f32 %v6047_v1, %v5663_v25  ;;  %v6112_v33 = vadd.f32 %v6048_v55, %v5664_v54  ;;  %v4259_v32 = vsel %vm4035_vm0, %v16714_v39, 0.0  ;;  %v16721_v1 = vld [vmem:[#allocation229_spill] sm:$0xff]  ;;  %v16722_v55 = vld [vmem:[#allocation183_spill] sm:$0xff] }
 0xb0f   : > { %v4260_v17 = vsel %vm4036_vm5, %v16714_v39, 0.0  ;;  %v4769_v21 = vadd.f32 %v4705_v46, %v4321_v56  ;;  %v4770_v62 = vadd.f32 %v4706_v50, %v4322_v47  ;;  %vm2709_vm6 = vcmp.eq.s32.totalorder %v16715_v0, %v10829_v51  ;;  %v16717_v56 = vld [vmem:[#allocation20_spill] sm:$0xff]  ;;  %v16723_v60 = vld [vmem:[#allocation287_spill] sm:$0xff] }
 0xb10   : > { %v13861_v58 = vadd.f32 %v13780_v22, %v13510_v40  ;;  %v13864_v25 = vadd.f32 %v3821_v36, %v13568_v48  ;;  %v4261_v54 = vsel %vm4037_vm9, %v16716_v10, 0.0  ;;  %v4262_v23 = vsel %vm4038_vm12, %v16716_v10, 0.0  ;;  %6256 = vmatmul.f32.gmra.mxu0 %v6111_v44  ;;  %6369 = vmatmul.f32.gmra.mxu1 %v6112_v33  ;;  %v16718_v40 = vld [vmem:[#allocation36_spill] sm:$0xff]  ;;  %v13882_v36 = vpop.permute.xlu0 %5789 }
 0xb11   : > { %vm4039_vm10 = vcmp.eq.s32.totalorder %v16717_v56, %v10829_v51  ;;  %vm4040_vm7 = vcmp.eq.s32.totalorder %v16717_v56, %v10898_v6  ;;  %vm4483_vm2 = vcmp.eq.s32.totalorder %v16718_v40, %v10829_v51  ;;  %vm4484_vm3 = vcmp.eq.s32.totalorder %v16718_v40, %v10898_v6  ;;  %v16719_v46 = vld [vmem:[#allocation412_spill] sm:$0xff]  ;;  %5952 = vperm.xlu2 %6778, %v16720_v31  }
 0xb12   : > { %v5217_v48 = vadd.f32 %v5153_v3, %v4769_v21  ;;  %v5218_v22 = vadd.f32 %v5154_v38, %v4770_v62  ;;  %v4323_v37 = vadd.f32 %v4259_v32, %v13693_v5  ;;  %v4324_v47 = vadd.f32 %v4260_v17, %v13695_v4  ;;  %6037 = vperm.xlu1 %6777, %v16721_v1   ;;  %v16724_v38 = vld [vmem:[#allocation281_spill] sm:$0xff]  ;;  %v5898_v4 = vpop.permute.xlu2 %5897 }
 0xb13   : > { %v4707_v50 = vsel %vm4483_vm2, %v16719_v46, 0.0  ;;  %v4708_v14 = vsel %vm4484_vm3, %v16719_v46, 0.0  ;;  %vm4931_vm9 = vcmp.eq.s32.totalorder %v16722_v55, %v10829_v51  ;;  %vm4932_vm4 = vcmp.eq.s32.totalorder %v16722_v55, %v10898_v6  ;;  %v16725_v21 = vld [vmem:[#allocation437_spill] sm:$0xff] }
 0xb14   : > { %v5665_v3 = vadd.f32 %v16723_v60, %v5217_v48  ;;  %v5666_v5 = vadd.f32 %v16724_v38, %v5218_v22  ;;  %vm5825_vm12 = vcmp.eq.s32.totalorder %v13281_v27, %v10829_v51  ;;  %vm5826_vm0 = vcmp.eq.s32.totalorder %v13281_v27, %v10898_v6  ;;  %v5968_v44 = vpop.permute.xlu1 %5967  ;;  %v16726_v27 = vld [vmem:[#allocation274_spill] sm:$0xff]  ;;  %v16727_v60 = vld [vmem:[#allocation159_spill] sm:$0xff] }
 0xb15   : > { %vm5853_vm5 = vcmp.eq.s32.totalorder %v13323_v52, %v10829_v51  ;;  %vm5854_vm14 = vcmp.eq.s32.totalorder %v13323_v52, %v10898_v6  ;;  %v6049_v33 = vsel %vm5825_vm12, %v5898_v4, 0.0  ;;  %v6050_v39 = vsel %vm5826_vm0, %v5898_v4, 0.0  ;;  %v6873_v38 = vld [vmem:[%s7053_s27 + $0x70] sm:$0xff]  ;;  %v16732_v4 = vld [vmem:[#allocation189_spill] sm:$0xff] }
 0xb16   : > { %v6077_v32 = vsel %vm5853_vm5, %v5968_v44, 0.0  ;;  %v6078_v17 = vsel %vm5854_vm14, %v5968_v44, 0.0  ;;  %v5155_v62 = vsel %vm4931_vm9, %v16725_v21, 0.0  ;;  %v5156_v10 = vsel %vm4932_vm4, %v16725_v21, 0.0 }
 0xb17   : > { %v6113_v40 = vadd.f32 %v6049_v33, %v5665_v3  ;;  %v6141_v48 = vadd.f32 %v6077_v32, %v12791_v9  ;;  %vm2707_vm8 = vcmp.eq.s32.totalorder %v16726_v27, %v10829_v51  ;;  %v4771_v22 = vadd.f32 %v4707_v50, %v4323_v37  ;;  %v16728_v9 = vld [vmem:[#allocation303_spill] sm:$0xff]  ;;  %v16731_v50 = vld [vmem:[#allocation422_spill] sm:$0xff] }
 0xb18   : > { %v4772_v46 = vadd.f32 %v4708_v14, %v4324_v47  ;;  %v6114_v31 = vadd.f32 %v6050_v39, %v5666_v5  ;;  %v6142_v52 = vadd.f32 %v6078_v17, %v12793_v16  ;;  %vm3598_vm13 = vcmp.eq.s32.totalorder %v16694_v24, %v10898_v6  ;;  %v16729_v16 = vld [vmem:[#allocation130_spill] sm:$0xff]  ;;  %v6874_v5 = vld [vmem:[%s7053_s27 + $0xf8] sm:$0xff]  ;;  %v13946_v56 = vpop.permute.xlu0 %5792  ;;  %s163_s27 = sand.u32 1, %s6937_s10  }
 0xb19   : > { %v4325_v1 = vadd.f32 %v4261_v54, %v13710_v28  ;;  %v4326_v55 = vadd.f32 %v4262_v23, %v13718_v43  ;;  %vm4485_vm15 = vcmp.eq.s32.totalorder %v16727_v60, %v10829_v51  ;;  %6259 = vmatmul.f32.gmra.mxu0 %v6113_v40  ;;  %6301 = vmatmul.f32.vlgmr.msra.gmra.mxu2 %v6141_v48  ;;  %v13920_v37 = vsel %vm2709_vm6, %v16728_v9, 0.0  ;;  %v16730_v54 = vld [vmem:[#allocation374_spill] sm:$0xff]  ;;  %s6634_s16 = sshll.u32 %s163_s27, 8  ;;  %s6528_s12 = scalar_lea.sflag [#allocation3], %s163_s27 }
 0xb1a   : > { %vm4041_vm1 = vcmp.eq.s32.totalorder %v16729_v16, %v10829_v51  ;;  %vm4042_vm11 = vcmp.eq.s32.totalorder %v16729_v16, %v10898_v6  ;;  %vm4486_vm2 = vcmp.eq.s32.totalorder %v16727_v60, %v10898_v6  ;;  %v5219_v28 = vadd.f32 %v5155_v62, %v4771_v22  ;;  %6372 = vmatmul.f32.gmra.mxu1 %v6114_v31  ;;  %v5903_v39 = vpop.permute.xlu2 %5902  ;;  %v16733_v62 = vld [vmem:[#allocation432_spill] sm:$0xff]  ;;  %v16735_v60 = vld [vmem:[#allocation305_spill] sm:$0xff]  ;;  %s14416_s18 = scalar_lea.vmem [#allocation2], %s6634_s16 }
 0xb1b   : > { %v5220_v43 = vadd.f32 %v5156_v10, %v4772_v46  ;;  %6414 = vmatmul.f32.vlgmr.msra.gmra.mxu3 %v6142_v52  ;;  %v4263_v23 = vsel %vm4039_vm10, %v16730_v54, 0.0  ;;  %v4264_v47 = vsel %vm4040_vm7, %v16730_v54, 0.0  ;;  %v4709_v14 = vsel %vm4485_vm15, %v16731_v50, 0.0  ;;  %5768 = vperm.xlu2 %6778, %v6873_v38   ;;  %v16742_v38 = vld [vmem:[#allocation304_spill] sm:$0xff]  ;;  %s6540_s26 = sshll.u32 %s14416_s18, 4  ;;  %s6541_s26 = int_to_ptr.vmem [resolvable:$true] %s6540_s26 }
 0xb1c   : > { %v4710_v3 = vsel %vm4486_vm2, %v16731_v50, 0.0  ;;  %5819 = vperm.xlu1 %6777, %v6874_v5   ;;  %vm4933_vm6 = vcmp.eq.s32.totalorder %v16732_v4, %v10829_v51  ;;  %vm4934_vm3 = vcmp.eq.s32.totalorder %v16732_v4, %v10898_v6  ;;  %v5667_v44 = vadd.f32 %v12645_v63, %v5219_v28  ;;  %v5973_v32 = vpop.permute.xlu1 %5972  ;;  %v16739_v50 = vld [vmem:[#allocation50_spill] sm:$0xff] }
 0xb1d   : > { %v5668_v33 = vadd.f32 %v12647_v13, %v5220_v43  ;;  %vm5855_vm10 = vcmp.eq.s32.totalorder %v13500_v29, %v10829_v51  ;;  %vm5856_vm7 = vcmp.eq.s32.totalorder %v13500_v29, %v10898_v6  ;;  %vm5827_vm9 = vcmp.eq.s32.totalorder %v13652_v11, %v10829_v51  ;;  %v16734_v29 = vld [vmem:[#allocation134_spill] sm:$0xff] }
 0xb1e   : > { %vm5828_vm4 = vcmp.eq.s32.totalorder %v13652_v11, %v10898_v6  ;;  %v6051_v17 = vsel %vm5827_vm9, %v5903_v39, 0.0  ;;  %v6079_v21 = vsel %vm5855_vm10, %v5973_v32, 0.0  ;;  %v6080_v13 = vsel %vm5856_vm7, %v5973_v32, 0.0  ;;  %v16743_v4 = vld [vmem:[#allocation306_spill] sm:$0xff] }
 0xb1f   : > { %v6052_v63 = vsel %vm5828_vm4, %v5903_v39, 0.0  ;;  %v5157_v10 = vsel %vm4933_vm6, %v16733_v62, 0.0  ;;  %v5158_v40 = vsel %vm4934_vm3, %v16733_v62, 0.0  ;;  %v6115_v48 = vadd.f32 %v6051_v17, %v5667_v44 }
 0xb20   : > { %v6143_v22 = vadd.f32 %v6079_v21, %v12610_v42  ;;  %vm4043_vm12 = vcmp.eq.s32.totalorder %v16734_v29, %v10829_v51  ;;  %v4773_v46 = vadd.f32 %v4709_v14, %v4325_v1  ;;  %v4774_v31 = vadd.f32 %v4710_v3, %v4326_v55  ;;  %v16736_v42 = vld [vmem:[#allocation156_spill] sm:$0xff]  ;;  %v14004_v39 = vpop.permute.xlu0 %5795 }
 0xb21   : > { %v6116_v52 = vadd.f32 %v6052_v63, %v5668_v33  ;;  %v6144_v11 = vadd.f32 %v6080_v13, %v12612_v53  ;;  %v13966_v28 = vsel %vm2707_vm8, %v16735_v60, 0.0  ;;  %v4327_v43 = vadd.f32 %v4263_v23, %v13783_v8  ;;  %6262 = vmatmul.f32.gmra.mxu0 %v6115_v48  ;;  %v16737_v8 = vld [vmem:[#allocation384_spill] sm:$0xff]  ;;  %v16744_v13 = vld [vmem:[#allocation445_spill] sm:$0xff] }
 0xb22   : > { %v4328_v54 = vadd.f32 %v4264_v47, %v13861_v58  ;;  %vm4487_vm0 = vcmp.eq.s32.totalorder %v16736_v42, %v10829_v51  ;;  %6304 = vmatmul.f32.gmra.mxu2 %v6143_v22  ;;  %v3822_v53 = vsel %vm3598_vm13, %v16706_v49, 0.0  ;;  %vm4488_vm5 = vcmp.eq.s32.totalorder %v16736_v42, %v10898_v6  ;;  %v16738_v47 = vld [vmem:[#allocation417_spill] sm:$0xff]  ;;  %v16740_v14 = vld [vmem:[#allocation236_spill] sm:$0xff]  ;;  %v5908_v16 = vpop.permute.xlu2 %5907 }
 0xb23   : > { %v5221_v1 = vadd.f32 %v5157_v10, %v4773_v46  ;;  %v5222_v55 = vadd.f32 %v5158_v40, %v4774_v31  ;;  %6375 = vmatmul.f32.gmra.mxu1 %v6116_v52  ;;  %6417 = vmatmul.f32.gmra.mxu3 %v6144_v11  ;;  %v4265_v58 = vsel %vm4041_vm1, %v16737_v8, 0.0  ;;  %v4266_v23 = vsel %vm4042_vm11, %v16737_v8, 0.0  ;;  %v16741_v3 = vld [vmem:[#allocation32_spill] sm:$0xff]  ;;  %v16746_v11 = vld [vmem:[#allocation377_spill] sm:$0xff] }
 0xb24   : > { %v4711_v24 = vsel %vm4487_vm0, %v16738_v47, 0.0  ;;  %v4712_v49 = vsel %vm4488_vm5, %v16738_v47, 0.0  ;;  %5962 = vperm.xlu1 %6777, %v16739_v50   ;;  %6042 = vperm.xlu2 %6778, %v16740_v14   ;;  %vm4935_vm14 = vcmp.eq.s32.totalorder %v16741_v3, %v10829_v51  ;;  %vm4936_vm8 = vcmp.eq.s32.totalorder %v16741_v3, %v10898_v6  ;;  %v5978_v33 = vpop.permute.xlu1 %5977  ;;  %v16745_v31 = vld [vmem:[#allocation72_spill] sm:$0xff]  ;;  %v16750_v47 = vld [vmem:[#allocation182_spill] sm:$0xff]  ;;  %v16752_v50 = vld [vmem:[#allocation51_spill] sm:$0xff] }
 0xb25   : > { %v5669_v5 = vadd.f32 %v16742_v38, %v5221_v1  ;;  %v5670_v44 = vadd.f32 %v16743_v4, %v5222_v55  ;;  %vm5829_vm13 = vcmp.eq.s32.totalorder %v13406_v7, %v10829_v51  ;;  %vm5830_vm15 = vcmp.eq.s32.totalorder %v13406_v7, %v10898_v6  ;;  %v16749_v1 = vld [vmem:[#allocation415_spill] sm:$0xff]  ;;  %v16753_v3 = vld [vmem:[#allocation336_spill] sm:$0xff] }
 0xb26   : > { %vm5857_vm1 = vcmp.eq.s32.totalorder %v13636_v12, %v10829_v51  ;;  %vm5858_vm11 = vcmp.eq.s32.totalorder %v13636_v12, %v10898_v6  ;;  %v6053_v32 = vsel %vm5829_vm13, %v5908_v16, 0.0  ;;  %v6054_v17 = vsel %vm5830_vm15, %v5908_v16, 0.0  ;;  %v16754_v4 = vld [vmem:[#allocation440_spill] sm:$0xff] }
 0xb27   : > { %v6081_v63 = vsel %vm5857_vm1, %v5978_v33, 0.0  ;;  %v6082_v21 = vsel %vm5858_vm11, %v5978_v33, 0.0  ;;  %v5159_v62 = vsel %vm4935_vm14, %v16744_v13, 0.0  ;;  %v5160_v10 = vsel %vm4936_vm8, %v16744_v13, 0.0 }
 0xb28   : > { %v6117_v40 = vadd.f32 %v6053_v32, %v5669_v5  ;;  %v6145_v7 = vadd.f32 %v6081_v63, %v12992_v57  ;;  %vm2708_vm2 = vcmp.eq.s32.totalorder %v16726_v27, %v10898_v6  ;;  %v4775_v48 = vadd.f32 %v4711_v24, %v4327_v43  ;;  %v16747_v43 = vld [vmem:[#allocation160_spill] sm:$0xff]  ;;  %v16751_v24 = vld [vmem:[#allocation290_spill] sm:$0xff] }
 0xb29   : > { %v4776_v12 = vadd.f32 %v4712_v49, %v4328_v54  ;;  %v6118_v22 = vadd.f32 %v6054_v17, %v5670_v44  ;;  %v6146_v46 = vadd.f32 %v6082_v21, %v12994_v30  ;;  %vm3155_vm6 = vcmp.eq.s32.totalorder %v16745_v31, %v10829_v51  ;;  %v16748_v30 = vld [vmem:[#allocation140_spill] sm:$0xff]  ;;  %v16756_v63 = vld [vmem:[#allocation106_spill] sm:$0xff] }
 0xb2a   : > { %v14015_v52 = vadd.f32 %v3822_v53, %v13583_v20  ;;  %vm4044_vm3 = vcmp.eq.s32.totalorder %v16734_v29, %v10898_v6  ;;  %v4267_v57 = vsel %vm4043_vm12, %v16746_v11, 0.0  ;;  %vm4489_vm10 = vcmp.eq.s32.totalorder %v16747_v43, %v10829_v51  ;;  %6265 = vmatmul.f32.gmra.mxu0 %v6117_v40  ;;  %6307 = vmatmul.f32.gmra.mxu2 %v6145_v7  ;;  %v16755_v32 = vld [vmem:[#allocation84_spill] sm:$0xff] }
 0xb2b   : > { %vm4045_vm7 = vcmp.eq.s32.totalorder %v16748_v30, %v10829_v51  ;;  %vm4046_vm9 = vcmp.eq.s32.totalorder %v16748_v30, %v10898_v6  ;;  %v4268_v20 = vsel %vm4044_vm3, %v16746_v11, 0.0  ;;  %vm4490_vm4 = vcmp.eq.s32.totalorder %v16747_v43, %v10898_v6  ;;  %6378 = vmatmul.f32.gmra.mxu1 %v6118_v22  ;;  %6420 = vmatmul.f32.gmra.mxu3 %v6146_v46  ;;  %v16758_v22 = vld [vmem:[#allocation162_spill] sm:$0xff]  ;;  %v16760_v27 = vld [vmem:[#allocation132_spill] sm:$0xff] }
 0xb2c   : > { %v5223_v54 = vadd.f32 %v5159_v62, %v4775_v48  ;;  %v5224_v42 = vadd.f32 %v5160_v10, %v4776_v12  ;;  %v4329_v29 = vadd.f32 %v4265_v58, %v13706_v26  ;;  %v4330_v53 = vadd.f32 %v4266_v23, %v13708_v2  ;;  %v5913_v26 = vpop.permute.xlu2 %5912  ;;  %v5983_v2 = vpop.permute.xlu1 %5982  ;;  %v16757_v10 = vld [vmem:[#allocation39_spill] sm:$0xff]  ;;  %v16759_v46 = vld [vmem:[#allocation326_spill] sm:$0xff] }
 0xb2d   : > { %v4713_v55 = vsel %vm4489_vm10, %v16749_v1, 0.0  ;;  %v4714_v8 = vsel %vm4490_vm4, %v16749_v1, 0.0  ;;  %vm4937_vm12 = vcmp.eq.s32.totalorder %v16750_v47, %v10829_v51  ;;  %vm4938_vm0 = vcmp.eq.s32.totalorder %v16750_v47, %v10898_v6  ;;  %v14055_v62 = vpop.permute.xlu0 %5798 }
 0xb2e   : > { %v5671_v49 = vadd.f32 %v16751_v24, %v5223_v54  ;;  %v5672_v14 = vadd.f32 %v16752_v50, %v5224_v42  ;;  %vm5831_vm5 = vcmp.eq.s32.totalorder %v16753_v3, %v10829_v51  ;;  %vm5832_vm14 = vcmp.eq.s32.totalorder %v16753_v3, %v10898_v6  ;;  %v16766_v3 = vld [vmem:[#allocation435_spill] sm:$0xff] }
 0xb2f   : > { %vm5859_vm8 = vcmp.eq.s32.totalorder %v13752_v61, %v10829_v51  ;;  %vm5860_vm13 = vcmp.eq.s32.totalorder %v13752_v61, %v10898_v6  ;;  %v6055_v58 = vsel %vm5831_vm5, %v5913_v26, 0.0  ;;  %v6056_v23 = vsel %vm5832_vm14, %v5913_v26, 0.0 }
 0xb30   : > { %v6083_v38 = vsel %vm5859_vm8, %v5983_v2, 0.0  ;;  %v6084_v5 = vsel %vm5860_vm13, %v5983_v2, 0.0  ;;  %v5161_v44 = vsel %vm4937_vm12, %v16754_v4, 0.0  ;;  %v5162_v16 = vsel %vm4938_vm0, %v16754_v4, 0.0 }
 0xb31   : > { %v6119_v33 = vadd.f32 %v6055_v58, %v5671_v49  ;;  %v6147_v17 = vadd.f32 %v6083_v38, %v16755_v32  ;;  %vm3599_vm15 = vcmp.eq.s32.totalorder %v16756_v63, %v10829_v51  ;;  %v4777_v21 = vadd.f32 %v4713_v55, %v4329_v29  ;;  %v16763_v29 = vld [vmem:[#allocation44_spill] sm:$0xff]  ;;  %v16765_v55 = vld [vmem:[#allocation314_spill] sm:$0xff] }
 0xb32   : > { %v4778_v13 = vadd.f32 %v4714_v8, %v4330_v53  ;;  %v6120_v61 = vadd.f32 %v6056_v23, %v5672_v14  ;;  %v6148_v40 = vadd.f32 %v6084_v5, %v16757_v10  ;;  %v14062_v7 = vsel %vm2708_vm2, %v16735_v60, 0.0  ;;  %v16761_v60 = vld [vmem:[#allocation378_spill] sm:$0xff]  ;;  %v16767_v23 = vld [vmem:[#allocation313_spill] sm:$0xff] }
 0xb33   : > { %vm3600_vm1 = vcmp.eq.s32.totalorder %v16756_v63, %v10898_v6  ;;  %v4331_v48 = vadd.f32 %v4267_v57, %v13771_v41  ;;  %v4332_v12 = vadd.f32 %v4268_v20, %v13774_v18  ;;  %vm4491_vm11 = vcmp.eq.s32.totalorder %v16758_v22, %v10829_v51  ;;  %6268 = vmatmul.f32.gmra.mxu0 %v6119_v33  ;;  %v16762_v20 = vld [vmem:[#allocation425_spill] sm:$0xff]  ;;  %v16764_v53 = vld [vmem:[#allocation58_spill] sm:$0xff] }
 0xb34   : > { %6310 = vmatmul.f32.gmra.mxu2 %v6147_v17  ;;  %v14074_v11 = vsel %vm3155_vm6, %v16759_v46, 0.0  ;;  %vm4047_vm2 = vcmp.eq.s32.totalorder %v16760_v27, %v10829_v51  ;;  %vm4048_vm3 = vcmp.eq.s32.totalorder %v16760_v27, %v10898_v6  ;;  %vm4492_vm10 = vcmp.eq.s32.totalorder %v16758_v22, %v10898_v6  ;;  %6381 = vmatmul.f32.gmra.mxu1 %v6120_v61  ;;  %v5918_v30 = vpop.permute.xlu2 %5917  ;;  %v5988_v47 = vpop.permute.xlu1 %5987  ;;  %v16770_v33 = vld [vmem:[#allocation350_spill] sm:$0xff] }
 0xb35   : > { %v5225_v41 = vadd.f32 %v5161_v44, %v4777_v21  ;;  %v5226_v18 = vadd.f32 %v5162_v16, %v4778_v13  ;;  %6423 = vmatmul.f32.gmra.mxu3 %v6148_v40  ;;  %v4269_v57 = vsel %vm4045_vm7, %v16761_v60, 0.0  ;;  %v4270_v43 = vsel %vm4046_vm9, %v16761_v60, 0.0  ;;  %v16769_v16 = vld [vmem:[#allocation77_spill] sm:$0xff]  ;;  %v16771_v13 = vld [vmem:[#allocation158_spill] sm:$0xff] }
 0xb36   : > { %v4715_v54 = vsel %vm4491_vm11, %v16762_v20, 0.0  ;;  %v4716_v42 = vsel %vm4492_vm10, %v16762_v20, 0.0  ;;  %vm4939_vm6 = vcmp.eq.s32.totalorder %v16763_v29, %v10829_v51  ;;  %vm4940_vm4 = vcmp.eq.s32.totalorder %v16763_v29, %v10898_v6  ;;  %v16775_v60 = vld [vmem:[#allocation310_spill] sm:$0xff] }
 0xb37   : > { %v5673_v1 = vadd.f32 %v16764_v53, %v5225_v41  ;;  %v5674_v8 = vadd.f32 %v16765_v55, %v5226_v18  ;;  %vm5833_vm7 = vcmp.eq.s32.totalorder %v13738_v15, %v10829_v51  ;;  %vm5834_vm9 = vcmp.eq.s32.totalorder %v13738_v15, %v10898_v6  ;;  %v16774_v18 = vld [vmem:[#allocation188_spill] sm:$0xff] }
 0xb38   : > { %vm5861_vm12 = vcmp.eq.s32.totalorder %v13813_v59, %v10829_v51  ;;  %vm5862_vm0 = vcmp.eq.s32.totalorder %v13813_v59, %v10898_v6  ;;  %v6057_v24 = vsel %vm5833_vm7, %v5918_v30, 0.0  ;;  %v6058_v49 = vsel %vm5834_vm9, %v5918_v30, 0.0  ;;  %v16768_v59 = vld [vmem:[#allocation64_spill] sm:$0xff] }
 0xb39   : > { %v6085_v50 = vsel %vm5861_vm12, %v5988_v47, 0.0  ;;  %v6086_v14 = vsel %vm5862_vm0, %v5988_v47, 0.0  ;;  %v5163_v26 = vsel %vm4939_vm6, %v16766_v3, 0.0  ;;  %v5164_v2 = vsel %vm4940_vm4, %v16766_v3, 0.0 }
 0xb3a   : > { %v6121_v58 = vadd.f32 %v6057_v24, %v5673_v1  ;;  %v6149_v38 = vadd.f32 %v6085_v50, %v16767_v23  ;;  %vm3156_vm5 = vcmp.eq.s32.totalorder %v16745_v31, %v10898_v6  ;;  %v4779_v15 = vadd.f32 %v4715_v54, %v4331_v48  ;;  %v14128_v48 = vpop.permute.xlu0 %5801  ;;  %v16777_v54 = vld [vmem:[#allocation341_spill] sm:$0xff] }
 0xb3b   : > { %v4780_v5 = vadd.f32 %v4716_v42, %v4332_v12  ;;  %v6122_v4 = vadd.f32 %v6058_v49, %v5674_v8  ;;  %v6150_v44 = vadd.f32 %v6086_v14, %v16768_v59  ;;  %vm3157_vm14 = vcmp.eq.s32.totalorder %v16769_v16, %v10829_v51  ;;  %v16773_v12 = vld [vmem:[#allocation420_spill] sm:$0xff]  ;;  %v16779_v49 = vld [vmem:[#allocation337_spill] sm:$0xff] }
 0xb3c   : > { %v3823_v32 = vsel %vm3599_vm15, %v16770_v33, 0.0  ;;  %v4333_v17 = vadd.f32 %v4269_v57, %v13864_v25  ;;  %v4334_v21 = vadd.f32 %v4270_v43, %v14015_v52  ;;  %vm4493_vm8 = vcmp.eq.s32.totalorder %v16771_v13, %v10829_v51  ;;  %6271 = vmatmul.f32.gmra.mxu0 %v6121_v58  ;;  %6313 = vmatmul.f32.gmra.mxu2 %v6149_v38  ;;  %v16772_v25 = vld [vmem:[#allocation388_spill] sm:$0xff]  ;;  %v16776_v43 = vld [vmem:[#allocation311_spill] sm:$0xff]  ;;  %v5923_v27 = vpop.permute.xlu2 %5922  ;;  %v5993_v42 = vpop.permute.xlu1 %5992 }
 0xb3d   : > { %v3824_v61 = vsel %vm3600_vm1, %v16770_v33, 0.0  ;;  %vm4494_vm13 = vcmp.eq.s32.totalorder %v16771_v13, %v10898_v6  ;;  %v5227_v10 = vadd.f32 %v5163_v26, %v4779_v15  ;;  %v5228_v40 = vadd.f32 %v5164_v2, %v4780_v5  ;;  %6384 = vmatmul.f32.gmra.mxu1 %v6122_v4  ;;  %6426 = vmatmul.f32.gmra.mxu3 %v6150_v44  ;;  %v16778_v8 = vld [vmem:[#allocation208_spill] sm:$0xff]  ;;  %v16781_v15 = vld [vmem:[#allocation163_spill] sm:$0xff]  ;;  %v16782_v5 = vld [vmem:[#allocation333_spill] sm:$0xff] }
 0xb3e   : > { %v4271_v52 = vsel %vm4047_vm2, %v16772_v25, 0.0  ;;  %v4272_v63 = vsel %vm4048_vm3, %v16772_v25, 0.0  ;;  %v4717_v22 = vsel %vm4493_vm8, %v16773_v12, 0.0  ;;  %v4718_v41 = vsel %vm4494_vm13, %v16773_v12, 0.0  ;;  %v16786_v13 = vld [vmem:[#allocation285_spill] sm:$0xff] }
 0xb3f   : > { %vm4941_vm15 = vcmp.eq.s32.totalorder %v16774_v18, %v10829_v51  ;;  %vm4942_vm1 = vcmp.eq.s32.totalorder %v16774_v18, %v10898_v6  ;;  %v5675_v57 = vadd.f32 %v16775_v60, %v5227_v10  ;;  %v5676_v20 = vadd.f32 %v16776_v43, %v5228_v40  ;;  %v16787_v40 = vld [vmem:[#allocation316_spill] sm:$0xff]  ;;  %v16788_v18 = vld [vmem:[#allocation443_spill] sm:$0xff] }
 0xb40   : > { %vm5835_vm11 = vcmp.eq.s32.totalorder %v16777_v54, %v10829_v51  ;;  %vm5836_vm2 = vcmp.eq.s32.totalorder %v16777_v54, %v10898_v6  ;;  %vm5863_vm3 = vcmp.eq.s32.totalorder %v13882_v36, %v10829_v51  ;;  %vm5864_vm10 = vcmp.eq.s32.totalorder %v13882_v36, %v10898_v6  ;;  %v16780_v36 = vld [vmem:[#allocation85_spill] sm:$0xff] }
 0xb41   : > { %v6059_v29 = vsel %vm5835_vm11, %v5923_v27, 0.0  ;;  %v6060_v53 = vsel %vm5836_vm2, %v5923_v27, 0.0  ;;  %v6087_v1 = vsel %vm5863_vm3, %v5993_v42, 0.0  ;;  %v6088_v55 = vsel %vm5864_vm10, %v5993_v42, 0.0 }
 0xb42   : > { %v5165_v30 = vsel %vm4941_vm15, %v16778_v8, 0.0  ;;  %v5166_v47 = vsel %vm4942_vm1, %v16778_v8, 0.0  ;;  %v6123_v24 = vadd.f32 %v6059_v29, %v5675_v57  ;;  %v6151_v50 = vadd.f32 %v6087_v1, %v16779_v49  ;;  %v14184_v10 = vpop.permute.xlu0 %5804 }
 0xb43   : > { %vm2710_vm6 = vcmp.eq.s32.totalorder %v16715_v0, %v10898_v6  ;;  %v4781_v14 = vadd.f32 %v4717_v22, %v4333_v17  ;;  %v4782_v3 = vadd.f32 %v4718_v41, %v4334_v21  ;;  %v6124_v26 = vadd.f32 %v6060_v53, %v5676_v20  ;;  %v16785_v17 = vld [vmem:[#allocation292_spill] sm:$0xff]  ;;  %v16789_v20 = vld [vmem:[#allocation318_spill] sm:$0xff] }
 0xb44   : > { %v6152_v2 = vadd.f32 %v6088_v55, %v16780_v36  ;;  %vm3158_vm4 = vcmp.eq.s32.totalorder %v16769_v16, %v10898_v6  ;;  %v3380_v58 = vsel %vm3156_vm5, %v16759_v46, 0.0  ;;  %v3887_v23 = vadd.f32 %v3823_v32, %v13614_v34  ;;  %6274 = vmatmul.f32.gmra.mxu0 %v6123_v24  ;;  %6316 = vmatmul.f32.gmra.mxu2 %v6151_v50  ;;  %v16784_v32 = vld [vmem:[#allocation9_spill] sm:$0xff]  ;;  %v5928_v25 = vpop.permute.xlu2 %5927  ;;  %v16790_v53 = vld [vmem:[#allocation332_spill] sm:$0xff]  ;;  %v16794_v16 = vld [vmem:[#allocation143_spill] sm:$0xff] }
 0xb45   : > { %v3888_v38 = vadd.f32 %v3824_v61, %v13616_v45  ;;  %vm4495_vm7 = vcmp.eq.s32.totalorder %v16781_v15, %v10829_v51  ;;  %v3381_v4 = vsel %vm3157_vm14, %v16782_v5, 0.0  ;;  %vm4496_vm9 = vcmp.eq.s32.totalorder %v16781_v15, %v10898_v6  ;;  %6387 = vmatmul.f32.gmra.mxu1 %v6124_v26  ;;  %v16783_v45 = vld [vmem:[#allocation418_spill] sm:$0xff]  ;;  %v16795_v50 = vld [vmem:[#allocation79_spill] sm:$0xff] }
 0xb46   : > { %v5229_v59 = vadd.f32 %v5165_v30, %v4781_v14  ;;  %v5230_v31 = vadd.f32 %v5166_v47, %v4782_v3  ;;  %6429 = vmatmul.f32.gmra.mxu3 %v6152_v2  ;;  %v4335_v34 = vadd.f32 %v4271_v52, %v3887_v23  ;;  %v4719_v44 = vsel %vm4495_vm7, %v16783_v45, 0.0  ;;  %v5998_v52 = vpop.permute.xlu1 %5997  ;;  %v16791_v30 = vld [vmem:[#allocation107_spill] sm:$0xff]  ;;  %v16796_v3 = vld [vmem:[#allocation82_spill] sm:$0xff] }
 0xb47   : > { %v4336_v46 = vadd.f32 %v4272_v63, %v3888_v38  ;;  %v4720_v33 = vsel %vm4496_vm9, %v16783_v45, 0.0  ;;  %vm4943_vm12 = vcmp.eq.s32.totalorder %v16784_v32, %v10829_v51  ;;  %vm4944_vm0 = vcmp.eq.s32.totalorder %v16784_v32, %v10898_v6 }
 0xb48   : > { %v5677_v21 = vadd.f32 %v16785_v17, %v5229_v59  ;;  %v5678_v61 = vadd.f32 %v16786_v13, %v5230_v31  ;;  %vm5837_vm5 = vcmp.eq.s32.totalorder %v16787_v40, %v10829_v51  ;;  %vm5838_vm14 = vcmp.eq.s32.totalorder %v16787_v40, %v10898_v6 }
 0xb49   : > { %vm5865_vm8 = vcmp.eq.s32.totalorder %v13946_v56, %v10829_v51  ;;  %vm5866_vm13 = vcmp.eq.s32.totalorder %v13946_v56, %v10898_v6  ;;  %v6061_v63 = vsel %vm5837_vm5, %v5928_v25, 0.0  ;;  %v6062_v12 = vsel %vm5838_vm14, %v5928_v25, 0.0 }
 0xb4a   : > { %v6089_v22 = vsel %vm5865_vm8, %v5998_v52, 0.0  ;;  %v6090_v41 = vsel %vm5866_vm13, %v5998_v52, 0.0  ;;  %v5167_v60 = vsel %vm4943_vm12, %v16788_v18, 0.0  ;;  %v5168_v57 = vsel %vm4944_vm0, %v16788_v18, 0.0  ;;  %v14234_v2 = vpop.permute.xlu0 %5807 }
 0xb4b   : > { %v6125_v43 = vadd.f32 %v6061_v63, %v5677_v21  ;;  %v6153_v54 = vadd.f32 %v6089_v22, %v16789_v20  ;;  %v4783_v27 = vadd.f32 %v4719_v44, %v4335_v34  ;;  %v4784_v42 = vadd.f32 %v4720_v33, %v4336_v46  ;;  %v16799_v46 = vld [vmem:[#allocation75_spill] sm:$0xff]  ;;  %v16800_v33 = vld [vmem:[#allocation76_spill] sm:$0xff]  ;;  %v16801_v21 = vld [vmem:[#allocation353_spill] sm:$0xff] }
 0xb4c   : > { %v6126_v29 = vadd.f32 %v6062_v12, %v5678_v61  ;;  %v6154_v1 = vadd.f32 %v6090_v41, %v16790_v53  ;;  %v2934_v56 = vsel %vm2710_vm6, %v16728_v9, 0.0  ;;  %v3443_v55 = vadd.f32 %v14074_v11, %v13966_v28  ;;  %v16793_v11 = vld [vmem:[#allocation358_spill] sm:$0xff]  ;;  %v16803_v63 = vld [vmem:[#allocation161_spill] sm:$0xff]  ;;  %v16805_v22 = vld [vmem:[#allocation423_spill] sm:$0xff] }
 0xb4d   : > { %v3444_v8 = vadd.f32 %v3380_v58, %v14062_v7  ;;  %vm3603_vm15 = vcmp.eq.s32.totalorder %v16791_v30, %v10829_v51  ;;  %6277 = vmatmul.f32.gmra.mxu0 %v6125_v43  ;;  %6319 = vmatmul.f32.gmra.mxu2 %v6153_v54  ;;  %v3382_v47 = vsel %vm3158_vm4, %v16782_v5, 0.0  ;;  %vm3604_vm1 = vcmp.eq.s32.totalorder %v16791_v30, %v10898_v6  ;;  %v16792_v7 = vld [vmem:[#allocation110_spill] sm:$0xff]  ;;  %v16804_v12 = vld [vmem:[#allocation17_spill] sm:$0xff] }
 0xb4e   : > { %v5231_v0 = vadd.f32 %v5167_v60, %v4783_v27  ;;  %v5232_v9 = vadd.f32 %v5168_v57, %v4784_v42  ;;  %6390 = vmatmul.f32.gmra.mxu1 %v6126_v29  ;;  %6432 = vmatmul.f32.gmra.mxu3 %v6154_v1  ;;  %v14214_v28 = vadd.f32 %v3381_v4, %v13920_v37  ;;  %v3827_v24 = vsel %vm3603_vm15, %v16793_v11, 0.0  ;;  %v5933_v37 = vpop.permute.xlu2 %5932  ;;  %v6003_v36 = vpop.permute.xlu1 %6002  ;;  %v16797_v5 = vld [vmem:[#allocation382_spill] sm:$0xff]  ;;  %v16806_v60 = vld [vmem:[#allocation211_spill] sm:$0xff]  ;;  %v16807_v20 = vld [vmem:[#allocation93_spill] sm:$0xff] }
 0xb4f   : > { %vm3605_vm11 = vcmp.eq.s32.totalorder %v16792_v7, %v10829_v51  ;;  %v3828_v49 = vsel %vm3604_vm1, %v16793_v11, 0.0  ;;  %vm4051_vm2 = vcmp.eq.s32.totalorder %v16794_v16, %v10829_v51  ;;  %vm4052_vm3 = vcmp.eq.s32.totalorder %v16794_v16, %v10898_v6  ;;  %v16802_v61 = vld [vmem:[#allocation26_spill] sm:$0xff]  ;;  %v16812_v11 = vld [vmem:[#allocation277_spill] sm:$0xff] }
 0xb50   : > { %v5679_v14 = vadd.f32 %v16795_v50, %v5231_v0  ;;  %v5680_v26 = vadd.f32 %v16796_v3, %v5232_v9  ;;  %vm5839_vm10 = vcmp.eq.s32.totalorder %v13797_v19, %v10829_v51  ;;  %vm5840_vm6 = vcmp.eq.s32.totalorder %v13797_v19, %v10898_v6  ;;  %v16798_v19 = vld [vmem:[#allocation70_spill] sm:$0xff]  ;;  %v16811_v9 = vld [vmem:[#allocation88_spill] sm:$0xff]  ;;  %v16814_v3 = vld [vmem:[#allocation329_spill] sm:$0xff] }
 0xb51   : > { %vm5867_vm4 = vcmp.eq.s32.totalorder %v14004_v39, %v10829_v51  ;;  %vm5868_vm7 = vcmp.eq.s32.totalorder %v14004_v39, %v10898_v6  ;;  %v6063_v58 = vsel %vm5839_vm10, %v5933_v37, 0.0  ;;  %v6064_v23 = vsel %vm5840_vm6, %v5933_v37, 0.0 }
 0xb52   : > { %v6091_v38 = vsel %vm5867_vm4, %v6003_v36, 0.0  ;;  %v6092_v15 = vsel %vm5868_vm7, %v6003_v36, 0.0  ;;  %v4275_v4 = vsel %vm4051_vm2, %v16797_v5, 0.0  ;;  %v4276_v59 = vsel %vm4052_vm3, %v16797_v5, 0.0 }
 0xb53   : > { %v6127_v31 = vadd.f32 %v6063_v58, %v5679_v14  ;;  %v6155_v34 = vadd.f32 %v6091_v38, %v16798_v19  ;;  %vm3161_vm9 = vcmp.eq.s32.totalorder %v16799_v46, %v10829_v51  ;;  %v3891_v45 = vadd.f32 %v3827_v24, %v3443_v55  ;;  %v16813_v24 = vld [vmem:[#allocation149_spill] sm:$0xff]  ;;  %v14289_v14 = vpop.permute.xlu0 %5810  ;;  %v16815_v58 = vld [vmem:[#allocation166_spill] sm:$0xff] }
 0xb54   : > { %v3892_v39 = vadd.f32 %v3828_v49, %v3444_v8  ;;  %v6128_v44 = vadd.f32 %v6064_v23, %v5680_v26  ;;  %v6156_v32 = vadd.f32 %v6092_v15, %v16800_v33  ;;  %vm3162_vm12 = vcmp.eq.s32.totalorder %v16799_v46, %v10898_v6  ;;  %v16809_v8 = vld [vmem:[#allocation87_spill] sm:$0xff]  ;;  %v16817_v19 = vld [vmem:[#allocation186_spill] sm:$0xff] }
 0xb55   : > { %v3446_v17 = vadd.f32 %v3382_v47, %v2934_v56  ;;  %vm3606_vm0 = vcmp.eq.s32.totalorder %v16792_v7, %v10898_v6  ;;  %v3829_v13 = vsel %vm3605_vm11, %v16801_v21, 0.0  ;;  %vm4053_vm5 = vcmp.eq.s32.totalorder %v16802_v61, %v10829_v51  ;;  %6280 = vmatmul.f32.gmra.mxu0 %v6127_v31  ;;  %6322 = vmatmul.f32.gmra.mxu2 %v6155_v34  ;;  %v16808_v56 = vld [vmem:[#allocation57_spill] sm:$0xff]  ;;  %v16810_v47 = vld [vmem:[#allocation312_spill] sm:$0xff]  ;;  %v16818_v34 = vld [vmem:[#allocation298_spill] sm:$0xff] }
 0xb56   : > { %v3830_v40 = vsel %vm3606_vm0, %v16801_v21, 0.0  ;;  %vm4054_vm14 = vcmp.eq.s32.totalorder %v16802_v61, %v10898_v6  ;;  %v4339_v25 = vadd.f32 %v4275_v4, %v3891_v45  ;;  %v4340_v52 = vadd.f32 %v4276_v59, %v3892_v39  ;;  %6393 = vmatmul.f32.gmra.mxu1 %v6128_v44  ;;  %6435 = vmatmul.f32.gmra.mxu3 %v6156_v32  ;;  %v5938_v54 = vpop.permute.xlu2 %5937  ;;  %v6008_v27 = vpop.permute.xlu1 %6007  ;;  %v16816_v4 = vld [vmem:[#allocation421_spill] sm:$0xff]  ;;  %v16820_v44 = vld [vmem:[#allocation91_spill] sm:$0xff] }
 0xb57   : > { %vm4499_vm8 = vcmp.eq.s32.totalorder %v16803_v63, %v10829_v51  ;;  %vm4500_vm13 = vcmp.eq.s32.totalorder %v16803_v63, %v10898_v6  ;;  %vm4947_vm15 = vcmp.eq.s32.totalorder %v16804_v12, %v10829_v51  ;;  %vm4948_vm1 = vcmp.eq.s32.totalorder %v16804_v12, %v10898_v6  ;;  %v16819_v45 = vld [vmem:[#allocation301_spill] sm:$0xff]  ;;  %v16822_v12 = vld [vmem:[#allocation334_spill] sm:$0xff] }
 0xb58   : > { %v4723_v41 = vsel %vm4499_vm8, %v16805_v22, 0.0  ;;  %v4724_v18 = vsel %vm4500_vm13, %v16805_v22, 0.0  ;;  %v5171_v57 = vsel %vm4947_vm15, %v16806_v60, 0.0  ;;  %v5172_v43 = vsel %vm4948_vm1, %v16806_v60, 0.0 }
 0xb59   : > { %vm5841_vm11 = vcmp.eq.s32.totalorder %v16807_v20, %v10829_v51  ;;  %vm5842_vm2 = vcmp.eq.s32.totalorder %v16807_v20, %v10898_v6  ;;  %vm5869_vm3 = vcmp.eq.s32.totalorder %v14055_v62, %v10829_v51  ;;  %vm5870_vm10 = vcmp.eq.s32.totalorder %v14055_v62, %v10898_v6 }
 0xb5a   : > { %v6065_v42 = vsel %vm5841_vm11, %v5938_v54, 0.0  ;;  %v6066_v29 = vsel %vm5842_vm2, %v5938_v54, 0.0  ;;  %v6093_v53 = vsel %vm5869_vm3, %v6008_v27, 0.0  ;;  %v6094_v1 = vsel %vm5870_vm10, %v6008_v27, 0.0  ;;  %v16825_v54 = vld [vmem:[#allocation108_spill] sm:$0xff] }
 0xb5b   : > { %v6129_v55 = vadd.f32 %v6065_v42, %v16808_v56  ;;  %v6157_v30 = vadd.f32 %v6093_v53, %v16809_v8  ;;  %v6130_v0 = vadd.f32 %v6066_v29, %v16810_v47  ;;  %v6158_v7 = vadd.f32 %v6094_v1, %v16811_v9  ;;  %v14335_v53 = vpop.permute.xlu0 %5813  ;;  %v16827_v47 = vld [vmem:[#allocation146_spill] sm:$0xff] }
 0xb5c   : > { %vm2713_vm6 = vcmp.eq.s32.totalorder %v16812_v11, %v10829_v51  ;;  %v4277_v62 = vsel %vm4053_vm5, %v16813_v24, 0.0  ;;  %v4278_v49 = vsel %vm4054_vm14, %v16813_v24, 0.0  ;;  %v4787_v16 = vadd.f32 %v4723_v41, %v4339_v25 }
 0xb5d   : > { %v4788_v50 = vadd.f32 %v4724_v18, %v4340_v52  ;;  %v3385_v26 = vsel %vm3161_vm9, %v16814_v3, 0.0  ;;  %v3893_v37 = vadd.f32 %v3829_v13, %v14214_v28  ;;  %v3894_v36 = vadd.f32 %v3830_v40, %v3446_v17  ;;  %6283 = vmatmul.f32.gmra.mxu0 %v6129_v55  ;;  %6325 = vmatmul.f32.gmra.mxu2 %v6157_v30  ;;  %v16821_v40 = vld [vmem:[#allocation446_spill] sm:$0xff]  ;;  %v16826_v55 = vld [vmem:[#allocation361_spill] sm:$0xff] }
 0xb5e   : > { %vm4501_vm4 = vcmp.eq.s32.totalorder %v16815_v58, %v10829_v51  ;;  %v3386_v23 = vsel %vm3162_vm12, %v16814_v3, 0.0  ;;  %vm4502_vm7 = vcmp.eq.s32.totalorder %v16815_v58, %v10898_v6  ;;  %v5235_v38 = vadd.f32 %v5171_v57, %v4787_v16  ;;  %6396 = vmatmul.f32.gmra.mxu1 %v6130_v0  ;;  %6438 = vmatmul.f32.gmra.mxu3 %v6158_v7  ;;  %v5943_v33 = vpop.permute.xlu2 %5942  ;;  %v6013_v32 = vpop.permute.xlu1 %6012  ;;  %v16823_v57 = vld [vmem:[#allocation335_spill] sm:$0xff]  ;;  %v16828_v0 = vld [vmem:[#allocation49_spill] sm:$0xff] }
 0xb5f   : > { %v5236_v15 = vadd.f32 %v5172_v43, %v4788_v50  ;;  %v4341_v5 = vadd.f32 %v4277_v62, %v3893_v37  ;;  %v4342_v28 = vadd.f32 %v4278_v49, %v3894_v36  ;;  %v4725_v59 = vsel %vm4501_vm4, %v16816_v4, 0.0  ;;  %v16829_v7 = vld [vmem:[#allocation331_spill] sm:$0xff]  ;;  %v16830_v37 = vld [vmem:[#allocation33_spill] sm:$0xff] }
 0xb60   : > { %v4726_v31 = vsel %vm4502_vm7, %v16816_v4, 0.0  ;;  %vm4949_vm9 = vcmp.eq.s32.totalorder %v16817_v19, %v10829_v51  ;;  %vm4950_vm0 = vcmp.eq.s32.totalorder %v16817_v19, %v10898_v6  ;;  %v5683_v46 = vadd.f32 %v16818_v34, %v5235_v38  ;;  %v16834_v19 = vld [vmem:[#allocation426_spill] sm:$0xff] }
 0xb61   : > { %v5684_v39 = vadd.f32 %v16819_v45, %v5236_v15  ;;  %vm5843_vm12 = vcmp.eq.s32.totalorder %v16820_v44, %v10829_v51  ;;  %vm5844_vm5 = vcmp.eq.s32.totalorder %v16820_v44, %v10898_v6  ;;  %vm5871_vm14 = vcmp.eq.s32.totalorder %v14128_v48, %v10829_v51  ;;  %v16832_v15 = vld [vmem:[#allocation386_spill] sm:$0xff]  ;;  %v16835_v45 = vld [vmem:[#allocation192_spill] sm:$0xff]  ;;  %v16836_v44 = vld [vmem:[#allocation95_spill] sm:$0xff] }
 0xb62   : > { %vm5872_vm8 = vcmp.eq.s32.totalorder %v14128_v48, %v10898_v6  ;;  %v6067_v17 = vsel %vm5843_vm12, %v5943_v33, 0.0  ;;  %v6068_v21 = vsel %vm5844_vm5, %v5943_v33, 0.0  ;;  %v6095_v13 = vsel %vm5871_vm14, %v6013_v32, 0.0  ;;  %v16824_v48 = vld [vmem:[#allocation308_spill] sm:$0xff] }
 0xb63   : > { %v6096_v61 = vsel %vm5872_vm8, %v6013_v32, 0.0  ;;  %v5173_v25 = vsel %vm4949_vm9, %v16821_v40, 0.0  ;;  %v5174_v52 = vsel %vm4950_vm0, %v16821_v40, 0.0  ;;  %v6131_v63 = vadd.f32 %v6067_v17, %v5683_v46  ;;  %v16837_v40 = vld [vmem:[#allocation60_spill] sm:$0xff] }
 0xb64   : > { %v6159_v22 = vadd.f32 %v6095_v13, %v16822_v12  ;;  %v4789_v41 = vadd.f32 %v4725_v59, %v4341_v5  ;;  %v4790_v18 = vadd.f32 %v4726_v31, %v4342_v28  ;;  %v6132_v60 = vadd.f32 %v6068_v21, %v5684_v39  ;;  %v16833_v31 = vld [vmem:[#allocation164_spill] sm:$0xff]  ;;  %v5817_v39 = vpop.permute.xlu0 %5816  ;;  %v16839_v12 = vld [vmem:[#allocation67_spill] sm:$0xff] }
 0xb65   : > { %v6160_v43 = vadd.f32 %v6096_v61, %v16823_v57  ;;  %vm2714_vm13 = vcmp.eq.s32.totalorder %v16812_v11, %v10898_v6  ;;  %v2937_v20 = vsel %vm2713_vm6, %v16824_v48, 0.0  ;;  %vm3609_vm15 = vcmp.eq.s32.totalorder %v16825_v54, %v10829_v51  ;;  %6286 = vmatmul.f32.gmra.mxu0 %v6131_v63 }
 0xb66   : > { %6328 = vmatmul.f32.gmra.mxu2 %v6159_v22  ;;  %v2938_v27 = vsel %vm2714_vm13, %v16824_v48, 0.0  ;;  %vm3610_vm1 = vcmp.eq.s32.totalorder %v16825_v54, %v10898_v6  ;;  %v5237_v42 = vadd.f32 %v5173_v25, %v4789_v41  ;;  %v5238_v29 = vadd.f32 %v5174_v52, %v4790_v18  ;;  %6399 = vmatmul.f32.gmra.mxu1 %v6132_v60  ;;  %v5948_v24 = vpop.permute.xlu2 %5947  ;;  %v6018_v62 = vpop.permute.xlu1 %6017  ;;  %v16838_v52 = vld [vmem:[#allocation252_spill] sm:$0xff]  ;;  %v16840_v41 = vld [vmem:[#allocation246_spill] sm:$0xff] }
 0xb67   : > { %6441 = vmatmul.f32.gmra.mxu3 %v6160_v43  ;;  %v3449_v1 = vadd.f32 %v3385_v26, %v2937_v20  ;;  %v3450_v56 = vadd.f32 %v3386_v23, %v2938_v27  ;;  %v3833_v8 = vsel %vm3609_vm15, %v16826_v55, 0.0  ;;  %v3834_v30 = vsel %vm3610_vm1, %v16826_v55, 0.0  ;;  %v16831_v23 = vld [vmem:[#allocation86_spill] sm:$0xff]  ;;  %v16842_v27 = vld [vmem:[#allocation307_spill] sm:$0xff] }
 0xb68   : > { %vm4057_vm11 = vcmp.eq.s32.totalorder %v16827_v47, %v10829_v51  ;;  %vm4058_vm2 = vcmp.eq.s32.totalorder %v16827_v47, %v10898_v6  ;;  %v5685_v9 = vadd.f32 %v16828_v0, %v5237_v42  ;;  %v5686_v11 = vadd.f32 %v16829_v7, %v5238_v29  ;;  %v16841_v60 = vld [vmem:[#allocation214_spill] sm:$0xff]  ;;  %v16843_v29 = vld [vmem:[#allocation309_spill] sm:$0xff] }
 0xb69   : > { %vm5845_vm3 = vcmp.eq.s32.totalorder %v13841_v35, %v10829_v51  ;;  %vm5846_vm10 = vcmp.eq.s32.totalorder %v13841_v35, %v10898_v6  ;;  %vm5873_vm6 = vcmp.eq.s32.totalorder %v14184_v10, %v10829_v51  ;;  %vm5874_vm4 = vcmp.eq.s32.totalorder %v14184_v10, %v10898_v6  ;;  %v16844_v0 = vld [vmem:[#allocation338_spill] sm:$0xff] }
 0xb6a   : > { %v6069_v49 = vsel %vm5845_vm3, %v5948_v24, 0.0  ;;  %v6070_v16 = vsel %vm5846_vm10, %v5948_v24, 0.0  ;;  %v6097_v50 = vsel %vm5873_vm6, %v6018_v62, 0.0  ;;  %v6098_v3 = vsel %vm5874_vm4, %v6018_v62, 0.0  ;;  %v16845_v7 = vld [vmem:[#allocation78_spill] sm:$0xff] }
 0xb6b   : > { %v6133_v26 = vadd.f32 %v6069_v49, %v5685_v9  ;;  %v6161_v36 = vadd.f32 %v6097_v50, %v16830_v37  ;;  %v6134_v58 = vadd.f32 %v6070_v16, %v5686_v11  ;;  %v6162_v38 = vadd.f32 %v6098_v3, %v16831_v23 }
 0xb6c   : > { %v4281_v35 = vsel %vm4057_vm11, %v16832_v15, 0.0  ;;  %v4282_v10 = vsel %vm4058_vm2, %v16832_v15, 0.0  ;;  %v3897_v5 = vadd.f32 %v3833_v8, %v3449_v1  ;;  %v3898_v28 = vadd.f32 %v3834_v30, %v3450_v56  ;;  %v5958_v8 = vpop.permute.xlu0 %5957 }
 0xb6d   : > { %6289 = vmatmul.f32.gmra.mxu0 %v6133_v26  ;;  %vm4505_vm7 = vcmp.eq.s32.totalorder %v16833_v31, %v10829_v51  ;;  %vm4506_vm9 = vcmp.eq.s32.totalorder %v16833_v31, %v10898_v6  ;;  %vm4953_vm0 = vcmp.eq.s32.totalorder %v16835_v45, %v10829_v51  ;;  %vm4954_vm12 = vcmp.eq.s32.totalorder %v16835_v45, %v10898_v6  ;;  %v16846_v26 = vld [vmem:[#allocation80_spill] sm:$0xff] }
 0xb6e   : > { %6331 = vmatmul.f32.gmra.mxu2 %v6161_v36  ;;  %6402 = vmatmul.f32.gmra.mxu1 %v6134_v58  ;;  %v4345_v4 = vadd.f32 %v4281_v35, %v3897_v5  ;;  %v4346_v59 = vadd.f32 %v4282_v10, %v3898_v28  ;;  %v4729_v34 = vsel %vm4505_vm7, %v16834_v19, 0.0  ;;  %v4730_v46 = vsel %vm4506_vm9, %v16834_v19, 0.0  ;;  %v5953_v33 = vpop.permute.xlu2 %5952  ;;  %v6023_v32 = vpop.permute.xlu1 %6022  ;;  %v16847_v36 = vld [vmem:[#allocation83_spill] sm:$0xff]  ;;  %v16848_v5 = vld [vmem:[#allocation92_spill] sm:$0xff] }
 0xb6f   : > { %6444 = vmatmul.f32.gmra.mxu3 %v6162_v38  ;;  %vm5847_vm5 = vcmp.eq.s32.totalorder %v16836_v44, %v10829_v51  ;;  %vm5848_vm14 = vcmp.eq.s32.totalorder %v16836_v44, %v10898_v6  ;;  %vm5875_vm8 = vcmp.eq.s32.totalorder %v14234_v2, %v10829_v51  ;;  %vm5876_vm13 = vcmp.eq.s32.totalorder %v14234_v2, %v10898_v6 }
 0xb70   : > { %v6071_v17 = vsel %vm5847_vm5, %v5953_v33, 0.0  ;;  %v6072_v21 = vsel %vm5848_vm14, %v5953_v33, 0.0  ;;  %v6099_v13 = vsel %vm5875_vm8, %v6023_v32, 0.0  ;;  %v6100_v61 = vsel %vm5876_vm13, %v6023_v32, 0.0  ;;  %v16850_v33 = vld [vmem:[#allocation339_spill] sm:$0xff] }
 0xb71   : > { %v6135_v25 = vadd.f32 %v6071_v17, %v16837_v40  ;;  %v6163_v63 = vadd.f32 %v6099_v13, %v16838_v52  ;;  %v6136_v22 = vadd.f32 %v6072_v21, %v16839_v12  ;;  %v6164_v18 = vadd.f32 %v6100_v61, %v16840_v41  ;;  %v16851_v17 = vld [vmem:[#allocation283_spill] sm:$0xff]  ;;  %v16852_v12 = vld [vmem:[#allocation81_spill] sm:$0xff] }
 0xb72   : > { %v5177_v57 = vsel %vm4953_vm0, %v16841_v60, 0.0  ;;  %v5178_v2 = vsel %vm4954_vm12, %v16841_v60, 0.0  ;;  %v4793_v43 = vadd.f32 %v4729_v34, %v4345_v4  ;;  %v4794_v48 = vadd.f32 %v4730_v46, %v4346_v59  ;;  %v16849_v4 = vld [vmem:[#allocation340_spill] sm:$0xff]  ;;  %v16853_v41 = vld [vmem:[#allocation315_spill] sm:$0xff] }
 0xb73   : > { %vm5877_vm15 = vcmp.eq.s32.totalorder %v14289_v14, %v10829_v51  ;;  %vm5878_vm1 = vcmp.eq.s32.totalorder %v14289_v14, %v10898_v6  ;;  %vm5879_vm3 = vcmp.eq.s32.totalorder %v14335_v53, %v10829_v51  ;;  %vm5880_vm10 = vcmp.eq.s32.totalorder %v14335_v53, %v10898_v6 }
 0xb74   : > { %v5241_v20 = vadd.f32 %v5177_v57, %v4793_v43  ;;  %v5242_v54 = vadd.f32 %v5178_v2, %v4794_v48  ;;  %vm5881_vm6 = vcmp.eq.s32.totalorder %v5817_v39, %v10829_v51  ;;  %vm5882_vm4 = vcmp.eq.s32.totalorder %v5817_v39, %v10898_v6  ;;  %v5772_v13 = vpop.permute.xlu0 %5771 }
 0xb75   : > { %6292 = vmatmul.f32.gmra.mxu0 %v6135_v25  ;;  %vm5851_vm0 = vcmp.eq.s32.totalorder %v5772_v13, %v10829_v51  ;;  %vm5852_vm12 = vcmp.eq.s32.totalorder %v5772_v13, %v10898_v6 }
 0xb76   : > { %6334 = vmatmul.f32.gmra.mxu2 %v6163_v63  ;;  %6405 = vmatmul.f32.gmra.mxu1 %v6136_v22  ;;  %v5689_v42 = vadd.f32 %v16842_v27, %v5241_v20  ;;  %v5690_v1 = vadd.f32 %v16843_v29, %v5242_v54  ;;  %v5769_v56 = vpop.permute.xlu2 %5768  ;;  %v6028_v55 = vpop.permute.xlu1 %6027 }
 0xb77   : > { %6447 = vmatmul.f32.gmra.mxu3 %v6164_v18  ;;  %vm5849_vm11 = vcmp.eq.s32.totalorder %v5769_v56, %v10829_v51  ;;  %vm5850_vm2 = vcmp.eq.s32.totalorder %v5769_v56, %v10898_v6  ;;  %v6101_v30 = vsel %vm5877_vm15, %v6028_v55, 0.0  ;;  %v6102_v47 = vsel %vm5878_vm1, %v6028_v55, 0.0 }
 0xb78   : > { %v6165_v9 = vadd.f32 %v6101_v30, %v16844_v0  ;;  %v6166_v11 = vadd.f32 %v6102_v47, %v16845_v7  ;;  %v6073_v24 = vsel %vm5849_vm11, %v5958_v8, 0.0  ;;  %v6074_v62 = vsel %vm5850_vm2, %v5958_v8, 0.0 }
 0xb79   : > { %v6137_v49 = vadd.f32 %v6073_v24, %v5689_v42  ;;  %v6138_v16 = vadd.f32 %v6074_v62, %v5690_v1 }
 0xb7d   : > { %6295 = vmatmul.f32.gmra.mxu0 %v6137_v49 }
 0xb7e   : > { %6337 = vmatmul.f32.gmra.mxu2 %v6165_v9  ;;  %6408 = vmatmul.f32.gmra.mxu1 %v6138_v16  ;;  %v6033_v14 = vpop.permute.xlu1 %6032  ;;  %v6043_v31 = vpop.permute.xlu2 %6042 }
 0xb7f   : > { %6450 = vmatmul.f32.gmra.mxu3 %v6166_v11  ;;  %v6103_v50 = vsel %vm5879_vm3, %v6033_v14, 0.0  ;;  %v6104_v3 = vsel %vm5880_vm10, %v6033_v14, 0.0 }
 0xb80   : > { %v6167_v37 = vadd.f32 %v6103_v50, %v16846_v26  ;;  %v6168_v58 = vadd.f32 %v6104_v3, %v16847_v36 }
 0xb85   : > { %v6254_v53 = vpop.f32.mrf.mxu0  ;;  %v6367_v35 = vpop.f32.mrf.mxu1 }
 0xb86   : > { %6340 = vmatmul.f32.gmra.mxu2 %v6167_v37  ;;  %v6038_v23 = vpop.permute.xlu1 %6037  ;;  %v6368_v10 = vadd.f32 %v6367_v35, %v6254_v53 }
 0xb87   : > { %6453 = vmatmul.f32.gmra.mxu3 %v6168_v58  ;;  %v6105_v38 = vsel %vm5881_vm6, %v6038_v23, 0.0  ;;  %v6106_v15 = vsel %vm5882_vm4, %v6038_v23, 0.0 }
 0xb88   : > { %v6169_v28 = vadd.f32 %v6105_v38, %v16848_v5  ;;  %v6170_v59 = vadd.f32 %v6106_v15, %v16849_v4  ;;  %6495 = vst [vmem:[%s14416_s18] sm:$0xff] %v6368_v10 }
 0xb8d   : > { %v6257_v34 = vpop.f32.mrf.mxu0  ;;  %v6370_v46 = vpop.f32.mrf.mxu1 }
 0xb8e   : > { %6343 = vmatmul.f32.gmra.mxu2 %v6169_v28  ;;  %v5820_v19 = vpop.permute.xlu1 %5819  ;;  %v6371_v45 = vadd.f32 %v6370_v46, %v6257_v34 }
 0xb8f   : > { %6456 = vmatmul.f32.gmra.mxu3 %v6170_v59  ;;  %vm5883_vm7 = vcmp.eq.s32.totalorder %v5820_v19, %v10829_v51  ;;  %vm5884_vm9 = vcmp.eq.s32.totalorder %v5820_v19, %v10898_v6 }
 0xb90   : > { %v6107_v39 = vsel %vm5883_vm7, %v6043_v31, 0.0  ;;  %v6108_v44 = vsel %vm5884_vm9, %v6043_v31, 0.0  ;;  %6496 = vst [vmem:[%s14416_s18 + $0x8] sm:$0xff] %v6371_v45 }
 0xb91   : > { %v6171_v32 = vadd.f32 %v6107_v39, %v16850_v33  ;;  %v6172_v21 = vadd.f32 %v6108_v44, %v16851_v17 }
 0xb96   : > { %6346 = vmatmul.f32.gmra.mxu2 %v6171_v32  ;;  %v5963_v61 = vpop.permute.xlu1 %5962  ;;  %v6260_v52 = vpop.f32.mrf.mxu0 }
 0xb97   : > { %6459 = vmatmul.f32.gmra.mxu3 %v6172_v21  ;;  %v6075_v40 = vsel %vm5851_vm0, %v5963_v61, 0.0  ;;  %v6076_v25 = vsel %vm5852_vm12, %v5963_v61, 0.0  ;;  %v6373_v63 = vpop.f32.mrf.mxu1 }
 0xb98   : > { %v6139_v22 = vadd.f32 %v6075_v40, %v16852_v12  ;;  %v6140_v18 = vadd.f32 %v6076_v25, %v16853_v41  ;;  %v6374_v60 = vadd.f32 %v6373_v63, %v6260_v52 }
 0xb9a   : > { %6298 = vmatmul.f32.gmra.mxu0 %v6139_v22  ;;  %6411 = vmatmul.f32.gmra.mxu1 %v6140_v18  ;;  %6497 = vst [vmem:[%s14416_s18 + $0x10] sm:$0xff] %v6374_v60 }
 0xb9c   : > { %v6302_v51 = vpop.f32.mrf.mxu2 }
 0xb9e   : > { %v6415_v57 = vpop.f32.mrf.mxu3  ;;  %v6263_v2 = vpop.f32.mrf.mxu0 }
 0xb9f   : > { %v6416_v6 = vadd.f32 %v6415_v57, %v6302_v51 }
 0xba0   : > { %v6376_v43 = vpop.f32.mrf.mxu1 }
 0xba1   : > { %v6377_v48 = vadd.f32 %v6376_v43, %v6263_v2  ;;  %6511 = vst [vmem:[%s14416_s18 + $0x80] sm:$0xff] %v6416_v6 }
 0xba3   : > { %6498 = vst [vmem:[%s14416_s18 + $0x18] sm:$0xff] %v6377_v48 }
 0xba5   : > { %v6305_v20 = vpop.f32.mrf.mxu2 }
 0xba6   : > { %v6418_v54 = vpop.f32.mrf.mxu3 }
 0xba7   : > { %v6419_v27 = vadd.f32 %v6418_v54, %v6305_v20  ;;  %v6266_v42 = vpop.f32.mrf.mxu0 }
 0xba8   : > { %v6379_v29 = vpop.f32.mrf.mxu1 }
 0xba9   : > { %v6380_v1 = vadd.f32 %v6379_v29, %v6266_v42  ;;  %6512 = vst [vmem:[%s14416_s18 + $0x88] sm:$0xff] %v6419_v27 }
 0xbab   : > { %6499 = vst [vmem:[%s14416_s18 + $0x20] sm:$0xff] %v6380_v1 }
 0xbad   : > { %v6308_v56 = vpop.f32.mrf.mxu2 }
 0xbae   : > { %v6421_v55 = vpop.f32.mrf.mxu3 }
 0xbaf   : > { %v6422_v8 = vadd.f32 %v6421_v55, %v6308_v56 }
 0xbb0   : > { %v6269_v30 = vpop.f32.mrf.mxu0 }
 0xbb1   : > { %v6382_v47 = vpop.f32.mrf.mxu1  ;;  %6513 = vst [vmem:[%s14416_s18 + $0x90] sm:$0xff] %v6422_v8 }
 0xbb2   : > { %v6383_v0 = vadd.f32 %v6382_v47, %v6269_v30 }
 0xbb4   : > { %6500 = vst [vmem:[%s14416_s18 + $0x28] sm:$0xff] %v6383_v0 }
 0xbb7   : > { %v6311_v9 = vpop.f32.mrf.mxu2 }
 0xbb8   : > { %v6424_v7 = vpop.f32.mrf.mxu3 }
 0xbb9   : > { %v6425_v11 = vadd.f32 %v6424_v7, %v6311_v9  ;;  %v6272_v24 = vpop.f32.mrf.mxu0 }
 0xbba   : > { %v6385_v62 = vpop.f32.mrf.mxu1 }
 0xbbb   : > { %v6386_v49 = vadd.f32 %v6385_v62, %v6272_v24  ;;  %6514 = vst [vmem:[%s14416_s18 + $0x98] sm:$0xff] %v6425_v11 }
 0xbbd   : > { %6501 = vst [vmem:[%s14416_s18 + $0x30] sm:$0xff] %v6386_v49 }
 0xbbf   : > { %v6314_v16 = vpop.f32.mrf.mxu2 }
 0xbc0   : > { %v6427_v14 = vpop.f32.mrf.mxu3 }
 0xbc1   : > { %v6428_v50 = vadd.f32 %v6427_v14, %v6314_v16  ;;  %v6275_v3 = vpop.f32.mrf.mxu0 }
 0xbc2   : > { %v6388_v26 = vpop.f32.mrf.mxu1 }
 0xbc3   : > { %v6389_v37 = vadd.f32 %v6388_v26, %v6275_v3  ;;  %6515 = vst [vmem:[%s14416_s18 + $0xa0] sm:$0xff] %v6428_v50 }
 0xbc5   : > { %6502 = vst [vmem:[%s14416_s18 + $0x38] sm:$0xff] %v6389_v37 }
 0xbc7   : > { %v6317_v36 = vpop.f32.mrf.mxu2 }
 0xbc9   : > { %v6430_v58 = vpop.f32.mrf.mxu3 }
 0xbca   : > { %v6431_v23 = vadd.f32 %v6430_v58, %v6317_v36  ;;  %v6278_v38 = vpop.f32.mrf.mxu0 }
 0xbcb   : > { %v6391_v15 = vpop.f32.mrf.mxu1 }
 0xbcc   : > { %v6392_v53 = vadd.f32 %v6391_v15, %v6278_v38  ;;  %6516 = vst [vmem:[%s14416_s18 + $0xa8] sm:$0xff] %v6431_v23 }
 0xbce   : > { %6503 = vst [vmem:[%s14416_s18 + $0x40] sm:$0xff] %v6392_v53 }
 0xbd0   : > { %v6320_v35 = vpop.f32.mrf.mxu2 }
 0xbd1   : > { %v6433_v10 = vpop.f32.mrf.mxu3 }
 0xbd2   : > { %v6434_v5 = vadd.f32 %v6433_v10, %v6320_v35  ;;  %v6281_v28 = vpop.f32.mrf.mxu0 }
 0xbd3   : > { %v6394_v4 = vpop.f32.mrf.mxu1 }
 0xbd4   : > { %v6395_v59 = vadd.f32 %v6394_v4, %v6281_v28  ;;  %6517 = vst [vmem:[%s14416_s18 + $0xb0] sm:$0xff] %v6434_v5 }
 0xbd6   : > { %6504 = vst [vmem:[%s14416_s18 + $0x48] sm:$0xff] %v6395_v59 }
 0xbd8   : > { %v6323_v31 = vpop.f32.mrf.mxu2 }
 0xbd9   : > { %v6436_v19 = vpop.f32.mrf.mxu3 }
 0xbda   : > { %v6437_v34 = vadd.f32 %v6436_v19, %v6323_v31  ;;  %v6284_v46 = vpop.f32.mrf.mxu0 }
 0xbdb   : > { %v6397_v45 = vpop.f32.mrf.mxu1 }
 0xbdc   : > { %v6398_v39 = vadd.f32 %v6397_v45, %v6284_v46  ;;  %6518 = vst [vmem:[%s14416_s18 + $0xb8] sm:$0xff] %v6437_v34 }
 0xbde   : > { %6505 = vst [vmem:[%s14416_s18 + $0x50] sm:$0xff] %v6398_v39 }
 0xbe0   : > { %v6326_v44 = vpop.f32.mrf.mxu2 }
 0xbe1   : > { %v6439_v33 = vpop.f32.mrf.mxu3 }
 0xbe2   : > { %v6440_v32 = vadd.f32 %v6439_v33, %v6326_v44  ;;  %v6287_v17 = vpop.f32.mrf.mxu0 }
 0xbe3   : > { %v6400_v21 = vpop.f32.mrf.mxu1 }
 0xbe4   : > { %v6401_v13 = vadd.f32 %v6400_v21, %v6287_v17  ;;  %6519 = vst [vmem:[%s14416_s18 + $0xc0] sm:$0xff] %v6440_v32 }
 0xbe6   : > { %6506 = vst [vmem:[%s14416_s18 + $0x58] sm:$0xff] %v6401_v13 }
 0xbe9   : > { %v6329_v61 = vpop.f32.mrf.mxu2 }
 0xbea   : > { %v6442_v40 = vpop.f32.mrf.mxu3  ;;  %v6290_v52 = vpop.f32.mrf.mxu0 }
 0xbeb   : > { %v6443_v25 = vadd.f32 %v6442_v40, %v6329_v61  ;;  %v6403_v63 = vpop.f32.mrf.mxu1 }
 0xbec   : > { %v6404_v12 = vadd.f32 %v6403_v63, %v6290_v52 }
 0xbed   : > { %6520 = vst [vmem:[%s14416_s18 + $0xc8] sm:$0xff] %v6443_v25 }
 0xbee   : > { %6507 = vst [vmem:[%s14416_s18 + $0x60] sm:$0xff] %v6404_v12 }
 0xbf1   : > { %v6332_v22 = vpop.f32.mrf.mxu2 }
 0xbf2   : > { %v6445_v41 = vpop.f32.mrf.mxu3  ;;  %v6293_v60 = vpop.f32.mrf.mxu0 }
 0xbf3   : > { %v6446_v18 = vadd.f32 %v6445_v41, %v6332_v22  ;;  %v6406_v51 = vpop.f32.mrf.mxu1 }
 0xbf4   : > { %v6407_v57 = vadd.f32 %v6406_v51, %v6293_v60 }
 0xbf5   : > { %6521 = vst [vmem:[%s14416_s18 + $0xd0] sm:$0xff] %v6446_v18 }
 0xbf6   : > { %6508 = vst [vmem:[%s14416_s18 + $0x68] sm:$0xff] %v6407_v57 }
 0xbf9   : > { %v6335_v6 = vpop.f32.mrf.mxu2 }
 0xbfa   : > { %v6448_v2 = vpop.f32.mrf.mxu3  ;;  %v6296_v48 = vpop.f32.mrf.mxu0 }
 0xbfb   : > { %v6449_v43 = vadd.f32 %v6448_v2, %v6335_v6  ;;  %v6409_v20 = vpop.f32.mrf.mxu1 }
 0xbfc   : > { %v6410_v54 = vadd.f32 %v6409_v20, %v6296_v48 }
 0xbfd   : > { %6522 = vst [vmem:[%s14416_s18 + $0xd8] sm:$0xff] %v6449_v43 }
 0xbfe   : > { %6509 = vst [vmem:[%s14416_s18 + $0x70] sm:$0xff] %v6410_v54 }
 0xc01   : > { %v6338_v27 = vpop.f32.mrf.mxu2 }
 0xc02   : > { %v6451_v42 = vpop.f32.mrf.mxu3 }
 0xc03   : > { %v6452_v29 = vadd.f32 %v6451_v42, %v6338_v27 }
 0xc05   : > { %6523 = vst [vmem:[%s14416_s18 + $0xe0] sm:$0xff] %v6452_v29 }
 0xc09   : > { %v6341_v1 = vpop.f32.mrf.mxu2 }
 0xc0a   : > { %v6454_v56 = vpop.f32.mrf.mxu3 }
 0xc0b   : > { %v6455_v55 = vadd.f32 %v6454_v56, %v6341_v1 }
 0xc0d   : > { %6524 = vst [vmem:[%s14416_s18 + $0xe8] sm:$0xff] %v6455_v55 }
 0xc11   : > { %v6344_v8 = vpop.f32.mrf.mxu2 }
 0xc12   : > { %v6457_v30 = vpop.f32.mrf.mxu3 }
 0xc13   : > { %v6458_v47 = vadd.f32 %v6457_v30, %v6344_v8 }
 0xc15   : > { %6525 = vst [vmem:[%s14416_s18 + $0xf0] sm:$0xff] %v6458_v47 }
 0xc17   : > { %v6299_v11 = vpop.f32.mrf.mxu0  ;;  %v6412_v24 = vpop.f32.mrf.mxu1 }
 0xc18   : > { %v6413_v62 = vadd.f32 %v6412_v24, %v6299_v11 }
 0xc19   : > { %v6347_v0 = vpop.f32.mrf.mxu2 }
 0xc1a   : > { %v6460_v9 = vpop.f32.mrf.mxu3  ;;  %6510 = vst [vmem:[%s14416_s18 + $0x78] sm:$0xff] %v6413_v62 }
 0xc1b   : > { %v6461_v7 = vadd.f32 %v6460_v9, %v6347_v0 }
 0xc1d   : > { %6526 = vst [vmem:[%s14416_s18 + $0xf8] sm:$0xff] %v6461_v7 }
 0xc1e   : > { %6902 = shalt.err (!%p6899_p5)
}
 0xc1f   : > { %s6977_s8 = smov 128   ;;  %s6978_s15 = smov 8  }
 0xc20   : > { %6675 = dma.vmem_to_hbm [thread:$0]  (%p7034_p4), %s6541_s26, 4096, %s6543_s28, %s6528_s12, %s6977_s8, %s6977_s8, %s6978_s15  }
 0xc21 PF: > { %p6681_p6 = scmp.ge.s32.totalorder %s6953_s14, 2  ;;  %s6557_s27 = sand.u32 1, %s6933_s9  }
 0xc22   : > { %s6558_s16 = scalar_lea.sflag [#allocation3], %s6557_s27 }
 0xc23   : > { %p6678_p7 = pnand %p6681_p6, %p7041_p8 }
 0xc25   : > { %p6679_p9 = pneg %p6678_p7 }
 0xc27   : > { %6928 = dma.done.wait (%p6679_p9), %s6558_s16, 4096  }
 0xc28   : > { %6930 = vsyncadd (%p6679_p9), %s6558_s16, 4294963200  ;;  %s15_s14 = sadd.s32 1, %s6953_s14   ;;  %s16854_s9 = smov %s6937_s10 }
 0xc29   : > { %p12_p10 = scmp.ge.s32.totalorder %s15_s14, 4   ;;  %s16855_s10 = smov %s6941_s11 }
 0xc2a   : > { %s16856_s11 = smov %s7047_s22  ;;  %s16857_s12 = smov %s6949_s13 }
 0xc2b   : > { %s16858_s13 = smov %s16860_s17  ;;  %14 = sbr.rel (!%p12_p10) target bundleno = 4 (0x4), region = 70 }
 0xc30   :  { %6564 = vsyncpa [#allocation3], 1 }
 0xc31   :  { %6566 = vsyncpa [#allocation3 + $0x1], 1 }

</bundles_post_ra>
